<compile_context>
chip_gen: v5e
topology: v5e:2x2
jax: 0.10.0
libtpu: 0.0.40
codegen_flags: <defaults>
</compile_context>

<pallas_src>
import numpy as np
import jax
import jax.numpy as jnp
from jax.experimental import pallas as pl
from jax.experimental.pallas import tpu as pltpu

CHANNELS = 1  # opt.channels == 1  (takes the `out[:, None, :]` branch)
CONV_CHANNELS = [(CHANNELS, 64), (64, 64), (64, 64), (64, 64),
                 (64, 32), (32, 32), (32, 32), (32, 32)]
LINEAR_DIMS = [(32, 100), (100, 50), (50, 1)]
SEQ_LEN = 256           # concat length; 8 stride-2 convs reduce 256 -> 1
PAD_ROWS = 8            # zero rows prepended so the x[2t-1] tap reads 0 at t=0
NEG_SLOPE = 0.2


def _leaky(x):
    return jnp.where(x > 0, x, NEG_SLOPE * x)


def _round_up(x, m):
    return ((x + m - 1) // m) * m


def _conv0_vpu(x_ref, w_ref, b_ref):
    """First Conv1d (c_in=1) + LeakyReLU, computed on the VPU (K=1 outer product).

    x_ref is (PAD_ROWS + SEQ_LEN, B_blk): rows [0, PAD_ROWS) are zeros, rows
    PAD_ROWS.. hold x[0..255] for B_blk batch columns.  Output position t reads
    x[2t-1], x[2t], x[2t+1]; the zero row PAD_ROWS-1 supplies x[-1] = 0.
    Returns (SEQ_LEN // 2, B_blk, 64) activations (length, batch, channel).
    """
    l_out = SEQ_LEN // 2
    ta = x_ref[pl.ds(PAD_ROWS - 1, l_out, stride=2), :]   # x[2t-1]
    tb = x_ref[pl.ds(PAD_ROWS, l_out, stride=2), :]       # x[2t]
    tc = x_ref[pl.ds(PAD_ROWS + 1, l_out, stride=2), :]   # x[2t+1]
    w = w_ref[...]                                         # (3, 64), tap-major
    b = b_ref[...]                                         # (1, 64)
    y = (ta[:, :, None] * w[0:1][None]
         + tb[:, :, None] * w[1:2][None]
         + tc[:, :, None] * w[2:3][None]
         + b[None])
    return _leaky(y)


def _conv_fused(h, w3_ref, b_ref):
    """Conv1d(k=3, s=2, p=1) + LeakyReLU with the three taps fused into one matmul.

    h: (l_in, B_blk, c_in) activations.  Returns (l_in // 2, B_blk, c_out).
    Batch is folded into M, so the MXU sees (l_out * B_blk, 3*c_in) x (3*c_in, c_out).
    """
    l_in, bblk, c_in = h.shape
    l_out = l_in // 2
    h4 = h.reshape(l_out, 2, bblk, c_in)       # outer-dim split: layout no-op
    tb = h4[:, 0]                              # x[2t]     (l_out, B_blk, c_in)
    tc = h4[:, 1]                              # x[2t+1]
    if l_out > 1:
        ta = jnp.concatenate(                  # x[2t-1]; row t=0 is the zero pad
            [jnp.zeros((1, bblk, c_in), jnp.float32), tc[:l_out - 1]], axis=0)
    else:
        ta = jnp.zeros((1, bblk, c_in), jnp.float32)
    x3 = jnp.concatenate([ta, tb, tc], axis=-1)            # (l_out, B_blk, 3*c_in)
    x2d = x3.reshape(l_out * bblk, 3 * c_in)                # fold batch into M
    c_out = w3_ref.shape[1]
    y = jnp.dot(x2d, w3_ref[...], preferred_element_type=jnp.float32) + b_ref[...]
    return _leaky(y).reshape(l_out, bblk, c_out)


def _disc_kernel(x_ref, *refs):
    # refs = 8*(conv_w, conv_b) + 3*(lin_w, lin_b) + (out_ref,)
    conv = [(refs[2 * i], refs[2 * i + 1]) for i in range(8)]
    lin = [(refs[16 + 2 * i], refs[16 + 2 * i + 1]) for i in range(3)]
    o_ref = refs[22]

    h = _conv0_vpu(x_ref, *conv[0])                 # (128, B_blk, 64)
    for w_ref, b_ref in conv[1:]:
        h = _conv_fused(h, w_ref, b_ref)            # length halves each layer
    bblk = h.shape[1]
    v = h.reshape(bblk, h.shape[2])                 # (B_blk, 32); flatten (L==1)

    # adv_layer: (Linear + LeakyReLU) x 3, batched over B_blk rows.
    for w_ref, b_ref in lin:
        v = _leaky(jnp.dot(v, w_ref[...], preferred_element_type=jnp.float32)
                   + b_ref[...])
    o_ref[...] = v                                  # (B_blk, 1)


def make_params(key):
    """Deterministic parameter init mirroring the PyTorch module's shapes."""
    params = {"convs": [], "linears": []}
    for (c_in, c_out) in CONV_CHANNELS:
        key, kw, kb = jax.random.split(key, 3)
        bound = 1.0 / np.sqrt(c_in * 3)
        w = jax.random.uniform(kw, (c_out, c_in, 3), jnp.float32, -bound, bound)
        b = jax.random.uniform(kb, (c_out,), jnp.float32, -bound, bound)
        params["convs"].append((w, b))
    for (d_in, d_out) in LINEAR_DIMS:
        key, kw, kb = jax.random.split(key, 3)
        bound = 1.0 / np.sqrt(d_in)
        w = jax.random.uniform(kw, (d_out, d_in), jnp.float32, -bound, bound)
        b = jax.random.uniform(kb, (d_out,), jnp.float32, -bound, bound)
        params["linears"].append((w, b))
    return params


def discriminator_forward(base, associate, params, block_b=32):
    out = jnp.concatenate([base, associate], axis=-1).astype(jnp.float32)   # (B, L)
    B, L = out.shape
    assert L == SEQ_LEN, "architecture requires concat length 256 (8 halvings -> 1)"

    # Batch block: multiple of 8 (sublane tiling), capped by block_b and by B.
    bblk = max(8, min(_round_up(block_b, 8), _round_up(B, 8)))
    b_pad = _round_up(B, bblk)
    n_blk = b_pad // bblk

    # (length, batch) layout: length on sublanes, batch on lanes.  Prepend
    # PAD_ROWS zero rows (the conv left padding), zero-pad batch to a multiple
    # of bblk, and split batch blocks into a leading grid dim so every block's
    # lane dim is the full array extent.
    xt = jnp.pad(out.T, ((PAD_ROWS, 0), (0, b_pad - B)))        # (L+8, b_pad)
    x_blk = xt.reshape(L + PAD_ROWS, n_blk, bblk).transpose(1, 0, 2)

    def full_spec(a):
        nd = a.ndim
        return pl.BlockSpec(a.shape, lambda b, _nd=nd: (0,) * _nd)

    kernel_args = [x_blk]
    in_specs = [pl.BlockSpec((None, L + PAD_ROWS, bblk), lambda b: (b, 0, 0))]

    # Conv weights packed tap-major: rows [j*c_in : (j+1)*c_in) of W3 hold tap j.
    for (w, bias) in params["convs"]:
        c_out, c_in, _k = w.shape
        wk = jnp.transpose(w, (2, 1, 0)).reshape(3 * c_in, c_out)   # (3*c_in, c_out)
        bk = bias[None, :]                                          # (1, c_out)
        kernel_args += [wk, bk]
        in_specs += [full_spec(wk), full_spec(bk)]
    for (w, bias) in params["linears"]:
        wk = jnp.transpose(w, (1, 0))             # (d_in, d_out)
        bk = bias[None, :]                        # (1, d_out)
        kernel_args += [wk, bk]
        in_specs += [full_spec(wk), full_spec(bk)]

    res = pl.pallas_call(
        _disc_kernel,
        out_shape=jax.ShapeDtypeStruct((b_pad, 1), jnp.float32),
        grid=(n_blk,),
        in_specs=in_specs,
        out_specs=pl.BlockSpec((bblk, 1), lambda b: (b, 0)),
        compiler_params=pltpu.CompilerParams(dimension_semantics=("parallel",)),
    )(*kernel_args)
    return res[:B]


def reference_forward(base, associate, params):
    """Pure-JAX reference matching the PyTorch semantics (NCL layout)."""
    out = jnp.concatenate([base, associate], axis=-1)
    x = out[:, None, :]                                       # (B, 1, L)
    for (w, b) in params["convs"]:
        x = jax.lax.conv_general_dilated(
            x, w, window_strides=(2,), padding=[(1, 1)],
            dimension_numbers=("NCH", "OIH", "NCH"))
        x = x + b[None, :, None]
        x = jnp.where(x > 0, x, NEG_SLOPE * x)
    v = x.reshape(x.shape[0], -1)                             # (B, 32)
    for (w, b) in params["linears"]:
        v = v @ w.T + b
        v = jnp.where(v > 0, v, NEG_SLOPE * v)
    return v


if __name__ == "__main__":
    key = jax.random.PRNGKey(0)
    pkey, bkey, akey = jax.random.split(key, 3)
    params = make_params(pkey)

    B = 2
    half = SEQ_LEN // 2                                   # 128 per input stream
    base = jax.random.normal(bkey, (B, half), jnp.float32)
    associate = jax.random.normal(akey, (B, half), jnp.float32)

    validity = discriminator_forward(base, associate, params)
    validity = jax.block_until_ready(validity)

    ref = reference_forward(base, associate, params)
    np.testing.assert_allclose(np.asarray(validity), np.asarray(ref),
                               rtol=2e-4, atol=2e-4)
    print("KERNEL_OK")
</pallas_src>

<mosaic_0001>
module attributes {stable_mosaic.version = 11 : i64} {
  func.func @_disc_kernel(%arg0: i32, %arg1: memref<1x264x8xf32, #tpu.memory_space<vmem>>, %arg2: memref<3x64xf32, #tpu.memory_space<vmem>>, %arg3: memref<1x64xf32, #tpu.memory_space<vmem>>, %arg4: memref<192x64xf32, #tpu.memory_space<vmem>>, %arg5: memref<1x64xf32, #tpu.memory_space<vmem>>, %arg6: memref<192x64xf32, #tpu.memory_space<vmem>>, %arg7: memref<1x64xf32, #tpu.memory_space<vmem>>, %arg8: memref<192x64xf32, #tpu.memory_space<vmem>>, %arg9: memref<1x64xf32, #tpu.memory_space<vmem>>, %arg10: memref<192x32xf32, #tpu.memory_space<vmem>>, %arg11: memref<1x32xf32, #tpu.memory_space<vmem>>, %arg12: memref<96x32xf32, #tpu.memory_space<vmem>>, %arg13: memref<1x32xf32, #tpu.memory_space<vmem>>, %arg14: memref<96x32xf32, #tpu.memory_space<vmem>>, %arg15: memref<1x32xf32, #tpu.memory_space<vmem>>, %arg16: memref<96x32xf32, #tpu.memory_space<vmem>>, %arg17: memref<1x32xf32, #tpu.memory_space<vmem>>, %arg18: memref<32x100xf32, #tpu.memory_space<vmem>>, %arg19: memref<1x100xf32, #tpu.memory_space<vmem>>, %arg20: memref<100x50xf32, #tpu.memory_space<vmem>>, %arg21: memref<1x50xf32, #tpu.memory_space<vmem>>, %arg22: memref<50x1xf32, #tpu.memory_space<vmem>>, %arg23: memref<1x1xf32, #tpu.memory_space<vmem>>, %arg24: memref<8x1xf32, #tpu.memory_space<vmem>>) attributes {dimension_semantics = [#tpu.dimension_semantics<parallel>], iteration_bounds = array<i64: 1>, scalar_prefetch = 0 : i64, scratch_operands = 0 : i64, tpu.core_type = #tpu.core_type<tc>, window_params = [{transform_indices = @transform_0, window_bounds = array<i64: 1, 264, 8>}, {pipeline_mode = #tpu.pipeline_mode<synchronous>, transform_indices = @transform_1, window_bounds = array<i64: 3, 64>}, {pipeline_mode = #tpu.pipeline_mode<synchronous>, transform_indices = @transform_2, window_bounds = array<i64: 1, 64>}, {pipeline_mode = #tpu.pipeline_mode<synchronous>, transform_indices = @transform_3, window_bounds = array<i64: 192, 64>}, {pipeline_mode = #tpu.pipeline_mode<synchronous>, transform_indices = @transform_4, window_bounds = array<i64: 1, 64>}, {pipeline_mode = #tpu.pipeline_mode<synchronous>, transform_indices = @transform_5, window_bounds = array<i64: 192, 64>}, {pipeline_mode = #tpu.pipeline_mode<synchronous>, transform_indices = @transform_6, window_bounds = array<i64: 1, 64>}, {pipeline_mode = #tpu.pipeline_mode<synchronous>, transform_indices = @transform_7, window_bounds = array<i64: 192, 64>}, {pipeline_mode = #tpu.pipeline_mode<synchronous>, transform_indices = @transform_8, window_bounds = array<i64: 1, 64>}, {pipeline_mode = #tpu.pipeline_mode<synchronous>, transform_indices = @transform_9, window_bounds = array<i64: 192, 32>}, {pipeline_mode = #tpu.pipeline_mode<synchronous>, transform_indices = @transform_10, window_bounds = array<i64: 1, 32>}, {pipeline_mode = #tpu.pipeline_mode<synchronous>, transform_indices = @transform_11, window_bounds = array<i64: 96, 32>}, {pipeline_mode = #tpu.pipeline_mode<synchronous>, transform_indices = @transform_12, window_bounds = array<i64: 1, 32>}, {pipeline_mode = #tpu.pipeline_mode<synchronous>, transform_indices = @transform_13, window_bounds = array<i64: 96, 32>}, {pipeline_mode = #tpu.pipeline_mode<synchronous>, transform_indices = @transform_14, window_bounds = array<i64: 1, 32>}, {pipeline_mode = #tpu.pipeline_mode<synchronous>, transform_indices = @transform_15, window_bounds = array<i64: 96, 32>}, {pipeline_mode = #tpu.pipeline_mode<synchronous>, transform_indices = @transform_16, window_bounds = array<i64: 1, 32>}, {pipeline_mode = #tpu.pipeline_mode<synchronous>, transform_indices = @transform_17, window_bounds = array<i64: 32, 100>}, {pipeline_mode = #tpu.pipeline_mode<synchronous>, transform_indices = @transform_18, window_bounds = array<i64: 1, 100>}, {pipeline_mode = #tpu.pipeline_mode<synchronous>, transform_indices = @transform_19, window_bounds = array<i64: 100, 50>}, {pipeline_mode = #tpu.pipeline_mode<synchronous>, transform_indices = @transform_20, window_bounds = array<i64: 1, 50>}, {pipeline_mode = #tpu.pipeline_mode<synchronous>, transform_indices = @transform_21, window_bounds = array<i64: 50, 1>}, {pipeline_mode = #tpu.pipeline_mode<synchronous>, transform_indices = @transform_22, window_bounds = array<i64: 1, 1>}, {transform_indices = @transform_23, window_bounds = array<i64: 8, 1>}]} {
    %c0 = arith.constant 0 : index
    %c7 = arith.constant 7 : index
    %c0_0 = arith.constant 0 : index
    %0 = tpu.strided_load %arg1[%c0, %c7, %c0_0] {strides = array<i32: 1, 2, 1>} : memref<1x264x8xf32, #tpu.memory_space<vmem>>, vector<1x128x8xf32>
    %1 = vector.shape_cast %0 : vector<1x128x8xf32> to vector<128x8xf32>
    %c0_1 = arith.constant 0 : index
    %c8 = arith.constant 8 : index
    %c0_2 = arith.constant 0 : index
    %2 = tpu.strided_load %arg1[%c0_1, %c8, %c0_2] {strides = array<i32: 1, 2, 1>} : memref<1x264x8xf32, #tpu.memory_space<vmem>>, vector<1x128x8xf32>
    %3 = vector.shape_cast %2 : vector<1x128x8xf32> to vector<128x8xf32>
    %c0_3 = arith.constant 0 : index
    %c9 = arith.constant 9 : index
    %c0_4 = arith.constant 0 : index
    %4 = tpu.strided_load %arg1[%c0_3, %c9, %c0_4] {strides = array<i32: 1, 2, 1>} : memref<1x264x8xf32, #tpu.memory_space<vmem>>, vector<1x128x8xf32>
    %5 = vector.shape_cast %4 : vector<1x128x8xf32> to vector<128x8xf32>
    %c0_5 = arith.constant 0 : index
    %c0_6 = arith.constant 0 : index
    %6 = vector.load %arg2[%c0_5, %c0_6] : memref<3x64xf32, #tpu.memory_space<vmem>>, vector<3x64xf32>
    %c0_7 = arith.constant 0 : index
    %c0_8 = arith.constant 0 : index
    %7 = vector.load %arg3[%c0_7, %c0_8] : memref<1x64xf32, #tpu.memory_space<vmem>>, vector<1x64xf32>
    %8 = vector.shape_cast %1 : vector<128x8xf32> to vector<128x8x1xf32>
    %9 = vector.extract_strided_slice %6 {offsets = [0, 0], sizes = [1, 64], strides = [1, 1]} : vector<3x64xf32> to vector<1x64xf32>
    %10 = vector.shape_cast %9 : vector<1x64xf32> to vector<1x1x64xf32>
    %11 = vector.broadcast %8 : vector<128x8x1xf32> to vector<128x8x64xf32>
    %12 = vector.broadcast %10 : vector<1x1x64xf32> to vector<128x8x64xf32>
    %13 = arith.mulf %11, %12 : vector<128x8x64xf32>
    %14 = vector.shape_cast %3 : vector<128x8xf32> to vector<128x8x1xf32>
    %15 = vector.extract_strided_slice %6 {offsets = [1, 0], sizes = [1, 64], strides = [1, 1]} : vector<3x64xf32> to vector<1x64xf32>
    %16 = vector.shape_cast %15 : vector<1x64xf32> to vector<1x1x64xf32>
    %17 = vector.broadcast %14 : vector<128x8x1xf32> to vector<128x8x64xf32>
    %18 = vector.broadcast %16 : vector<1x1x64xf32> to vector<128x8x64xf32>
    %19 = arith.mulf %17, %18 : vector<128x8x64xf32>
    %20 = arith.addf %13, %19 : vector<128x8x64xf32>
    %21 = vector.shape_cast %5 : vector<128x8xf32> to vector<128x8x1xf32>
    %22 = vector.extract_strided_slice %6 {offsets = [2, 0], sizes = [1, 64], strides = [1, 1]} : vector<3x64xf32> to vector<1x64xf32>
    %23 = vector.shape_cast %22 : vector<1x64xf32> to vector<1x1x64xf32>
    %24 = vector.broadcast %21 : vector<128x8x1xf32> to vector<128x8x64xf32>
    %25 = vector.broadcast %23 : vector<1x1x64xf32> to vector<128x8x64xf32>
    %26 = arith.mulf %24, %25 : vector<128x8x64xf32>
    %27 = arith.addf %20, %26 : vector<128x8x64xf32>
    %28 = vector.shape_cast %7 : vector<1x64xf32> to vector<1x1x64xf32>
    %29 = vector.broadcast %28 : vector<1x1x64xf32> to vector<128x8x64xf32>
    %30 = arith.addf %27, %29 : vector<128x8x64xf32>
    %cst = arith.constant 0.000000e+00 : f32
    %31 = vector.broadcast %cst : f32 to vector<128x8x64xf32>
    %32 = arith.cmpf ogt, %30, %31 : vector<128x8x64xf32>
    %cst_9 = arith.constant 2.000000e-01 : f32
    %33 = vector.broadcast %cst_9 : f32 to vector<128x8x64xf32>
    %34 = arith.mulf %33, %30 : vector<128x8x64xf32>
    %35 = arith.select %32, %30, %34 : vector<128x8x64xi1>, vector<128x8x64xf32>
    %36 = vector.shape_cast %35 : vector<128x8x64xf32> to vector<64x2x8x64xf32>
    %37 = vector.extract_strided_slice %36 {offsets = [0, 0, 0, 0], sizes = [64, 1, 8, 64], strides = [1, 1, 1, 1]} : vector<64x2x8x64xf32> to vector<64x1x8x64xf32>
    %38 = vector.shape_cast %37 : vector<64x1x8x64xf32> to vector<64x8x64xf32>
    %39 = vector.extract_strided_slice %36 {offsets = [0, 1, 0, 0], sizes = [64, 1, 8, 64], strides = [1, 1, 1, 1]} : vector<64x2x8x64xf32> to vector<64x1x8x64xf32>
    %40 = vector.shape_cast %39 : vector<64x1x8x64xf32> to vector<64x8x64xf32>
    %cst_10 = arith.constant 0.000000e+00 : f32
    %41 = vector.broadcast %cst_10 : f32 to vector<1x8x64xf32>
    %42 = vector.extract_strided_slice %40 {offsets = [0, 0, 0], sizes = [63, 8, 64], strides = [1, 1, 1]} : vector<64x8x64xf32> to vector<63x8x64xf32>
    %43 = tpu.concatenate %41, %42 in 0 : vector<1x8x64xf32>, vector<63x8x64xf32> -> vector<64x8x64xf32>
    %44 = tpu.concatenate %43, %38, %40 in 2 : vector<64x8x64xf32>, vector<64x8x64xf32>, vector<64x8x64xf32> -> vector<64x8x192xf32>
    %45 = vector.shape_cast %44 : vector<64x8x192xf32> to vector<512x192xf32>
    %c0_11 = arith.constant 0 : index
    %c0_12 = arith.constant 0 : index
    %46 = vector.load %arg4[%c0_11, %c0_12] : memref<192x64xf32, #tpu.memory_space<vmem>>, vector<192x64xf32>
    %cst_13 = arith.constant dense<0.000000e+00> : vector<512x64xf32>
    %47 = tpu.matmul %45, %46, %cst_13 {dimension_numbers = #tpu.dot_dimension_numbers<[1], [0], [0], [1], [0, 0, 1, 1], [], []>} : vector<512x192xf32>, vector<192x64xf32>, vector<512x64xf32> -> vector<512x64xf32>
    %c0_14 = arith.constant 0 : index
    %c0_15 = arith.constant 0 : index
    %48 = vector.load %arg5[%c0_14, %c0_15] : memref<1x64xf32, #tpu.memory_space<vmem>>, vector<1x64xf32>
    %49 = vector.broadcast %48 : vector<1x64xf32> to vector<512x64xf32>
    %50 = arith.addf %47, %49 : vector<512x64xf32>
    %cst_16 = arith.constant 0.000000e+00 : f32
    %51 = vector.broadcast %cst_16 : f32 to vector<512x64xf32>
    %52 = arith.cmpf ogt, %50, %51 : vector<512x64xf32>
    %cst_17 = arith.constant 2.000000e-01 : f32
    %53 = vector.broadcast %cst_17 : f32 to vector<512x64xf32>
    %54 = arith.mulf %53, %50 : vector<512x64xf32>
    %55 = arith.select %52, %50, %54 : vector<512x64xi1>, vector<512x64xf32>
    %56 = vector.shape_cast %55 : vector<512x64xf32> to vector<64x8x64xf32>
    %57 = vector.shape_cast %56 : vector<64x8x64xf32> to vector<32x2x8x64xf32>
    %58 = vector.extract_strided_slice %57 {offsets = [0, 0, 0, 0], sizes = [32, 1, 8, 64], strides = [1, 1, 1, 1]} : vector<32x2x8x64xf32> to vector<32x1x8x64xf32>
    %59 = vector.shape_cast %58 : vector<32x1x8x64xf32> to vector<32x8x64xf32>
    %60 = vector.extract_strided_slice %57 {offsets = [0, 1, 0, 0], sizes = [32, 1, 8, 64], strides = [1, 1, 1, 1]} : vector<32x2x8x64xf32> to vector<32x1x8x64xf32>
    %61 = vector.shape_cast %60 : vector<32x1x8x64xf32> to vector<32x8x64xf32>
    %cst_18 = arith.constant 0.000000e+00 : f32
    %62 = vector.broadcast %cst_18 : f32 to vector<1x8x64xf32>
    %63 = vector.extract_strided_slice %61 {offsets = [0, 0, 0], sizes = [31, 8, 64], strides = [1, 1, 1]} : vector<32x8x64xf32> to vector<31x8x64xf32>
    %64 = tpu.concatenate %62, %63 in 0 : vector<1x8x64xf32>, vector<31x8x64xf32> -> vector<32x8x64xf32>
    %65 = tpu.concatenate %64, %59, %61 in 2 : vector<32x8x64xf32>, vector<32x8x64xf32>, vector<32x8x64xf32> -> vector<32x8x192xf32>
    %66 = vector.shape_cast %65 : vector<32x8x192xf32> to vector<256x192xf32>
    %c0_19 = arith.constant 0 : index
    %c0_20 = arith.constant 0 : index
    %67 = vector.load %arg6[%c0_19, %c0_20] : memref<192x64xf32, #tpu.memory_space<vmem>>, vector<192x64xf32>
    %cst_21 = arith.constant dense<0.000000e+00> : vector<256x64xf32>
    %68 = tpu.matmul %66, %67, %cst_21 {dimension_numbers = #tpu.dot_dimension_numbers<[1], [0], [0], [1], [0, 0, 1, 1], [], []>} : vector<256x192xf32>, vector<192x64xf32>, vector<256x64xf32> -> vector<256x64xf32>
    %c0_22 = arith.constant 0 : index
    %c0_23 = arith.constant 0 : index
    %69 = vector.load %arg7[%c0_22, %c0_23] : memref<1x64xf32, #tpu.memory_space<vmem>>, vector<1x64xf32>
    %70 = vector.broadcast %69 : vector<1x64xf32> to vector<256x64xf32>
    %71 = arith.addf %68, %70 : vector<256x64xf32>
    %cst_24 = arith.constant 0.000000e+00 : f32
    %72 = vector.broadcast %cst_24 : f32 to vector<256x64xf32>
    %73 = arith.cmpf ogt, %71, %72 : vector<256x64xf32>
    %cst_25 = arith.constant 2.000000e-01 : f32
    %74 = vector.broadcast %cst_25 : f32 to vector<256x64xf32>
    %75 = arith.mulf %74, %71 : vector<256x64xf32>
    %76 = arith.select %73, %71, %75 : vector<256x64xi1>, vector<256x64xf32>
    %77 = vector.shape_cast %76 : vector<256x64xf32> to vector<32x8x64xf32>
    %78 = vector.shape_cast %77 : vector<32x8x64xf32> to vector<16x2x8x64xf32>
    %79 = vector.extract_strided_slice %78 {offsets = [0, 0, 0, 0], sizes = [16, 1, 8, 64], strides = [1, 1, 1, 1]} : vector<16x2x8x64xf32> to vector<16x1x8x64xf32>
    %80 = vector.shape_cast %79 : vector<16x1x8x64xf32> to vector<16x8x64xf32>
    %81 = vector.extract_strided_slice %78 {offsets = [0, 1, 0, 0], sizes = [16, 1, 8, 64], strides = [1, 1, 1, 1]} : vector<16x2x8x64xf32> to vector<16x1x8x64xf32>
    %82 = vector.shape_cast %81 : vector<16x1x8x64xf32> to vector<16x8x64xf32>
    %cst_26 = arith.constant 0.000000e+00 : f32
    %83 = vector.broadcast %cst_26 : f32 to vector<1x8x64xf32>
    %84 = vector.extract_strided_slice %82 {offsets = [0, 0, 0], sizes = [15, 8, 64], strides = [1, 1, 1]} : vector<16x8x64xf32> to vector<15x8x64xf32>
    %85 = tpu.concatenate %83, %84 in 0 : vector<1x8x64xf32>, vector<15x8x64xf32> -> vector<16x8x64xf32>
    %86 = tpu.concatenate %85, %80, %82 in 2 : vector<16x8x64xf32>, vector<16x8x64xf32>, vector<16x8x64xf32> -> vector<16x8x192xf32>
    %87 = vector.shape_cast %86 : vector<16x8x192xf32> to vector<128x192xf32>
    %c0_27 = arith.constant 0 : index
    %c0_28 = arith.constant 0 : index
    %88 = vector.load %arg8[%c0_27, %c0_28] : memref<192x64xf32, #tpu.memory_space<vmem>>, vector<192x64xf32>
    %cst_29 = arith.constant dense<0.000000e+00> : vector<128x64xf32>
    %89 = tpu.matmul %87, %88, %cst_29 {dimension_numbers = #tpu.dot_dimension_numbers<[1], [0], [0], [1], [0, 0, 1, 1], [], []>} : vector<128x192xf32>, vector<192x64xf32>, vector<128x64xf32> -> vector<128x64xf32>
    %c0_30 = arith.constant 0 : index
    %c0_31 = arith.constant 0 : index
    %90 = vector.load %arg9[%c0_30, %c0_31] : memref<1x64xf32, #tpu.memory_space<vmem>>, vector<1x64xf32>
    %91 = vector.broadcast %90 : vector<1x64xf32> to vector<128x64xf32>
    %92 = arith.addf %89, %91 : vector<128x64xf32>
    %cst_32 = arith.constant 0.000000e+00 : f32
    %93 = vector.broadcast %cst_32 : f32 to vector<128x64xf32>
    %94 = arith.cmpf ogt, %92, %93 : vector<128x64xf32>
    %cst_33 = arith.constant 2.000000e-01 : f32
    %95 = vector.broadcast %cst_33 : f32 to vector<128x64xf32>
    %96 = arith.mulf %95, %92 : vector<128x64xf32>
    %97 = arith.select %94, %92, %96 : vector<128x64xi1>, vector<128x64xf32>
    %98 = vector.shape_cast %97 : vector<128x64xf32> to vector<16x8x64xf32>
    %99 = vector.shape_cast %98 : vector<16x8x64xf32> to vector<8x2x8x64xf32>
    %100 = vector.extract_strided_slice %99 {offsets = [0, 0, 0, 0], sizes = [8, 1, 8, 64], strides = [1, 1, 1, 1]} : vector<8x2x8x64xf32> to vector<8x1x8x64xf32>
    %101 = vector.shape_cast %100 : vector<8x1x8x64xf32> to vector<8x8x64xf32>
    %102 = vector.extract_strided_slice %99 {offsets = [0, 1, 0, 0], sizes = [8, 1, 8, 64], strides = [1, 1, 1, 1]} : vector<8x2x8x64xf32> to vector<8x1x8x64xf32>
    %103 = vector.shape_cast %102 : vector<8x1x8x64xf32> to vector<8x8x64xf32>
    %cst_34 = arith.constant 0.000000e+00 : f32
    %104 = vector.broadcast %cst_34 : f32 to vector<1x8x64xf32>
    %105 = vector.extract_strided_slice %103 {offsets = [0, 0, 0], sizes = [7, 8, 64], strides = [1, 1, 1]} : vector<8x8x64xf32> to vector<7x8x64xf32>
    %106 = tpu.concatenate %104, %105 in 0 : vector<1x8x64xf32>, vector<7x8x64xf32> -> vector<8x8x64xf32>
    %107 = tpu.concatenate %106, %101, %103 in 2 : vector<8x8x64xf32>, vector<8x8x64xf32>, vector<8x8x64xf32> -> vector<8x8x192xf32>
    %108 = vector.shape_cast %107 : vector<8x8x192xf32> to vector<64x192xf32>
    %c0_35 = arith.constant 0 : index
    %c0_36 = arith.constant 0 : index
    %109 = vector.load %arg10[%c0_35, %c0_36] : memref<192x32xf32, #tpu.memory_space<vmem>>, vector<192x32xf32>
    %cst_37 = arith.constant dense<0.000000e+00> : vector<64x32xf32>
    %110 = tpu.matmul %108, %109, %cst_37 {dimension_numbers = #tpu.dot_dimension_numbers<[1], [0], [0], [1], [0, 0, 1, 1], [], []>} : vector<64x192xf32>, vector<192x32xf32>, vector<64x32xf32> -> vector<64x32xf32>
    %c0_38 = arith.constant 0 : index
    %c0_39 = arith.constant 0 : index
    %111 = vector.load %arg11[%c0_38, %c0_39] : memref<1x32xf32, #tpu.memory_space<vmem>>, vector<1x32xf32>
    %112 = vector.broadcast %111 : vector<1x32xf32> to vector<64x32xf32>
    %113 = arith.addf %110, %112 : vector<64x32xf32>
    %cst_40 = arith.constant 0.000000e+00 : f32
    %114 = vector.broadcast %cst_40 : f32 to vector<64x32xf32>
    %115 = arith.cmpf ogt, %113, %114 : vector<64x32xf32>
    %cst_41 = arith.constant 2.000000e-01 : f32
    %116 = vector.broadcast %cst_41 : f32 to vector<64x32xf32>
    %117 = arith.mulf %116, %113 : vector<64x32xf32>
    %118 = arith.select %115, %113, %117 : vector<64x32xi1>, vector<64x32xf32>
    %119 = vector.shape_cast %118 : vector<64x32xf32> to vector<8x8x32xf32>
    %120 = vector.shape_cast %119 : vector<8x8x32xf32> to vector<4x2x8x32xf32>
    %121 = vector.extract_strided_slice %120 {offsets = [0, 0, 0, 0], sizes = [4, 1, 8, 32], strides = [1, 1, 1, 1]} : vector<4x2x8x32xf32> to vector<4x1x8x32xf32>
    %122 = vector.shape_cast %121 : vector<4x1x8x32xf32> to vector<4x8x32xf32>
    %123 = vector.extract_strided_slice %120 {offsets = [0, 1, 0, 0], sizes = [4, 1, 8, 32], strides = [1, 1, 1, 1]} : vector<4x2x8x32xf32> to vector<4x1x8x32xf32>
    %124 = vector.shape_cast %123 : vector<4x1x8x32xf32> to vector<4x8x32xf32>
    %cst_42 = arith.constant 0.000000e+00 : f32
    %125 = vector.broadcast %cst_42 : f32 to vector<1x8x32xf32>
    %126 = vector.extract_strided_slice %124 {offsets = [0, 0, 0], sizes = [3, 8, 32], strides = [1, 1, 1]} : vector<4x8x32xf32> to vector<3x8x32xf32>
    %127 = tpu.concatenate %125, %126 in 0 : vector<1x8x32xf32>, vector<3x8x32xf32> -> vector<4x8x32xf32>
    %128 = tpu.concatenate %127, %122, %124 in 2 : vector<4x8x32xf32>, vector<4x8x32xf32>, vector<4x8x32xf32> -> vector<4x8x96xf32>
    %129 = vector.shape_cast %128 : vector<4x8x96xf32> to vector<32x96xf32>
    %c0_43 = arith.constant 0 : index
    %c0_44 = arith.constant 0 : index
    %130 = vector.load %arg12[%c0_43, %c0_44] : memref<96x32xf32, #tpu.memory_space<vmem>>, vector<96x32xf32>
    %cst_45 = arith.constant dense<0.000000e+00> : vector<32x32xf32>
    %131 = tpu.matmul %129, %130, %cst_45 {dimension_numbers = #tpu.dot_dimension_numbers<[1], [0], [0], [1], [0, 0, 1, 1], [], []>} : vector<32x96xf32>, vector<96x32xf32>, vector<32x32xf32> -> vector<32x32xf32>
    %c0_46 = arith.constant 0 : index
    %c0_47 = arith.constant 0 : index
    %132 = vector.load %arg13[%c0_46, %c0_47] : memref<1x32xf32, #tpu.memory_space<vmem>>, vector<1x32xf32>
    %133 = vector.broadcast %132 : vector<1x32xf32> to vector<32x32xf32>
    %134 = arith.addf %131, %133 : vector<32x32xf32>
    %cst_48 = arith.constant 0.000000e+00 : f32
    %135 = vector.broadcast %cst_48 : f32 to vector<32x32xf32>
    %136 = arith.cmpf ogt, %134, %135 : vector<32x32xf32>
    %cst_49 = arith.constant 2.000000e-01 : f32
    %137 = vector.broadcast %cst_49 : f32 to vector<32x32xf32>
    %138 = arith.mulf %137, %134 : vector<32x32xf32>
    %139 = arith.select %136, %134, %138 : vector<32x32xi1>, vector<32x32xf32>
    %140 = vector.shape_cast %139 : vector<32x32xf32> to vector<4x8x32xf32>
    %141 = vector.shape_cast %140 : vector<4x8x32xf32> to vector<2x2x8x32xf32>
    %142 = vector.extract_strided_slice %141 {offsets = [0, 0, 0, 0], sizes = [2, 1, 8, 32], strides = [1, 1, 1, 1]} : vector<2x2x8x32xf32> to vector<2x1x8x32xf32>
    %143 = vector.shape_cast %142 : vector<2x1x8x32xf32> to vector<2x8x32xf32>
    %144 = vector.extract_strided_slice %141 {offsets = [0, 1, 0, 0], sizes = [2, 1, 8, 32], strides = [1, 1, 1, 1]} : vector<2x2x8x32xf32> to vector<2x1x8x32xf32>
    %145 = vector.shape_cast %144 : vector<2x1x8x32xf32> to vector<2x8x32xf32>
    %cst_50 = arith.constant 0.000000e+00 : f32
    %146 = vector.broadcast %cst_50 : f32 to vector<1x8x32xf32>
    %147 = vector.extract_strided_slice %145 {offsets = [0, 0, 0], sizes = [1, 8, 32], strides = [1, 1, 1]} : vector<2x8x32xf32> to vector<1x8x32xf32>
    %148 = tpu.concatenate %146, %147 in 0 : vector<1x8x32xf32>, vector<1x8x32xf32> -> vector<2x8x32xf32>
    %149 = tpu.concatenate %148, %143, %145 in 2 : vector<2x8x32xf32>, vector<2x8x32xf32>, vector<2x8x32xf32> -> vector<2x8x96xf32>
    %150 = vector.shape_cast %149 : vector<2x8x96xf32> to vector<16x96xf32>
    %c0_51 = arith.constant 0 : index
    %c0_52 = arith.constant 0 : index
    %151 = vector.load %arg14[%c0_51, %c0_52] : memref<96x32xf32, #tpu.memory_space<vmem>>, vector<96x32xf32>
    %cst_53 = arith.constant dense<0.000000e+00> : vector<16x32xf32>
    %152 = tpu.matmul %150, %151, %cst_53 {dimension_numbers = #tpu.dot_dimension_numbers<[1], [0], [0], [1], [0, 0, 1, 1], [], []>} : vector<16x96xf32>, vector<96x32xf32>, vector<16x32xf32> -> vector<16x32xf32>
    %c0_54 = arith.constant 0 : index
    %c0_55 = arith.constant 0 : index
    %153 = vector.load %arg15[%c0_54, %c0_55] : memref<1x32xf32, #tpu.memory_space<vmem>>, vector<1x32xf32>
    %154 = vector.broadcast %153 : vector<1x32xf32> to vector<16x32xf32>
    %155 = arith.addf %152, %154 : vector<16x32xf32>
    %cst_56 = arith.constant 0.000000e+00 : f32
    %156 = vector.broadcast %cst_56 : f32 to vector<16x32xf32>
    %157 = arith.cmpf ogt, %155, %156 : vector<16x32xf32>
    %cst_57 = arith.constant 2.000000e-01 : f32
    %158 = vector.broadcast %cst_57 : f32 to vector<16x32xf32>
    %159 = arith.mulf %158, %155 : vector<16x32xf32>
    %160 = arith.select %157, %155, %159 : vector<16x32xi1>, vector<16x32xf32>
    %161 = vector.shape_cast %160 : vector<16x32xf32> to vector<2x8x32xf32>
    %162 = vector.shape_cast %161 : vector<2x8x32xf32> to vector<1x2x8x32xf32>
    %163 = vector.extract_strided_slice %162 {offsets = [0, 0, 0, 0], sizes = [1, 1, 8, 32], strides = [1, 1, 1, 1]} : vector<1x2x8x32xf32> to vector<1x1x8x32xf32>
    %164 = vector.shape_cast %163 : vector<1x1x8x32xf32> to vector<1x8x32xf32>
    %165 = vector.extract_strided_slice %162 {offsets = [0, 1, 0, 0], sizes = [1, 1, 8, 32], strides = [1, 1, 1, 1]} : vector<1x2x8x32xf32> to vector<1x1x8x32xf32>
    %166 = vector.shape_cast %165 : vector<1x1x8x32xf32> to vector<1x8x32xf32>
    %cst_58 = arith.constant 0.000000e+00 : f32
    %167 = vector.broadcast %cst_58 : f32 to vector<1x8x32xf32>
    %168 = tpu.concatenate %167, %164, %166 in 2 : vector<1x8x32xf32>, vector<1x8x32xf32>, vector<1x8x32xf32> -> vector<1x8x96xf32>
    %169 = vector.shape_cast %168 : vector<1x8x96xf32> to vector<8x96xf32>
    %c0_59 = arith.constant 0 : index
    %c0_60 = arith.constant 0 : index
    %170 = vector.load %arg16[%c0_59, %c0_60] : memref<96x32xf32, #tpu.memory_space<vmem>>, vector<96x32xf32>
    %cst_61 = arith.constant dense<0.000000e+00> : vector<8x32xf32>
    %171 = tpu.matmul %169, %170, %cst_61 {dimension_numbers = #tpu.dot_dimension_numbers<[1], [0], [0], [1], [0, 0, 1, 1], [], []>} : vector<8x96xf32>, vector<96x32xf32>, vector<8x32xf32> -> vector<8x32xf32>
    %c0_62 = arith.constant 0 : index
    %c0_63 = arith.constant 0 : index
    %172 = vector.load %arg17[%c0_62, %c0_63] : memref<1x32xf32, #tpu.memory_space<vmem>>, vector<1x32xf32>
    %173 = vector.broadcast %172 : vector<1x32xf32> to vector<8x32xf32>
    %174 = arith.addf %171, %173 : vector<8x32xf32>
    %cst_64 = arith.constant 0.000000e+00 : f32
    %175 = vector.broadcast %cst_64 : f32 to vector<8x32xf32>
    %176 = arith.cmpf ogt, %174, %175 : vector<8x32xf32>
    %cst_65 = arith.constant 2.000000e-01 : f32
    %177 = vector.broadcast %cst_65 : f32 to vector<8x32xf32>
    %178 = arith.mulf %177, %174 : vector<8x32xf32>
    %179 = arith.select %176, %174, %178 : vector<8x32xi1>, vector<8x32xf32>
    %180 = vector.shape_cast %179 : vector<8x32xf32> to vector<1x8x32xf32>
    %181 = vector.shape_cast %180 : vector<1x8x32xf32> to vector<8x32xf32>
    %c0_66 = arith.constant 0 : index
    %c0_67 = arith.constant 0 : index
    %182 = vector.load %arg18[%c0_66, %c0_67] : memref<32x100xf32, #tpu.memory_space<vmem>>, vector<32x100xf32>
    %cst_68 = arith.constant dense<0.000000e+00> : vector<8x100xf32>
    %183 = tpu.matmul %181, %182, %cst_68 {dimension_numbers = #tpu.dot_dimension_numbers<[1], [0], [0], [1], [0, 0, 1, 1], [], []>} : vector<8x32xf32>, vector<32x100xf32>, vector<8x100xf32> -> vector<8x100xf32>
    %c0_69 = arith.constant 0 : index
    %c0_70 = arith.constant 0 : index
    %184 = vector.load %arg19[%c0_69, %c0_70] : memref<1x100xf32, #tpu.memory_space<vmem>>, vector<1x100xf32>
    %185 = vector.broadcast %184 : vector<1x100xf32> to vector<8x100xf32>
    %186 = arith.addf %183, %185 : vector<8x100xf32>
    %cst_71 = arith.constant 0.000000e+00 : f32
    %187 = vector.broadcast %cst_71 : f32 to vector<8x100xf32>
    %188 = arith.cmpf ogt, %186, %187 : vector<8x100xf32>
    %cst_72 = arith.constant 2.000000e-01 : f32
    %189 = vector.broadcast %cst_72 : f32 to vector<8x100xf32>
    %190 = arith.mulf %189, %186 : vector<8x100xf32>
    %191 = arith.select %188, %186, %190 : vector<8x100xi1>, vector<8x100xf32>
    %c0_73 = arith.constant 0 : index
    %c0_74 = arith.constant 0 : index
    %192 = vector.load %arg20[%c0_73, %c0_74] : memref<100x50xf32, #tpu.memory_space<vmem>>, vector<100x50xf32>
    %cst_75 = arith.constant dense<0.000000e+00> : vector<8x50xf32>
    %193 = tpu.matmul %191, %192, %cst_75 {dimension_numbers = #tpu.dot_dimension_numbers<[1], [0], [0], [1], [0, 0, 1, 1], [], []>} : vector<8x100xf32>, vector<100x50xf32>, vector<8x50xf32> -> vector<8x50xf32>
    %c0_76 = arith.constant 0 : index
    %c0_77 = arith.constant 0 : index
    %194 = vector.load %arg21[%c0_76, %c0_77] : memref<1x50xf32, #tpu.memory_space<vmem>>, vector<1x50xf32>
    %195 = vector.broadcast %194 : vector<1x50xf32> to vector<8x50xf32>
    %196 = arith.addf %193, %195 : vector<8x50xf32>
    %cst_78 = arith.constant 0.000000e+00 : f32
    %197 = vector.broadcast %cst_78 : f32 to vector<8x50xf32>
    %198 = arith.cmpf ogt, %196, %197 : vector<8x50xf32>
    %cst_79 = arith.constant 2.000000e-01 : f32
    %199 = vector.broadcast %cst_79 : f32 to vector<8x50xf32>
    %200 = arith.mulf %199, %196 : vector<8x50xf32>
    %201 = arith.select %198, %196, %200 : vector<8x50xi1>, vector<8x50xf32>
    %c0_80 = arith.constant 0 : index
    %c0_81 = arith.constant 0 : index
    %202 = vector.load %arg22[%c0_80, %c0_81] : memref<50x1xf32, #tpu.memory_space<vmem>>, vector<50x1xf32>
    %cst_82 = arith.constant dense<0.000000e+00> : vector<8x1xf32>
    %203 = tpu.matmul %201, %202, %cst_82 {dimension_numbers = #tpu.dot_dimension_numbers<[1], [0], [0], [1], [0, 0, 1, 1], [], []>} : vector<8x50xf32>, vector<50x1xf32>, vector<8x1xf32> -> vector<8x1xf32>
    %c0_83 = arith.constant 0 : index
    %c0_84 = arith.constant 0 : index
    %204 = vector.load %arg23[%c0_83, %c0_84] : memref<1x1xf32, #tpu.memory_space<vmem>>, vector<1x1xf32>
    %205 = vector.broadcast %204 : vector<1x1xf32> to vector<8x1xf32>
    %206 = arith.addf %203, %205 : vector<8x1xf32>
    %cst_85 = arith.constant 0.000000e+00 : f32
    %207 = vector.broadcast %cst_85 : f32 to vector<8x1xf32>
    %208 = arith.cmpf ogt, %206, %207 : vector<8x1xf32>
    %cst_86 = arith.constant 2.000000e-01 : f32
    %209 = vector.broadcast %cst_86 : f32 to vector<8x1xf32>
    %210 = arith.mulf %209, %206 : vector<8x1xf32>
    %211 = arith.select %208, %206, %210 : vector<8x1xi1>, vector<8x1xf32>
    %c0_87 = arith.constant 0 : index
    %c0_88 = arith.constant 0 : index
    %212 = vector.load %arg24[%c0_87, %c0_88] : memref<8x1xf32, #tpu.memory_space<vmem>>, vector<8x1xf32>
    tpu.vector_store %arg24[%c0_87, %c0_88], %211 {strides = array<i32>} : memref<8x1xf32, #tpu.memory_space<vmem>>, vector<8x1xf32>,
    return
  }
  func.func @transform_0(%arg0: i32) -> (i32, i32, i32) {
    %c0_i32 = arith.constant 0 : i32
    %c0_i32_0 = arith.constant 0 : i32
    %c0_i32_1 = arith.constant 0 : i32
    return %arg0, %c0_i32, %c0_i32_0 : i32, i32, i32
  }
  func.func @transform_1(%arg0: i32) -> (i32, i32) {
    %c0_i32 = arith.constant 0 : i32
    %c0_i32_0 = arith.constant 0 : i32
    %c0_i32_1 = arith.constant 0 : i32
    return %c0_i32, %c0_i32_0 : i32, i32
  }
  func.func @transform_2(%arg0: i32) -> (i32, i32) {
    %c0_i32 = arith.constant 0 : i32
    %c0_i32_0 = arith.constant 0 : i32
    %c0_i32_1 = arith.constant 0 : i32
    return %c0_i32, %c0_i32_0 : i32, i32
  }
  func.func @transform_3(%arg0: i32) -> (i32, i32) {
    %c0_i32 = arith.constant 0 : i32
    %c0_i32_0 = arith.constant 0 : i32
    %c0_i32_1 = arith.constant 0 : i32
    return %c0_i32, %c0_i32_0 : i32, i32
  }
  func.func @transform_4(%arg0: i32) -> (i32, i32) {
    %c0_i32 = arith.constant 0 : i32
    %c0_i32_0 = arith.constant 0 : i32
    %c0_i32_1 = arith.constant 0 : i32
    return %c0_i32, %c0_i32_0 : i32, i32
  }
  func.func @transform_5(%arg0: i32) -> (i32, i32) {
    %c0_i32 = arith.constant 0 : i32
    %c0_i32_0 = arith.constant 0 : i32
    %c0_i32_1 = arith.constant 0 : i32
    return %c0_i32, %c0_i32_0 : i32, i32
  }
  func.func @transform_6(%arg0: i32) -> (i32, i32) {
    %c0_i32 = arith.constant 0 : i32
    %c0_i32_0 = arith.constant 0 : i32
    %c0_i32_1 = arith.constant 0 : i32
    return %c0_i32, %c0_i32_0 : i32, i32
  }
  func.func @transform_7(%arg0: i32) -> (i32, i32) {
    %c0_i32 = arith.constant 0 : i32
    %c0_i32_0 = arith.constant 0 : i32
    %c0_i32_1 = arith.constant 0 : i32
    return %c0_i32, %c0_i32_0 : i32, i32
  }
  func.func @transform_8(%arg0: i32) -> (i32, i32) {
    %c0_i32 = arith.constant 0 : i32
    %c0_i32_0 = arith.constant 0 : i32
    %c0_i32_1 = arith.constant 0 : i32
    return %c0_i32, %c0_i32_0 : i32, i32
  }
  func.func @transform_9(%arg0: i32) -> (i32, i32) {
    %c0_i32 = arith.constant 0 : i32
    %c0_i32_0 = arith.constant 0 : i32
    %c0_i32_1 = arith.constant 0 : i32
    return %c0_i32, %c0_i32_0 : i32, i32
  }
  func.func @transform_10(%arg0: i32) -> (i32, i32) {
    %c0_i32 = arith.constant 0 : i32
    %c0_i32_0 = arith.constant 0 : i32
    %c0_i32_1 = arith.constant 0 : i32
    return %c0_i32, %c0_i32_0 : i32, i32
  }
  func.func @transform_11(%arg0: i32) -> (i32, i32) {
    %c0_i32 = arith.constant 0 : i32
    %c0_i32_0 = arith.constant 0 : i32
    %c0_i32_1 = arith.constant 0 : i32
    return %c0_i32, %c0_i32_0 : i32, i32
  }
  func.func @transform_12(%arg0: i32) -> (i32, i32) {
    %c0_i32 = arith.constant 0 : i32
    %c0_i32_0 = arith.constant 0 : i32
    %c0_i32_1 = arith.constant 0 : i32
    return %c0_i32, %c0_i32_0 : i32, i32
  }
  func.func @transform_13(%arg0: i32) -> (i32, i32) {
    %c0_i32 = arith.constant 0 : i32
    %c0_i32_0 = arith.constant 0 : i32
    %c0_i32_1 = arith.constant 0 : i32
    return %c0_i32, %c0_i32_0 : i32, i32
  }
  func.func @transform_14(%arg0: i32) -> (i32, i32) {
    %c0_i32 = arith.constant 0 : i32
    %c0_i32_0 = arith.constant 0 : i32
    %c0_i32_1 = arith.constant 0 : i32
    return %c0_i32, %c0_i32_0 : i32, i32
  }
  func.func @transform_15(%arg0: i32) -> (i32, i32) {
    %c0_i32 = arith.constant 0 : i32
    %c0_i32_0 = arith.constant 0 : i32
    %c0_i32_1 = arith.constant 0 : i32
    return %c0_i32, %c0_i32_0 : i32, i32
  }
  func.func @transform_16(%arg0: i32) -> (i32, i32) {
    %c0_i32 = arith.constant 0 : i32
    %c0_i32_0 = arith.constant 0 : i32
    %c0_i32_1 = arith.constant 0 : i32
    return %c0_i32, %c0_i32_0 : i32, i32
  }
  func.func @transform_17(%arg0: i32) -> (i32, i32) {
    %c0_i32 = arith.constant 0 : i32
    %c0_i32_0 = arith.constant 0 : i32
    %c0_i32_1 = arith.constant 0 : i32
    return %c0_i32, %c0_i32_0 : i32, i32
  }
  func.func @transform_18(%arg0: i32) -> (i32, i32) {
    %c0_i32 = arith.constant 0 : i32
    %c0_i32_0 = arith.constant 0 : i32
    %c0_i32_1 = arith.constant 0 : i32
    return %c0_i32, %c0_i32_0 : i32, i32
  }
  func.func @transform_19(%arg0: i32) -> (i32, i32) {
    %c0_i32 = arith.constant 0 : i32
    %c0_i32_0 = arith.constant 0 : i32
    %c0_i32_1 = arith.constant 0 : i32
    return %c0_i32, %c0_i32_0 : i32, i32
  }
  func.func @transform_20(%arg0: i32) -> (i32, i32) {
    %c0_i32 = arith.constant 0 : i32
    %c0_i32_0 = arith.constant 0 : i32
    %c0_i32_1 = arith.constant 0 : i32
    return %c0_i32, %c0_i32_0 : i32, i32
  }
  func.func @transform_21(%arg0: i32) -> (i32, i32) {
    %c0_i32 = arith.constant 0 : i32
    %c0_i32_0 = arith.constant 0 : i32
    %c0_i32_1 = arith.constant 0 : i32
    return %c0_i32, %c0_i32_0 : i32, i32
  }
  func.func @transform_22(%arg0: i32) -> (i32, i32) {
    %c0_i32 = arith.constant 0 : i32
    %c0_i32_0 = arith.constant 0 : i32
    %c0_i32_1 = arith.constant 0 : i32
    return %c0_i32, %c0_i32_0 : i32, i32
  }
  func.func @transform_23(%arg0: i32) -> (i32, i32) {
    %c0_i32 = arith.constant 0 : i32
    %c0_i32_0 = arith.constant 0 : i32
    return %arg0, %c0_i32 : i32, i32
  }
}

</mosaic_0001>

<bundles_post_ra>
// kernel: tpu_custom_call.1
= control target key start
LH: loop header
LB: loop body
LE: loop exit
PB: predicated region body
PF: predicated region fallthrough
CT: control target
= control target key end

     0   :  { %v175_v0 = vlaneseq  ;;  %s7099_s27 = smov 64   ;;  %vm4276_vm3 = vcmask 523264   ;;  %s10386_s0 = inlined_call_operand.vmem [shape: f32[1,264,8], index: 0, kind: input, shape index: {}]   ;;  %s10387_s2 = inlined_call_operand.vmem [shape: f32[1,64], index: 2, kind: input, shape index: {}]   ;;  %s10388_s1 = inlined_call_operand.vmem [shape: f32[3,64], index: 1, kind: input, shape index: {}]   ;;  %s10389_s3 = inlined_call_operand.vmem [shape: f32[192,64], index: 3, kind: input, shape index: {}]   ;;  %s10390_s4 = inlined_call_operand.vmem [shape: f32[1,64], index: 4, kind: input, shape index: {}]   ;;  %s10391_s5 = inlined_call_operand.vmem [shape: f32[192,64], index: 5, kind: input, shape index: {}]   ;;  %s10392_s6 = inlined_call_operand.vmem [shape: f32[1,64], index: 6, kind: input, shape index: {}]   ;;  %s10393_s7 = inlined_call_operand.vmem [shape: f32[192,64], index: 7, kind: input, shape index: {}]   ;;  %s10394_s8 = inlined_call_operand.vmem [shape: f32[1,64], index: 8, kind: input, shape index: {}]   ;;  %s10395_s9 = inlined_call_operand.vmem [shape: f32[192,32], index: 9, kind: input, shape index: {}]   ;;  %s10396_s10 = inlined_call_operand.vmem [shape: f32[1,32], index: 10, kind: input, shape index: {}]   ;;  %s10397_s11 = inlined_call_operand.vmem [shape: f32[96,32], index: 11, kind: input, shape index: {}]   ;;  %s10398_s12 = inlined_call_operand.vmem [shape: f32[1,32], index: 12, kind: input, shape index: {}]   ;;  %s10399_s13 = inlined_call_operand.vmem [shape: f32[96,32], index: 13, kind: input, shape index: {}]   ;;  %s10400_s14 = inlined_call_operand.vmem [shape: f32[1,32], index: 14, kind: input, shape index: {}]   ;;  %s10401_s16 = inlined_call_operand.vmem [shape: f32[1,32], index: 16, kind: input, shape index: {}]   ;;  %s10402_s15 = inlined_call_operand.vmem [shape: f32[96,32], index: 15, kind: input, shape index: {}]   ;;  %s10403_s17 = inlined_call_operand.vmem [shape: f32[32,100], index: 17, kind: input, shape index: {}]   ;;  %s10404_s18 = inlined_call_operand.vmem [shape: f32[1,100], index: 18, kind: input, shape index: {}]   ;;  %s10405_s19 = inlined_call_operand.vmem [shape: f32[100,50], index: 19, kind: input, shape index: {}]   ;;  %s10406_s20 = inlined_call_operand.vmem [shape: f32[1,50], index: 20, kind: input, shape index: {}]   ;;  %s10407_s21 = inlined_call_operand.vmem [shape: f32[50,1], index: 21, kind: input, shape index: {}]   ;;  %s10408_s22 = inlined_call_operand.<no memory space> [shape: f32[1,1], index: 22, kind: input, shape index: {}]   ;;  %s10409_s23 = inlined_call_operand.vmem [shape: f32[8,1], index: 23, kind: output, shape index: {}]  }
   0x1   :  { %10431 = sst [smem:[#allocation60_spill]] %s10386_s0  ;;  %vm7702_vm10 = vmneg %vm4276_vm3 }
   0x2   :  { %10432 = sst [smem:[#allocation61_spill]] %s10387_s2  ;;  %v176_v1 = vshrl.u32 %v175_v0, 7 }
   0x3   :  { %10433 = sst [smem:[#allocation62_spill]] %s10388_s1  ;;  %s7100_s1 = smov 32  }
   0x4   :  { %10434 = sst [smem:[#allocation63_spill]] %s10389_s3  ;;  %6865 = vset.pattern.permute.xlu2 %v176_v1  ;;  %6864 = vset.pattern.permute.xlu1 %v176_v1 }
   0x5   :  { %10435 = sst [smem:[#allocation64_spill]] %s10390_s4  ;;  %6863 = vset.pattern.permute.xlu0 %v176_v1 }
   0x6   :  { %10436 = sst [smem:[#allocation65_spill]] %s10391_s5 }
   0x7   :  { %10437 = sst [smem:[#allocation66_spill]] %s10392_s6 }
   0x8   :  { %10438 = sst [smem:[#allocation67_spill]] %s10393_s7 }
   0x9   :  { %s10439_s24 = sld [smem:[#allocation60_spill]] }
   0xa   :  { %s10497_s3 = sld [smem:[#allocation62_spill]] }
   0xb   :  { %s10498_s30 = sld [smem:[#allocation63_spill]] }
   0xc   :  { %s10502_s5 = sld [smem:[#allocation65_spill]] }
   0xd   :  { %s10503_s4 = sld [smem:[#allocation64_spill]] }
   0xe   :  { %s10619_s28 = sld [smem:[#allocation67_spill]] }
   0xf   :  { %v6673_v2 = vld [vmem:[%s10439_s24 + $0x7] ss:$2 sm:$0xff]  ;;  %v6674_v9 = vld [vmem:[%s10439_s24 + $0x17] ss:$2 sm:$0xff]  ;;  %s10624_s29 = sld [smem:[#allocation66_spill]] }
  0x10   :  { %v202_v3 = vperm.slane %v6673_v2, 4  ;;  %v188_v4 = vperm.slane %v6673_v2, 2  ;;  %v174_v5 = vperm.slane %v6673_v2, 0  ;;  %v209_v6 = vperm.slane %v6673_v2, 5  ;;  %v6675_v19 = vld [vmem:[%s10439_s24 + $0x27] ss:$2 sm:$0xff] }
  0x11   :  { %v195_v7 = vperm.slane %v6673_v2, 3  ;;  %v181_v8 = vperm.slane %v6673_v2, 1  ;;  %v230_v10 = vperm.slane %v6674_v9, 0  ;;  %v223_v11 = vperm.slane %v6673_v2, 7  ;;  %v6676_v29 = vld [vmem:[%s10439_s24 + $0x37] ss:$2 sm:$0xff] }
  0x12   :  { %207 = vperm.xlu2 %6865, %v202_v3   ;;  %193 = vperm.xlu1 %6864, %v188_v4   ;;  %v216_v12 = vperm.slane %v6673_v2, 6  ;;  %v251_v13 = vperm.slane %v6674_v9, 3  ;;  %v244_v14 = vperm.slane %v6674_v9, 2  ;;  %v237_v15 = vperm.slane %v6674_v9, 1  ;;  %v6677_v36 = vld [vmem:[%s10439_s24 + $0x47] ss:$2 sm:$0xff] }
  0x13   :  { %179 = vperm.xlu0 %6863, %v174_v5   ;;  %v272_v16 = vperm.slane %v6674_v9, 6  ;;  %v265_v17 = vperm.slane %v6674_v9, 5  ;;  %v258_v18 = vperm.slane %v6674_v9, 4  ;;  %v293_v20 = vperm.slane %v6675_v19, 1  ;;  %v6678_v47 = vld [vmem:[%s10439_s24 + $0x57] ss:$2 sm:$0xff] }
  0x14   :  { %v286_v21 = vperm.slane %v6675_v19, 0  ;;  %v279_v22 = vperm.slane %v6674_v9, 7  ;;  %v314_v23 = vperm.slane %v6675_v19, 4  ;;  %v307_v24 = vperm.slane %v6675_v19, 3  ;;  %v6679_v62 = vld [vmem:[%s10439_s24 + $0x67] ss:$2 sm:$0xff] }
  0x15   :  { %v300_v25 = vperm.slane %v6675_v19, 2  ;;  %v335_v26 = vperm.slane %v6675_v19, 7  ;;  %v328_v27 = vperm.slane %v6675_v19, 6  ;;  %v321_v28 = vperm.slane %v6675_v19, 5 }
  0x16   :  { %v356_v30 = vperm.slane %v6676_v29, 2  ;;  %v349_v31 = vperm.slane %v6676_v29, 1  ;;  %v342_v32 = vperm.slane %v6676_v29, 0  ;;  %v377_v33 = vperm.slane %v6676_v29, 5 }
  0x17   :  { %v370_v34 = vperm.slane %v6676_v29, 4  ;;  %v363_v35 = vperm.slane %v6676_v29, 3  ;;  %v398_v37 = vperm.slane %v6677_v36, 0  ;;  %v391_v38 = vperm.slane %v6676_v29, 7 }
  0x18   :  { %v384_v39 = vperm.slane %v6676_v29, 6  ;;  %v419_v40 = vperm.slane %v6677_v36, 3  ;;  %v412_v41 = vperm.slane %v6677_v36, 2  ;;  %v405_v42 = vperm.slane %v6677_v36, 1 }
  0x19   :  { %v440_v44 = vperm.slane %v6677_v36, 6  ;;  %v433_v45 = vperm.slane %v6677_v36, 5  ;;  %v426_v46 = vperm.slane %v6677_v36, 4  ;;  %v461_v49 = vperm.slane %v6678_v47, 1 }
  0x1a   :  { %214 = vperm.xlu2 %6865, %v209_v6   ;;  %200 = vperm.xlu1 %6864, %v195_v7   ;;  %v454_v50 = vperm.slane %v6678_v47, 0  ;;  %v447_v51 = vperm.slane %v6677_v36, 7  ;;  %v482_v53 = vperm.slane %v6678_v47, 4  ;;  %v475_v54 = vperm.slane %v6678_v47, 3 }
  0x1b   :  { %186 = vperm.xlu0 %6863, %v181_v8   ;;  %v468_v55 = vperm.slane %v6678_v47, 2  ;;  %v503_v59 = vperm.slane %v6678_v47, 7  ;;  %v496_v60 = vperm.slane %v6678_v47, 6  ;;  %v489_v61 = vperm.slane %v6678_v47, 5 }
  0x1c   :  { %v524_v2 = vperm.slane %v6679_v62, 2  ;;  %v517_v3 = vperm.slane %v6679_v62, 1  ;;  %v510_v4 = vperm.slane %v6679_v62, 0  ;;  %v545_v8 = vperm.slane %v6679_v62, 5 }
  0x1d   :  { %v538_v9 = vperm.slane %v6679_v62, 4 }
  0x22   :  { %235 = vperm.xlu2 %6865, %v230_v10   ;;  %228 = vperm.xlu1 %6864, %v223_v11   ;;  %v531_v10 = vperm.slane %v6679_v62, 3  ;;  %v6680_v11 = vld [vmem:[%s10439_s24 + $0x77] ss:$2 sm:$0xff] }
  0x23   :  { %221 = vperm.xlu0 %6863, %v216_v12   ;;  %v594_v29 = vperm.slane %v6680_v11, 4  ;;  %v615_v36 = vperm.slane %v6680_v11, 7 }
  0x2a   :  { %256 = vperm.xlu2 %6865, %v251_v13   ;;  %249 = vperm.xlu1 %6864, %v244_v14  }
  0x2b   :  { %242 = vperm.xlu0 %6863, %v237_v15   ;;  %v566_v15 = vperm.slane %v6680_v11, 0 }
  0x32   :  { %277 = vperm.xlu2 %6865, %v272_v16   ;;  %270 = vperm.xlu1 %6864, %v265_v17   ;;  %v559_v16 = vperm.slane %v6679_v62, 7  ;;  %v552_v17 = vperm.slane %v6679_v62, 6 }
  0x33   :  { %263 = vperm.xlu0 %6863, %v258_v18  }
  0x3a   :  { %298 = vperm.xlu2 %6865, %v293_v20   ;;  %291 = vperm.xlu1 %6864, %v286_v21   ;;  %v587_v21 = vperm.slane %v6680_v11, 3 }
  0x3b   :  { %284 = vperm.xlu0 %6863, %v279_v22   ;;  %v580_v22 = vperm.slane %v6680_v11, 2 }
  0x42   :  { %319 = vperm.xlu2 %6865, %v314_v23   ;;  %312 = vperm.xlu1 %6864, %v307_v24   ;;  %v573_v23 = vperm.slane %v6680_v11, 1 }
  0x43   :  { %305 = vperm.xlu0 %6863, %v300_v25  }
  0x4a   :  { %340 = vperm.xlu2 %6865, %v335_v26   ;;  %333 = vperm.xlu1 %6864, %v328_v27   ;;  %v608_v27 = vperm.slane %v6680_v11, 6 }
  0x4b   :  { %326 = vperm.xlu0 %6863, %v321_v28   ;;  %v601_v28 = vperm.slane %v6680_v11, 5 }
  0x52   :  { %361 = vperm.xlu2 %6865, %v356_v30   ;;  %354 = vperm.xlu1 %6864, %v349_v31   ;;  %v6681_v30 = vld [vmem:[%s10439_s24 + $0x87] ss:$2 sm:$0xff] }
  0x53   :  { %347 = vperm.xlu0 %6863, %v342_v32   ;;  %v671_v47 = vperm.slane %v6681_v30, 7 }
  0x5a   :  { %382 = vperm.xlu2 %6865, %v377_v33   ;;  %375 = vperm.xlu1 %6864, %v370_v34   ;;  %v629_v34 = vperm.slane %v6681_v30, 1 }
  0x5b   :  { %368 = vperm.xlu0 %6863, %v363_v35   ;;  %v622_v35 = vperm.slane %v6681_v30, 0 }
  0x62   :  { %403 = vperm.xlu2 %6865, %v398_v37   ;;  %396 = vperm.xlu1 %6864, %v391_v38  }
  0x63   :  { %389 = vperm.xlu0 %6863, %v384_v39  }
  0x6a   :  { %424 = vperm.xlu2 %6865, %v419_v40   ;;  %417 = vperm.xlu1 %6864, %v412_v41   ;;  %v650_v40 = vperm.slane %v6681_v30, 4  ;;  %v643_v41 = vperm.slane %v6681_v30, 3 }
  0x6b   :  { %410 = vperm.xlu0 %6863, %v405_v42   ;;  %v636_v42 = vperm.slane %v6681_v30, 2 }
  0x6c   :  { %v7236_v43 = vpop.permute.xlu2 %207 }
  0x72   :  { %445 = vperm.xlu2 %6865, %v440_v44   ;;  %438 = vperm.xlu1 %6864, %v433_v45  }
  0x73   :  { %431 = vperm.xlu0 %6863, %v426_v46  }
  0x74   :  { %v7241_v48 = vpop.permute.xlu2 %214 }
  0x7a   :  { %466 = vperm.xlu2 %6865, %v461_v49   ;;  %459 = vperm.xlu1 %6864, %v454_v50   ;;  %v664_v49 = vperm.slane %v6681_v30, 6  ;;  %v657_v50 = vperm.slane %v6681_v30, 5 }
  0x7b   :  { %452 = vperm.xlu0 %6863, %v447_v51   ;;  %v6682_v51 = vld [vmem:[%s10439_s24 + $0x97] ss:$2 sm:$0xff] }
  0x7c   :  { %v7243_v52 = vpop.permute.xlu2 %235 }
  0x82   :  { %487 = vperm.xlu2 %6865, %v482_v53   ;;  %480 = vperm.xlu1 %6864, %v475_v54  }
  0x83   :  { %473 = vperm.xlu0 %6863, %v468_v55  }
  0x84   :  { %v7245_v56 = vpop.permute.xlu2 %256  ;;  %v7247_v57 = vpop.permute.xlu1 %193 }
  0x85   :  { %v7249_v58 = vpop.permute.xlu0 %179 }
  0x8a   :  { %508 = vperm.xlu2 %6865, %v503_v59   ;;  %501 = vperm.xlu1 %6864, %v496_v60   ;;  %v692_v59 = vperm.slane %v6682_v51, 2  ;;  %v685_v60 = vperm.slane %v6682_v51, 1 }
  0x8b   :  { %494 = vperm.xlu0 %6863, %v489_v61   ;;  %v678_v61 = vperm.slane %v6682_v51, 0 }
  0x8c   :  { %v7254_v63 = vpop.permute.xlu2 %277  ;;  %v7256_v0 = vpop.permute.xlu1 %200 }
  0x8d   :  { %v7258_v1 = vpop.permute.xlu0 %186 }
  0x92   :  { %529 = vperm.xlu2 %6865, %v524_v2   ;;  %522 = vperm.xlu1 %6864, %v517_v3  }
  0x93   :  { %515 = vperm.xlu0 %6863, %v510_v4   ;;  %v713_v4 = vperm.slane %v6682_v51, 5 }
  0x94   :  { %v7260_v5 = vpop.permute.xlu2 %298  ;;  %v7262_v6 = vpop.permute.xlu1 %228 }
  0x95   :  { %v7264_v7 = vpop.permute.xlu0 %221 }
  0x9a   :  { %550 = vperm.xlu2 %6865, %v545_v8   ;;  %543 = vperm.xlu1 %6864, %v538_v9   ;;  %v706_v8 = vperm.slane %v6682_v51, 4  ;;  %v699_v9 = vperm.slane %v6682_v51, 3 }
  0x9b   :  { %536 = vperm.xlu0 %6863, %v531_v10   ;;  %v6683_v10 = vld [vmem:[%s10439_s24 + $0xa7] ss:$2 sm:$0xff] }
  0x9c   :  { %v7269_v12 = vpop.permute.xlu2 %319  ;;  %v7271_v13 = vpop.permute.xlu1 %249  ;;  %v748_v30 = vperm.slane %v6683_v10, 2 }
  0x9d   :  { %v7273_v14 = vpop.permute.xlu0 %242 }
  0xa2   :  { %571 = vperm.xlu2 %6865, %v566_v15   ;;  %564 = vperm.xlu1 %6864, %v559_v16  }
  0xa3   :  { %557 = vperm.xlu0 %6863, %v552_v17   ;;  %v734_v17 = vperm.slane %v6683_v10, 0 }
  0xa4   :  { %v7275_v18 = vpop.permute.xlu2 %340  ;;  %v7277_v19 = vpop.permute.xlu1 %270 }
  0xa5   :  { %v7279_v20 = vpop.permute.xlu0 %263 }
  0xaa   :  { %592 = vperm.xlu2 %6865, %v587_v21   ;;  %585 = vperm.xlu1 %6864, %v580_v22   ;;  %v727_v21 = vperm.slane %v6682_v51, 7  ;;  %v720_v22 = vperm.slane %v6682_v51, 6 }
  0xab   :  { %578 = vperm.xlu0 %6863, %v573_v23  }
  0xac   :  { %v7281_v24 = vpop.permute.xlu2 %361  ;;  %v7283_v25 = vpop.permute.xlu1 %291 }
  0xad   :  { %v7285_v26 = vpop.permute.xlu0 %284 }
  0xb2   :  { %613 = vperm.xlu2 %6865, %v608_v27   ;;  %606 = vperm.xlu1 %6864, %v601_v28  }
  0xb3   :  { %599 = vperm.xlu0 %6863, %v594_v29   ;;  %v755_v29 = vperm.slane %v6683_v10, 3 }
  0xb4   :  { %v7290_v31 = vpop.permute.xlu2 %382  ;;  %v7292_v32 = vpop.permute.xlu1 %312 }
  0xb5   :  { %v7294_v33 = vpop.permute.xlu0 %305 }
  0xba   :  { %634 = vperm.xlu2 %6865, %v629_v34   ;;  %627 = vperm.xlu1 %6864, %v622_v35   ;;  %v741_v34 = vperm.slane %v6683_v10, 1 }
  0xbb   :  { %620 = vperm.xlu0 %6863, %v615_v36  }
  0xbc   :  { %v7296_v37 = vpop.permute.xlu2 %403  ;;  %v7298_v38 = vpop.permute.xlu1 %333 }
  0xbd   :  { %v7300_v39 = vpop.permute.xlu0 %326 }
  0xc2   :  { %655 = vperm.xlu2 %6865, %v650_v40   ;;  %648 = vperm.xlu1 %6864, %v643_v41   ;;  %v776_v41 = vperm.slane %v6683_v10, 6 }
  0xc3   :  { %641 = vperm.xlu0 %6863, %v636_v42   ;;  %v769_v42 = vperm.slane %v6683_v10, 5 }
  0xc4   :  { %v7302_v44 = vpop.permute.xlu2 %424  ;;  %v7304_v45 = vpop.permute.xlu1 %354 }
  0xc5   :  { %10440 = vst [vmem:[#allocation3_spill] sm:$0xff] %v7302_v44  ;;  %v7306_v46 = vpop.permute.xlu0 %347 }
  0xca   :  { %676 = vperm.xlu2 %6865, %v671_v47   ;;  %669 = vperm.xlu1 %6864, %v664_v49   ;;  %v762_v47 = vperm.slane %v6683_v10, 4  ;;  %v6684_v49 = vld [vmem:[%s10439_s24 + $0xb7] ss:$2 sm:$0xff] }
  0xcb   :  { %662 = vperm.xlu0 %6863, %v657_v50  }
  0xcc   :  { %v7311_v53 = vpop.permute.xlu2 %445  ;;  %v7313_v54 = vpop.permute.xlu1 %375 }
  0xcd   :  { %v7315_v55 = vpop.permute.xlu0 %368 }
  0xd2   :  { %697 = vperm.xlu2 %6865, %v692_v59   ;;  %690 = vperm.xlu1 %6864, %v685_v60   ;;  %v797_v60 = vperm.slane %v6684_v49, 1 }
  0xd3   :  { %683 = vperm.xlu0 %6863, %v678_v61   ;;  %v790_v61 = vperm.slane %v6684_v49, 0 }
  0xd4   :  { %v7317_v62 = vpop.permute.xlu2 %466  ;;  %v7319_v2 = vpop.permute.xlu1 %396 }
  0xd5   :  { %10441 = vst [vmem:[#allocation4_spill] sm:$0xff] %v7317_v62  ;;  %v7321_v3 = vpop.permute.xlu0 %389  ;;  %v4360_v62 = vld [vmem:[%s10498_s30 + $0x98] sm:$0xff] }
  0xd6   :  { %10442 = vst [vmem:[#allocation5_spill] sm:$0xff] %v7319_v2 }
  0xda   :  { %718 = vperm.xlu2 %6865, %v713_v4   ;;  %711 = vperm.xlu1 %6864, %v706_v8   ;;  %v783_v4 = vperm.slane %v6683_v10, 7  ;;  %v7367_v10 = vld [vmem:[%s10439_s24 + $0x9] ss:$2 sm:$0xff] }
  0xdb   :  { %704 = vperm.xlu0 %6863, %v699_v9  }
  0xdc   :  { %v7326_v11 = vpop.permute.xlu2 %487  ;;  %v7328_v15 = vpop.permute.xlu1 %417 }
  0xdd   :  { %10443 = vst [vmem:[#allocation6_spill] sm:$0xff] %v7326_v11  ;;  %v7330_v16 = vpop.permute.xlu0 %410 }
  0xde   :  { %10444 = vst [vmem:[#allocation7_spill] sm:$0xff] %v7330_v16 }
  0xe2   :  { %739 = vperm.xlu2 %6865, %v734_v17   ;;  %732 = vperm.xlu1 %6864, %v727_v21   ;;  %v818_v21 = vperm.slane %v6684_v49, 4 }
  0xe3   :  { %725 = vperm.xlu0 %6863, %v720_v22   ;;  %v811_v22 = vperm.slane %v6684_v49, 3 }
  0xe4   :  { %v7332_v23 = vpop.permute.xlu2 %508  ;;  %v7334_v27 = vpop.permute.xlu1 %438 }
  0xe5   :  { %10445 = vst [vmem:[#allocation8_spill] sm:$0xff] %v7332_v23  ;;  %v7336_v28 = vpop.permute.xlu0 %431 }
  0xe6   :  { %10446 = vst [vmem:[#allocation9_spill] sm:$0xff] %v7334_v27  ;;  %v7552_v27 = vld [vmem:[%s10439_s24 + $0x39] ss:$2 sm:$0xff] }
  0xea   :  { %760 = vperm.xlu2 %6865, %v755_v29   ;;  %753 = vperm.xlu1 %6864, %v748_v30   ;;  %v804_v29 = vperm.slane %v6684_v49, 2  ;;  %v7362_v30 = vld [vmem:[%s10439_s24 + $0x8] ss:$2 sm:$0xff]  ;;  %v2352_v49 = vperm.slane %v7367_v10, 0 }
  0xeb   :  { %746 = vperm.xlu0 %6863, %v741_v34  }
  0xec   :  { %v7338_v35 = vpop.permute.xlu2 %529  ;;  %v7340_v36 = vpop.permute.xlu1 %459 }
  0xed   :  { %10447 = vst [vmem:[#allocation10_spill] sm:$0xff] %v7338_v35  ;;  %v7342_v40 = vpop.permute.xlu0 %452 }
  0xee   :  { %10448 = vst [vmem:[#allocation11_spill] sm:$0xff] %v7342_v40 }
  0xf2   :  { %781 = vperm.xlu2 %6865, %v776_v41   ;;  %774 = vperm.xlu1 %6864, %v769_v42  }
  0xf3   :  { %767 = vperm.xlu0 %6863, %v762_v47   ;;  %v1213_v47 = vperm.slane %v7362_v30, 2 }
  0xf4   :  { %v7347_v50 = vpop.permute.xlu2 %550  ;;  %v7349_v51 = vpop.permute.xlu1 %480 }
  0xf5   :  { %10449 = vst [vmem:[#allocation12_spill] sm:$0xff] %v7347_v50  ;;  %v7351_v59 = vpop.permute.xlu0 %473 }
  0xf6   :  { %10450 = vst [vmem:[#allocation13_spill] sm:$0xff] %v7349_v51 }
  0xf7   :  { %10451 = vst [vmem:[#allocation14_spill] sm:$0xff] %v7351_v59 }
  0xfa   :  { %802 = vperm.xlu2 %6865, %v797_v60   ;;  %795 = vperm.xlu1 %6864, %v790_v61   ;;  %v1199_v60 = vperm.slane %v7362_v30, 0 }
  0xfb   :  { %788 = vperm.xlu0 %6863, %v783_v4  }
  0xfc   :  { %v7353_v8 = vpop.permute.xlu2 %571  ;;  %v7355_v9 = vpop.permute.xlu1 %501 }
  0xfd   :  { %10452 = vst [vmem:[#allocation15_spill] sm:$0xff] %v7353_v8  ;;  %v7357_v17 = vpop.permute.xlu0 %494 }
  0xfe   :  { %10453 = vst [vmem:[#allocation16_spill] sm:$0xff] %v7355_v9 }
  0xff   :  { %10454 = vst [vmem:[#allocation17_spill] sm:$0xff] %v7357_v17 }
 0x102   :  { %823 = vperm.xlu2 %6865, %v818_v21   ;;  %816 = vperm.xlu1 %6864, %v811_v22   ;;  %v2380_v22 = vperm.slane %v7367_v10, 4 }
 0x103   :  { %809 = vperm.xlu0 %6863, %v804_v29   ;;  %v1227_v29 = vperm.slane %v7362_v30, 4 }
 0x104   :  { %v7369_v34 = vpop.permute.xlu2 %592  ;;  %v7371_v41 = vpop.permute.xlu1 %522 }
 0x105   :  { %10455 = vst [vmem:[#allocation18_spill] sm:$0xff] %v7369_v34  ;;  %v7373_v42 = vpop.permute.xlu0 %515  ;;  %v2366_v34 = vperm.slane %v7367_v10, 2 }
 0x106   :  { %10456 = vst [vmem:[#allocation19_spill] sm:$0xff] %v7371_v41  ;;  %v1241_v41 = vperm.slane %v7362_v30, 6 }
 0x107   :  { %10457 = vst [vmem:[#allocation20_spill] sm:$0xff] %v7373_v42 }
 0x10a   :  { %1218 = vperm.xlu2 %6865, %v1213_v47   ;;  %2357 = vperm.xlu1 %6864, %v2352_v49   ;;  %v7390_v47 = vld [vmem:[%s10439_s24 + $0x18] ss:$2 sm:$0xff] }
 0x10b   :  { %1204 = vperm.xlu0 %6863, %v1199_v60   ;;  %v1255_v50 = vperm.slane %v7390_v47, 0  ;;  %v1269_v23 = vperm.slane %v7390_v47, 2 }
 0x10c   :  { %v7378_v61 = vpop.permute.xlu2 %613  ;;  %v7380_v4 = vpop.permute.xlu1 %543 }
 0x10d   :  { %10458 = vst [vmem:[#allocation21_spill] sm:$0xff] %v7378_v61  ;;  %v7382_v21 = vpop.permute.xlu0 %536 }
 0x10e   :  { %10459 = vst [vmem:[#allocation22_spill] sm:$0xff] %v7380_v4 }
 0x10f   :  { %10460 = vst [vmem:[#allocation23_spill] sm:$0xff] %v7382_v21  ;;  %v2394_v21 = vperm.slane %v7367_v10, 6 }
 0x112   :  { %2385 = vperm.xlu2 %6865, %v2380_v22   ;;  %1232 = vperm.xlu1 %6864, %v1227_v29   ;;  %v7406_v22 = vld [vmem:[%s10439_s24 + $0x19] ss:$2 sm:$0xff] }
 0x113   :  { %2371 = vperm.xlu0 %6863, %v2366_v34  }
 0x114   :  { %v7392_v49 = vpop.permute.xlu2 %634  ;;  %v7394_v60 = vpop.permute.xlu1 %564 }
 0x115   :  { %10461 = vst [vmem:[#allocation24_spill] sm:$0xff] %v7392_v49  ;;  %v7396_v61 = vpop.permute.xlu0 %557 }
 0x116   :  { %10462 = vst [vmem:[#allocation25_spill] sm:$0xff] %v7394_v60  ;;  %v1206_v60 = vperm.slane %v7362_v30, 1 }
 0x117   :  { %10463 = vst [vmem:[#allocation26_spill] sm:$0xff] %v7396_v61  ;;  %v2408_v61 = vperm.slane %v7406_v22, 0 }
 0x11a   :  { %1260 = vperm.xlu2 %6865, %v1255_v50   ;;  %2399 = vperm.xlu1 %6864, %v2394_v21   ;;  %v1283_v21 = vperm.slane %v7390_v47, 4 }
 0x11b   :  { %1246 = vperm.xlu0 %6863, %v1241_v41  }
 0x11c   :  { %v7401_v34 = vpop.permute.xlu1 %585  ;;  %v7410_v49 = vpop.permute.xlu2 %655 }
 0x11d   :  { %10464 = vst [vmem:[#allocation27_spill] sm:$0xff] %v7401_v34  ;;  %v7408_v29 = vpop.permute.xlu0 %578  ;;  %v2359_v34 = vperm.slane %v7367_v10, 1 }
 0x11e   :  { %10465 = vst [vmem:[#allocation28_spill] sm:$0xff] %v7408_v29  ;;  %v2422_v29 = vperm.slane %v7406_v22, 2 }
 0x11f   :  { %10466 = vst [vmem:[#allocation29_spill] sm:$0xff] %v7410_v49 }
 0x122   :  { %1211 = vperm.xlu2 %6865, %v1206_v60   ;;  %1274 = vperm.xlu1 %6864, %v1269_v23   ;;  %v2436_v23 = vperm.slane %v7406_v22, 4 }
 0x123   :  { %2413 = vperm.xlu0 %6863, %v2408_v61   ;;  %v1220_v61 = vperm.slane %v7362_v30, 3 }
 0x124   :  { %v7415_v50 = vpop.permute.xlu1 %606  ;;  %v7422_v49 = vpop.permute.xlu2 %676 }
 0x125   :  { %10467 = vst [vmem:[#allocation30_spill] sm:$0xff] %v7415_v50  ;;  %v7417_v41 = vpop.permute.xlu0 %599 }
 0x126   :  { %10468 = vst [vmem:[#allocation31_spill] sm:$0xff] %v7417_v41 }
 0x127   :  { %10469 = vst [vmem:[#allocation32_spill] sm:$0xff] %v7422_v49 }
 0x12a   :  { %1288 = vperm.xlu2 %6865, %v1283_v21   ;;  %2364 = vperm.xlu1 %6864, %v2359_v34   ;;  %v1297_v21 = vperm.slane %v7390_v47, 6  ;;  %v2373_v34 = vperm.slane %v7367_v10, 3 }
 0x12b   :  { %2427 = vperm.xlu0 %6863, %v2422_v29  }
 0x12c   :  { %v7424_v17 = vpop.permute.xlu1 %627  ;;  %v7430_v50 = vpop.permute.xlu2 %697 }
 0x12d   :  { %10470 = vst [vmem:[#allocation33_spill] sm:$0xff] %v7424_v17  ;;  %v7426_v60 = vpop.permute.xlu0 %620 }
 0x12e   :  { %10471 = vst [vmem:[#allocation34_spill] sm:$0xff] %v7426_v60 }
 0x12f   :  { %10472 = vst [vmem:[#allocation35_spill] sm:$0xff] %v7430_v50  ;;  %v2450_v50 = vperm.slane %v7406_v22, 6 }
 0x132   :  { %2441 = vperm.xlu1 %6864, %v2436_v23  }
 0x133   :  { %1225 = vperm.xlu0 %6863, %v1220_v61   ;;  %v7450_v61 = vld [vmem:[%s10439_s24 + $0x28] ss:$2 sm:$0xff] }
 0x134   :  { %v7432_v41 = vpop.permute.xlu1 %648  ;;  %v7438_v29 = vpop.permute.xlu2 %718 }
 0x135   :  { %10473 = vst [vmem:[#allocation36_spill] sm:$0xff] %v7432_v41  ;;  %v7434_v8 = vpop.permute.xlu0 %641 }
 0x136   :  { %10474 = vst [vmem:[#allocation37_spill] sm:$0xff] %v7434_v8 }
 0x137   :  { %10475 = vst [vmem:[#allocation38_spill] sm:$0xff] %v7438_v29 }
 0x13a   :  { %1302 = vperm.xlu1 %6864, %v1297_v21  }
 0x13b   :  { %2378 = vperm.xlu0 %6863, %v2373_v34   ;;  %v1311_v34 = vperm.slane %v7450_v61, 0 }
 0x13c   :  { %v7440_v49 = vpop.permute.xlu1 %669  ;;  %v7454_v21 = vpop.permute.xlu2 %739 }
 0x13d   :  { %10476 = vst [vmem:[#allocation39_spill] sm:$0xff] %v7440_v49  ;;  %v7442_v60 = vpop.permute.xlu0 %662 }
 0x13e   :  { %10477 = vst [vmem:[#allocation40_spill] sm:$0xff] %v7442_v60 }
 0x13f   :  { %10480 = vst [vmem:[#allocation43_spill] sm:$0xff] %v7454_v21 }
 0x143   :  { %2455 = vperm.xlu0 %6863, %v2450_v50   ;;  %v2401_v50 = vperm.slane %v7367_v10, 7 }
 0x144   :  { %v7445_v23 = vpop.permute.xlu1 %690  ;;  %v7462_v49 = vpop.permute.xlu2 %760 }
 0x145   :  { %10478 = vst [vmem:[#allocation41_spill] sm:$0xff] %v7445_v23  ;;  %v7452_v41 = vpop.permute.xlu0 %683 }
 0x146   :  { %10479 = vst [vmem:[#allocation42_spill] sm:$0xff] %v7452_v41  ;;  %v7469_v41 = vld [vmem:[%s10439_s24 + $0x29] ss:$2 sm:$0xff] }
 0x147   :  { %10483 = vst [vmem:[#allocation46_spill] sm:$0xff] %v7462_v49 }
 0x14b   :  { %1316 = vperm.xlu0 %6863, %v1311_v34   ;;  %v2478_v34 = vperm.slane %v7469_v41, 2 }
 0x14c   :  { %v7457_v29 = vpop.permute.xlu1 %711  ;;  %v7474_v8 = vpop.permute.xlu2 %781 }
 0x14d   :  { %10481 = vst [vmem:[#allocation44_spill] sm:$0xff] %v7457_v29  ;;  %v7459_v60 = vpop.permute.xlu0 %704 }
 0x14e   :  { %10482 = vst [vmem:[#allocation45_spill] sm:$0xff] %v7459_v60 }
 0x14f   :  { %10486 = vst [vmem:[#allocation49_spill] sm:$0xff] %v7474_v8 }
 0x153   :  { %2406 = vperm.xlu0 %6863, %v2401_v50   ;;  %v1339_v50 = vperm.slane %v7450_v61, 4 }
 0x154   :  { %v7464_v23 = vpop.permute.xlu1 %732  ;;  %v7481_v49 = vpop.permute.xlu2 %802 }
 0x155   :  { %10484 = vst [vmem:[#allocation47_spill] sm:$0xff] %v7464_v23  ;;  %v7471_v21 = vpop.permute.xlu0 %725 }
 0x156   :  { %10485 = vst [vmem:[#allocation48_spill] sm:$0xff] %v7471_v21  ;;  %v2429_v21 = vperm.slane %v7406_v22, 3 }
 0x157   :  { %10489 = vst [vmem:[#allocation52_spill] sm:$0xff] %v7481_v49 }
 0x15b   :  { %2483 = vperm.xlu0 %6863, %v2478_v34  }
 0x15c   :  { %v7476_v60 = vpop.permute.xlu1 %753  ;;  %v7492_v34 = vpop.permute.xlu2 %823 }
 0x15d   :  { %10487 = vst [vmem:[#allocation50_spill] sm:$0xff] %v7476_v60  ;;  %v7478_v29 = vpop.permute.xlu0 %746 }
 0x15e   :  { %10488 = vst [vmem:[#allocation51_spill] sm:$0xff] %v7478_v29  ;;  %v2506_v29 = vperm.slane %v7469_v41, 6 }
 0x15f   :  { %10494 = vst [vmem:[#allocation57_spill] sm:$0xff] %v7492_v34 }
 0x163   :  { %1344 = vperm.xlu0 %6863, %v1339_v50   ;;  %v7500_v50 = vld [vmem:[%s10439_s24 + $0x38] ss:$2 sm:$0xff] }
 0x164   :  { %v7483_v23 = vpop.permute.xlu1 %774 }
 0x165   :  { %10490 = vst [vmem:[#allocation53_spill] sm:$0xff] %v7483_v23  ;;  %v7485_v17 = vpop.permute.xlu0 %767  ;;  %v4364_v23 = vld [vmem:[%s10498_s30 + $0xb8] sm:$0xff] }
 0x166   :  { %10491 = vst [vmem:[#allocation54_spill] sm:$0xff] %v7485_v17  ;;  %4778 = vmatpush.msra.mxu1 %v4364_v23  ;;  %v4361_v23 = vld [vmem:[%s10498_s30 + $0xa0] sm:$0xff] }
 0x16b   :  { %2434 = vperm.xlu0 %6863, %v2429_v21   ;;  %v172_v21 = vld [vmem:[%s10497_s3] sm:$0x7]  ;;  %s10499_s3 = sld [smem:[#allocation61_spill]] }
 0x16c   :  { %v7488_v51 = vpop.permute.xlu1 %795  ;;  %v7514_v34 = vperm.slane %v172_v21, 0  ;;  %v7526_v40 = vperm.slane %v172_v21, 2 }
 0x16d   :  { %10492 = vst [vmem:[#allocation55_spill] sm:$0xff] %v7488_v51  ;;  %v7490_v8 = vpop.permute.xlu0 %788  ;;  %v7519_v51 = vperm.slane %v172_v21, 1 }
 0x16e   :  { %10493 = vst [vmem:[#allocation56_spill] sm:$0xff] %v7490_v8  ;;  %v1367_v8 = vperm.slane %v7500_v50, 0  ;;  %v1071_v4 = vmul.f32 %v7514_v34, %v7249_v58  ;;  %v4359_v58 = vld [vmem:[%s10498_s30 + $0x90] sm:$0xff] }
 0x171   :  { %v7537_v42 = vld [vmem:[%s10499_s3] ss:$0 sm:$0xff] }
 0x173   :  { %2511 = vperm.xlu0 %6863, %v2506_v29   ;;  %v1219_v29 = vpop.permute.xlu2 %1218 }
 0x174   :  { %v7495_v60 = vpop.permute.xlu1 %816 }
 0x175   :  { %10495 = vst [vmem:[#allocation58_spill] sm:$0xff] %v7495_v60  ;;  %v7502_v49 = vpop.permute.xlu0 %809  ;;  %v4363_v60 = vld [vmem:[%s10498_s30 + $0xb0] sm:$0xff] }
 0x176   :  { %10496 = vst [vmem:[#allocation59_spill] sm:$0xff] %v7502_v49  ;;  %4779 = vmatpush.msra.mxu1 %v4363_v60  ;;  %v4362_v49 = vld [vmem:[%s10498_s30 + $0xa8] sm:$0xff]  ;;  %v2457_v60 = vperm.slane %v7406_v22, 7 }
 0x178   :  { %4780 = vmatpush.msra.mxu1 %v4362_v49 }
 0x17a   :  { %4781 = vmatpush.msra.mxu1 %v4361_v23 }
 0x17b   :  { %1372 = vperm.xlu0 %6863, %v1367_v8   ;;  %v2386_v21 = vpop.permute.xlu2 %2385 }
 0x17c   :  { %v2358_v17 = vpop.permute.xlu1 %2357  ;;  %4782 = vmatpush.msra.mxu1 %v4360_v62  ;;  %v3253_v44 = vmul.f32 %v7526_v40, %v2386_v21  ;;  %v1234_v21 = vperm.slane %v7362_v30, 5 }
 0x17d   :  { %v1205_v35 = vpop.permute.xlu0 %1204  ;;  %v3249_v49 = vmul.f32 %v7526_v40, %v2358_v17  ;;  %v4358_v17 = vld [vmem:[%s10498_s30 + $0x88] sm:$0xff] }
 0x17e   :  { %v2096_v8 = vmul.f32 %v7519_v51, %v1205_v35  ;;  %v2098_v35 = vmul.f32 %v7519_v51, %v1219_v29  ;;  %4783 = vmatpush.msra.mxu1 %v4359_v58 }
 0x180   :  { %v2224_v9 = vadd.f32 %v2096_v8, %v1071_v4  ;;  %v1073_v4 = vmul.f32 %v7514_v34, %v7247_v57  ;;  %4784 = vmatpush.msra.mxu1 %v4358_v17  ;;  %v2534_v17 = vperm.slane %v7552_v27, 2 }
 0x182   :  { %v3377_v23 = vadd.f32 %v3249_v49, %v2224_v9  ;;  %v1075_v9 = vmul.f32 %v7514_v34, %v7236_v43  ;;  %v4357_v49 = vld [vmem:[%s10498_s30 + $0x80] sm:$0xff]  ;;  %v2226_v57 = vadd.f32 %v2098_v35, %v1073_v4 }
 0x183   :  { %2462 = vperm.xlu0 %6863, %v2457_v60   ;;  %4785 = vmatpush.msra.mxu1 %v4357_v49  ;;  %v1261_v4 = vpop.permute.xlu2 %1260 }
 0x184   :  { %v1233_v8 = vpop.permute.xlu1 %1232  ;;  %v3508_v62 = vadd.f32 %v7537_v42, %v3377_v23 }
 0x185   :  { %v2100_v29 = vmul.f32 %v7519_v51, %v1233_v8  ;;  %v2372_v60 = vpop.permute.xlu0 %2371 }
 0x186   :  { %v3251_v58 = vmul.f32 %v7526_v40, %v2372_v60  ;;  %vm3636_vm0 = vcmp.gt.f32.partialorder %v3508_v62, 0.0  ;;  %v3764_v23 = vmul.f32 0.2, %v3508_v62 }
 0x187   :  { %v2228_v59 = vadd.f32 %v2100_v29, %v1075_v9 }
 0x188   :  { %v3379_v16 = vadd.f32 %v3251_v58, %v2226_v57  ;;  %v3892_v43 = vsel %vm3636_vm0, %v3508_v62, %v3764_v23  ;;  %v1395_v62 = vperm.slane %v7500_v50, 4  ;;  %v1079_v58 = vmul.f32 %v7514_v34, %v7243_v52 }
 0x189   :  { %v3381_v11 = vadd.f32 %v3253_v44, %v2228_v59  ;;  %4084 = vrot.lane.b32.xlu2 %v3892_v43, %s7099_s27  ;;  %v1077_v23 = vmul.f32 %v7514_v34, %v7264_v7  ;;  %v2387_v43 = vperm.slane %v7367_v10, 5  ;;  %v1072_v7 = vmul.f32 %v7514_v34, %v7258_v1 }
 0x18a   :  { %v3510_v8 = vadd.f32 %v7537_v42, %v3379_v16 }
 0x18b   :  { %v3512_v35 = vadd.f32 %v7537_v42, %v3381_v11  ;;  %2539 = vperm.xlu0 %6863, %v2534_v17   ;;  %v2104_v11 = vmul.f32 %v7519_v51, %v1261_v4 }
 0x18c   :  { %v2400_v60 = vpop.permute.xlu1 %2399  ;;  %vm3638_vm1 = vcmp.gt.f32.partialorder %v3510_v8, 0.0  ;;  %v3766_v49 = vmul.f32 0.2, %v3510_v8 }
 0x18d   :  { %v1247_v2 = vpop.permute.xlu0 %1246  ;;  %vm3640_vm2 = vcmp.gt.f32.partialorder %v3512_v35, 0.0  ;;  %v3768_v9 = vmul.f32 0.2, %v3512_v35  ;;  %v2232_v4 = vadd.f32 %v2104_v11, %v1079_v58  ;;  %v1325_v58 = vperm.slane %v7450_v61, 2 }
 0x18e   :  { %v3894_v44 = vsel %vm3638_vm1, %v3510_v8, %v3766_v49  ;;  %v2102_v16 = vmul.f32 %v7519_v51, %v1247_v2  ;;  %v1212_v8 = vpop.permute.xlu2 %1211  ;;  %v1248_v49 = vperm.slane %v7362_v30, 7  ;;  %v2485_v2 = vperm.slane %v7469_v41, 3 }
 0x18f   :  { %v3896_v59 = vsel %vm3640_vm2, %v3512_v35, %v3768_v9  ;;  %v2097_v9 = vmul.f32 %v7519_v51, %v1212_v8 }
 0x190   :  { %v6866_v29 = vpack.i.bf16 %v3896_v59, %v3894_v44 }
 0x191   :  { %1239 = vperm.xlu2 %6865, %v1234_v21   ;;  %v2230_v21 = vadd.f32 %v2102_v16, %v1077_v23  ;;  %v2225_v59 = vadd.f32 %v2097_v9, %v1072_v7  ;;  %v2464_v16 = vperm.slane %v7469_v41, 0  ;;  %v1262_v9 = vperm.slane %v7390_v47, 1  ;;  %v4354_v7 = vld [vmem:[%s10498_s30 + $0x68] sm:$0xff] }
 0x192   :  { %6867 = vrot.lane.b32.xlu1 %v6866_v29, %s7099_s27 }
 0x193   :  { %1400 = vperm.xlu0 %6863, %v1395_v62   ;;  %v3255_v62 = vmul.f32 %v7526_v40, %v2400_v60 }
 0x194   :  { %v7571_v57 = vpop.permute.xlu1 %1274 }
 0x195   :  { %v2414_v17 = vpop.permute.xlu0 %2413  ;;  %v3383_v10 = vadd.f32 %v3255_v62, %v2230_v21 }
 0x196   :  { %v3257_v35 = vmul.f32 %v7526_v40, %v2414_v17  ;;  %v2562_v17 = vperm.slane %v7552_v27, 6 }
 0x197   :  { %v3514_v60 = vadd.f32 %v7537_v42, %v3383_v10 }
 0x198   :  { %v3385_v52 = vadd.f32 %v3257_v35, %v2232_v4  ;;  %v7598_v4 = vld [vmem:[%s10439_s24 + $0x48] ss:$2 sm:$0xff] }
 0x199   :  { %2392 = vperm.xlu2 %6865, %v2387_v43   ;;  %v3770_v35 = vmul.f32 0.2, %v3514_v60  ;;  %vm3642_vm6 = vcmp.gt.f32.partialorder %v3514_v60, 0.0  ;;  %v1423_v10 = vperm.slane %v7598_v4, 0 }
 0x19a   :  { %1253 = vperm.xlu1 %6864, %v1248_v49   ;;  %v3516_v30 = vadd.f32 %v7537_v42, %v3385_v52  ;;  %v4356_v49 = vld [vmem:[%s10498_s30 + $0x78] sm:$0xff]  ;;  %v4355_v52 = vld [vmem:[%s10498_s30 + $0x70] sm:$0xff] }
 0x19b   :  { %2490 = vperm.xlu0 %6863, %v2485_v2   ;;  %4561 = vmatpush.msra.mxu0 %v4356_v49  ;;  %v2415_v49 = vperm.slane %v7406_v22, 1 }
 0x19c   :  { %v2365_v44 = vpop.permute.xlu1 %2364  ;;  %v3772_v43 = vmul.f32 0.2, %v3516_v30  ;;  %vm3644_vm4 = vcmp.gt.f32.partialorder %v3516_v30, 0.0 }
 0x19d   :  { %v3250_v29 = vmul.f32 %v7526_v40, %v2365_v44  ;;  %v2428_v11 = vpop.permute.xlu0 %2427  ;;  %v3898_v44 = vsel %vm3642_vm6, %v3514_v60, %v3770_v35  ;;  %4562 = vmatpush.msra.mxu0 %v4355_v52  ;;  %v4352_v60 = vld [vmem:[%s10498_s30 + $0x58] sm:$0xff] }
 0x19e   :  { %v3900_v62 = vsel %vm3644_vm4, %v3516_v30, %v3772_v43  ;;  %v4353_v30 = vld [vmem:[%s10498_s30 + $0x60] sm:$0xff]  ;;  %v2106_v43 = vmul.f32 %v7519_v51, %v7571_v57  ;;  %v1081_v57 = vmul.f32 %v7514_v34, %v7271_v13  ;;  %v4348_v13 = vld [vmem:[%s10498_s30 + $0x38] sm:$0xff] }
 0x19f   :  { %v3378_v23 = vadd.f32 %v3250_v29, %v2225_v59  ;;  %v1289_v59 = vpop.permute.xlu2 %1288  ;;  %v6871_v29 = vpack.i.bf16 %v3900_v62, %v3898_v44  ;;  %4563 = vmatpush.msra.mxu0 %v4354_v7  ;;  %v1276_v62 = vperm.slane %v7390_v47, 3  ;;  %v3259_v7 = vmul.f32 %v7526_v40, %v2428_v11 }
 0x1a1   :  { %v3509_v1 = vadd.f32 %v7537_v42, %v3378_v23  ;;  %2469 = vperm.xlu2 %6865, %v2464_v16   ;;  %v2108_v23 = vmul.f32 %v7519_v51, %v1289_v59  ;;  %4564 = vmatpush.msra.mxu0 %v4353_v30  ;;  %v2234_v59 = vadd.f32 %v2106_v43, %v1081_v57  ;;  %v4349_v30 = vld [vmem:[%s10498_s30 + $0x40] sm:$0xff]  ;;  %v1353_v43 = vperm.slane %v7450_v61, 6 }
 0x1a2   :  { %1330 = vperm.xlu1 %6864, %v1325_v58   ;;  %v1290_v57 = vperm.slane %v7390_v47, 5 }
 0x1a3   :  { %2567 = vperm.xlu0 %6863, %v2562_v17   ;;  %vm3637_vm5 = vcmp.gt.f32.partialorder %v3509_v1, 0.0  ;;  %v3765_v8 = vmul.f32 0.2, %v3509_v1  ;;  %v1074_v17 = vmul.f32 %v7514_v34, %v7256_v0  ;;  %4565 = vmatpush.msra.mxu0 %v4352_v60  ;;  %v4351_v0 = vld [vmem:[%s10498_s30 + $0x50] sm:$0xff] }
 0x1a4   :  { %v2442_v16 = vpop.permute.xlu1 %2441 }
 0x1a5   :  { %v1226_v21 = vpop.permute.xlu0 %1225  ;;  %v7600_v2 = vsel %vm3637_vm5, %v3509_v1, %v3765_v8  ;;  %v1083_v1 = vmul.f32 %v7514_v34, %v7279_v20  ;;  %v3261_v8 = vmul.f32 %v7526_v40, %v2442_v16  ;;  %v4350_v20 = vld [vmem:[%s10498_s30 + $0x48] sm:$0xff]  ;;  %4566 = vmatpush.msra.mxu0 %v4351_v0 }
 0x1a6   :  { %6723 = vmatmul.msk.f32.vlgmr.msra.gmra.mxu1 %vm4276_vm3, %v7600_v2  ;;  %v2099_v58 = vmul.f32 %v7519_v51, %v1226_v21 }
 0x1a7   :  { %v2236_v52 = vadd.f32 %v2108_v23, %v1083_v1  ;;  %4567 = vmatpush.msra.mxu0 %v4350_v20  ;;  %v7651_v23 = vld [vmem:[%s10439_s24 + $0x49] ss:$2 sm:$0xff]  ;;  %v4344_v20 = vld [vmem:[%s10498_s30 + $0x18] sm:$0xff] }
 0x1a8   :  { %v2227_v21 = vadd.f32 %v2099_v58, %v1074_v17  ;;  %v3387_v58 = vadd.f32 %v3259_v7, %v2234_v59  ;;  %v2492_v17 = vperm.slane %v7469_v41, 4  ;;  %v4343_v7 = vld [vmem:[%s10498_s30 + $0x10] sm:$0xff] }
 0x1a9   :  { %1267 = vperm.xlu2 %6865, %v1262_v9   ;;  %4568 = vmatpush.msra.mxu0 %v4349_v30  ;;  %v4341_v30 = vld [vmem:[%s10498_s30] sm:$0xff] }
 0x1aa   :  { %6872 = vrot.lane.b32.xlu1 %v6871_v29, %s7099_s27  ;;  %v3389_v29 = vadd.f32 %v3261_v8, %v2236_v52  ;;  %v4347_v8 = vld [vmem:[%s10498_s30 + $0x30] sm:$0xff] }
 0x1ab   :  { %1428 = vperm.xlu0 %6863, %v1423_v10   ;;  %v2513_v10 = vperm.slane %v7469_v41, 7  ;;  %4569 = vmatpush.msra.mxu0 %v4348_v13  ;;  %v2541_v13 = vperm.slane %v7552_v27, 3 }
 0x1ac   :  { %v3520_v60 = vadd.f32 %v7537_v42, %v3389_v29 }
 0x1ad   :  { %v2379_v35 = vpop.permute.xlu0 %2378  ;;  %4570 = vmatpush.msra.mxu0 %v4347_v8 }
 0x1ae   :  { %v3252_v9 = vmul.f32 %v7526_v40, %v2379_v35  ;;  %v3518_v35 = vadd.f32 %v7537_v42, %v3387_v58  ;;  %vm3648_vm8 = vcmp.gt.f32.partialorder %v3520_v60, 0.0  ;;  %v1304_v58 = vperm.slane %v7390_v47, 7 }
 0x1af   :  { %v1318_v47 = vperm.slane %v7450_v61, 1 }
 0x1b0   :  { %v3380_v44 = vadd.f32 %v3252_v9, %v2227_v21  ;;  %v4346_v21 = vld [vmem:[%s10498_s30 + $0x28] sm:$0xff]  ;;  %v3776_v9 = vmul.f32 0.2, %v3520_v60  ;;  %v3774_v0 = vmul.f32 0.2, %v3518_v35  ;;  %vm3646_vm9 = vcmp.gt.f32.partialorder %v3518_v35, 0.0 }
 0x1b1   :  { %2420 = vperm.xlu2 %6865, %v2415_v49   ;;  %v2590_v49 = vperm.slane %v7651_v23, 2  ;;  %4571 = vmatpush.msra.mxu0 %v4346_v21 }
 0x1b2   :  { %v3511_v16 = vadd.f32 %v7537_v42, %v3380_v44  ;;  %1281 = vperm.xlu1 %6864, %v1276_v62   ;;  %v4345_v62 = vld [vmem:[%s10498_s30 + $0x20] sm:$0xff]  ;;  %v3904_v52 = vsel %vm3648_vm8, %v3520_v60, %v3776_v9  ;;  %v1451_v44 = vperm.slane %v7598_v4, 4  ;;  %v3902_v59 = vsel %vm3646_vm9, %v3518_v35, %v3774_v0 }
 0x1b3   :  { %2518 = vperm.xlu0 %6863, %v2513_v10   ;;  %4572 = vmatpush.msra.mxu0 %v4345_v62  ;;  %v4342_v10 = vld [vmem:[%s10498_s30 + $0x8] sm:$0xff]  ;;  %v6876_v29 = vpack.i.bf16 %v3904_v52, %v3902_v59  ;;  %v1381_v60 = vperm.slane %v7500_v50, 2  ;;  %v2471_v35 = vperm.slane %v7469_v41, 1  ;;  %v7711_v0 = vld [vmem:[%s10439_s24 + $0x59] ss:$2 sm:$0xff] }
 0x1b4   :  { %vm3639_vm7 = vcmp.gt.f32.partialorder %v3511_v16, 0.0  ;;  %v3767_v11 = vmul.f32 0.2, %v3511_v16 }
 0x1b5   :  { %4573 = vmatpush.msra.mxu0 %v4344_v20  ;;  %v2456_v8 = vpop.permute.xlu0 %2455  ;;  %v2548_v20 = vperm.slane %v7552_v27, 4 }
 0x1b6   :  { %v7655_v1 = vsel %vm3639_vm7, %v3511_v16, %v3767_v11  ;;  %v2443_v16 = vperm.slane %v7406_v22, 5  ;;  %v2520_v11 = vperm.slane %v7552_v27, 0  ;;  %v7695_v22 = vld [vmem:[%s10439_s24 + $0x58] ss:$2 sm:$0xff] }
 0x1b7   :  { %6724 = vmatmul.msk.f32.gmra.mxu1 %vm4276_vm3, %v7655_v1  ;;  %4574 = vmatpush.msra.mxu0 %v4343_v7  ;;  %v1507_v59 = vperm.slane %v7695_v22, 4 }
 0x1b9   :  { %2497 = vperm.xlu2 %6865, %v2492_v17   ;;  %4575 = vmatpush.msra.mxu0 %v4342_v10  ;;  %v2618_v17 = vperm.slane %v7651_v23, 6  ;;  %v1346_v10 = vperm.slane %v7450_v61, 5 }
 0x1ba   :  { %1358 = vperm.xlu1 %6864, %v1353_v43   ;;  %v1479_v43 = vperm.slane %v7695_v22, 0 }
 0x1bb   :  { %2595 = vperm.xlu0 %6863, %v2590_v49   ;;  %4576 = vmatpush.msra.mxu0 %v4341_v30  ;;  %v2569_v49 = vperm.slane %v7552_v27, 7  ;;  %v1076_v30 = vmul.f32 %v7514_v34, %v7241_v48  ;;  %v2597_v48 = vperm.slane %v7651_v23, 3 }
 0x1bd   :  { %v1317_v9 = vpop.permute.xlu0 %1316 }
 0x1c1   :  { %1295 = vperm.xlu2 %6865, %v1290_v57   ;;  %v2646_v57 = vperm.slane %v7711_v0, 2 }
 0x1c2   :  { %6877 = vrot.lane.b32.xlu1 %v6876_v29, %s7099_s27 }
 0x1c3   :  { %1456 = vperm.xlu0 %6863, %v1451_v44   ;;  %v1303_v44 = vpop.permute.xlu1 %1302 }
 0x1c5   :  { %v7715_v7 = vpop.permute.xlu0 %2406 }
 0x1c9   :  { %2448 = vperm.xlu2 %6865, %v2443_v16   ;;  %v2110_v16 = vmul.f32 %v7519_v51, %v1303_v44 }
 0x1ca   :  { %1309 = vperm.xlu1 %6864, %v1304_v58  }
 0x1cb   :  { %2546 = vperm.xlu0 %6863, %v2541_v13   ;;  %v1085_v13 = vmul.f32 %v7514_v34, %v7254_v63  ;;  %v1087_v63 = vmul.f32 %v7514_v34, %v7283_v25 }
 0x1d1   :  { %2525 = vperm.xlu2 %6865, %v2520_v11   ;;  %v3263_v11 = vmul.f32 %v7526_v40, %v2456_v8 }
 0x1d2   :  { %1386 = vperm.xlu1 %6864, %v1381_v60  }
 0x1d3   :  { %2623 = vperm.xlu0 %6863, %v2618_v17  }
 0x1d9   :  { %1323 = vperm.xlu2 %6865, %v1318_v47   ;;  %v2499_v47 = vperm.slane %v7469_v41, 5 }
 0x1db   :  { %1484 = vperm.xlu0 %6863, %v1479_v43   ;;  %v2238_v43 = vadd.f32 %v2110_v16, %v1085_v13 }
 0x1e1   :  { %2476 = vperm.xlu2 %6865, %v2471_v35  }
 0x1e3   :  { %2574 = vperm.xlu0 %6863, %v2569_v49   ;;  %v4085_v62 = vpop.permute.xlu2 %4084  ;;  %v7728_v49 = vpop.permute.xlu0 %2483 }
 0x1e4   :  { %6722 = vmatmul.msk.f32.vlgmr.msra.gmra.mxu0 %vm7702_vm10, %v4085_v62  ;;  %v3391_v62 = vadd.f32 %v3263_v11, %v2238_v43  ;;  %v7747_v43 = vld [vmem:[%s10439_s24 + $0x68] ss:$2 sm:$0xff] }
 0x1e6   :  { %v3522_v41 = vadd.f32 %v7537_v42, %v3391_v62  ;;  %v1374_v62 = vperm.slane %v7500_v50, 1 }
 0x1e8   :  { %v3778_v16 = vmul.f32 0.2, %v3522_v41  ;;  %vm3650_vm12 = vcmp.gt.f32.partialorder %v3522_v41, 0.0 }
 0x1e9   :  { %2553 = vperm.xlu2 %6865, %v2548_v20   ;;  %v2112_v20 = vmul.f32 %v7519_v51, %v1317_v9  ;;  %v2576_v9 = vperm.slane %v7651_v23, 0 }
 0x1eb   :  { %2651 = vperm.xlu0 %6863, %v2646_v57   ;;  %v1240_v52 = vpop.permute.xlu2 %1239 }
 0x1ec   :  { %v2101_v29 = vmul.f32 %v7519_v51, %v1240_v52 }
 0x1ee   :  { %v2229_v60 = vadd.f32 %v2101_v29, %v1076_v30  ;;  %v2674_v30 = vperm.slane %v7711_v0, 6 }
 0x1f1   :  { %1351 = vperm.xlu2 %6865, %v1346_v10   ;;  %v2240_v10 = vadd.f32 %v2112_v20, %v1087_v63 }
 0x1f3   :  { %1512 = vperm.xlu0 %6863, %v1507_v59   ;;  %v2393_v58 = vpop.permute.xlu2 %2392 }
 0x1f4   :  { %v3254_v17 = vmul.f32 %v7526_v40, %v2393_v58  ;;  %v1345_v58 = vpop.permute.xlu0 %1344 }
 0x1f6   :  { %v3382_v35 = vadd.f32 %v3254_v17, %v2229_v60  ;;  %v3906_v17 = vsel %vm3650_vm12, %v3522_v41, %v3778_v16  ;;  %v1332_v41 = vperm.slane %v7450_v61, 3 }
 0x1f8   :  { %v3513_v57 = vadd.f32 %v7537_v42, %v3382_v35 }
 0x1f9   :  { %2504 = vperm.xlu2 %6865, %v2499_v47  }
 0x1fa   :  { %vm3641_vm11 = vcmp.gt.f32.partialorder %v3513_v57, 0.0  ;;  %v3769_v8 = vmul.f32 0.2, %v3513_v57 }
 0x1fb   :  { %2602 = vperm.xlu0 %6863, %v2597_v48   ;;  %v2470_v52 = vpop.permute.xlu2 %2469 }
 0x1fc   :  { %v3265_v44 = vmul.f32 %v7526_v40, %v2470_v52  ;;  %v7737_v59 = vsel %vm3641_vm11, %v3513_v57, %v3769_v8  ;;  %v1535_v57 = vperm.slane %v7747_v43, 0  ;;  %v7754_v63 = vpop.permute.xlu0 %2434 }
 0x1fd   :  { %6725 = vmatmul.msk.f32.gmra.mxu1 %vm4276_vm3, %v7737_v59 }
 0x1fe   :  { %v3393_v29 = vadd.f32 %v3265_v44, %v2240_v10  ;;  %v1078_v44 = vmul.f32 %v7514_v34, %v7262_v6  ;;  %v2625_v6 = vperm.slane %v7651_v23, 7 }
 0x200   :  { %v3524_v25 = vadd.f32 %v7537_v42, %v3393_v29 }
 0x201   :  { %2581 = vperm.xlu2 %6865, %v2576_v9  }
 0x202   :  { %vm3652_vm13 = vcmp.gt.f32.partialorder %v3524_v25, 0.0  ;;  %v3780_v13 = vmul.f32 0.2, %v3524_v25 }
 0x203   :  { %2679 = vperm.xlu0 %6863, %v2674_v30   ;;  %v1268_v11 = vpop.permute.xlu2 %1267  ;;  %v1080_v30 = vmul.f32 %v7514_v34, %v7273_v14  ;;  %v1091_v14 = vmul.f32 %v7514_v34, %v7269_v12 }
 0x204   :  { %v6868_v60 = vpop.permute.xlu1 %6867  ;;  %v3908_v47 = vsel %vm3652_vm13, %v3524_v25, %v3780_v13  ;;  %v2105_v9 = vmul.f32 %v7519_v51, %v1268_v11  ;;  %v3256_v25 = vmul.f32 %v7526_v40, %v7715_v7  ;;  %v2116_v11 = vmul.f32 %v7519_v51, %v1345_v58  ;;  %v7783_v12 = vpop.permute.xlu0 %2511 }
 0x205   :  { %v6869_v35 = vunpack.i.l.bf16 %v6868_v60  ;;  %v6881_v48 = vpack.i.bf16 %v3908_v47, %v3906_v17  ;;  %v6870_v8 = vunpack.i.h.bf16 %v6868_v60 }
 0x206   :  { %v2233_v17 = vadd.f32 %v2105_v9, %v1080_v30 }
 0x207   :  { %6882 = vrot.lane.b32.xlu1 %v6881_v48, %s7099_s27  ;;  %v4278_v20 = vsel %vm4276_vm3, %v7600_v2, %v6869_v35  ;;  %v2527_v2 = vperm.slane %v7552_v27, 1  ;;  %v4279_v60 = vsel %vm4276_vm3, %v7655_v1, %v6870_v8  ;;  %v1409_v48 = vperm.slane %v7500_v50, 6  ;;  %v7781_v8 = vld [vmem:[%s10439_s24 + $0x69] ss:$2 sm:$0xff] }
 0x208   :  { %4580 = vmatmul.f32.gmra.mxu0 %v4278_v20  ;;  %v1089_v1 = vmul.f32 %v7514_v34, %v7294_v33  ;;  %v2244_v20 = vadd.f32 %v2116_v11, %v1091_v14  ;;  %v3267_v33 = vmul.f32 %v7526_v40, %v7728_v49  ;;  %v2702_v30 = vperm.slane %v7781_v8, 2 }
 0x209   :  { %1379 = vperm.xlu2 %6865, %v1374_v62   ;;  %v1402_v14 = vperm.slane %v7500_v50, 5 }
 0x20b   :  { %1540 = vperm.xlu0 %6863, %v1535_v57   ;;  %v2421_v52 = vpop.permute.xlu2 %2420 }
 0x20c   :  { %v1254_v10 = vpop.permute.xlu1 %1253  ;;  %v3258_v16 = vmul.f32 %v7526_v40, %v2421_v52 }
 0x20d   :  { %v2103_v29 = vmul.f32 %v7519_v51, %v1254_v10 }
 0x20e   :  { %v3386_v35 = vadd.f32 %v3258_v16, %v2233_v17 }
 0x20f   :  { %v2231_v13 = vadd.f32 %v2103_v29, %v1078_v44  ;;  %1337 = vperm.xlu1 %6864, %v1332_v41   ;;  %v2604_v41 = vperm.slane %v7651_v23, 4 }
 0x210   :  { %4583 = vmatmul.f32.gmra.mxu0 %v4279_v60  ;;  %v3517_v9 = vadd.f32 %v7537_v42, %v3386_v35  ;;  %v1563_v35 = vperm.slane %v7747_v43, 4 }
 0x211   :  { %v3384_v47 = vadd.f32 %v3256_v25, %v2231_v13  ;;  %2532 = vperm.xlu2 %6865, %v2527_v2  }
 0x212   :  { %v3773_v49 = vmul.f32 0.2, %v3517_v9  ;;  %vm3645_vm0 = vcmp.gt.f32.partialorder %v3517_v9, 0.0 }
 0x213   :  { %2630 = vperm.xlu0 %6863, %v2625_v6   ;;  %v2498_v7 = vpop.permute.xlu2 %2497  ;;  %v3515_v62 = vadd.f32 %v7537_v42, %v3384_v47 }
 0x214   :  { %v3269_v58 = vmul.f32 %v7526_v40, %v2498_v7  ;;  %v1331_v57 = vpop.permute.xlu1 %1330  ;;  %v1373_v7 = vpop.permute.xlu0 %1372 }
 0x215   :  { %v2114_v52 = vmul.f32 %v7519_v51, %v1331_v57  ;;  %vm3643_vm14 = vcmp.gt.f32.partialorder %v3515_v62, 0.0  ;;  %v3771_v10 = vmul.f32 0.2, %v3515_v62 }
 0x216   :  { %v3397_v44 = vadd.f32 %v3269_v58, %v2244_v20 }
 0x217   :  { %v2242_v29 = vadd.f32 %v2114_v52, %v1089_v1  ;;  %1414 = vperm.xlu1 %6864, %v1409_v48   ;;  %v3899_v2 = vsel %vm3643_vm14, %v3515_v62, %v3771_v10  ;;  %v7798_v62 = vsel %vm3645_vm0, %v3517_v9, %v3773_v49  ;;  %v1082_v10 = vmul.f32 %v7514_v34, %v7245_v56 }
 0x218   :  { %v3528_v25 = vadd.f32 %v7537_v42, %v3397_v44  ;;  %6726 = vmatmul.msk.f32.gmra.mxu1 %vm4276_vm3, %v3899_v2  ;;  %v2555_v44 = vperm.slane %v7552_v27, 5  ;;  %v1084_v9 = vmul.f32 %v7514_v34, %v7277_v19  ;;  %v2653_v56 = vperm.slane %v7711_v0, 3 }
 0x219   :  { %v3395_v16 = vadd.f32 %v3267_v33, %v2242_v29  ;;  %2609 = vperm.xlu2 %6865, %v2604_v41   ;;  %v3260_v29 = vmul.f32 %v7526_v40, %v7754_v63  ;;  %v1095_v19 = vmul.f32 %v7514_v34, %v7306_v46  ;;  %v3271_v46 = vmul.f32 %v7526_v40, %v7783_v12 }
 0x21a   :  { %v3784_v13 = vmul.f32 0.2, %v3528_v25  ;;  %vm3656_vm15 = vcmp.gt.f32.partialorder %v3528_v25, 0.0 }
 0x21b   :  { %v3526_v60 = vadd.f32 %v7537_v42, %v3395_v16  ;;  %2707 = vperm.xlu0 %6863, %v2702_v30   ;;  %v1296_v6 = vpop.permute.xlu2 %1295  ;;  %v1360_v30 = vperm.slane %v7450_v61, 7 }
 0x21c   :  { %v6873_v11 = vpop.permute.xlu1 %6872  ;;  %v3912_v20 = vsel %vm3656_vm15, %v3528_v25, %v3784_v13 }
 0x21d   :  { %v3782_v17 = vmul.f32 0.2, %v3526_v60  ;;  %v6874_v47 = vunpack.i.l.bf16 %v6873_v11  ;;  %vm3654_vm1 = vcmp.gt.f32.partialorder %v3526_v60, 0.0  ;;  %v6875_v57 = vunpack.i.h.bf16 %v6873_v11 }
 0x21f   :  { %v4280_v48 = vsel %vm4276_vm3, %v7737_v59, %v6874_v47  ;;  %v3910_v1 = vsel %vm3654_vm1, %v3526_v60, %v3782_v17  ;;  %v2109_v59 = vmul.f32 %v7519_v51, %v1296_v6  ;;  %v4281_v13 = vsel %vm4276_vm3, %v3899_v2, %v6875_v57  ;;  %v7817_v6 = vpop.permute.xlu0 %2462 }
 0x220   :  { %4586 = vmatmul.f32.gmra.mxu0 %v4280_v48  ;;  %6727 = vmatmul.msk.f32.gmra.mxu1 %vm4276_vm3, %v7798_v62  ;;  %v6886_v58 = vpack.i.bf16 %v3912_v20, %v3910_v1  ;;  %v2120_v60 = vmul.f32 %v7519_v51, %v1373_v7  ;;  %v1093_v2 = vmul.f32 %v7514_v34, %v7298_v38  ;;  %v2632_v7 = vperm.slane %v7711_v0, 0 }
 0x221   :  { %1407 = vperm.xlu2 %6865, %v1402_v14   ;;  %v2237_v27 = vadd.f32 %v2109_v59, %v1084_v9  ;;  %v1437_v20 = vperm.slane %v7598_v4, 2 }
 0x222   :  { %6887 = vrot.lane.b32.xlu1 %v6886_v58, %s7099_s27  ;;  %v2248_v17 = vadd.f32 %v2120_v60, %v1095_v19 }
 0x223   :  { %1568 = vperm.xlu0 %6863, %v1563_v35   ;;  %v2449_v52 = vpop.permute.xlu2 %2448 }
 0x224   :  { %v1282_v41 = vpop.permute.xlu1 %1281  ;;  %v3262_v25 = vmul.f32 %v7526_v40, %v2449_v52  ;;  %v2730_v52 = vperm.slane %v7781_v8, 6 }
 0x225   :  { %v2107_v33 = vmul.f32 %v7519_v51, %v1282_v41 }
 0x226   :  { %v3390_v61 = vadd.f32 %v3262_v25, %v2237_v27 }
 0x227   :  { %v2235_v16 = vadd.f32 %v2107_v33, %v1082_v10  ;;  %v2540_v59 = vpop.permute.xlu0 %2539 }
 0x228   :  { %4589 = vmatmul.f32.gmra.mxu0 %v4281_v13  ;;  %v3521_v58 = vadd.f32 %v7537_v42, %v3390_v61  ;;  %v1430_v13 = vperm.slane %v7598_v4, 1 }
 0x229   :  { %v3388_v49 = vadd.f32 %v3260_v29, %v2235_v16  ;;  %2560 = vperm.xlu2 %6865, %v2555_v44   ;;  %v7838_v29 = vld [vmem:[%s10439_s24 + $0x78] ss:$2 sm:$0xff] }
 0x22a   :  { %1365 = vperm.xlu1 %6864, %v1360_v30   ;;  %v3777_v9 = vmul.f32 0.2, %v3521_v58  ;;  %vm3649_vm5 = vcmp.gt.f32.partialorder %v3521_v58, 0.0 }
 0x22b   :  { %2658 = vperm.xlu0 %6863, %v2653_v56   ;;  %v2526_v63 = vpop.permute.xlu2 %2525  ;;  %v3519_v11 = vadd.f32 %v7537_v42, %v3388_v49  ;;  %v1591_v56 = vperm.slane %v7838_v29, 0 }
 0x22c   :  { %v3273_v47 = vmul.f32 %v7526_v40, %v2526_v63  ;;  %v1359_v14 = vpop.permute.xlu1 %1358  ;;  %v7844_v27 = vsel %vm3649_vm5, %v3521_v58, %v3777_v9  ;;  %v2681_v58 = vperm.slane %v7711_v0, 7  ;;  %v7872_v9 = vld [vmem:[%s10439_s24 + $0x79] ss:$2 sm:$0xff] }
 0x22d   :  { %v2118_v35 = vmul.f32 %v7519_v51, %v1359_v14  ;;  %vm3647_vm2 = vcmp.gt.f32.partialorder %v3519_v11, 0.0  ;;  %v3775_v48 = vmul.f32 0.2, %v3519_v11 }
 0x22e   :  { %v3401_v1 = vadd.f32 %v3273_v47, %v2248_v17  ;;  %v1086_v17 = vmul.f32 %v7514_v34, %v7285_v26 }
 0x22f   :  { %v2246_v57 = vadd.f32 %v2118_v35, %v1093_v2  ;;  %v3903_v38 = vsel %vm3647_vm2, %v3519_v11, %v3775_v48  ;;  %v2583_v35 = vperm.slane %v7651_v23, 1  ;;  %v3264_v48 = vmul.f32 %v7526_v40, %v7817_v6 }
 0x230   :  { %v3532_v41 = vadd.f32 %v7537_v42, %v3401_v1  ;;  %6728 = vmatmul.msk.f32.gmra.mxu1 %vm4276_vm3, %v3903_v38 }
 0x231   :  { %v3399_v10 = vadd.f32 %v3271_v46, %v2246_v57  ;;  %2637 = vperm.xlu2 %6865, %v2632_v7   ;;  %v1088_v7 = vmul.f32 %v7514_v34, %v7260_v5  ;;  %v1388_v46 = vperm.slane %v7500_v50, 3  ;;  %v1099_v5 = vmul.f32 %v7514_v34, %v7313_v54 }
 0x232   :  { %1442 = vperm.xlu1 %6864, %v1437_v20   ;;  %v3788_v33 = vmul.f32 0.2, %v3532_v41  ;;  %vm3660_vm4 = vcmp.gt.f32.partialorder %v3532_v41, 0.0 }
 0x233   :  { %v3530_v12 = vadd.f32 %v7537_v42, %v3399_v10  ;;  %2735 = vperm.xlu0 %6863, %v2730_v52   ;;  %v1324_v44 = vpop.permute.xlu2 %1323 }
 0x234   :  { %v6878_v30 = vpop.permute.xlu1 %6877  ;;  %v3916_v19 = vsel %vm3660_vm4, %v3532_v41, %v3788_v33  ;;  %v2113_v47 = vmul.f32 %v7519_v51, %v1324_v44 }
 0x235   :  { %v3786_v25 = vmul.f32 0.2, %v3530_v12  ;;  %v6879_v16 = vunpack.i.l.bf16 %v6878_v30  ;;  %vm3658_vm6 = vcmp.gt.f32.partialorder %v3530_v12, 0.0  ;;  %v6880_v63 = vunpack.i.h.bf16 %v6878_v30 }
 0x236   :  { %v2241_v52 = vadd.f32 %v2113_v47, %v1088_v7  ;;  %v2660_v30 = vperm.slane %v7711_v0, 4 }
 0x237   :  { %v4282_v60 = vsel %vm4276_vm3, %v7798_v62, %v6879_v16  ;;  %v3914_v49 = vsel %vm3658_vm6, %v3530_v12, %v3786_v25  ;;  %v1401_v62 = vpop.permute.xlu0 %1400  ;;  %v4283_v26 = vsel %vm4276_vm3, %v3903_v38, %v6880_v63  ;;  %v1097_v38 = vmul.f32 %v7514_v34, %v7281_v24 }
 0x238   :  { %4592 = vmatmul.f32.gmra.mxu0 %v4282_v60  ;;  %6729 = vmatmul.msk.f32.gmra.mxu1 %vm4276_vm3, %v7844_v27  ;;  %v6891_v61 = vpack.i.bf16 %v3916_v19, %v3914_v49  ;;  %v2124_v57 = vmul.f32 %v7519_v51, %v1401_v62  ;;  %v3275_v16 = vmul.f32 %v7526_v40, %v2540_v59  ;;  %v1465_v24 = vperm.slane %v7598_v4, 6 }
 0x239   :  { %1435 = vperm.xlu2 %6865, %v1430_v13   ;;  %v2758_v19 = vperm.slane %v7872_v9, 2  ;;  %v1458_v62 = vperm.slane %v7598_v4, 5  ;;  %v7072_v4 = vld [vmem:[%s10439_s24 + $0x38] ss:$2 sm:$0xff] }
 0x23a   :  { %6892 = vrot.lane.b32.xlu1 %v6891_v61, %s7099_s27  ;;  %v2252_v33 = vadd.f32 %v2124_v57, %v1099_v5  ;;  %v1493_v57 = vperm.slane %v7695_v22, 2  ;;  %v5352_v5 = vld [vmem:[%s10502_s5 + $0xa8] sm:$0xff] }
 0x23b   :  { %1596 = vperm.xlu0 %6863, %v1591_v56   ;;  %v2477_v11 = vpop.permute.xlu2 %2476 }
 0x23c   :  { %v1310_v2 = vpop.permute.xlu1 %1309  ;;  %v3266_v1 = vmul.f32 %v7526_v40, %v2477_v11 }
 0x23d   :  { %v2111_v14 = vmul.f32 %v7519_v51, %v1310_v2 }
 0x23e   :  { %v3394_v6 = vadd.f32 %v3266_v1, %v2241_v52  ;;  %v2709_v1 = vperm.slane %v7781_v8, 3  ;;  %v2786_v52 = vperm.slane %v7872_v9, 6 }
 0x23f   :  { %v2239_v20 = vadd.f32 %v2111_v14, %v1086_v17  ;;  %v1619_v14 = vperm.slane %v7838_v29, 4 }
 0x240   :  { %4595 = vmatmul.f32.gmra.mxu0 %v4283_v26  ;;  %v3525_v56 = vadd.f32 %v7537_v42, %v3394_v6  ;;  %v2688_v26 = vperm.slane %v7781_v8, 0  ;;  %v7913_v6 = vld [vmem:[%s10439_s24 + $0x88] ss:$2 sm:$0xff] }
 0x241   :  { %v3392_v41 = vadd.f32 %v3264_v48, %v2239_v20  ;;  %2588 = vperm.xlu2 %6865, %v2583_v35   ;;  %v2491_v20 = vpop.permute.xlu0 %2490 }
 0x242   :  { %1393 = vperm.xlu1 %6864, %v1388_v46   ;;  %v3781_v2 = vmul.f32 0.2, %v3525_v56  ;;  %vm3653_vm9 = vcmp.gt.f32.partialorder %v3525_v56, 0.0  ;;  %v1416_v46 = vperm.slane %v7072_v4, 7  ;;  %v1090_v4 = vmul.f32 %v7514_v34, %v7292_v32 }
 0x243   :  { %2686 = vperm.xlu0 %6863, %v2681_v58   ;;  %v2554_v50 = vpop.permute.xlu2 %2553  ;;  %v3523_v10 = vadd.f32 %v7537_v42, %v3392_v41  ;;  %v5353_v41 = vld [vmem:[%s10502_s5 + $0xb0] sm:$0xff] }
 0x244   :  { %v3277_v12 = vmul.f32 %v7526_v40, %v2554_v50  ;;  %v1387_v44 = vpop.permute.xlu1 %1386  ;;  %v7887_v47 = vsel %vm3653_vm9, %v3525_v56, %v3781_v2  ;;  %v5351_v50 = vld [vmem:[%s10502_s5 + $0xa0] sm:$0xff] }
 0x245   :  { %v2122_v54 = vmul.f32 %v7519_v51, %v1387_v44  ;;  %vm3651_vm7 = vcmp.gt.f32.partialorder %v3523_v10, 0.0  ;;  %v3779_v25 = vmul.f32 0.2, %v3523_v10 }
 0x246   :  { %v3405_v13 = vadd.f32 %v3277_v12, %v2252_v33  ;;  %v5350_v33 = vld [vmem:[%s10502_s5 + $0x98] sm:$0xff]  ;;  %v1647_v12 = vperm.slane %v7913_v6, 0 }
 0x247   :  { %v2250_v60 = vadd.f32 %v2122_v54, %v1097_v38  ;;  %v7879_v49 = vsel %vm3651_vm7, %v3523_v10, %v3779_v25  ;;  %v1486_v10 = vperm.slane %v7695_v22, 1  ;;  %v5349_v54 = vld [vmem:[%s10502_s5 + $0x90] sm:$0xff]  ;;  %v5347_v25 = vld [vmem:[%s10502_s5 + $0x80] sm:$0xff] }
 0x248   :  { %v3536_v61 = vadd.f32 %v7537_v42, %v3405_v13  ;;  %6730 = vmatmul.msk.f32.gmra.mxu1 %vm4276_vm3, %v7879_v49  ;;  %v2737_v13 = vperm.slane %v7781_v8, 7 }
 0x249   :  { %v3403_v63 = vadd.f32 %v3275_v16, %v2250_v60  ;;  %2665 = vperm.xlu2 %6865, %v2660_v30   ;;  %v7919_v38 = vpop.permute.xlu0 %2567  ;;  %v5348_v30 = vld [vmem:[%s10502_s5 + $0x88] sm:$0xff]  ;;  %v2639_v16 = vperm.slane %v7711_v0, 1 }
 0x24a   :  { %1470 = vperm.xlu1 %6864, %v1465_v24   ;;  %v3792_v11 = vmul.f32 0.2, %v3536_v61  ;;  %vm3664_vm8 = vcmp.gt.f32.partialorder %v3536_v61, 0.0  ;;  %v7939_v60 = vld [vmem:[%s10439_s24 + $0x89] ss:$2 sm:$0xff] }
 0x24b   :  { %v3534_v59 = vadd.f32 %v7537_v42, %v3403_v63  ;;  %2763 = vperm.xlu0 %6863, %v2758_v19   ;;  %v2611_v42 = vperm.slane %v7651_v23, 5  ;;  %v1352_v58 = vpop.permute.xlu2 %1351  ;;  %v5354_v23 = vld [vmem:[%s10502_s5 + $0xb8] sm:$0xff]  ;;  %v2716_v19 = vperm.slane %v7781_v8, 4 }
 0x24c   :  { %v3920_v7 = vsel %vm3664_vm8, %v3536_v61, %v3792_v11  ;;  %5576 = vmatpush.msra.mxu3 %v5354_v23  ;;  %v2814_v61 = vperm.slane %v7939_v60, 2  ;;  %v3268_v23 = vmul.f32 %v7526_v40, %v2491_v20  ;;  %v2667_v20 = vperm.slane %v7711_v0, 5 }
 0x24d   :  { %v3790_v17 = vmul.f32 0.2, %v3534_v59  ;;  %vm3662_vm11 = vcmp.gt.f32.partialorder %v3534_v59, 0.0 }
 0x24e   :  { %5577 = vmatpush.msra.mxu3 %v5353_v41 }
 0x24f   :  { %v3918_v35 = vsel %vm3662_vm11, %v3534_v59, %v3790_v17 }
 0x250   :  { %6731 = vmatmul.msk.f32.gmra.mxu1 %vm4276_vm3, %v7887_v47  ;;  %v6896_v48 = vpack.i.bf16 %v3920_v7, %v3918_v35  ;;  %5578 = vmatpush.msra.mxu3 %v5352_v5  ;;  %v7952_v35 = vpop.f32.mrf.mxu1  ;;  %v1675_v7 = vperm.slane %v7913_v6, 4 }
 0x251   :  { %1463 = vperm.xlu2 %6865, %v1458_v62   ;;  %v1429_v24 = vpop.permute.xlu0 %1428 }
 0x252   :  { %6897 = vrot.lane.b32.xlu1 %v6896_v48, %s7099_s27  ;;  %5579 = vmatpush.msra.mxu3 %v5351_v50 }
 0x253   :  { %1624 = vperm.xlu0 %6863, %v1619_v14   ;;  %v2505_v44 = vpop.permute.xlu2 %2504  ;;  %v1514_v14 = vperm.slane %v7695_v22, 5 }
 0x254   :  { %5580 = vmatpush.msra.mxu3 %v5350_v33  ;;  %v3270_v41 = vmul.f32 %v7526_v40, %v2505_v44 }
 0x256   :  { %5581 = vmatpush.msra.mxu3 %v5349_v54 }
 0x258   :  { %5582 = vmatpush.msra.mxu3 %v5348_v30  ;;  %v4790_v54 = vpop.f32.mrf.mxu1  ;;  %v2765_v30 = vperm.slane %v7872_v9, 3 }
 0x259   :  { %2616 = vperm.xlu2 %6865, %v2611_v42   ;;  %v7943_v11 = vpop.permute.xlu0 %2518 }
 0x25a   :  { %1421 = vperm.xlu1 %6864, %v1416_v46   ;;  %5583 = vmatpush.msra.mxu3 %v5347_v25  ;;  %v2128_v46 = vmul.f32 %v7519_v51, %v1429_v24  ;;  %v1101_v24 = vmul.f32 %v7514_v34, %v7321_v3 }
 0x25b   :  { %2714 = vperm.xlu0 %6863, %v2709_v1   ;;  %v2582_v56 = vpop.permute.xlu2 %2581  ;;  %v2117_v1 = vmul.f32 %v7519_v51, %v1352_v58  ;;  %v7972_v58 = vld [vmem:[%s10503_s4] ss:$0 sm:$0xff] }
 0x25c   :  { %v3281_v32 = vmul.f32 %v7526_v40, %v2582_v56 }
 0x261   :  { %2693 = vperm.xlu2 %6865, %v2688_v26   ;;  %v7949_v62 = vpop.f32.mrf.mxu0  ;;  %v1103_v26 = vmul.f32 %v7514_v34, %v7296_v37 }
 0x262   :  { %1498 = vperm.xlu1 %6864, %v1493_v57   ;;  %v1092_v57 = vmul.f32 %v7514_v34, %v7300_v39 }
 0x263   :  { %2791 = vperm.xlu0 %6863, %v2786_v52   ;;  %v7945_v2 = vpop.permute.xlu2 %1379  ;;  %v7965_v52 = vpop.permute.xlu0 %2595  ;;  %v2256_v50 = vadd.f32 %v2128_v46, %v1103_v26 }
 0x269   :  { %1491 = vperm.xlu2 %6865, %v1486_v10   ;;  %v2245_v10 = vadd.f32 %v2117_v1, %v1092_v57 }
 0x26b   :  { %1652 = vperm.xlu0 %6863, %v1647_v12   ;;  %v7977_v33 = vpop.permute.xlu2 %2532  ;;  %v3398_v25 = vadd.f32 %v3270_v41, %v2245_v10 }
 0x271   :  { %2644 = vperm.xlu2 %6865, %v2639_v16   ;;  %v3409_v16 = vadd.f32 %v3281_v32, %v2256_v50 }
 0x273   :  { %2742 = vperm.xlu0 %6863, %v2737_v13  }
 0x279   :  { %2721 = vperm.xlu2 %6865, %v2716_v19   ;;  %v6883_v63 = vpop.permute.xlu1 %6882 }
 0x27a   :  { %v6884_v59 = vunpack.i.l.bf16 %v6883_v63  ;;  %v6885_v48 = vunpack.i.h.bf16 %v6883_v63  ;;  %v3279_v63 = vmul.f32 %v7526_v40, %v7919_v38  ;;  %v2842_v38 = vperm.slane %v7939_v60, 6 }
 0x27b   :  { %2819 = vperm.xlu0 %6863, %v2814_v61  }
 0x27c   :  { %v4284_v17 = vsel %vm4276_vm3, %v7844_v27, %v6884_v59  ;;  %v4285_v37 = vsel %vm4276_vm3, %v7879_v49, %v6885_v48  ;;  %v7984_v49 = vld [vmem:[%s10499_s3] ss:$0 sm:$0xff] }
 0x27d   :  { %4598 = vmatmul.f32.gmra.mxu0 %v4284_v17  ;;  %v3529_v17 = vadd.f32 %v7984_v49, %v3398_v25 }
 0x27f   :  { %v3785_v57 = vmul.f32 0.2, %v3529_v17  ;;  %vm3657_vm15 = vcmp.gt.f32.partialorder %v3529_v17, 0.0 }
 0x281   :  { %1519 = vperm.xlu2 %6865, %v1514_v14   ;;  %v1338_v42 = vpop.permute.xlu1 %1337  ;;  %v3540_v14 = vadd.f32 %v7984_v49, %v3409_v16  ;;  %v8002_v32 = vsel %vm3657_vm15, %v3529_v17, %v3785_v57 }
 0x282   :  { %v2115_v27 = vmul.f32 %v7519_v51, %v1338_v42  ;;  %v2744_v42 = vperm.slane %v7872_v9, 0 }
 0x283   :  { %1680 = vperm.xlu0 %6863, %v1675_v7   ;;  %v3796_v1 = vmul.f32 0.2, %v3540_v14  ;;  %vm3668_vm14 = vcmp.gt.f32.partialorder %v3540_v14, 0.0 }
 0x284   :  { %v2243_v5 = vadd.f32 %v2115_v27, %v1090_v4  ;;  %v1457_v4 = vpop.permute.xlu0 %1456  ;;  %v2610_v27 = vpop.permute.xlu2 %2609 }
 0x285   :  { %4601 = vmatmul.f32.gmra.mxu0 %v4285_v37  ;;  %v4581_v39 = vpop.f32.mrf.mxu0  ;;  %v3924_v37 = vsel %vm3668_vm14, %v3540_v14, %v3796_v1  ;;  %v2695_v14 = vperm.slane %v7781_v8, 1  ;;  %v2793_v1 = vperm.slane %v7872_v9, 7 }
 0x286   :  { %v3396_v12 = vadd.f32 %v3268_v23, %v2243_v5  ;;  %v4582_v44 = vadd.f32 %v7972_v58, %v4581_v39  ;;  %v8007_v39 = vld [vmem:[%s10439_s24 + $0x98] ss:$2 sm:$0xff] }
 0x288   :  { %v4791_v13 = vadd.f32 %v4790_v54, %v4582_v44  ;;  %v3527_v0 = vadd.f32 %v7984_v49, %v3396_v12  ;;  %v1542_v12 = vperm.slane %v7747_v43, 1  ;;  %v8014_v44 = vpop.f32.mrf.mxu1 }
 0x289   :  { %2672 = vperm.xlu2 %6865, %v2667_v20   ;;  %v1415_v56 = vpop.permute.xlu1 %1414 }
 0x28a   :  { %v2126_v19 = vmul.f32 %v7519_v51, %v1415_v56  ;;  %vm3655_vm12 = vcmp.gt.f32.partialorder %v3527_v0, 0.0  ;;  %v3783_v61 = vmul.f32 0.2, %v3527_v0  ;;  %vm4980_vm13 = vcmp.gt.f32.partialorder %v4791_v13, 0.0 }
 0x28b   :  { %2770 = vperm.xlu0 %6863, %v2765_v30   ;;  %v5044_v59 = vmul.f32 0.2, %v4791_v13  ;;  %v1703_v30 = vperm.slane %v8007_v39, 0  ;;  %v2121_v56 = vmul.f32 %v7519_v51, %v7945_v2  ;;  %v3274_v2 = vmul.f32 %v7526_v40, %v7977_v33 }
 0x28c   :  { %v2254_v7 = vadd.f32 %v2126_v19, %v1101_v24  ;;  %v3911_v48 = vsel %vm3655_vm12, %v3527_v0, %v3783_v61  ;;  %v8020_v25 = vpop.permute.xlu0 %2546  ;;  %v8022_v16 = vpop.permute.xlu2 %1407  ;;  %v8027_v0 = vld [vmem:[%s10439_s24 + $0x48] ss:$2 sm:$0xff]  ;;  %v1096_v61 = vmul.f32 %v7514_v34, %v7304_v45  ;;  %v3285_v45 = vmul.f32 %v7526_v40, %v2610_v27 }
 0x28d   :  { %6732 = vmatmul.msk.f32.gmra.mxu1 %vm4276_vm3, %v3911_v48  ;;  %v7995_v3 = vsel %vm4980_vm13, %v4791_v13, %v5044_v59  ;;  %v8009_v20 = vpop.f32.mrf.mxu0  ;;  %v1444_v24 = vperm.slane %v8027_v0, 3  ;;  %v1521_v27 = vperm.slane %v7695_v22, 6  ;;  %v2772_v22 = vperm.slane %v7872_v9, 4 }
 0x28e   :  { %v3407_v46 = vadd.f32 %v3279_v63, %v2254_v7  ;;  %6789 = vmatmul.msk.f32.vlgmr.msra.gmra.mxu3 %vm4276_vm3, %v7995_v3  ;;  %v2132_v63 = vmul.f32 %v7519_v51, %v1457_v4  ;;  %v1107_v7 = vmul.f32 %v7514_v34, %v7336_v28 }
 0x290   :  { %v3538_v26 = vadd.f32 %v7984_v49, %v3407_v46  ;;  %v2260_v28 = vadd.f32 %v2132_v63, %v1107_v7 }
 0x291   :  { %2749 = vperm.xlu2 %6865, %v2744_v42  }
 0x292   :  { %v3794_v23 = vmul.f32 0.2, %v3538_v26  ;;  %vm3666_vm0 = vcmp.gt.f32.partialorder %v3538_v26, 0.0 }
 0x293   :  { %2847 = vperm.xlu0 %6863, %v2842_v38  }
 0x294   :  { %v6888_v41 = vpop.permute.xlu1 %6887  ;;  %v3922_v5 = vsel %vm3666_vm0, %v3538_v26, %v3794_v23  ;;  %v2249_v26 = vadd.f32 %v2121_v56, %v1096_v61 }
 0x295   :  { %v6889_v50 = vunpack.i.l.bf16 %v6888_v41  ;;  %6733 = vmatmul.msk.f32.gmra.mxu1 %vm4276_vm3, %v8002_v32  ;;  %v6901_v10 = vpack.i.bf16 %v3924_v37, %v3922_v5  ;;  %v6890_v13 = vunpack.i.h.bf16 %v6888_v41  ;;  %v4796_v46 = vpop.f32.mrf.mxu1  ;;  %v3413_v5 = vadd.f32 %v3285_v45, %v2260_v28 }
 0x296   :  { %v3402_v33 = vadd.f32 %v3274_v2, %v2249_v26  ;;  %v1570_v45 = vperm.slane %v7747_v43, 5  ;;  %v1731_v26 = vperm.slane %v8007_v39, 4 }
 0x297   :  { %6902 = vrot.lane.b32.xlu1 %v6901_v10, %s7099_s27  ;;  %v4286_v54 = vsel %vm4276_vm3, %v7887_v47, %v6889_v50  ;;  %v1094_v47 = vmul.f32 %v7514_v34, %v7275_v18  ;;  %v3272_v18 = vmul.f32 %v7526_v40, %v7943_v11  ;;  %v4287_v38 = vsel %vm4276_vm3, %v3911_v48, %v6890_v13  ;;  %v8049_v11 = vpop.permute.xlu0 %2623  ;;  %v2561_v50 = vpop.permute.xlu2 %2560 }
 0x298   :  { %4604 = vmatmul.f32.gmra.mxu0 %v4286_v54  ;;  %v1105_v48 = vmul.f32 %v7514_v34, %v7328_v15  ;;  %v8060_v54 = vld [vmem:[%s10439_s24 + $0x99] ss:$2 sm:$0xff]  ;;  %v3283_v15 = vmul.f32 %v7526_v40, %v7965_v52 }
 0x299   :  { %1547 = vperm.xlu2 %6865, %v1542_v12   ;;  %v2870_v61 = vperm.slane %v8060_v54, 2 }
 0x29b   :  { %1708 = vperm.xlu0 %6863, %v1703_v30  }
 0x29c   :  { %v1366_v19 = vpop.permute.xlu1 %1365 }
 0x29d   :  { %v2119_v59 = vmul.f32 %v7519_v51, %v1366_v19  ;;  %v4587_v17 = vpop.f32.mrf.mxu0 }
 0x29e   :  { %v4588_v42 = vadd.f32 %v7972_v58, %v4587_v17 }
 0x29f   :  { %v2247_v4 = vadd.f32 %v2119_v59, %v1094_v47  ;;  %1449 = vperm.xlu1 %6864, %v1444_v24   ;;  %v3533_v24 = vadd.f32 %v7984_v49, %v3402_v33  ;;  %v3544_v47 = vadd.f32 %v7984_v49, %v3413_v5  ;;  %v1485_v52 = vpop.permute.xlu0 %1484  ;;  %v2125_v5 = vmul.f32 %v7519_v51, %v8022_v16 }
 0x2a0   :  { %v4797_v57 = vadd.f32 %v4796_v46, %v4588_v42  ;;  %4607 = vmatmul.f32.gmra.mxu0 %v4287_v38  ;;  %v2638_v46 = vpop.permute.xlu2 %2637  ;;  %v8078_v38 = vpop.f32.mrf.mxu1 }
 0x2a1   :  { %v3400_v23 = vadd.f32 %v3272_v18, %v2247_v4  ;;  %2700 = vperm.xlu2 %6865, %v2695_v14   ;;  %v3789_v59 = vmul.f32 0.2, %v3533_v24  ;;  %v3800_v17 = vmul.f32 0.2, %v3544_v47  ;;  %vm3661_vm4 = vcmp.gt.f32.partialorder %v3533_v24, 0.0 }
 0x2a2   :  { %vm4982_vm1 = vcmp.gt.f32.partialorder %v4797_v57, 0.0  ;;  %v5046_v41 = vmul.f32 0.2, %v4797_v57  ;;  %vm3672_vm5 = vcmp.gt.f32.partialorder %v3544_v47, 0.0 }
 0x2a3   :  { %2798 = vperm.xlu0 %6863, %v2793_v1   ;;  %v3531_v37 = vadd.f32 %v7984_v49, %v3400_v23  ;;  %v8076_v4 = vsel %vm3661_vm4, %v3533_v24, %v3789_v59  ;;  %v3928_v28 = vsel %vm3672_vm5, %v3544_v47, %v3800_v17 }
 0x2a4   :  { %v1443_v10 = vpop.permute.xlu1 %1442  ;;  %v8055_v12 = vsel %vm4982_vm1, %v4797_v57, %v5046_v41  ;;  %v1100_v41 = vmul.f32 %v7514_v34, %v7290_v31  ;;  %v3276_v31 = vmul.f32 %v7526_v40, %v8020_v25 }
 0x2a5   :  { %v2130_v30 = vmul.f32 %v7519_v51, %v1443_v10  ;;  %6790 = vmatmul.msk.f32.gmra.mxu3 %vm4276_vm3, %v8055_v12  ;;  %vm3659_vm2 = vcmp.gt.f32.partialorder %v3531_v37, 0.0  ;;  %v3787_v13 = vmul.f32 0.2, %v3531_v37  ;;  %v8073_v2 = vpop.f32.mrf.mxu0 }
 0x2a7   :  { %v2258_v56 = vadd.f32 %v2130_v30, %v1105_v48  ;;  %1526 = vperm.xlu1 %6864, %v1521_v27   ;;  %v3915_v19 = vsel %vm3659_vm2, %v3531_v37, %v3787_v13  ;;  %v1111_v37 = vmul.f32 %v7514_v34, %v7340_v36  ;;  %v2136_v48 = vmul.f32 %v7519_v51, %v1485_v52  ;;  %v8099_v13 = vpop.permute.xlu0 %2574 }
 0x2a8   :  { %6734 = vmatmul.msk.f32.gmra.mxu1 %vm4276_vm3, %v3915_v19  ;;  %v3289_v36 = vmul.f32 %v7526_v40, %v2638_v46 }
 0x2a9   :  { %v3411_v63 = vadd.f32 %v3283_v15, %v2258_v56  ;;  %2777 = vperm.xlu2 %6865, %v2772_v22   ;;  %v2723_v22 = vperm.slane %v7781_v8, 5  ;;  %v1472_v15 = vperm.slane %v8027_v0, 7  ;;  %v2253_v8 = vadd.f32 %v2125_v5, %v1100_v41 }
 0x2aa   :  { %v2264_v25 = vadd.f32 %v2136_v48, %v1111_v37  ;;  %v8129_v48 = vld [vmem:[%s10439_s24 + $0xa8] ss:$2 sm:$0xff] }
 0x2ab   :  { %v3542_v14 = vadd.f32 %v7984_v49, %v3411_v63  ;;  %2875 = vperm.xlu0 %6863, %v2870_v61   ;;  %v2821_v61 = vperm.slane %v7939_v60, 3  ;;  %v1436_v63 = vpop.permute.xlu2 %1435 }
 0x2ac   :  { %v6893_v7 = vpop.permute.xlu1 %6892  ;;  %v3417_v0 = vadd.f32 %v3289_v36, %v2264_v25 }
 0x2ad   :  { %v3798_v18 = vmul.f32 0.2, %v3542_v14  ;;  %v6894_v42 = vunpack.i.l.bf16 %v6893_v7  ;;  %vm3670_vm6 = vcmp.gt.f32.partialorder %v3542_v14, 0.0  ;;  %v6895_v33 = vunpack.i.h.bf16 %v6893_v7  ;;  %v4802_v24 = vpop.f32.mrf.mxu1 }
 0x2af   :  { %v4288_v1 = vsel %vm4276_vm3, %v8002_v32, %v6894_v42  ;;  %v3926_v57 = vsel %vm3670_vm6, %v3542_v14, %v3798_v18  ;;  %v1098_v32 = vmul.f32 %v7514_v34, %v7315_v55  ;;  %v3278_v55 = vmul.f32 %v7526_v40, %v2561_v50  ;;  %v8122_v41 = vpop.permute.xlu0 %2651 }
 0x2b0   :  { %4610 = vmatmul.f32.gmra.mxu0 %v4288_v1  ;;  %6735 = vmatmul.msk.f32.gmra.mxu1 %vm4276_vm3, %v8076_v4  ;;  %v6906_v23 = vpack.i.bf16 %v3928_v28, %v3926_v57  ;;  %v4289_v56 = vsel %vm4276_vm3, %v3915_v19, %v6895_v33  ;;  %v1109_v19 = vmul.f32 %v7514_v34, %v7311_v53  ;;  %v1549_v57 = vperm.slane %v7747_v43, 2 }
 0x2b1   :  { %1575 = vperm.xlu2 %6865, %v1570_v45   ;;  %v3406_v50 = vadd.f32 %v3278_v55, %v2253_v8  ;;  %v2800_v45 = vperm.slane %v7939_v60, 0  ;;  %v3287_v1 = vmul.f32 %v7526_v40, %v8049_v11  ;;  %v3548_v53 = vadd.f32 %v7984_v49, %v3417_v0 }
 0x2b2   :  { %6907 = vrot.lane.b32.xlu1 %v6906_v23, %s7099_s27  ;;  %v2898_v33 = vperm.slane %v8060_v54, 6 }
 0x2b3   :  { %1736 = vperm.xlu0 %6863, %v1731_v26   ;;  %v3537_v26 = vadd.f32 %v7984_v49, %v3406_v50  ;;  %v2589_v5 = vpop.permute.xlu2 %2588  ;;  %v3804_v11 = vmul.f32 0.2, %v3548_v53  ;;  %vm3676_vm11 = vcmp.gt.f32.partialorder %v3548_v53, 0.0 }
 0x2b4   :  { %v1394_v27 = vpop.permute.xlu1 %1393 }
 0x2b5   :  { %v2123_v10 = vmul.f32 %v7519_v51, %v1394_v27  ;;  %v4593_v30 = vpop.f32.mrf.mxu0  ;;  %v3793_v27 = vmul.f32 0.2, %v3537_v26  ;;  %vm3665_vm9 = vcmp.gt.f32.partialorder %v3537_v26, 0.0  ;;  %v3932_v36 = vsel %vm3676_vm11, %v3548_v53, %v3804_v11  ;;  %v10507_v11 = vld [vmem:[#allocation14_spill] sm:$0xff] }
 0x2b6   :  { %v4594_v16 = vadd.f32 %v7972_v58, %v4593_v30  ;;  %v2849_v53 = vperm.slane %v7939_v60, 7 }
 0x2b7   :  { %v2251_v47 = vadd.f32 %v2123_v10, %v1098_v32 }
 0x2b8   :  { %v4803_v59 = vadd.f32 %v4802_v24, %v4594_v16  ;;  %4613 = vmatmul.f32.gmra.mxu0 %v4289_v56  ;;  %v1759_v16 = vperm.slane %v8129_v48, 0 }
 0x2b9   :  { %v3404_v17 = vadd.f32 %v3276_v31, %v2251_v47  ;;  %2728 = vperm.xlu2 %6865, %v2723_v22   ;;  %v1598_v22 = vperm.slane %v7838_v29, 1  ;;  %v8132_v31 = vsel %vm3665_vm9, %v3537_v26, %v3793_v27  ;;  %v1513_v47 = vpop.permute.xlu0 %1512 }
 0x2ba   :  { %1477 = vperm.xlu1 %6864, %v1472_v15   ;;  %vm4984_vm7 = vcmp.gt.f32.partialorder %v4803_v59, 0.0  ;;  %v5048_v14 = vmul.f32 0.2, %v4803_v59 }
 0x2bb   :  { %2826 = vperm.xlu0 %6863, %v2821_v61   ;;  %v3535_v52 = vadd.f32 %v7984_v49, %v3404_v17  ;;  %v10504_v61 = vld [vmem:[#allocation5_spill] sm:$0xff]  ;;  %v10505_v17 = vld [vmem:[#allocation6_spill] sm:$0xff] }
 0x2bc   :  { %v1471_v7 = vpop.permute.xlu1 %1470  ;;  %v8110_v18 = vsel %vm4984_vm7, %v4803_v59, %v5048_v14  ;;  %v1102_v8 = vmul.f32 %v7514_v34, %v10504_v61  ;;  %v2666_v59 = vpop.permute.xlu2 %2665  ;;  %v1115_v50 = vmul.f32 %v7514_v34, %v10505_v17  ;;  %v2140_v14 = vmul.f32 %v7519_v51, %v1513_v47 }
 0x2bd   :  { %v2134_v42 = vmul.f32 %v7519_v51, %v1471_v7  ;;  %6791 = vmatmul.msk.f32.gmra.mxu3 %vm4276_vm3, %v8110_v18  ;;  %vm3663_vm8 = vcmp.gt.f32.partialorder %v3535_v52, 0.0  ;;  %v3791_v46 = vmul.f32 0.2, %v3535_v52  ;;  %v1626_v17 = vperm.slane %v7838_v29, 5 }
 0x2bf   :  { %v2262_v28 = vadd.f32 %v2134_v42, %v1109_v19  ;;  %v3919_v23 = vsel %vm3663_vm8, %v3535_v52, %v3791_v46  ;;  %v2751_v52 = vperm.slane %v7872_v9, 1  ;;  %v10506_v19 = vld [vmem:[#allocation7_spill] sm:$0xff]  ;;  %v3280_v42 = vmul.f32 %v7526_v40, %v8099_v13 }
 0x2c0   :  { %6736 = vmatmul.msk.f32.gmra.mxu1 %vm4276_vm3, %v3919_v23  ;;  %v1104_v7 = vmul.f32 %v7514_v34, %v10506_v19 }
 0x2c1   :  { %v3415_v32 = vadd.f32 %v3287_v1, %v2262_v28  ;;  %2805 = vperm.xlu2 %6865, %v2800_v45   ;;  %v3282_v45 = vmul.f32 %v7526_v40, %v2589_v5  ;;  %v3293_v1 = vmul.f32 %v7526_v40, %v2666_v59 }
 0x2c2   :  { %1554 = vperm.xlu1 %6864, %v1549_v57  }
 0x2c3   :  { %v3546_v37 = vadd.f32 %v7984_v49, %v3415_v32  ;;  %2903 = vperm.xlu0 %6863, %v2898_v33   ;;  %v2268_v33 = vadd.f32 %v2140_v14, %v1115_v50  ;;  %v1787_v14 = vperm.slane %v8129_v48, 4 }
 0x2c4   :  { %v6898_v43 = vpop.permute.xlu1 %6897 }
 0x2c5   :  { %v3802_v10 = vmul.f32 0.2, %v3546_v37  ;;  %v6899_v30 = vunpack.i.l.bf16 %v6898_v43  ;;  %vm3674_vm12 = vcmp.gt.f32.partialorder %v3546_v37, 0.0  ;;  %v6900_v56 = vunpack.i.h.bf16 %v6898_v43 }
 0x2c6   :  { %v3421_v5 = vadd.f32 %v3293_v1, %v2268_v33  ;;  %v2856_v1 = vperm.slane %v8060_v54, 0  ;;  %v1654_v33 = vperm.slane %v7913_v6, 1 }
 0x2c7   :  { %v4290_v55 = vsel %vm4276_vm3, %v8076_v4, %v6899_v30  ;;  %v3930_v15 = vsel %vm3674_vm12, %v3546_v37, %v3802_v10  ;;  %v2129_v4 = vmul.f32 %v7519_v51, %v1436_v63  ;;  %v7075_v63 = vld [vmem:[%s10439_s24 + $0x58] ss:$2 sm:$0xff]  ;;  %v4291_v57 = vsel %vm4276_vm3, %v3919_v23, %v6900_v56  ;;  %v8165_v23 = vld [vmem:[%s10439_s24 + $0xa9] ss:$2 sm:$0xff] }
 0x2c8   :  { %4616 = vmatmul.f32.gmra.mxu0 %v4290_v55  ;;  %6737 = vmatmul.msk.f32.gmra.mxu1 %vm4276_vm3, %v8132_v31  ;;  %v6911_v24 = vpack.i.bf16 %v3932_v36, %v3930_v15  ;;  %v1500_v46 = vperm.slane %v7075_v63, 3  ;;  %v1113_v37 = vmul.f32 %v7514_v34, %v10507_v11  ;;  %v2828_v30 = vperm.slane %v7939_v60, 4  ;;  %v8175_v15 = vld [vmem:[%s10439_s24 + $0x68] ss:$2 sm:$0xff] }
 0x2c9   :  { %1603 = vperm.xlu2 %6865, %v1598_v22   ;;  %v2257_v28 = vadd.f32 %v2129_v4, %v1104_v7  ;;  %v3291_v55 = vmul.f32 %v7526_v40, %v8122_v41  ;;  %v1577_v36 = vperm.slane %v8175_v15, 6  ;;  %v2926_v61 = vperm.slane %v8165_v23, 2 }
 0x2ca   :  { %6912 = vrot.lane.b32.xlu1 %v6911_v24, %s7099_s27  ;;  %v3552_v24 = vadd.f32 %v7984_v49, %v3421_v5  ;;  %v2779_v7 = vperm.slane %v7872_v9, 5  ;;  %v8199_v9 = vpop.f32.mrf.mxu1 }
 0x2cb   :  { %1764 = vperm.xlu0 %6863, %v1759_v16   ;;  %v3410_v13 = vadd.f32 %v3282_v45, %v2257_v28  ;;  %v2877_v45 = vperm.slane %v8060_v54, 3  ;;  %v8197_v28 = vpop.f32.mrf.mxu0 }
 0x2cc   :  { %v1422_v25 = vpop.permute.xlu1 %1421  ;;  %vm3680_vm14 = vcmp.gt.f32.partialorder %v3552_v24, 0.0 }
 0x2cd   :  { %v2127_v0 = vmul.f32 %v7519_v51, %v1422_v25  ;;  %v3541_v16 = vadd.f32 %v7984_v49, %v3410_v13 }
 0x2cf   :  { %v2255_v26 = vadd.f32 %v2127_v0, %v1102_v8  ;;  %v3808_v8 = vmul.f32 0.2, %v3552_v24  ;;  %v3797_v59 = vmul.f32 0.2, %v3541_v16  ;;  %vm3669_vm15 = vcmp.gt.f32.partialorder %v3541_v16, 0.0 }
 0x2d0   :  { %4619 = vmatmul.f32.gmra.mxu0 %v4291_v57  ;;  %v1605_v57 = vperm.slane %v7838_v29, 2 }
 0x2d1   :  { %v3408_v32 = vadd.f32 %v3280_v42, %v2255_v26  ;;  %2756 = vperm.xlu2 %6865, %v2751_v52   ;;  %v8186_v50 = vsel %vm3669_vm15, %v3541_v16, %v3797_v59  ;;  %v3936_v52 = vsel %vm3680_vm14, %v3552_v24, %v3808_v8  ;;  %v1528_v42 = vperm.slane %v7075_v63, 7  ;;  %v1464_v26 = vpop.permute.xlu2 %1463  ;;  %v8204_v63 = vld [vmem:[%s10439_s24 + $0xb8] ss:$2 sm:$0xff] }
 0x2d2   :  { %1505 = vperm.xlu1 %6864, %v1500_v46   ;;  %v2603_v46 = vpop.permute.xlu0 %2602  ;;  %v1815_v29 = vperm.slane %v8204_v63, 0  ;;  %v4808_v11 = vpop.f32.mrf.mxu1  ;;  %v2884_v24 = vperm.slane %v8060_v54, 4 }
 0x2d3   :  { %2854 = vperm.xlu0 %6863, %v2849_v53   ;;  %v3539_v27 = vadd.f32 %v7984_v49, %v3408_v32  ;;  %v2954_v53 = vperm.slane %v8165_v23, 6 }
 0x2d4   :  { %v1499_v43 = vpop.permute.xlu1 %1498 }
 0x2d5   :  { %v2138_v10 = vmul.f32 %v7519_v51, %v1499_v43  ;;  %vm3667_vm13 = vcmp.gt.f32.partialorder %v3539_v27, 0.0  ;;  %v3795_v22 = vmul.f32 0.2, %v3539_v27  ;;  %v2807_v43 = vperm.slane %v7939_v60, 1 }
 0x2d7   :  { %v2266_v47 = vadd.f32 %v2138_v10, %v1113_v37  ;;  %v8179_v56 = vsel %vm3667_vm13, %v3539_v27, %v3795_v22 }
 0x2d8   :  { %6738 = vmatmul.msk.f32.gmra.mxu1 %vm4276_vm3, %v8179_v56 }
 0x2d9   :  { %v3419_v41 = vadd.f32 %v3291_v55, %v2266_v47  ;;  %2833 = vperm.xlu2 %6865, %v2828_v30   ;;  %v2617_v13 = vpop.permute.xlu2 %2616  ;;  %v2905_v30 = vperm.slane %v8060_v54, 7 }
 0x2da   :  { %1582 = vperm.xlu1 %6864, %v1577_v36   ;;  %v8207_v32 = vpop.permute.xlu0 %2679  ;;  %v8220_v36 = vld [vmem:[%s10439_s24 + $0xb9] ss:$2 sm:$0xff] }
 0x2db   :  { %v3550_v4 = vadd.f32 %v7984_v49, %v3419_v41  ;;  %2931 = vperm.xlu0 %6863, %v2926_v61   ;;  %v2982_v47 = vperm.slane %v8220_v36, 2 }
 0x2dd   :  { %v3806_v25 = vmul.f32 0.2, %v3550_v4  ;;  %vm3678_vm0 = vcmp.gt.f32.partialorder %v3550_v4, 0.0 }
 0x2df   :  { %v3934_v0 = vsel %vm3678_vm0, %v3550_v4, %v3806_v25 }
 0x2e0   :  { %6739 = vmatmul.msk.f32.gmra.mxu1 %vm4276_vm3, %v8186_v50  ;;  %v6916_v19 = vpack.i.bf16 %v3936_v52, %v3934_v0  ;;  %v1843_v0 = vperm.slane %v8204_v63, 4 }
 0x2e1   :  { %1631 = vperm.xlu2 %6865, %v1626_v17   ;;  %v2694_v16 = vpop.permute.xlu2 %2693  ;;  %v1682_v17 = vperm.slane %v7913_v6, 5  ;;  %v10511_v6 = vld [vmem:[#allocation20_spill] sm:$0xff] }
 0x2e2   :  { %6917 = vrot.lane.b32.xlu1 %v6916_v19, %s7099_s27  ;;  %v1541_v22 = vpop.permute.xlu0 %1540 }
 0x2e3   :  { %1792 = vperm.xlu0 %6863, %v1787_v14   ;;  %v8233_v14 = vpop.f32.mrf.mxu1 }
 0x2e9   :  { %2784 = vperm.xlu2 %6865, %v2779_v7   ;;  %v8226_v4 = vpop.permute.xlu2 %1491  ;;  %v10509_v7 = vld [vmem:[#allocation3_spill] sm:$0xff] }
 0x2ea   :  { %1533 = vperm.xlu1 %6864, %v1528_v42   ;;  %v8224_v41 = vpop.permute.xlu0 %2630  ;;  %v1106_v42 = vmul.f32 %v7514_v34, %v10509_v7  ;;  %v3295_v7 = vmul.f32 %v7526_v40, %v8207_v32  ;;  %v1794_v32 = vperm.slane %v8129_v48, 5 }
 0x2eb   :  { %2882 = vperm.xlu0 %6863, %v2877_v45   ;;  %v2144_v45 = vmul.f32 %v7519_v51, %v1541_v22 }
 0x2f1   :  { %2861 = vperm.xlu2 %6865, %v2856_v1   ;;  %v2133_v1 = vmul.f32 %v7519_v51, %v1464_v26 }
 0x2f2   :  { %1610 = vperm.xlu1 %6864, %v1605_v57   ;;  %v10510_v57 = vld [vmem:[#allocation9_spill] sm:$0xff] }
 0x2f3   :  { %2959 = vperm.xlu0 %6863, %v2954_v53   ;;  %v1108_v53 = vmul.f32 %v7514_v34, %v10510_v57 }
 0x2f5   :  { %v2261_v22 = vadd.f32 %v2133_v1, %v1108_v53 }
 0x2f9   :  { %1659 = vperm.xlu2 %6865, %v1654_v33   ;;  %v1119_v33 = vmul.f32 %v7514_v34, %v10511_v6  ;;  %v2912_v6 = vperm.slane %v8165_v23, 0 }
 0x2fa   :  { %v4599_v5 = vpop.f32.mrf.mxu0 }
 0x2fb   :  { %v4600_v27 = vadd.f32 %v7972_v58, %v4599_v5  ;;  %1820 = vperm.xlu0 %6863, %v1815_v29   ;;  %v3284_v29 = vmul.f32 %v7526_v40, %v2603_v46  ;;  %v8246_v5 = vpop.permute.xlu0 %2707 }
 0x2fd   :  { %v4809_v37 = vadd.f32 %v4808_v11, %v4600_v27  ;;  %v3286_v27 = vmul.f32 %v7526_v40, %v2617_v13  ;;  %v3297_v11 = vmul.f32 %v7526_v40, %v2694_v16  ;;  %v2933_v13 = vperm.slane %v8165_v23, 3 }
 0x2ff   :  { %vm4986_vm1 = vcmp.gt.f32.partialorder %v4809_v37, 0.0  ;;  %v5050_v10 = vmul.f32 0.2, %v4809_v37 }
 0x301   :  { %2812 = vperm.xlu2 %6865, %v2807_v43   ;;  %v8213_v55 = vsel %vm4986_vm1, %v4809_v37, %v5050_v10  ;;  %v2835_v10 = vperm.slane %v7939_v60, 5 }
 0x302   :  { %10508 = vst [vmem:[#allocation5_spill] sm:$0xff] %v8213_v55  ;;  %6792 = vmatmul.msk.f32.gmra.mxu3 %vm4276_vm3, %v8213_v55  ;;  %v8230_v25 = vpop.f32.mrf.mxu0 }
 0x303   :  { %2910 = vperm.xlu0 %6863, %v2905_v30   ;;  %v2272_v30 = vadd.f32 %v2144_v45, %v1119_v33  ;;  %v1569_v33 = vpop.permute.xlu0 %1568 }
 0x305   :  { %v3425_v16 = vadd.f32 %v3297_v11, %v2272_v30 }
 0x307   :  { %v3556_v1 = vadd.f32 %v7984_v49, %v3425_v16 }
 0x309   :  { %2889 = vperm.xlu2 %6865, %v2884_v24   ;;  %v6903_v61 = vpop.permute.xlu1 %6902  ;;  %v8253_v24 = vpop.permute.xlu2 %2644  ;;  %vm3684_vm5 = vcmp.gt.f32.partialorder %v3556_v1, 0.0 }
 0x30a   :  { %v6904_v8 = vunpack.i.l.bf16 %v6903_v61  ;;  %v6905_v52 = vunpack.i.h.bf16 %v6903_v61  ;;  %v4814_v61 = vpop.f32.mrf.mxu1 }
 0x30b   :  { %2987 = vperm.xlu0 %6863, %v2982_v47  }
 0x30c   :  { %v4292_v59 = vsel %vm4276_vm3, %v8132_v31, %v6904_v8  ;;  %v4293_v26 = vsel %vm4276_vm3, %v8179_v56, %v6905_v52  ;;  %v3414_v8 = vadd.f32 %v3286_v27, %v2261_v22  ;;  %v10512_v56 = vld [vmem:[#allocation16_spill] sm:$0xff]  ;;  %v3812_v27 = vmul.f32 0.2, %v3556_v1 }
 0x30d   :  { %4622 = vmatmul.f32.gmra.mxu0 %v4292_v59 }
 0x30e   :  { %v3545_v45 = vadd.f32 %v7984_v49, %v3414_v8  ;;  %v1710_v8 = vperm.slane %v8007_v39, 1 }
 0x310   :  { %vm3673_vm6 = vcmp.gt.f32.partialorder %v3545_v45, 0.0 }
 0x311   :  { %1687 = vperm.xlu2 %6865, %v1682_v17   ;;  %v1450_v19 = vpop.permute.xlu1 %1449  ;;  %v2722_v11 = vpop.permute.xlu2 %2721 }
 0x312   :  { %v2131_v31 = vmul.f32 %v7519_v51, %v1450_v19  ;;  %v8280_v16 = vpop.f32.mrf.mxu1 }
 0x313   :  { %1848 = vperm.xlu0 %6863, %v1843_v0   ;;  %v1117_v0 = vmul.f32 %v7514_v34, %v10512_v56  ;;  %v8286_v56 = vpop.permute.xlu0 %2658 }
 0x314   :  { %v2259_v37 = vadd.f32 %v2131_v31, %v1106_v42 }
 0x315   :  { %4625 = vmatmul.f32.gmra.mxu0 %v4293_v26  ;;  %v4605_v43 = vpop.f32.mrf.mxu0  ;;  %v3801_v26 = vmul.f32 0.2, %v3545_v45 }
 0x316   :  { %v3412_v46 = vadd.f32 %v3284_v29, %v2259_v37  ;;  %v4606_v47 = vadd.f32 %v7972_v58, %v4605_v43 }
 0x317   :  { %v8273_v30 = vsel %vm3673_vm6, %v3545_v45, %v3801_v26  ;;  %v3288_v26 = vmul.f32 %v7526_v40, %v8224_v41 }
 0x318   :  { %v4815_v59 = vadd.f32 %v4814_v61, %v4606_v47  ;;  %v3543_v17 = vadd.f32 %v7984_v49, %v3412_v46  ;;  %v3940_v46 = vsel %vm3684_vm5, %v3556_v1, %v3812_v27  ;;  %v10516_v27 = vld [vmem:[#allocation22_spill] sm:$0xff] }
 0x319   :  { %2840 = vperm.xlu2 %6865, %v2835_v10   ;;  %v1527_v60 = vpop.permute.xlu1 %1526 }
 0x31a   :  { %v2142_v52 = vmul.f32 %v7519_v51, %v1527_v60  ;;  %vm3671_vm2 = vcmp.gt.f32.partialorder %v3543_v17, 0.0  ;;  %v3799_v19 = vmul.f32 0.2, %v3543_v17  ;;  %vm4988_vm4 = vcmp.gt.f32.partialorder %v4815_v59, 0.0 }
 0x31b   :  { %2938 = vperm.xlu0 %6863, %v2933_v13   ;;  %v5052_v42 = vmul.f32 0.2, %v4815_v59  ;;  %v8310_v41 = vpop.permute.xlu0 %2735 }
 0x31c   :  { %v2270_v31 = vadd.f32 %v2142_v52, %v1117_v0  ;;  %v3927_v57 = vsel %vm3671_vm2, %v3543_v17, %v3799_v19  ;;  %v2947_v17 = vperm.slane %v8165_v23, 5  ;;  %v8288_v0 = vpop.permute.xlu2 %1519  ;;  %v1556_v52 = vperm.slane %v8175_v15, 3  ;;  %v10514_v19 = vld [vmem:[#allocation4_spill] sm:$0xff] }
 0x31d   :  { %6740 = vmatmul.msk.f32.gmra.mxu1 %vm4276_vm3, %v3927_v57  ;;  %v8266_v53 = vsel %vm4988_vm4, %v4815_v59, %v5052_v42  ;;  %v8275_v47 = vpop.f32.mrf.mxu0  ;;  %v2137_v42 = vmul.f32 %v7519_v51, %v8226_v4  ;;  %v3290_v4 = vmul.f32 %v7526_v40, %v8253_v24 }
 0x31e   :  { %10513 = vst [vmem:[#allocation6_spill] sm:$0xff] %v8266_v53  ;;  %v3423_v29 = vadd.f32 %v3295_v7, %v2270_v31  ;;  %6793 = vmatmul.msk.f32.gmra.mxu3 %vm4276_vm3, %v8266_v53  ;;  %v1112_v7 = vmul.f32 %v7514_v34, %v10514_v19  ;;  %v2148_v31 = vmul.f32 %v7519_v51, %v1569_v33 }
 0x320   :  { %v3554_v37 = vadd.f32 %v7984_v49, %v3423_v29 }
 0x321   :  { %2917 = vperm.xlu2 %6865, %v2912_v6  }
 0x322   :  { %v3810_v43 = vmul.f32 0.2, %v3554_v37  ;;  %vm3682_vm7 = vcmp.gt.f32.partialorder %v3554_v37, 0.0 }
 0x323   :  { %1799 = vperm.xlu0 %6863, %v1794_v32   ;;  %v2863_v32 = vperm.slane %v8060_v54, 1 }
 0x324   :  { %v6908_v10 = vpop.permute.xlu1 %6907  ;;  %v3938_v22 = vsel %vm3682_vm7, %v3554_v37, %v3810_v43  ;;  %v1123_v37 = vmul.f32 %v7514_v34, %v10516_v27 }
 0x325   :  { %v6909_v61 = vunpack.i.l.bf16 %v6908_v10  ;;  %6741 = vmatmul.msk.f32.gmra.mxu1 %vm4276_vm3, %v8273_v30  ;;  %v6921_v13 = vpack.i.bf16 %v3940_v46, %v3938_v22  ;;  %v6910_v60 = vunpack.i.h.bf16 %v6908_v10  ;;  %v3301_v10 = vmul.f32 %v7526_v40, %v2722_v11  ;;  %v4820_v22 = vpop.f32.mrf.mxu1  ;;  %v8315_v11 = vld [vmem:[%s10439_s24 + $0x78] ss:$2 sm:$0xff] }
 0x327   :  { %6922 = vrot.lane.b32.xlu1 %v6921_v13, %s7099_s27  ;;  %v4294_v59 = vsel %vm4276_vm3, %v8186_v50, %v6909_v61  ;;  %v10515_v50 = vld [vmem:[#allocation11_spill] sm:$0xff]  ;;  %v4295_v46 = vsel %vm4276_vm3, %v3927_v57, %v6910_v60  ;;  %v1808_v61 = vperm.slane %v8129_v48, 7  ;;  %v2265_v13 = vadd.f32 %v2137_v42, %v1112_v7  ;;  %v2673_v42 = vpop.permute.xlu2 %2672 }
 0x328   :  { %4628 = vmatmul.f32.gmra.mxu0 %v4294_v59  ;;  %v1110_v1 = vmul.f32 %v7514_v34, %v10515_v50  ;;  %v2276_v59 = vadd.f32 %v2148_v31, %v1123_v37  ;;  %v1633_v57 = vperm.slane %v8315_v11, 6 }
 0x329   :  { %1715 = vperm.xlu2 %6865, %v1710_v8   ;;  %v3418_v24 = vadd.f32 %v3290_v4, %v2265_v13  ;;  %v8342_v13 = vld [vmem:[%s10439_s24 + $0xc9] ss:$2 sm:$0xff] }
 0x32a   :  { %v3429_v19 = vadd.f32 %v3301_v10, %v2276_v59 }
 0x32b   :  { %2952 = vperm.xlu0 %6863, %v2947_v17   ;;  %v3549_v27 = vadd.f32 %v7984_v49, %v3418_v24  ;;  %v1738_v24 = vperm.slane %v8007_v39, 5 }
 0x32c   :  { %v1478_v45 = vpop.permute.xlu1 %1477  ;;  %v3560_v37 = vadd.f32 %v7984_v49, %v3429_v19 }
 0x32d   :  { %v2135_v6 = vmul.f32 %v7519_v51, %v1478_v45  ;;  %v4611_v29 = vpop.f32.mrf.mxu0  ;;  %vm3677_vm11 = vcmp.gt.f32.partialorder %v3549_v27, 0.0 }
 0x32e   :  { %v4612_v43 = vadd.f32 %v7972_v58, %v4611_v29  ;;  %vm3688_vm12 = vcmp.gt.f32.partialorder %v3560_v37, 0.0 }
 0x32f   :  { %v2263_v33 = vadd.f32 %v2135_v6, %v1110_v1  ;;  %1561 = vperm.xlu1 %6864, %v1556_v52   ;;  %v10517_v52 = vld [vmem:[#allocation10_spill] sm:$0xff]  ;;  %v8326_v1 = vld [vmem:[%s10439_s24 + $0xc7] ss:$2 sm:$0xff]  ;;  %v2940_v6 = vperm.slane %v8165_v23, 4 }
 0x330   :  { %v4821_v8 = vadd.f32 %v4820_v22, %v4612_v43  ;;  %4631 = vmatmul.f32.gmra.mxu0 %v4295_v46  ;;  %v1121_v7 = vmul.f32 %v7514_v34, %v10517_v52  ;;  %v860_v43 = vperm.slane %v8326_v1, 2  ;;  %v3805_v22 = vmul.f32 0.2, %v3549_v27 }
 0x331   :  { %v3416_v17 = vadd.f32 %v3288_v26, %v2263_v33  ;;  %2868 = vperm.xlu2 %6865, %v2863_v32   ;;  %v3299_v32 = vmul.f32 %v7526_v40, %v8246_v5  ;;  %v3816_v33 = vmul.f32 0.2, %v3560_v37  ;;  %v1597_v5 = vpop.permute.xlu0 %1596 }
 0x332   :  { %vm4990_vm8 = vcmp.gt.f32.partialorder %v4821_v8, 0.0  ;;  %v5054_v58 = vmul.f32 0.2, %v4821_v8  ;;  %v8347_v19 = vsel %vm3677_vm11, %v3549_v27, %v3805_v22 }
 0x333   :  { %1813 = vperm.xlu0 %6863, %v1808_v61   ;;  %v3547_v60 = vadd.f32 %v7984_v49, %v3416_v17 }
 0x334   :  { %v1555_v45 = vpop.permute.xlu1 %1554  ;;  %v8321_v50 = vsel %vm4990_vm8, %v4821_v8, %v5054_v58  ;;  %v2750_v58 = vpop.permute.xlu2 %2749 }
 0x335   :  { %10518 = vst [vmem:[#allocation7_spill] sm:$0xff] %v8321_v50  ;;  %v2146_v31 = vmul.f32 %v7519_v51, %v1555_v45  ;;  %6794 = vmatmul.msk.f32.gmra.mxu3 %vm4276_vm3, %v8321_v50  ;;  %vm3675_vm9 = vcmp.gt.f32.partialorder %v3547_v60, 0.0  ;;  %v3803_v29 = vmul.f32 0.2, %v3547_v60  ;;  %v8344_v59 = vpop.f32.mrf.mxu0 }
 0x337   :  { %v2274_v26 = vadd.f32 %v2146_v31, %v1121_v7  ;;  %1638 = vperm.xlu1 %6864, %v1633_v57   ;;  %v3931_v4 = vsel %vm3675_vm9, %v3547_v60, %v3803_v29  ;;  %v3038_v60 = vperm.slane %v8342_v13, 2  ;;  %v3944_v7 = vsel %vm3688_vm12, %v3560_v37, %v3816_v33  ;;  %v10519_v31 = vld [vmem:[#allocation13_spill] sm:$0xff]  ;;  %v10520_v29 = vld [vmem:[#allocation15_spill] sm:$0xff] }
 0x338   :  { %6742 = vmatmul.msk.f32.gmra.mxu1 %vm4276_vm3, %v3931_v4  ;;  %v10521_v37 = vld [vmem:[#allocation17_spill] sm:$0xff]  ;;  %v2891_v33 = vperm.slane %v8060_v54, 5 }
 0x339   :  { %v3427_v10 = vadd.f32 %v3299_v32, %v2274_v26  ;;  %2945 = vperm.xlu2 %6865, %v2940_v6   ;;  %v1114_v6 = vmul.f32 %v7514_v34, %v10519_v31  ;;  %v2141_v32 = vmul.f32 %v7519_v51, %v8288_v0  ;;  %v1116_v26 = vmul.f32 %v7514_v34, %v10521_v37  ;;  %v8376_v0 = vld [vmem:[%s10503_s4] ss:$0 sm:$0xff] }
 0x33b   :  { %v3558_v46 = vadd.f32 %v7984_v49, %v3427_v10  ;;  %865 = vperm.xlu0 %6863, %v860_v43   ;;  %v8349_v49 = vpop.f32.mrf.mxu1  ;;  %v2152_v43 = vmul.f32 %v7519_v51, %v1597_v5  ;;  %v1584_v5 = vperm.slane %v8175_v15, 7 }
 0x33c   :  { %v6913_v61 = vpop.permute.xlu1 %6912 }
 0x33d   :  { %v3814_v8 = vmul.f32 0.2, %v3558_v46  ;;  %v6914_v17 = vunpack.i.l.bf16 %v6913_v61  ;;  %vm3686_vm13 = vcmp.gt.f32.partialorder %v3558_v46, 0.0  ;;  %v6915_v39 = vunpack.i.h.bf16 %v6913_v61  ;;  %v8370_v61 = vpop.permute.xlu0 %2686 }
 0x33f   :  { %v4296_v57 = vsel %vm4276_vm3, %v8273_v30, %v6914_v17  ;;  %v3942_v52 = vsel %vm3686_vm13, %v3558_v46, %v3814_v8  ;;  %v1127_v30 = vmul.f32 %v7514_v34, %v10520_v29  ;;  %v3292_v46 = vmul.f32 %v7526_v40, %v8286_v56 }
 0x340   :  { %4634 = vmatmul.f32.gmra.mxu0 %v4296_v57  ;;  %6743 = vmatmul.msk.f32.gmra.mxu1 %vm4276_vm3, %v8347_v19  ;;  %v6926_v45 = vpack.i.bf16 %v3944_v7, %v3942_v52  ;;  %v3294_v8 = vmul.f32 %v7526_v40, %v2673_v42  ;;  %v874_v56 = vperm.slane %v8326_v1, 4  ;;  %v2269_v52 = vadd.f32 %v2141_v32, %v1116_v26  ;;  %v1548_v7 = vpop.permute.xlu2 %1547 }
 0x341   :  { %1743 = vperm.xlu2 %6865, %v1738_v24   ;;  %v3305_v24 = vmul.f32 %v7526_v40, %v2750_v58  ;;  %v8386_v58 = vld [vmem:[%s10499_s3] ss:$0 sm:$0xff]  ;;  %v2968_v26 = vperm.slane %v8220_v36, 0 }
 0x342   :  { %6927 = vrot.lane.b32.xlu1 %v6926_v45, %s7099_s27  ;;  %v2280_v45 = vadd.f32 %v2152_v43, %v1127_v30  ;;  %v3422_v29 = vadd.f32 %v3294_v8, %v2269_v52 }
 0x343   :  { %3043 = vperm.xlu0 %6863, %v3038_v60   ;;  %v4826_v57 = vpop.f32.mrf.mxu1  ;;  %v4297_v60 = vsel %vm4276_vm3, %v3931_v4, %v6915_v39  ;;  %v10522_v39 = vld [vmem:[#allocation26_spill] sm:$0xff] }
 0x344   :  { %v1506_v27 = vpop.permute.xlu1 %1505  ;;  %v3433_v15 = vadd.f32 %v3305_v24, %v2280_v45  ;;  %v3052_v24 = vperm.slane %v8342_v13, 4  ;;  %v8415_v45 = vld [vmem:[%s10439_s24 + $0xc8] ss:$2 sm:$0xff] }
 0x345   :  { %v2139_v10 = vmul.f32 %v7519_v51, %v1506_v27  ;;  %v4617_v22 = vpop.f32.mrf.mxu0 }
 0x346   :  { %v4618_v17 = vadd.f32 %v8376_v0, %v4617_v22  ;;  %v3553_v22 = vadd.f32 %v8386_v58, %v3422_v29  ;;  %v3564_v8 = vadd.f32 %v8386_v58, %v3433_v15 }
 0x347   :  { %v2267_v54 = vadd.f32 %v2139_v10, %v1114_v6  ;;  %v1125_v6 = vmul.f32 %v7514_v34, %v10522_v39  ;;  %v3303_v10 = vmul.f32 %v7526_v40, %v8310_v41  ;;  %v1913_v39 = vperm.slane %v8415_v45, 6 }
 0x348   :  { %v4827_v42 = vadd.f32 %v4826_v57, %v4618_v17  ;;  %4637 = vmatmul.f32.gmra.mxu0 %v4297_v60  ;;  %v8408_v57 = vpop.permute.xlu0 %2763  ;;  %v3809_v60 = vmul.f32 0.2, %v3553_v22  ;;  %vm3681_vm0 = vcmp.gt.f32.partialorder %v3553_v22, 0.0  ;;  %vm3692_vm1 = vcmp.gt.f32.partialorder %v3564_v8, 0.0 }
 0x349   :  { %v3420_v31 = vadd.f32 %v3292_v46, %v2267_v54  ;;  %2896 = vperm.xlu2 %6865, %v2891_v33   ;;  %v8403_v33 = vld [vmem:[%s10439_s24 + $0x88] ss:$2 sm:$0xff]  ;;  %v2701_v54 = vpop.permute.xlu2 %2700 }
 0x34a   :  { %1589 = vperm.xlu1 %6864, %v1584_v5   ;;  %vm4992_vm14 = vcmp.gt.f32.partialorder %v4827_v42, 0.0  ;;  %v5056_v27 = vmul.f32 0.2, %v4827_v42  ;;  %v1661_v46 = vperm.slane %v8403_v33, 2  ;;  %v8418_v15 = vsel %vm3681_vm0, %v3553_v22, %v3809_v60 }
 0x34b   :  { %879 = vperm.xlu0 %6863, %v874_v56   ;;  %v3551_v4 = vadd.f32 %v8386_v58, %v3420_v31  ;;  %v3820_v56 = vmul.f32 0.2, %v3564_v8  ;;  %v2919_v60 = vperm.slane %v8165_v23, 1 }
 0x34c   :  { %v1583_v32 = vpop.permute.xlu1 %1582  ;;  %v8391_v30 = vsel %vm4992_vm14, %v4827_v42, %v5056_v27  ;;  %v1766_v27 = vperm.slane %v8129_v48, 1 }
 0x34d   :  { %10523 = vst [vmem:[#allocation14_spill] sm:$0xff] %v8391_v30  ;;  %v2150_v37 = vmul.f32 %v7519_v51, %v1583_v32  ;;  %6795 = vmatmul.msk.f32.gmra.mxu3 %vm4276_vm3, %v8391_v30  ;;  %vm3679_vm15 = vcmp.gt.f32.partialorder %v3551_v4, 0.0  ;;  %v3807_v43 = vmul.f32 0.2, %v3551_v4  ;;  %v3948_v32 = vsel %vm3692_vm1, %v3564_v8, %v3820_v56  ;;  %v10526_v56 = vld [vmem:[#allocation31_spill] sm:$0xff] }
 0x34f   :  { %v2278_v17 = vadd.f32 %v2150_v37, %v1125_v6  ;;  %v3935_v5 = vsel %vm3679_vm15, %v3551_v4, %v3807_v43  ;;  %v10524_v43 = vld [vmem:[#allocation8_spill] sm:$0xff] }
 0x350   :  { %6744 = vmatmul.msk.f32.gmra.mxu1 %vm4276_vm3, %v3935_v5 }
 0x351   :  { %v3431_v41 = vadd.f32 %v3303_v10, %v2278_v17  ;;  %2973 = vperm.xlu2 %6865, %v2968_v26   ;;  %v1625_v26 = vpop.permute.xlu0 %1624  ;;  %v1118_v10 = vmul.f32 %v7514_v34, %v10524_v43  ;;  %v2778_v22 = vpop.permute.xlu2 %2777  ;;  %v10525_v17 = vld [vmem:[#allocation19_spill] sm:$0xff] }
 0x352   :  { %1666 = vperm.xlu1 %6864, %v1661_v46   ;;  %v1120_v8 = vmul.f32 %v7514_v34, %v10525_v17 }
 0x353   :  { %v3562_v52 = vadd.f32 %v8386_v58, %v3431_v41  ;;  %3057 = vperm.xlu0 %6863, %v3052_v24   ;;  %v2156_v24 = vmul.f32 %v7519_v51, %v1625_v26 }
 0x354   :  { %v6918_v42 = vpop.permute.xlu1 %6917 }
 0x355   :  { %v3818_v31 = vmul.f32 0.2, %v3562_v52  ;;  %v6919_v29 = vunpack.i.l.bf16 %v6918_v42  ;;  %vm3690_vm2 = vcmp.gt.f32.partialorder %v3562_v52, 0.0  ;;  %v6920_v48 = vunpack.i.h.bf16 %v6918_v42 }
 0x356   :  { %v3296_v42 = vmul.f32 %v7526_v40, %v8370_v61 }
 0x357   :  { %v4298_v4 = vsel %vm4276_vm3, %v8347_v19, %v6919_v29  ;;  %v3946_v6 = vsel %vm3690_vm2, %v3562_v52, %v3818_v31  ;;  %v2145_v19 = vmul.f32 %v7519_v51, %v1548_v7  ;;  %v1131_v52 = vmul.f32 %v7514_v34, %v10526_v56 }
 0x358   :  { %4640 = vmatmul.f32.gmra.mxu0 %v4298_v4  ;;  %6745 = vmatmul.msk.f32.gmra.mxu1 %vm4276_vm3, %v8418_v15  ;;  %v6931_v37 = vpack.i.bf16 %v3948_v32, %v3946_v6  ;;  %v3298_v31 = vmul.f32 %v7526_v40, %v2701_v54  ;;  %v1612_v7 = vperm.slane %v8315_v11, 3  ;;  %v3309_v29 = vmul.f32 %v7526_v40, %v2778_v22  ;;  %v10527_v54 = vld [vmem:[#allocation27_spill] sm:$0xff] }
 0x359   :  { %1771 = vperm.xlu2 %6865, %v1766_v27   ;;  %v4299_v4 = vsel %vm4276_vm3, %v3935_v5, %v6920_v48  ;;  %v2273_v6 = vadd.f32 %v2145_v19, %v1120_v8  ;;  %v2284_v23 = vadd.f32 %v2156_v24, %v1131_v52  ;;  %v1129_v43 = vmul.f32 %v7514_v34, %v10527_v54  ;;  %v6686_v5 = vld [vmem:[%s10439_s24 + $0xd7] ss:$2 sm:$0xff] }
 0x35a   :  { %6932 = vrot.lane.b32.xlu1 %v6931_v37, %s7099_s27  ;;  %v1689_v8 = vperm.slane %v8403_v33, 6  ;;  %v902_v56 = vperm.slane %v6686_v5, 0  ;;  %v1878_v54 = vperm.slane %v8415_v45, 1  ;;  %v867_v45 = vperm.slane %v8326_v1, 3 }
 0x35b   :  { %1918 = vperm.xlu0 %6863, %v1913_v39   ;;  %v3066_v39 = vperm.slane %v8342_v13, 6  ;;  %v3426_v37 = vadd.f32 %v3298_v31, %v2273_v6  ;;  %v3437_v26 = vadd.f32 %v3309_v29, %v2284_v23  ;;  %v1640_v23 = vperm.slane %v8315_v11, 7 }
 0x35c   :  { %v1534_v46 = vpop.permute.xlu1 %1533 }
 0x35d   :  { %v2143_v41 = vmul.f32 %v7519_v51, %v1534_v46  ;;  %v3307_v46 = vmul.f32 %v7526_v40, %v8408_v57  ;;  %v3557_v17 = vadd.f32 %v8386_v58, %v3426_v37  ;;  %v3568_v24 = vadd.f32 %v8386_v58, %v3437_v26  ;;  %v2715_v37 = vpop.permute.xlu0 %2714  ;;  %v1576_v26 = vpop.permute.xlu2 %1575 }
 0x35f   :  { %v2271_v27 = vadd.f32 %v2143_v41, %v1118_v10  ;;  %v2996_v10 = vperm.slane %v8220_v36, 4  ;;  %v3824_v36 = vmul.f32 0.2, %v3568_v24  ;;  %v3813_v57 = vmul.f32 0.2, %v3557_v17 }
 0x360   :  { %4643 = vmatmul.f32.gmra.mxu0 %v4299_v4  ;;  %vm3696_vm5 = vcmp.gt.f32.partialorder %v3568_v24, 0.0  ;;  %vm3685_vm6 = vcmp.gt.f32.partialorder %v3557_v17, 0.0 }
 0x361   :  { %v3424_v32 = vadd.f32 %v3296_v42, %v2271_v27  ;;  %2924 = vperm.xlu2 %6865, %v2919_v60   ;;  %v8462_v29 = vsel %vm3685_vm6, %v3557_v17, %v3813_v57  ;;  %v1864_v27 = vperm.slane %v8204_v63, 7 }
 0x362   :  { %1617 = vperm.xlu1 %6864, %v1612_v7   ;;  %v1857_v7 = vperm.slane %v8204_v63, 6  ;;  %v8472_v63 = vld [vmem:[%s10439_s24 + $0x98] ss:$2 sm:$0xff] }
 0x363   :  { %3071 = vperm.xlu0 %6863, %v3066_v39   ;;  %v3555_v61 = vadd.f32 %v8386_v58, %v3424_v32  ;;  %v3952_v39 = vsel %vm3696_vm5, %v3568_v24, %v3824_v36  ;;  %v916_v32 = vperm.slane %v6686_v5, 2  ;;  %v3031_v5 = vperm.slane %v8342_v13, 1 }
 0x364   :  { %v1611_v22 = vpop.permute.xlu1 %1610 }
 0x365   :  { %v2154_v48 = vmul.f32 %v7519_v51, %v1611_v22  ;;  %vm3683_vm4 = vcmp.gt.f32.partialorder %v3555_v61, 0.0  ;;  %v3811_v19 = vmul.f32 0.2, %v3555_v61  ;;  %v8478_v22 = vpop.f32.mrf.mxu1  ;;  %v2792_v11 = vpop.permute.xlu0 %2791 }
 0x367   :  { %v2282_v41 = vadd.f32 %v2154_v48, %v1129_v43  ;;  %v8456_v60 = vsel %vm3683_vm4, %v3555_v61, %v3811_v19  ;;  %v1717_v61 = vperm.slane %v8472_v63, 2  ;;  %v8476_v43 = vpop.f32.mrf.mxu0  ;;  %v2729_v48 = vpop.permute.xlu2 %2728 }
 0x368   :  { %6746 = vmatmul.msk.f32.gmra.mxu1 %vm4276_vm3, %v8456_v60 }
 0x369   :  { %v3435_v52 = vadd.f32 %v3307_v46, %v2282_v41  ;;  %3001 = vperm.xlu2 %6865, %v2996_v10  }
 0x36a   :  { %1694 = vperm.xlu1 %6864, %v1689_v8  }
 0x36b   :  { %v3566_v42 = vadd.f32 %v8386_v58, %v3435_v52  ;;  %907 = vperm.xlu0 %6863, %v902_v56   ;;  %v3045_v52 = vperm.slane %v8342_v13, 3  ;;  %v10529_v13 = vld [vmem:[#allocation23_spill] sm:$0xff] }
 0x36d   :  { %v3822_v31 = vmul.f32 0.2, %v3566_v42  ;;  %vm3694_vm7 = vcmp.gt.f32.partialorder %v3566_v42, 0.0  ;;  %v4832_v46 = vpop.f32.mrf.mxu1  ;;  %v1653_v24 = vpop.permute.xlu0 %1652 }
 0x36f   :  { %v3950_v4 = vsel %vm3694_vm7, %v3566_v42, %v3822_v31  ;;  %v2806_v56 = vpop.permute.xlu2 %2805 }
 0x370   :  { %6747 = vmatmul.msk.f32.gmra.mxu1 %vm4276_vm3, %v8462_v29  ;;  %v6936_v6 = vpack.i.bf16 %v3952_v39, %v3950_v4  ;;  %v881_v39 = vperm.slane %v8326_v1, 5 }
 0x371   :  { %1862 = vperm.xlu2 %6865, %v1857_v7  }
 0x372   :  { %6937 = vrot.lane.b32.xlu1 %v6936_v6, %s7099_s27 }
 0x373   :  { %1869 = vperm.xlu0 %6863, %v1864_v27  }
 0x375   :  { %v8488_v42 = vpop.permute.xlu0 %2742  ;;  %v8496_v4 = vpop.f32.mrf.mxu1 }
 0x377   :  { %v8490_v31 = vpop.permute.xlu2 %1603 }
 0x37a   :  { %1645 = vperm.xlu1 %6864, %v1640_v23  }
 0x37b   :  { %921 = vperm.xlu0 %6863, %v916_v32   ;;  %v1122_v32 = vmul.f32 %v7514_v34, %v10529_v13 }
 0x37d   :  { %v8509_v1 = vpop.permute.xlu0 %2819 }
 0x382   :  { %1722 = vperm.xlu1 %6864, %v1717_v61   ;;  %v2160_v61 = vmul.f32 %v7519_v51, %v1653_v24 }
 0x383   :  { %1883 = vperm.xlu0 %6863, %v1878_v54   ;;  %v2149_v54 = vmul.f32 %v7519_v51, %v1576_v26 }
 0x38a   :  { %v4623_v10 = vpop.f32.mrf.mxu0 }
 0x38b   :  { %v4624_v19 = vadd.f32 %v8376_v0, %v4623_v10  ;;  %3036 = vperm.xlu0 %6863, %v3031_v5   ;;  %v10530_v10 = vld [vmem:[#allocation12_spill] sm:$0xff] }
 0x38d   :  { %v4833_v17 = vadd.f32 %v4832_v46, %v4624_v19  ;;  %v10531_v19 = vld [vmem:[#allocation33_spill] sm:$0xff] }
 0x38e   :  { %v1135_v46 = vmul.f32 %v7514_v34, %v10531_v19 }
 0x38f   :  { %vm4994_vm8 = vcmp.gt.f32.partialorder %v4833_v17, 0.0  ;;  %v5058_v8 = vmul.f32 0.2, %v4833_v17 }
 0x391   :  { %v8483_v41 = vsel %vm4994_vm8, %v4833_v17, %v5058_v8  ;;  %v3300_v17 = vmul.f32 %v7526_v40, %v2715_v37  ;;  %v3302_v8 = vmul.f32 %v7526_v40, %v2729_v48 }
 0x392   :  { %10528 = vst [vmem:[#allocation3_spill] sm:$0xff] %v8483_v41  ;;  %6796 = vmatmul.msk.f32.gmra.mxu3 %vm4276_vm3, %v8483_v41  ;;  %v8494_v27 = vpop.f32.mrf.mxu0  ;;  %v10532_v41 = vld [vmem:[#allocation21_spill] sm:$0xff] }
 0x393   :  { %872 = vperm.xlu0 %6863, %v867_v45   ;;  %v3313_v45 = vmul.f32 %v7526_v40, %v2806_v56  ;;  %v1133_v56 = vmul.f32 %v7514_v34, %v10532_v41  ;;  %v1681_v41 = vpop.permute.xlu0 %1680 }
 0x399   :  { %v6923_v36 = vpop.permute.xlu1 %6922 }
 0x39a   :  { %v6924_v57 = vunpack.i.l.bf16 %v6923_v36  ;;  %v6925_v6 = vunpack.i.h.bf16 %v6923_v36  ;;  %v2288_v36 = vadd.f32 %v2160_v61, %v1135_v46  ;;  %v4838_v37 = vpop.f32.mrf.mxu1  ;;  %v3311_v61 = vmul.f32 %v7526_v40, %v2792_v11 }
 0x39b   :  { %3050 = vperm.xlu0 %6863, %v3045_v52  }
 0x39c   :  { %v4300_v7 = vsel %vm4276_vm3, %v8418_v15, %v6924_v57  ;;  %v1124_v15 = vmul.f32 %v7514_v34, %v10530_v10  ;;  %v4301_v26 = vsel %vm4276_vm3, %v8456_v60, %v6925_v6  ;;  %v3441_v10 = vadd.f32 %v3313_v45, %v2288_v36 }
 0x39d   :  { %4646 = vmatmul.f32.gmra.mxu0 %v4300_v7  ;;  %v2757_v7 = vpop.permute.xlu2 %2756 }
 0x39e   :  { %v2277_v57 = vadd.f32 %v2149_v54, %v1124_v15  ;;  %v3572_v15 = vadd.f32 %v8386_v58, %v3441_v10 }
 0x3a0   :  { %vm3700_vm12 = vcmp.gt.f32.partialorder %v3572_v15, 0.0 }
 0x3a1   :  { %v1562_v23 = vpop.permute.xlu1 %1561 }
 0x3a2   :  { %v2147_v5 = vmul.f32 %v7519_v51, %v1562_v23 }
 0x3a3   :  { %886 = vperm.xlu0 %6863, %v881_v39   ;;  %v3430_v39 = vadd.f32 %v3302_v8, %v2277_v57 }
 0x3a4   :  { %v2275_v24 = vadd.f32 %v2147_v5, %v1122_v32 }
 0x3a5   :  { %4649 = vmatmul.f32.gmra.mxu0 %v4301_v26  ;;  %v4629_v52 = vpop.f32.mrf.mxu0  ;;  %v3561_v5 = vadd.f32 %v8386_v58, %v3430_v39  ;;  %v2834_v26 = vpop.permute.xlu2 %2833 }
 0x3a6   :  { %v3428_v23 = vadd.f32 %v3300_v17, %v2275_v24  ;;  %v4630_v13 = vadd.f32 %v8376_v0, %v4629_v52  ;;  %v3828_v24 = vmul.f32 0.2, %v3572_v15 }
 0x3a7   :  { %v3817_v52 = vmul.f32 0.2, %v3561_v5  ;;  %vm3689_vm13 = vcmp.gt.f32.partialorder %v3561_v5, 0.0 }
 0x3a8   :  { %v3559_v19 = vadd.f32 %v8386_v58, %v3428_v23  ;;  %v4839_v48 = vadd.f32 %v4838_v37, %v4630_v13  ;;  %v3956_v37 = vsel %vm3700_vm12, %v3572_v15, %v3828_v24 }
 0x3a9   :  { %v1639_v32 = vpop.permute.xlu1 %1638  ;;  %v8529_v23 = vsel %vm3689_vm13, %v3561_v5, %v3817_v52  ;;  %v10534_v5 = vld [vmem:[#allocation25_spill] sm:$0xff] }
 0x3aa   :  { %v2158_v60 = vmul.f32 %v7519_v51, %v1639_v32  ;;  %vm3687_vm9 = vcmp.gt.f32.partialorder %v3559_v19, 0.0  ;;  %v3815_v6 = vmul.f32 0.2, %v3559_v19  ;;  %vm4996_vm11 = vcmp.gt.f32.partialorder %v4839_v48, 0.0  ;;  %v8540_v32 = vpop.permute.xlu0 %2770 }
 0x3ab   :  { %v5060_v54 = vmul.f32 0.2, %v4839_v48  ;;  %v1126_v15 = vmul.f32 %v7514_v34, %v10534_v5 }
 0x3ac   :  { %v2286_v46 = vadd.f32 %v2158_v60, %v1133_v56  ;;  %v3943_v17 = vsel %vm3687_vm9, %v3559_v19, %v3815_v6 }
 0x3ad   :  { %6748 = vmatmul.msk.f32.gmra.mxu1 %vm4276_vm3, %v3943_v17  ;;  %v8524_v8 = vsel %vm4996_vm11, %v4839_v48, %v5060_v54  ;;  %v8531_v39 = vpop.f32.mrf.mxu0  ;;  %v8535_v48 = vpop.f32.mrf.mxu1 }
 0x3ae   :  { %10533 = vst [vmem:[#allocation9_spill] sm:$0xff] %v8524_v8  ;;  %v3439_v45 = vadd.f32 %v3311_v61, %v2286_v46  ;;  %6797 = vmatmul.msk.f32.gmra.mxu3 %vm4276_vm3, %v8524_v8  ;;  %v8542_v60 = vpop.permute.xlu2 %1631  ;;  %v1668_v61 = vperm.slane %v8403_v33, 3  ;;  %v2164_v46 = vmul.f32 %v7519_v51, %v1681_v41  ;;  %v3317_v41 = vmul.f32 %v7526_v40, %v2834_v26 }
 0x3af   :  { %v1745_v26 = vperm.slane %v8472_v63, 6 }
 0x3b0   :  { %v3570_v11 = vadd.f32 %v8386_v58, %v3439_v45  ;;  %v2153_v45 = vmul.f32 %v7519_v51, %v8490_v31 }
 0x3b2   :  { %v3826_v36 = vmul.f32 0.2, %v3570_v11  ;;  %vm3698_vm14 = vcmp.gt.f32.partialorder %v3570_v11, 0.0 }
 0x3b4   :  { %v6928_v57 = vpop.permute.xlu1 %6927  ;;  %v3954_v13 = vsel %vm3698_vm14, %v3570_v11, %v3826_v36  ;;  %v10535_v11 = vld [vmem:[#allocation29_spill] sm:$0xff]  ;;  %v10536_v36 = vld [vmem:[#allocation28_spill] sm:$0xff] }
 0x3b5   :  { %v6929_v10 = vunpack.i.l.bf16 %v6928_v57  ;;  %6749 = vmatmul.msk.f32.gmra.mxu1 %vm4276_vm3, %v8529_v23  ;;  %v6941_v19 = vpack.i.bf16 %v3956_v37, %v3954_v13  ;;  %v6930_v6 = vunpack.i.h.bf16 %v6928_v57  ;;  %v1139_v52 = vmul.f32 %v7514_v34, %v10535_v11 }
 0x3b6   :  { %v1128_v57 = vmul.f32 %v7514_v34, %v10536_v36  ;;  %v3304_v13 = vmul.f32 %v7526_v40, %v8488_v42  ;;  %v8561_v36 = vpop.permute.xlu0 %2847  ;;  %v2785_v50 = vpop.permute.xlu2 %2784 }
 0x3b7   :  { %6942 = vrot.lane.b32.xlu1 %v6941_v19, %s7099_s27  ;;  %v4302_v56 = vsel %vm4276_vm3, %v8462_v29, %v6929_v10  ;;  %v3306_v10 = vmul.f32 %v7526_v40, %v2757_v7  ;;  %v4844_v19 = vpop.f32.mrf.mxu1  ;;  %v2292_v5 = vadd.f32 %v2164_v46, %v1139_v52 }
 0x3b8   :  { %4652 = vmatmul.f32.gmra.mxu0 %v4302_v56  ;;  %v4303_v56 = vsel %vm4276_vm3, %v3943_v17, %v6930_v6  ;;  %v2281_v11 = vadd.f32 %v2153_v45, %v1128_v57  ;;  %v10538_v17 = vld [vmem:[#allocation37_spill] sm:$0xff] }
 0x3b9   :  { %v1137_v6 = vmul.f32 %v7514_v34, %v10538_v17 }
 0x3ba   :  { %v3434_v30 = vadd.f32 %v3306_v10, %v2281_v11 }
 0x3bc   :  { %v1590_v54 = vpop.permute.xlu1 %1589 }
 0x3bd   :  { %v2151_v24 = vmul.f32 %v7519_v51, %v1590_v54  ;;  %v4635_v29 = vpop.f32.mrf.mxu0 }
 0x3be   :  { %v4636_v37 = vadd.f32 %v8376_v0, %v4635_v29  ;;  %v3445_v29 = vadd.f32 %v3317_v41, %v2292_v5  ;;  %v2862_v5 = vpop.permute.xlu2 %2861 }
 0x3bf   :  { %v2279_v31 = vadd.f32 %v2151_v24, %v1126_v15  ;;  %1673 = vperm.xlu1 %6864, %v1668_v61   ;;  %v3315_v24 = vmul.f32 %v7526_v40, %v8509_v1  ;;  %v8580_v11 = vpop.f32.mrf.mxu1 }
 0x3c0   :  { %v4845_v54 = vadd.f32 %v4844_v19, %v4636_v37  ;;  %4655 = vmatmul.f32.gmra.mxu0 %v4303_v56  ;;  %v3576_v52 = vadd.f32 %v8386_v58, %v3445_v29  ;;  %10540 = vst [vmem:[#allocation4_spill] sm:$0xff] %v8580_v11 }
 0x3c1   :  { %v3432_v8 = vadd.f32 %v3304_v13, %v2279_v31  ;;  %v1709_v31 = vpop.permute.xlu0 %1708 }
 0x3c2   :  { %vm4998_vm15 = vcmp.gt.f32.partialorder %v4845_v54, 0.0  ;;  %v5062_v42 = vmul.f32 0.2, %v4845_v54  ;;  %v3832_v10 = vmul.f32 0.2, %v3576_v52  ;;  %vm3704_vm1 = vcmp.gt.f32.partialorder %v3576_v52, 0.0 }
 0x3c3   :  { %v3563_v7 = vadd.f32 %v8386_v58, %v3432_v8  ;;  %v3565_v8 = vadd.f32 %v8386_v58, %v3434_v30 }
 0x3c4   :  { %v1667_v15 = vpop.permute.xlu1 %1666  ;;  %v8565_v61 = vsel %vm4998_vm15, %v4845_v54, %v5062_v42 }
 0x3c5   :  { %10537 = vst [vmem:[#allocation20_spill] sm:$0xff] %v8565_v61  ;;  %v2162_v46 = vmul.f32 %v7519_v51, %v1667_v15  ;;  %6798 = vmatmul.msk.f32.gmra.mxu3 %vm4276_vm3, %v8565_v61  ;;  %vm3691_vm0 = vcmp.gt.f32.partialorder %v3563_v7, 0.0  ;;  %v3819_v45 = vmul.f32 0.2, %v3563_v7  ;;  %v3821_v19 = vmul.f32 0.2, %v3565_v8  ;;  %v8578_v1 = vpop.f32.mrf.mxu0 }
 0x3c6   :  { %vm3693_vm2 = vcmp.gt.f32.partialorder %v3565_v8, 0.0  ;;  %10539 = vst [vmem:[#allocation16_spill] sm:$0xff] %v8578_v1 }
 0x3c7   :  { %v2290_v57 = vadd.f32 %v2162_v46, %v1137_v6  ;;  %1750 = vperm.xlu1 %6864, %v1745_v26   ;;  %v3947_v13 = vsel %vm3691_vm0, %v3563_v7, %v3819_v45  ;;  %v8584_v29 = vsel %vm3693_vm2, %v3565_v8, %v3821_v19  ;;  %v3960_v26 = vsel %vm3704_vm1, %v3576_v52, %v3832_v10  ;;  %v10541_v6 = vld [vmem:[#allocation18_spill] sm:$0xff] }
 0x3c8   :  { %6750 = vmatmul.msk.f32.gmra.mxu1 %vm4276_vm3, %v3947_v13  ;;  %v1130_v46 = vmul.f32 %v7514_v34, %v10541_v6  ;;  %v2157_v8 = vmul.f32 %v7519_v51, %v8542_v60  ;;  %v10543_v10 = vld [vmem:[#allocation42_spill] sm:$0xff]  ;;  %v3308_v19 = vmul.f32 %v7526_v40, %v8540_v32 }
 0x3c9   :  { %v3443_v37 = vadd.f32 %v3315_v24, %v2290_v57  ;;  %v10542_v24 = vld [vmem:[#allocation30_spill] sm:$0xff] }
 0x3ca   :  { %v1132_v57 = vmul.f32 %v7514_v34, %v10542_v24 }
 0x3cb   :  { %v3574_v41 = vadd.f32 %v8386_v58, %v3443_v37 }
 0x3cc   :  { %v6933_v56 = vpop.permute.xlu1 %6932  ;;  %v2285_v24 = vadd.f32 %v2157_v8, %v1132_v57  ;;  %v3319_v57 = vmul.f32 %v7526_v40, %v8561_v36 }
 0x3cd   :  { %v3830_v54 = vmul.f32 0.2, %v3574_v41  ;;  %v6934_v30 = vunpack.i.l.bf16 %v6933_v56  ;;  %vm3702_vm4 = vcmp.gt.f32.partialorder %v3574_v41, 0.0  ;;  %v6935_v17 = vunpack.i.h.bf16 %v6933_v56  ;;  %v8601_v56 = vpop.permute.xlu0 %2798  ;;  %v4850_v60 = vpop.f32.mrf.mxu1 }
 0x3cf   :  { %v4304_v42 = vsel %vm4276_vm3, %v8529_v23, %v6934_v30  ;;  %v3958_v7 = vsel %vm3702_vm4, %v3574_v41, %v3830_v54  ;;  %v2168_v23 = vmul.f32 %v7519_v51, %v1709_v31  ;;  %v1143_v41 = vmul.f32 %v7514_v34, %v10543_v10 }
 0x3d0   :  { %4658 = vmatmul.f32.gmra.mxu0 %v4304_v42  ;;  %6751 = vmatmul.msk.f32.gmra.mxu1 %vm4276_vm3, %v8584_v29  ;;  %v6946_v15 = vpack.i.bf16 %v3960_v26, %v3958_v7  ;;  %v1696_v30 = vperm.slane %v8403_v33, 7  ;;  %v3310_v31 = vmul.f32 %v7526_v40, %v2785_v50  ;;  %v3321_v42 = vmul.f32 %v7526_v40, %v2862_v5  ;;  %v10545_v5 = vld [vmem:[#allocation39_spill] sm:$0xff] }
 0x3d1   :  { %v4305_v26 = vsel %vm4276_vm3, %v3947_v13, %v6935_v17 }
 0x3d2   :  { %6947 = vrot.lane.b32.xlu1 %v6946_v15, %s7099_s27  ;;  %v1660_v15 = vpop.permute.xlu2 %1659 }
 0x3d4   :  { %v1618_v45 = vpop.permute.xlu1 %1617 }
 0x3d5   :  { %v2155_v52 = vmul.f32 %v7519_v51, %v1618_v45  ;;  %v4641_v37 = vpop.f32.mrf.mxu0  ;;  %v2296_v45 = vadd.f32 %v2168_v23, %v1143_v41  ;;  %v8621_v23 = vld [vmem:[%s10439_s24 + $0xa8] ss:$2 sm:$0xff] }
 0x3d6   :  { %v4642_v54 = vadd.f32 %v8376_v0, %v4641_v37  ;;  %v3438_v37 = vadd.f32 %v3310_v31, %v2285_v24  ;;  %v1773_v8 = vperm.slane %v8621_v23, 2 }
 0x3d7   :  { %v2283_v7 = vadd.f32 %v2155_v52, %v1130_v46  ;;  %v3449_v61 = vadd.f32 %v3321_v42, %v2296_v45  ;;  %v1141_v46 = vmul.f32 %v7514_v34, %v10545_v5 }
 0x3d8   :  { %v4851_v6 = vadd.f32 %v4850_v60, %v4642_v54  ;;  %4661 = vmatmul.f32.gmra.mxu0 %v4305_v26  ;;  %v3569_v52 = vadd.f32 %v8386_v58, %v3438_v37 }
 0x3d9   :  { %v3436_v32 = vadd.f32 %v3308_v19, %v2283_v7  ;;  %v3580_v41 = vadd.f32 %v8386_v58, %v3449_v61 }
 0x3da   :  { %1701 = vperm.xlu1 %6864, %v1696_v30   ;;  %vm5000_vm5 = vcmp.gt.f32.partialorder %v4851_v6, 0.0  ;;  %v5064_v10 = vmul.f32 0.2, %v4851_v6  ;;  %v2876_v30 = vpop.permute.xlu0 %2875  ;;  %v2813_v42 = vpop.permute.xlu2 %2812  ;;  %v3825_v7 = vmul.f32 0.2, %v3569_v52  ;;  %vm3697_vm8 = vcmp.gt.f32.partialorder %v3569_v52, 0.0 }
 0x3db   :  { %v3567_v33 = vadd.f32 %v8386_v58, %v3436_v32  ;;  %v3836_v36 = vmul.f32 0.2, %v3580_v41  ;;  %vm3708_vm7 = vcmp.gt.f32.partialorder %v3580_v41, 0.0 }
 0x3dc   :  { %v1695_v50 = vpop.permute.xlu1 %1694  ;;  %v8609_v53 = vsel %vm5000_vm5, %v4851_v6, %v5064_v10  ;;  %v8630_v24 = vsel %vm3697_vm8, %v3569_v52, %v3825_v7  ;;  %v10547_v52 = vld [vmem:[#allocation24_spill] sm:$0xff]  ;;  %v3314_v7 = vmul.f32 %v7526_v40, %v2813_v42 }
 0x3dd   :  { %10544 = vst [vmem:[#allocation11_spill] sm:$0xff] %v8609_v53  ;;  %v2166_v13 = vmul.f32 %v7519_v51, %v1695_v50  ;;  %6799 = vmatmul.msk.f32.gmra.mxu3 %vm4276_vm3, %v8609_v53  ;;  %vm3695_vm6 = vcmp.gt.f32.partialorder %v3567_v33, 0.0  ;;  %v3823_v17 = vmul.f32 0.2, %v3567_v33  ;;  %v3964_v10 = vsel %vm3708_vm7, %v3580_v41, %v3836_v36 }
 0x3de   :  { %v1136_v41 = vmul.f32 %v7514_v34, %v10547_v52  ;;  %v3312_v36 = vmul.f32 %v7526_v40, %v8601_v56  ;;  %v10549_v56 = vld [vmem:[#allocation35_spill] sm:$0xff] }
 0x3df   :  { %v2294_v19 = vadd.f32 %v2166_v13, %v1141_v46  ;;  %v3951_v54 = vsel %vm3695_vm6, %v3567_v33, %v3823_v17  ;;  %v10546_v13 = vld [vmem:[#allocation34_spill] sm:$0xff] }
 0x3e0   :  { %6752 = vmatmul.msk.f32.gmra.mxu1 %vm4276_vm3, %v3951_v54  ;;  %v1134_v17 = vmul.f32 %v7514_v34, %v10546_v13  ;;  %v1145_v13 = vmul.f32 %v7514_v34, %v10549_v56 }
 0x3e1   :  { %v3447_v31 = vadd.f32 %v3319_v57, %v2294_v19  ;;  %v2161_v57 = vmul.f32 %v7519_v51, %v1660_v15  ;;  %v10548_v19 = vld [vmem:[#allocation44_spill] sm:$0xff] }
 0x3e2   :  { %1778 = vperm.xlu1 %6864, %v1773_v8   ;;  %v1737_v33 = vpop.permute.xlu0 %1736  ;;  %v2890_v5 = vpop.permute.xlu2 %2889 }
 0x3e3   :  { %v3578_v60 = vadd.f32 %v8386_v58, %v3447_v31  ;;  %v1147_v31 = vmul.f32 %v7514_v34, %v10548_v19 }
 0x3e4   :  { %v6938_v26 = vpop.permute.xlu1 %6937 }
 0x3e5   :  { %v3834_v6 = vmul.f32 0.2, %v3578_v60  ;;  %v6939_v45 = vunpack.i.l.bf16 %v6938_v26  ;;  %vm3706_vm9 = vcmp.gt.f32.partialorder %v3578_v60, 0.0  ;;  %v6940_v50 = vunpack.i.h.bf16 %v6938_v26 }
 0x3e6   :  { %v3325_v26 = vmul.f32 %v7526_v40, %v2890_v5 }
 0x3e7   :  { %v4306_v61 = vsel %vm4276_vm3, %v8584_v29, %v6939_v45  ;;  %v3962_v32 = vsel %vm3706_vm9, %v3578_v60, %v3834_v6  ;;  %v2172_v29 = vmul.f32 %v7519_v51, %v1737_v33  ;;  %v1724_v60 = vperm.slane %v8472_v63, 3 }
 0x3e8   :  { %4664 = vmatmul.f32.gmra.mxu0 %v4306_v61  ;;  %6753 = vmatmul.msk.f32.gmra.mxu1 %vm4276_vm3, %v8630_v24  ;;  %v6951_v37 = vpack.i.bf16 %v3964_v10, %v3962_v32  ;;  %v4307_v15 = vsel %vm4276_vm3, %v3951_v54, %v6940_v50  ;;  %v2289_v61 = vadd.f32 %v2161_v57, %v1136_v41  ;;  %v1801_v54 = vperm.slane %v8621_v23, 6 }
 0x3e9   :  { %v2300_v45 = vadd.f32 %v2172_v29, %v1147_v31 }
 0x3ea   :  { %6952 = vrot.lane.b32.xlu1 %v6951_v37, %s7099_s27  ;;  %v3442_v10 = vadd.f32 %v3314_v7, %v2289_v61  ;;  %v2827_v61 = vpop.permute.xlu0 %2826 }
 0x3eb   :  { %v3453_v37 = vadd.f32 %v3325_v26, %v2300_v45 }
 0x3ec   :  { %v1646_v46 = vpop.permute.xlu1 %1645  ;;  %v3573_v50 = vadd.f32 %v8386_v58, %v3442_v10  ;;  %v8674_v10 = vpop.f32.mrf.mxu1 }
 0x3ed   :  { %v2159_v8 = vmul.f32 %v7519_v51, %v1646_v46  ;;  %v3584_v29 = vadd.f32 %v8386_v58, %v3453_v37  ;;  %10551 = vst [vmem:[#allocation10_spill] sm:$0xff] %v8674_v10  ;;  %v1688_v37 = vpop.permute.xlu2 %1687 }
 0x3ee   :  { %v3829_v31 = vmul.f32 0.2, %v3573_v50  ;;  %vm3701_vm13 = vcmp.gt.f32.partialorder %v3573_v50, 0.0 }
 0x3ef   :  { %v2287_v6 = vadd.f32 %v2159_v8, %v1134_v17  ;;  %v3323_v17 = vmul.f32 %v7526_v40, %v2876_v30  ;;  %v3840_v41 = vmul.f32 0.2, %v3584_v29  ;;  %vm3712_vm12 = vcmp.gt.f32.partialorder %v3584_v29, 0.0 }
 0x3f0   :  { %4667 = vmatmul.f32.gmra.mxu0 %v4307_v15  ;;  %v8660_v30 = vsel %vm3701_vm13, %v3573_v50, %v3829_v31  ;;  %v8669_v15 = vld [vmem:[%s10439_s24 + $0xb8] ss:$2 sm:$0xff] }
 0x3f1   :  { %v3440_v32 = vadd.f32 %v3312_v36, %v2287_v6  ;;  %v3968_v7 = vsel %vm3712_vm12, %v3584_v29, %v3840_v41  ;;  %v1752_v6 = vperm.slane %v8472_v63, 7  ;;  %v1829_v45 = vperm.slane %v8669_v15, 2 }
 0x3f2   :  { %1729 = vperm.xlu1 %6864, %v1724_v60  }
 0x3f3   :  { %v3571_v33 = vadd.f32 %v8386_v58, %v3440_v32  ;;  %v8672_v32 = vpop.f32.mrf.mxu0 }
 0x3f4   :  { %v1723_v46 = vpop.permute.xlu1 %1722  ;;  %10550 = vst [vmem:[#allocation22_spill] sm:$0xff] %v8672_v32  ;;  %v4856_v63 = vpop.f32.mrf.mxu1 }
 0x3f5   :  { %v2170_v42 = vmul.f32 %v7519_v51, %v1723_v46  ;;  %vm3699_vm11 = vcmp.gt.f32.partialorder %v3571_v33, 0.0  ;;  %v3827_v5 = vmul.f32 0.2, %v3571_v33 }
 0x3f7   :  { %v2298_v57 = vadd.f32 %v2170_v42, %v1145_v13  ;;  %v3955_v8 = vsel %vm3699_vm11, %v3571_v33, %v3827_v5  ;;  %v2904_v33 = vpop.permute.xlu0 %2903 }
 0x3f8   :  { %6754 = vmatmul.msk.f32.gmra.mxu1 %vm4276_vm3, %v3955_v8 }
 0x3f9   :  { %v3451_v52 = vadd.f32 %v3323_v17, %v2298_v57  ;;  %v2841_v17 = vpop.permute.xlu2 %2840 }
 0x3fa   :  { %1806 = vperm.xlu1 %6864, %v1801_v54  }
 0x3fb   :  { %v3582_v19 = vadd.f32 %v8386_v58, %v3451_v52 }
 0x3fc   :  { %v8687_v31 = vpop.f32.mrf.mxu1 }
 0x3fd   :  { %v3838_v36 = vmul.f32 0.2, %v3582_v19  ;;  %vm3710_vm14 = vcmp.gt.f32.partialorder %v3582_v19, 0.0  ;;  %10554 = vst [vmem:[#allocation17_spill] sm:$0xff] %v8687_v31 }
 0x3ff   :  { %v3966_v60 = vsel %vm3710_vm14, %v3582_v19, %v3838_v36  ;;  %v1765_v54 = vpop.permute.xlu0 %1764 }
 0x400   :  { %6755 = vmatmul.msk.f32.gmra.mxu1 %vm4276_vm3, %v8660_v30  ;;  %v6956_v26 = vpack.i.bf16 %v3968_v7, %v3966_v60  ;;  %v10555_v7 = vld [vmem:[#allocation36_spill] sm:$0xff] }
 0x401   :  { %v2918_v57 = vpop.permute.xlu2 %2917 }
 0x402   :  { %6957 = vrot.lane.b32.xlu1 %v6956_v26, %s7099_s27  ;;  %v1138_v26 = vmul.f32 %v7514_v34, %v10555_v7 }
 0x407   :  { %v8685_v19 = vpop.permute.xlu0 %2854 }
 0x40a   :  { %1757 = vperm.xlu1 %6864, %v1752_v6   ;;  %v2176_v6 = vmul.f32 %v7519_v51, %v1765_v54 }
 0x412   :  { %1834 = vperm.xlu1 %6864, %v1829_v45   ;;  %v2165_v45 = vmul.f32 %v7519_v51, %v1688_v37 }
 0x41a   :  { %v4647_v46 = vpop.f32.mrf.mxu0 }
 0x41b   :  { %v4648_v56 = vadd.f32 %v8376_v0, %v4647_v46 }
 0x41d   :  { %v4857_v13 = vadd.f32 %v4856_v63, %v4648_v56  ;;  %v10556_v56 = vld [vmem:[#allocation43_spill] sm:$0xff]  ;;  %v10557_v63 = vld [vmem:[#allocation40_spill] sm:$0xff] }
 0x41f   :  { %vm5002_vm15 = vcmp.gt.f32.partialorder %v4857_v13, 0.0  ;;  %v5066_v42 = vmul.f32 0.2, %v4857_v13 }
 0x421   :  { %v8677_v5 = vsel %vm5002_vm15, %v4857_v13, %v5066_v42  ;;  %v1140_v13 = vmul.f32 %v7514_v34, %v10557_v63  ;;  %v3316_v42 = vmul.f32 %v7526_v40, %v2827_v61 }
 0x422   :  { %10552 = vst [vmem:[#allocation13_spill] sm:$0xff] %v8677_v5  ;;  %6800 = vmatmul.msk.f32.gmra.mxu3 %vm4276_vm3, %v8677_v5  ;;  %v8683_v41 = vpop.f32.mrf.mxu0 }
 0x423   :  { %10553 = vst [vmem:[#allocation15_spill] sm:$0xff] %v8683_v41  ;;  %v2293_v5 = vadd.f32 %v2165_v45, %v1140_v13  ;;  %v8703_v41 = vpop.permute.xlu0 %2931  ;;  %v3327_v45 = vmul.f32 %v7526_v40, %v2904_v33 }
 0x429   :  { %v6943_v50 = vpop.permute.xlu1 %6942 }
 0x42a   :  { %v6944_v29 = vunpack.i.l.bf16 %v6943_v50  ;;  %v6945_v36 = vunpack.i.h.bf16 %v6943_v50  ;;  %v3318_v50 = vmul.f32 %v7526_v40, %v2841_v17  ;;  %v4862_v31 = vpop.f32.mrf.mxu1 }
 0x42c   :  { %v4308_v52 = vsel %vm4276_vm3, %v8630_v24, %v6944_v29  ;;  %v1151_v24 = vmul.f32 %v7514_v34, %v10556_v56  ;;  %v3329_v29 = vmul.f32 %v7526_v40, %v2918_v57  ;;  %v4309_v7 = vsel %vm4276_vm3, %v3955_v8, %v6945_v36  ;;  %v10558_v57 = vld [vmem:[#allocation48_spill] sm:$0xff] }
 0x42d   :  { %4670 = vmatmul.f32.gmra.mxu0 %v4308_v52  ;;  %v3446_v63 = vadd.f32 %v3318_v50, %v2293_v5 }
 0x42e   :  { %v2304_v37 = vadd.f32 %v2176_v6, %v1151_v24 }
 0x430   :  { %v3457_v61 = vadd.f32 %v3329_v29, %v2304_v37 }
 0x431   :  { %v1674_v60 = vpop.permute.xlu1 %1673 }
 0x432   :  { %v2163_v46 = vmul.f32 %v7519_v51, %v1674_v60  ;;  %v1716_v60 = vpop.permute.xlu2 %1715  ;;  %v3588_v5 = vadd.f32 %v8386_v58, %v3457_v61 }
 0x434   :  { %v2291_v52 = vadd.f32 %v2163_v46, %v1138_v26  ;;  %v1149_v26 = vmul.f32 %v7514_v34, %v10558_v57  ;;  %v3577_v46 = vadd.f32 %v8386_v58, %v3446_v63  ;;  %vm3716_vm2 = vcmp.gt.f32.partialorder %v3588_v5, 0.0  ;;  %v8724_v57 = vpop.f32.mrf.mxu1 }
 0x435   :  { %4673 = vmatmul.f32.gmra.mxu0 %v4309_v7  ;;  %v4653_v54 = vpop.f32.mrf.mxu0  ;;  %10561 = vst [vmem:[#allocation19_spill] sm:$0xff] %v8724_v57 }
 0x436   :  { %v3444_v53 = vadd.f32 %v3316_v42, %v2291_v52  ;;  %v4654_v56 = vadd.f32 %v8376_v0, %v4653_v54  ;;  %v3844_v42 = vmul.f32 0.2, %v3588_v5  ;;  %v3833_v33 = vmul.f32 0.2, %v3577_v46  ;;  %v1793_v52 = vpop.permute.xlu0 %1792 }
 0x437   :  { %vm3705_vm4 = vcmp.gt.f32.partialorder %v3577_v46, 0.0 }
 0x438   :  { %v3575_v17 = vadd.f32 %v8386_v58, %v3444_v53  ;;  %v4863_v10 = vadd.f32 %v4862_v31, %v4654_v56  ;;  %v8718_v37 = vsel %vm3705_vm4, %v3577_v46, %v3833_v33  ;;  %v10564_v33 = vld [vmem:[#allocation54_spill] sm:$0xff] }
 0x439   :  { %v1751_v8 = vpop.permute.xlu1 %1750 }
 0x43a   :  { %v2174_v36 = vmul.f32 %v7519_v51, %v1751_v8  ;;  %vm3703_vm0 = vcmp.gt.f32.partialorder %v3575_v17, 0.0  ;;  %v3831_v6 = vmul.f32 0.2, %v3575_v17  ;;  %vm5004_vm1 = vcmp.gt.f32.partialorder %v4863_v10, 0.0  ;;  %v2869_v50 = vpop.permute.xlu2 %2868 }
 0x43b   :  { %v5068_v0 = vmul.f32 0.2, %v4863_v10 }
 0x43c   :  { %v2302_v24 = vadd.f32 %v2174_v36, %v1149_v26  ;;  %v3959_v13 = vsel %vm3703_vm0, %v3575_v17, %v3831_v6  ;;  %v1780_v36 = vperm.slane %v8621_v23, 3  ;;  %v3320_v23 = vmul.f32 %v7526_v40, %v8685_v19 }
 0x43d   :  { %6756 = vmatmul.msk.f32.gmra.mxu1 %vm4276_vm3, %v3959_v13  ;;  %v8713_v53 = vsel %vm5004_vm1, %v4863_v10, %v5068_v0  ;;  %v3972_v10 = vsel %vm3716_vm2, %v3588_v5, %v3844_v42  ;;  %v8720_v63 = vpop.f32.mrf.mxu0  ;;  %v10562_v0 = vld [vmem:[#allocation32_spill] sm:$0xff]  ;;  %v2180_v5 = vmul.f32 %v7519_v51, %v1793_v52 }
 0x43e   :  { %10559 = vst [vmem:[#allocation26_spill] sm:$0xff] %v8713_v53  ;;  %v3455_v31 = vadd.f32 %v3327_v45, %v2302_v24  ;;  %6801 = vmatmul.msk.f32.gmra.mxu3 %vm4276_vm3, %v8713_v53  ;;  %v8730_v6 = vpop.permute.xlu0 %2882  ;;  %v1142_v46 = vmul.f32 %v7514_v34, %v10562_v0  ;;  %v2169_v24 = vmul.f32 %v7519_v51, %v1716_v60 }
 0x43f   :  { %10560 = vst [vmem:[#allocation8_spill] sm:$0xff] %v8720_v63  ;;  %v3322_v60 = vmul.f32 %v7526_v40, %v2869_v50  ;;  %v8755_v50 = vld [vmem:[%s10499_s3] ss:$0 sm:$0xff] }
 0x440   :  { %v3586_v29 = vadd.f32 %v8386_v58, %v3455_v31 }
 0x442   :  { %v3842_v7 = vmul.f32 0.2, %v3586_v29  ;;  %vm3714_vm5 = vcmp.gt.f32.partialorder %v3586_v29, 0.0  ;;  %v2946_v26 = vpop.permute.xlu2 %2945 }
 0x444   :  { %v6948_v54 = vpop.permute.xlu1 %6947  ;;  %v3970_v56 = vsel %vm3714_vm5, %v3586_v29, %v3842_v7  ;;  %v10563_v29 = vld [vmem:[#allocation41_spill] sm:$0xff]  ;;  %v1155_v7 = vmul.f32 %v7514_v34, %v10564_v33 }
 0x445   :  { %v6949_v61 = vunpack.i.l.bf16 %v6948_v54  ;;  %6757 = vmatmul.msk.f32.gmra.mxu1 %vm4276_vm3, %v8718_v37  ;;  %v6961_v17 = vpack.i.bf16 %v3972_v10, %v3970_v56  ;;  %v6950_v8 = vunpack.i.h.bf16 %v6948_v54  ;;  %v8746_v54 = vld [vmem:[%s10503_s4] ss:$0 sm:$0xff]  ;;  %v3333_v56 = vmul.f32 %v7526_v40, %v2946_v26  ;;  %v4868_v10 = vpop.f32.mrf.mxu1 }
 0x447   :  { %6962 = vrot.lane.b32.xlu1 %v6961_v17, %s7099_s27  ;;  %v4310_v58 = vsel %vm4276_vm3, %v8660_v30, %v6949_v61  ;;  %v1144_v30 = vmul.f32 %v7514_v34, %v10563_v29  ;;  %v4311_v17 = vsel %vm4276_vm3, %v3959_v13, %v6950_v8  ;;  %v8761_v13 = vld [vmem:[%s10439_s24 + $0xb7] ss:$2 sm:$0xff] }
 0x448   :  { %4676 = vmatmul.f32.gmra.mxu0 %v4310_v58  ;;  %v832_v8 = vperm.slane %v8761_v13, 6 }
 0x449   :  { %v2297_v19 = vadd.f32 %v2169_v24, %v1144_v30  ;;  %v10566_v24 = vld [vmem:[#allocation50_spill] sm:$0xff] }
 0x44b   :  { %v3450_v33 = vadd.f32 %v3322_v60, %v2297_v19 }
 0x44c   :  { %v1702_v45 = vpop.permute.xlu1 %1701 }
 0x44d   :  { %v2167_v31 = vmul.f32 %v7519_v51, %v1702_v45  ;;  %v4659_v42 = vpop.f32.mrf.mxu0  ;;  %v2308_v45 = vadd.f32 %v2180_v5, %v1155_v7  ;;  %v3331_v7 = vmul.f32 %v7526_v40, %v8703_v41 }
 0x44e   :  { %v4660_v52 = vadd.f32 %v8746_v54, %v4659_v42 }
 0x44f   :  { %v2295_v61 = vadd.f32 %v2167_v31, %v1142_v46  ;;  %1785 = vperm.xlu1 %6864, %v1780_v36   ;;  %v3461_v53 = vadd.f32 %v3333_v56, %v2308_v45  ;;  %v1744_v36 = vpop.permute.xlu2 %1743  ;;  %v1153_v31 = vmul.f32 %v7514_v34, %v10566_v24  ;;  %v8782_v45 = vld [vmem:[%s10439_s24 + $0xb9] ss:$2 sm:$0xff] }
 0x450   :  { %v4869_v58 = vadd.f32 %v4868_v10, %v4660_v52  ;;  %4679 = vmatmul.f32.gmra.mxu0 %v4311_v17  ;;  %v3581_v52 = vadd.f32 %v8755_v50, %v3450_v33  ;;  %v3010_v41 = vperm.slane %v8782_v45, 6 }
 0x451   :  { %v3448_v0 = vadd.f32 %v3320_v23, %v2295_v61  ;;  %v8773_v23 = vpop.permute.xlu0 %2959  ;;  %v3592_v60 = vadd.f32 %v8755_v50, %v3461_v53 }
 0x452   :  { %vm5006_vm6 = vcmp.gt.f32.partialorder %v4869_v58, 0.0  ;;  %v5070_v29 = vmul.f32 0.2, %v4869_v58  ;;  %v3837_v19 = vmul.f32 0.2, %v3581_v52  ;;  %vm3709_vm9 = vcmp.gt.f32.partialorder %v3581_v52, 0.0 }
 0x453   :  { %v3579_v26 = vadd.f32 %v8755_v50, %v3448_v0  ;;  %v3848_v17 = vmul.f32 0.2, %v3592_v60  ;;  %vm3720_vm8 = vcmp.gt.f32.partialorder %v3592_v60, 0.0 }
 0x454   :  { %v1779_v46 = vpop.permute.xlu1 %1778  ;;  %v8764_v5 = vsel %vm5006_vm6, %v4869_v58, %v5070_v29  ;;  %v8791_v24 = vsel %vm3709_vm9, %v3581_v52, %v3837_v19 }
 0x455   :  { %10565 = vst [vmem:[#allocation31_spill] sm:$0xff] %v8764_v5  ;;  %v2178_v42 = vmul.f32 %v7519_v51, %v1779_v46  ;;  %6802 = vmatmul.msk.f32.gmra.mxu3 %vm4276_vm3, %v8764_v5  ;;  %vm3707_vm7 = vcmp.gt.f32.partialorder %v3579_v26, 0.0  ;;  %v3835_v30 = vmul.f32 0.2, %v3579_v26  ;;  %v8785_v29 = vpop.f32.mrf.mxu0 }
 0x456   :  { %10567 = vst [vmem:[#allocation27_spill] sm:$0xff] %v8785_v29 }
 0x457   :  { %v2306_v56 = vadd.f32 %v2178_v42, %v1153_v31  ;;  %837 = vperm.xlu1 %6864, %v832_v8   ;;  %v3963_v10 = vsel %vm3707_vm7, %v3579_v26, %v3835_v30  ;;  %v2897_v26 = vpop.permute.xlu2 %2896  ;;  %v8787_v8 = vpop.f32.mrf.mxu1  ;;  %v3976_v42 = vsel %vm3720_vm8, %v3592_v60, %v3848_v17  ;;  %v2173_v17 = vmul.f32 %v7519_v51, %v1744_v36 }
 0x458   :  { %6758 = vmatmul.msk.f32.gmra.mxu1 %vm4276_vm3, %v3963_v10  ;;  %10568 = vst [vmem:[#allocation23_spill] sm:$0xff] %v8787_v8  ;;  %v3326_v36 = vmul.f32 %v7526_v40, %v2897_v26  ;;  %v8824_v26 = vld [vmem:[%s10439_s24 + $0xc9] ss:$2 sm:$0xff] }
 0x459   :  { %v3459_v61 = vadd.f32 %v3331_v7, %v2306_v56  ;;  %v1821_v30 = vpop.permute.xlu0 %1820 }
 0x45a   :  { %v2184_v29 = vmul.f32 %v7519_v51, %v1821_v30 }
 0x45b   :  { %v3590_v58 = vadd.f32 %v8755_v50, %v3459_v61  ;;  %v8799_v61 = vld [vmem:[%s10439_s24 + $0xc7] ss:$2 sm:$0xff] }
 0x45c   :  { %v6953_v0 = vpop.permute.xlu1 %6952 }
 0x45d   :  { %v3846_v53 = vmul.f32 0.2, %v3590_v58  ;;  %v6954_v33 = vunpack.i.l.bf16 %v6953_v0  ;;  %vm3718_vm11 = vcmp.gt.f32.partialorder %v3590_v58, 0.0  ;;  %v6955_v56 = vunpack.i.h.bf16 %v6953_v0 }
 0x45f   :  { %3015 = vperm.xlu1 %6864, %v3010_v41   ;;  %v4312_v46 = vsel %vm4276_vm3, %v8718_v37, %v6954_v33  ;;  %v3974_v31 = vsel %vm3718_vm11, %v3590_v58, %v3846_v53  ;;  %v846_v37 = vperm.slane %v8799_v61, 0  ;;  %v10569_v41 = vld [vmem:[#allocation45_spill] sm:$0xff]  ;;  %v10570_v53 = vld [vmem:[#allocation38_spill] sm:$0xff] }
 0x460   :  { %4682 = vmatmul.f32.gmra.mxu0 %v4312_v46  ;;  %6759 = vmatmul.msk.f32.gmra.mxu1 %vm4276_vm3, %v8791_v24  ;;  %v6966_v7 = vpack.i.bf16 %v3976_v42, %v3974_v31  ;;  %v1146_v60 = vmul.f32 %v7514_v34, %v10569_v41  ;;  %v1148_v33 = vmul.f32 %v7514_v34, %v10570_v53  ;;  %v8812_v46 = vld [vmem:[%s10439_s24 + $0xc8] ss:$2 sm:$0xff]  ;;  %v2974_v53 = vpop.permute.xlu2 %2973 }
 0x461   :  { %v1871_v31 = vperm.slane %v8812_v46, 0  ;;  %v3324_v42 = vmul.f32 %v7526_v40, %v8730_v6  ;;  %v4313_v41 = vsel %vm4276_vm3, %v3963_v10, %v6955_v56  ;;  %v2911_v57 = vpop.permute.xlu0 %2910  ;;  %v3024_v10 = vperm.slane %v8824_v26, 0  ;;  %v10571_v56 = vld [vmem:[#allocation55_spill] sm:$0xff] }
 0x462   :  { %6967 = vrot.lane.b32.xlu2 %v6966_v7, %s7099_s27  ;;  %v4874_v7 = vpop.f32.mrf.mxu1 }
 0x464   :  { %v1730_v52 = vpop.permute.xlu1 %1729 }
 0x465   :  { %v2171_v58 = vmul.f32 %v7519_v51, %v1730_v52  ;;  %v4665_v19 = vpop.f32.mrf.mxu0 }
 0x466   :  { %v4666_v0 = vadd.f32 %v8746_v54, %v4665_v19  ;;  %v2301_v19 = vadd.f32 %v2173_v17, %v1148_v33 }
 0x467   :  { %v2299_v52 = vadd.f32 %v2171_v58, %v1146_v60  ;;  %851 = vperm.xlu1 %6864, %v846_v37   ;;  %v1159_v37 = vmul.f32 %v7514_v34, %v10571_v56  ;;  %v3337_v60 = vmul.f32 %v7526_v40, %v2974_v53  ;;  %v10573_v58 = vld [vmem:[#allocation49_spill] sm:$0xff]  ;;  %v1885_v56 = vperm.slane %v8812_v46, 2 }
 0x468   :  { %v4875_v5 = vadd.f32 %v4874_v7, %v4666_v0  ;;  %4685 = vmatmul.f32.gmra.mxu0 %v4313_v41  ;;  %v3454_v32 = vadd.f32 %v3326_v36, %v2301_v19  ;;  %v1157_v33 = vmul.f32 %v7514_v34, %v10573_v58  ;;  %v1772_v19 = vpop.permute.xlu2 %1771 }
 0x469   :  { %v3452_v8 = vadd.f32 %v3324_v42, %v2299_v52  ;;  %v7091_v42 = vld [vmem:[%s10439_s24 + $0xa9] ss:$2 sm:$0xff] }
 0x46a   :  { %1876 = vperm.xlu2 %6865, %v1871_v31   ;;  %vm5008_vm12 = vcmp.gt.f32.partialorder %v4875_v5, 0.0  ;;  %v5072_v63 = vmul.f32 0.2, %v4875_v5  ;;  %v2312_v31 = vadd.f32 %v2184_v29, %v1159_v37  ;;  %v2961_v36 = vperm.slane %v7091_v42, 7 }
 0x46b   :  { %v3583_v6 = vadd.f32 %v8755_v50, %v3452_v8 }
 0x46c   :  { %v1807_v30 = vpop.permute.xlu1 %1806  ;;  %v8830_v17 = vsel %vm5008_vm12, %v4875_v5, %v5072_v63  ;;  %v3335_v63 = vmul.f32 %v7526_v40, %v8773_v23  ;;  %v3585_v5 = vadd.f32 %v8755_v50, %v3454_v32  ;;  %v3465_v41 = vadd.f32 %v3337_v60, %v2312_v31 }
 0x46d   :  { %10572 = vst [vmem:[#allocation12_spill] sm:$0xff] %v8830_v17  ;;  %v2182_v8 = vmul.f32 %v7519_v51, %v1807_v30  ;;  %6803 = vmatmul.msk.f32.gmra.mxu3 %vm4276_vm3, %v8830_v17  ;;  %vm3711_vm13 = vcmp.gt.f32.partialorder %v3583_v6, 0.0  ;;  %v3839_v0 = vmul.f32 0.2, %v3583_v6  ;;  %v2988_v30 = vpop.permute.xlu0 %2987 }
 0x46e   :  { %v3841_v37 = vmul.f32 0.2, %v3585_v5  ;;  %v3596_v58 = vadd.f32 %v8755_v50, %v3465_v41  ;;  %vm3713_vm14 = vcmp.gt.f32.partialorder %v3585_v5, 0.0 }
 0x46f   :  { %v2310_v7 = vadd.f32 %v2182_v8, %v1157_v33  ;;  %3029 = vperm.xlu1 %6864, %v3024_v10   ;;  %v3967_v52 = vsel %vm3711_vm13, %v3583_v6, %v3839_v0  ;;  %v1822_v6 = vperm.slane %v8669_v15, 1 }
 0x470   :  { %6760 = vmatmul.msk.f32.gmra.mxu1 %vm4276_vm3, %v3967_v52  ;;  %v8850_v60 = vsel %vm3713_vm14, %v3585_v5, %v3841_v37  ;;  %v3852_v8 = vmul.f32 0.2, %v3596_v58  ;;  %vm3724_vm0 = vcmp.gt.f32.partialorder %v3596_v58, 0.0  ;;  %v2925_v42 = vpop.permute.xlu2 %2924 }
 0x471   :  { %v3463_v53 = vadd.f32 %v3335_v63, %v2310_v7  ;;  %v10574_v7 = vld [vmem:[#allocation47_spill] sm:$0xff] }
 0x472   :  { %2966 = vperm.xlu2 %6865, %v2961_v36   ;;  %v3980_v63 = vsel %vm3724_vm0, %v3596_v58, %v3852_v8  ;;  %v1150_v41 = vmul.f32 %v7514_v34, %v10574_v7 }
 0x473   :  { %v3594_v29 = vadd.f32 %v8755_v50, %v3463_v53 }
 0x474   :  { %v6958_v23 = vpop.permute.xlu1 %6957 }
 0x475   :  { %v6959_v32 = vunpack.i.l.bf16 %v6958_v23  ;;  %v3850_v33 = vmul.f32 0.2, %v3594_v29  ;;  %vm3722_vm15 = vcmp.gt.f32.partialorder %v3594_v29, 0.0  ;;  %v6960_v31 = vunpack.i.h.bf16 %v6958_v23 }
 0x476   :  { %v3330_v23 = vmul.f32 %v7526_v40, %v2925_v42  ;;  %v1836_v42 = vperm.slane %v8669_v15, 3 }
 0x477   :  { %1890 = vperm.xlu1 %6864, %v1885_v56   ;;  %v4314_v10 = vsel %vm4276_vm3, %v8791_v24, %v6959_v32  ;;  %v3978_v0 = vsel %vm3722_vm15, %v3594_v29, %v3850_v33  ;;  %v2177_v24 = vmul.f32 %v7519_v51, %v1772_v19  ;;  %v10575_v56 = vld [vmem:[#allocation51_spill] sm:$0xff]  ;;  %v1849_v32 = vpop.permute.xlu0 %1848  ;;  %v3328_v29 = vmul.f32 %v7526_v40, %v2911_v57 }
 0x478   :  { %4688 = vmatmul.f32.gmra.mxu0 %v4314_v10  ;;  %6761 = vmatmul.msk.f32.gmra.mxu1 %vm4276_vm3, %v8850_v60  ;;  %v6971_v53 = vpack.i.bf16 %v3980_v63, %v3978_v0  ;;  %v1152_v37 = vmul.f32 %v7514_v34, %v10575_v56  ;;  %v2975_v10 = vperm.slane %v8782_v45, 1  ;;  %v4315_v58 = vsel %vm4276_vm3, %v3967_v52, %v6960_v31  ;;  %v10576_v31 = vld [vmem:[#allocation59_spill] sm:$0xff] }
 0x479   :  { %v2188_v56 = vmul.f32 %v7519_v51, %v1849_v32 }
 0x47a   :  { %1827 = vperm.xlu2 %6865, %v1822_v6   ;;  %v2305_v19 = vadd.f32 %v2177_v24, %v1152_v37  ;;  %v1161_v24 = vmul.f32 %v7514_v34, %v10576_v31  ;;  %v1850_v31 = vperm.slane %v8669_v15, 5 }
 0x47c   :  { %v1758_v36 = vpop.permute.xlu1 %1757  ;;  %v3458_v8 = vadd.f32 %v3330_v23, %v2305_v19  ;;  %v10577_v23 = vld [vmem:[#allocation57_spill] sm:$0xff] }
 0x47d   :  { %v2175_v5 = vmul.f32 %v7519_v51, %v1758_v36  ;;  %v1899_v36 = vperm.slane %v8812_v46, 4 }
 0x47f   :  { %v2303_v33 = vadd.f32 %v2175_v5, %v1150_v41  ;;  %6972 = vrot.lane.b32.xlu1 %v6971_v53, %s7099_s27  ;;  %v3589_v41 = vadd.f32 %v8755_v50, %v3458_v8  ;;  %v8874_v5 = vpop.permute.xlu0 %2938  ;;  %v3002_v53 = vpop.permute.xlu2 %3001 }
 0x480   :  { %4691 = vmatmul.f32.gmra.mxu0 %v4315_v58  ;;  %v3339_v58 = vmul.f32 %v7526_v40, %v2988_v30  ;;  %v3341_v19 = vmul.f32 %v7526_v40, %v3002_v53  ;;  %v825_v30 = vperm.slane %v8761_v13, 5 }
 0x481   :  { %v3456_v6 = vadd.f32 %v3328_v29, %v2303_v33  ;;  %v3845_v29 = vmul.f32 0.2, %v3589_v41  ;;  %v1163_v33 = vmul.f32 %v7514_v34, %v10577_v23  ;;  %vm3717_vm2 = vcmp.gt.f32.partialorder %v3589_v41, 0.0  ;;  %v8900_v23 = vpop.f32.mrf.mxu0 }
 0x482   :  { %2980 = vperm.xlu2 %6865, %v2975_v10   ;;  %v2989_v10 = vperm.slane %v8782_v45, 3  ;;  %10578 = vst [vmem:[#allocation33_spill] sm:$0xff] %v8900_v23 }
 0x483   :  { %v3587_v0 = vadd.f32 %v8755_v50, %v3456_v6  ;;  %v2316_v6 = vadd.f32 %v2188_v56, %v1163_v33  ;;  %v8903_v33 = vpop.f32.mrf.mxu1 }
 0x484   :  { %v1835_v63 = vpop.permute.xlu1 %1834  ;;  %10579 = vst [vmem:[#allocation21_spill] sm:$0xff] %v8903_v33 }
 0x485   :  { %vm3715_vm1 = vcmp.gt.f32.partialorder %v3587_v0, 0.0  ;;  %v3843_v7 = vmul.f32 0.2, %v3587_v0  ;;  %v2186_v57 = vmul.f32 %v7519_v51, %v1835_v63  ;;  %v3469_v32 = vadd.f32 %v3341_v19, %v2316_v6  ;;  %v8909_v6 = vld [vmem:[%s10439_s24 + $0xd9] ss:$2 sm:$0xff] }
 0x486   :  { %v839_v19 = vperm.slane %v8761_v13, 7 }
 0x487   :  { %1904 = vperm.xlu1 %6864, %v1899_v36   ;;  %v8870_v52 = vsel %vm3715_vm1, %v3587_v0, %v3843_v7  ;;  %v2314_v37 = vadd.f32 %v2186_v57, %v1161_v24  ;;  %v888_v0 = vperm.slane %v8799_v61, 6  ;;  %v8885_v36 = vsel %vm3717_vm2, %v3589_v41, %v3845_v29  ;;  %v1800_v63 = vpop.permute.xlu0 %1799  ;;  %v8898_v29 = vld [vmem:[%s10439_s24 + $0xd8] ss:$2 sm:$0xff] }
 0x488   :  { %6762 = vmatmul.msk.f32.gmra.mxu1 %vm4276_vm3, %v8870_v52  ;;  %v3600_v57 = vadd.f32 %v8755_v50, %v3469_v32  ;;  %v1927_v15 = vperm.slane %v8898_v29, 0  ;;  %v3080_v32 = vperm.slane %v8909_v6, 0 }
 0x489   :  { %v3467_v8 = vadd.f32 %v3339_v58, %v2314_v37 }
 0x48a   :  { %1841 = vperm.xlu2 %6865, %v1836_v42   ;;  %v3856_v24 = vmul.f32 0.2, %v3600_v57  ;;  %vm3728_vm5 = vcmp.gt.f32.partialorder %v3600_v57, 0.0 }
 0x48b   :  { %v3598_v7 = vadd.f32 %v8755_v50, %v3467_v8 }
 0x48c   :  { %v3984_v56 = vsel %vm3728_vm5, %v3600_v57, %v3856_v24  ;;  %v3017_v57 = vperm.slane %v8782_v45, 7  ;;  %v1941_v24 = vperm.slane %v8898_v29, 2 }
 0x48d   :  { %v3854_v42 = vmul.f32 0.2, %v3598_v7  ;;  %vm3726_vm4 = vcmp.gt.f32.partialorder %v3598_v7, 0.0 }
 0x48f   :  { %2994 = vperm.xlu1 %6864, %v2989_v10   ;;  %v3982_v41 = vsel %vm3726_vm4, %v3598_v7, %v3854_v42  ;;  %v2953_v53 = vpop.permute.xlu0 %2952  ;;  %v3003_v10 = vperm.slane %v8782_v45, 5  ;;  %v4880_v7 = vpop.f32.mrf.mxu1 }
 0x490   :  { %6763 = vmatmul.msk.f32.gmra.mxu1 %vm4276_vm3, %v8885_v36  ;;  %v6976_v37 = vpack.i.bf16 %v3984_v56, %v3982_v41  ;;  %v8921_v41 = vpop.permute.xlu2 %1862  ;;  %v853_v56 = vperm.slane %v8799_v61, 1 }
 0x492   :  { %893 = vperm.xlu2 %6865, %v888_v0  }
 0x497   :  { %830 = vperm.xlu1 %6864, %v825_v30   ;;  %v1814_v58 = vpop.permute.xlu0 %1813 }
 0x49a   :  { %1855 = vperm.xlu2 %6865, %v1850_v31  }
 0x49f   :  { %6977 = vrot.lane.b32.xlu1 %v6976_v37, %s7099_s27  ;;  %v8914_v13 = vpop.permute.xlu0 %865 }
 0x4a2   :  { %3008 = vperm.xlu2 %6865, %v3003_v10  }
 0x4a7   :  { %1932 = vperm.xlu1 %6864, %v1927_v15   ;;  %v8924_v45 = vpop.permute.xlu0 %3043  ;;  %v3094_v15 = vperm.slane %v8909_v6, 2 }
 0x4aa   :  { %v4671_v8 = vpop.f32.mrf.mxu0  ;;  %844 = vperm.xlu2 %6865, %v839_v19  }
 0x4ab   :  { %v4672_v0 = vadd.f32 %v8746_v54, %v4671_v8 }
 0x4ad   :  { %v4881_v30 = vadd.f32 %v4880_v7, %v4672_v0 }
 0x4af   :  { %3085 = vperm.xlu1 %6864, %v3080_v32   ;;  %vm5010_vm6 = vcmp.gt.f32.partialorder %v4881_v30, 0.0  ;;  %v5074_v42 = vmul.f32 0.2, %v4881_v30  ;;  %v8931_v32 = vpop.f32.mrf.mxu1 }
 0x4b0   :  { %10582 = vst [vmem:[#allocation28_spill] sm:$0xff] %v8931_v32 }
 0x4b1   :  { %v8916_v31 = vsel %vm5010_vm6, %v4881_v30, %v5074_v42 }
 0x4b2   :  { %10580 = vst [vmem:[#allocation25_spill] sm:$0xff] %v8916_v31  ;;  %6804 = vmatmul.msk.f32.gmra.mxu3 %vm4276_vm3, %v8916_v31  ;;  %3022 = vperm.xlu2 %6865, %v3017_v57   ;;  %v8929_v0 = vpop.f32.mrf.mxu0  ;;  %v10583_v57 = vld [vmem:[#allocation46_spill] sm:$0xff]  ;;  %v10584_v31 = vld [vmem:[#allocation53_spill] sm:$0xff] }
 0x4b3   :  { %10581 = vst [vmem:[#allocation29_spill] sm:$0xff] %v8929_v0  ;;  %v1154_v42 = vmul.f32 %v7514_v34, %v10583_v57  ;;  %v1156_v17 = vmul.f32 %v7514_v34, %v10584_v31 }
 0x4b7   :  { %1946 = vperm.xlu1 %6864, %v1941_v24   ;;  %v2181_v24 = vmul.f32 %v7519_v51, %v1800_v63 }
 0x4b9   :  { %v6963_v37 = vpop.permute.xlu1 %6962  ;;  %v2309_v33 = vadd.f32 %v2181_v24, %v1156_v17  ;;  %v10585_v17 = vld [vmem:[#allocation56_spill] sm:$0xff] }
 0x4ba   :  { %v6964_v10 = vunpack.i.l.bf16 %v6963_v37  ;;  %858 = vperm.xlu2 %6865, %v853_v56   ;;  %v6965_v7 = vunpack.i.h.bf16 %v6963_v37  ;;  %v3332_v37 = vmul.f32 %v7526_v40, %v8874_v5  ;;  %v4886_v0 = vpop.f32.mrf.mxu1  ;;  %v1158_v24 = vmul.f32 %v7514_v34, %v10585_v17 }
 0x4bc   :  { %v6968_v19 = vpop.permute.xlu2 %6967  ;;  %v4316_v8 = vsel %vm4276_vm3, %v8850_v60, %v6964_v10  ;;  %v8942_v60 = vld [vmem:[%s10439_s24 + $0xd7] ss:$2 sm:$0xff]  ;;  %v4317_v31 = vsel %vm4276_vm3, %v8870_v52, %v6965_v7  ;;  %v1892_v7 = vperm.slane %v8812_v46, 3 }
 0x4bd   :  { %4694 = vmatmul.f32.gmra.mxu0 %v4316_v8  ;;  %v930_v10 = vperm.slane %v8942_v60, 4  ;;  %v8948_v8 = vpop.permute.xlu0 %879  ;;  %v6969_v5 = vunpack.i.l.bf16 %v6968_v19 }
 0x4bf   :  { %3099 = vperm.xlu1 %6864, %v3094_v15   ;;  %v3334_v15 = vmul.f32 %v7526_v40, %v2953_v53 }
 0x4c1   :  { %v1786_v30 = vpop.permute.xlu1 %1785  ;;  %v3462_v55 = vadd.f32 %v3334_v15, %v2309_v33  ;;  %v4318_v33 = vsel %vm4276_vm3, %v8885_v36, %v6969_v5  ;;  %v6970_v36 = vunpack.i.h.bf16 %v6968_v19 }
 0x4c2   :  { %v2179_v56 = vmul.f32 %v7519_v51, %v1786_v30 }
 0x4c4   :  { %v2307_v63 = vadd.f32 %v2179_v56, %v1154_v42  ;;  %v8950_v57 = vpop.permute.xlu2 %1876  ;;  %v2183_v42 = vmul.f32 %v7519_v51, %v1814_v58 }
 0x4c5   :  { %4697 = vmatmul.f32.gmra.mxu0 %v4317_v31  ;;  %v4677_v30 = vpop.f32.mrf.mxu0  ;;  %v8967_v15 = vpop.permute.xlu0 %3057 }
 0x4c6   :  { %v3460_v23 = vadd.f32 %v3332_v37, %v2307_v63  ;;  %v4678_v32 = vadd.f32 %v8746_v54, %v4677_v30  ;;  %v3593_v37 = vadd.f32 %v8755_v50, %v3462_v55  ;;  %v944_v30 = vperm.slane %v8942_v60, 6 }
 0x4c7   :  { %935 = vperm.xlu1 %6864, %v930_v10  }
 0x4c8   :  { %v3591_v53 = vadd.f32 %v8755_v50, %v3460_v23  ;;  %v4887_v11 = vadd.f32 %v4886_v0, %v4678_v32  ;;  %v2311_v32 = vadd.f32 %v2183_v42, %v1158_v24  ;;  %v3849_v63 = vmul.f32 0.2, %v3593_v37 }
 0x4c9   :  { %v838_v1 = vpop.permute.xlu1 %837  ;;  %vm3721_vm9 = vcmp.gt.f32.partialorder %v3593_v37, 0.0  ;;  %v2190_v24 = vmul.f32 %v7519_v51, %v8921_v41 }
 0x4ca   :  { %vm3719_vm7 = vcmp.gt.f32.partialorder %v3591_v53, 0.0  ;;  %v3847_v56 = vmul.f32 0.2, %v3591_v53  ;;  %vm5012_vm8 = vcmp.gt.f32.partialorder %v4887_v11, 0.0  ;;  %v5076_v52 = vmul.f32 0.2, %v4887_v11 }
 0x4cc   :  { %v2967_v10 = vpop.permute.xlu2 %2966  ;;  %v3975_v23 = vsel %vm3719_vm7, %v3591_v53, %v3847_v56  ;;  %v8965_v58 = vsel %vm5012_vm8, %v4887_v11, %v5076_v52  ;;  %v8974_v56 = vsel %vm3721_vm9, %v3593_v37, %v3849_v63  ;;  %v8980_v52 = vpop.f32.mrf.mxu1 }
 0x4cd   :  { %v3336_v0 = vmul.f32 %v7526_v40, %v2967_v10  ;;  %4700 = vmatmul.f32.gmra.mxu0 %v4318_v33  ;;  %6764 = vmatmul.msk.f32.gmra.mxu1 %vm4276_vm3, %v3975_v23  ;;  %10586 = vst [vmem:[#allocation37_spill] sm:$0xff] %v8965_v58  ;;  %v4319_v11 = vsel %vm4276_vm3, %v3975_v23, %v6970_v36  ;;  %v8976_v42 = vpop.f32.mrf.mxu0  ;;  %v8983_v19 = vpop.permute.xlu0 %1918  ;;  %v10587_v23 = vld [vmem:[#allocation52_spill] sm:$0xff] }
 0x4ce   :  { %6805 = vmatmul.msk.f32.gmra.mxu3 %vm4276_vm3, %v8965_v58 }
 0x4cf   :  { %1897 = vperm.xlu1 %6864, %v1892_v7   ;;  %v3464_v55 = vadd.f32 %v3336_v0, %v2311_v32  ;;  %v1165_v7 = vmul.f32 %v7514_v34, %v838_v1  ;;  %v1160_v0 = vmul.f32 %v7514_v34, %v10587_v23 }
 0x4d1   :  { %v3016_v31 = vpop.permute.xlu1 %3015  ;;  %v3595_v5 = vadd.f32 %v8755_v50, %v3464_v55  ;;  %v2318_v32 = vadd.f32 %v2190_v24, %v1165_v7  ;;  %v1906_v55 = vperm.slane %v8812_v46, 5  ;;  %v2192_v7 = vmul.f32 %v7519_v51, %v8950_v57 }
 0x4d2   :  { %v3343_v37 = vmul.f32 %v7526_v40, %v3016_v31 }
 0x4d3   :  { %v3851_v17 = vmul.f32 0.2, %v3595_v5  ;;  %vm3723_vm11 = vcmp.gt.f32.partialorder %v3595_v5, 0.0 }
 0x4d4   :  { %v1828_v53 = vpop.permute.xlu2 %1827  ;;  %v3471_v36 = vadd.f32 %v3343_v37, %v2318_v32 }
 0x4d5   :  { %4703 = vmatmul.f32.gmra.mxu0 %v4319_v11  ;;  %6765 = vmatmul.msk.f32.gmra.mxu1 %vm4276_vm3, %v8974_v56  ;;  %v2185_v10 = vmul.f32 %v7519_v51, %v1828_v53  ;;  %v8992_v63 = vsel %vm3723_vm11, %v3595_v5, %v3851_v17  ;;  %v4892_v58 = vpop.f32.mrf.mxu1  ;;  %v4579_v17 = vadd.f32 %v8746_v54, %v7949_v62 }
 0x4d6   :  { %v3602_v24 = vadd.f32 %v8755_v50, %v3471_v36 }
 0x4d7   :  { %949 = vperm.xlu1 %6864, %v944_v30   ;;  %v2313_v30 = vadd.f32 %v2185_v10, %v1160_v0  ;;  %v9005_v0 = vpop.permute.xlu0 %3071  ;;  %v4788_v36 = vadd.f32 %v7952_v35, %v4579_v17 }
 0x4d8   :  { %vm3730_vm14 = vcmp.gt.f32.partialorder %v3602_v24, 0.0 }
 0x4d9   :  { %v852_v33 = vpop.permute.xlu1 %851  ;;  %vm4979_vm0 = vcmp.gt.f32.partialorder %v4788_v36, 0.0 }
 0x4da   :  { %v1167_v31 = vmul.f32 %v7514_v34, %v852_v33 }
 0x4dc   :  { %v2981_v1 = vpop.permute.xlu2 %2980  ;;  %v2320_v33 = vadd.f32 %v2192_v7, %v1167_v31 }
 0x4dd   :  { %v3338_v11 = vmul.f32 %v7526_v40, %v2981_v1  ;;  %6766 = vmatmul.msk.f32.gmra.mxu1 %vm4276_vm3, %v8992_v63  ;;  %v4683_v41 = vpop.f32.mrf.mxu0 }
 0x4de   :  { %v4684_v53 = vadd.f32 %v8746_v54, %v4683_v41  ;;  %v3858_v41 = vmul.f32 0.2, %v3602_v24 }
 0x4df   :  { %v3466_v23 = vadd.f32 %v3338_v11, %v2313_v30  ;;  %1911 = vperm.xlu1 %6864, %v1906_v55   ;;  %v3059_v55 = vperm.slane %v8824_v26, 5 }
 0x4e0   :  { %v4893_v5 = vadd.f32 %v4892_v58, %v4684_v53  ;;  %v3986_v7 = vsel %vm3730_vm14, %v3602_v24, %v3858_v41  ;;  %v9033_v24 = vld [vmem:[%s10439_s24 + $0xe9] ss:$2 sm:$0xff]  ;;  %v1169_v41 = vmul.f32 %v7514_v34, %v8914_v13 }
 0x4e1   :  { %v3597_v37 = vadd.f32 %v8755_v50, %v3466_v23  ;;  %v3030_v10 = vpop.permute.xlu1 %3029 }
 0x4e2   :  { %v3345_v32 = vmul.f32 %v7526_v40, %v3030_v10  ;;  %vm5014_vm12 = vcmp.gt.f32.partialorder %v4893_v5, 0.0  ;;  %v5078_v1 = vmul.f32 0.2, %v4893_v5  ;;  %v5043_v10 = vmul.f32 0.2, %v4788_v36 }
 0x4e3   :  { %vm3725_vm13 = vcmp.gt.f32.partialorder %v3597_v37, 0.0  ;;  %v3853_v57 = vmul.f32 0.2, %v3597_v37 }
 0x4e4   :  { %v3473_v58 = vadd.f32 %v3345_v32, %v2320_v33  ;;  %v1842_v30 = vpop.permute.xlu2 %1841  ;;  %v9009_v11 = vsel %vm5014_vm12, %v4893_v5, %v5078_v1  ;;  %v5107_v17 = vsel %vm4979_vm0, %v4788_v36, %v5043_v10  ;;  %v9026_v1 = vpop.f32.mrf.mxu1  ;;  %v3136_v36 = vperm.slane %v9033_v24, 0 }
 0x4e5   :  { %10588 = vst [vmem:[#allocation18_spill] sm:$0xff] %v9009_v11  ;;  %6806 = vmatmul.msk.f32.gmra.mxu3 %vm4276_vm3, %v9009_v11  ;;  %v9013_v62 = vsel %vm3725_vm13, %v3597_v37, %v3853_v57  ;;  %v9019_v37 = vpop.permute.xlu0 %907  ;;  %v9023_v35 = vpop.f32.mrf.mxu0  ;;  %v3347_v10 = vmul.f32 %v7526_v40, %v8924_v45  ;;  %v3349_v45 = vmul.f32 %v7526_v40, %v8967_v15  ;;  %v10591_v15 = vld [vmem:[#allocation58_spill] sm:$0xff] }
 0x4e6   :  { %v3604_v31 = vadd.f32 %v8755_v50, %v3473_v58  ;;  %6767 = vmatmul.msk.f32.gmra.mxu1 %vm4276_vm3, %v9013_v62  ;;  %10589 = vst [vmem:[#allocation30_spill] sm:$0xff] %v9023_v35  ;;  %v1955_v58 = vperm.slane %v8898_v29, 4 }
 0x4e7   :  { %3064 = vperm.xlu1 %6864, %v3059_v55   ;;  %10590 = vst [vmem:[#allocation42_spill] sm:$0xff] %v9026_v1 }
 0x4e8   :  { %vm3732_vm15 = vcmp.gt.f32.partialorder %v3604_v31, 0.0  ;;  %v3860_v53 = vmul.f32 0.2, %v3604_v31 }
 0x4e9   :  { %v1891_v23 = vpop.permute.xlu1 %1890 }
 0x4ea   :  { %v3988_v5 = vsel %vm3732_vm15, %v3604_v31, %v3860_v53  ;;  %v2194_v55 = vmul.f32 %v7519_v51, %v1891_v23 }
 0x4eb   :  { %v6981_v33 = vpack.i.bf16 %v3988_v5, %v3986_v7 }
 0x4ec   :  { %v9021_v32 = vpop.permute.xlu2 %893  ;;  %v2322_v53 = vadd.f32 %v2194_v55, %v1169_v41  ;;  %v3108_v41 = vperm.slane %v8909_v6, 4 }
 0x4ed   :  { %6982 = vrot.lane.b32.xlu2 %v6981_v33, %s7099_s27  ;;  %v9043_v33 = vpop.permute.xlu0 %1869  ;;  %v4898_v11 = vpop.f32.mrf.mxu1 }
 0x4ee   :  { %v3475_v13 = vadd.f32 %v3347_v10, %v2322_v53 }
 0x4ef   :  { %5203 = vrot.lane.b32.xlu1 %v5107_v17, %s7099_s27 }
 0x4f1   :  { %v6973_v57 = vpop.permute.xlu1 %6972 }
 0x4f2   :  { %v6974_v31 = vunpack.i.l.bf16 %v6973_v57  ;;  %v6975_v1 = vunpack.i.h.bf16 %v6973_v57 }
 0x4f4   :  { %v1856_v7 = vpop.permute.xlu2 %1855  ;;  %v4320_v5 = vsel %vm4276_vm3, %v8974_v56, %v6974_v31  ;;  %v1171_v56 = vmul.f32 %v7514_v34, %v8948_v8  ;;  %v2187_v8 = vmul.f32 %v7519_v51, %v1842_v30 }
 0x4f5   :  { %1960 = vperm.xlu2 %6865, %v1955_v58   ;;  %4706 = vmatmul.f32.gmra.mxu0 %v4320_v5  ;;  %v4689_v23 = vpop.f32.mrf.mxu0  ;;  %v909_v5 = vperm.slane %v8942_v60, 1 }
 0x4f6   :  { %v4690_v17 = vadd.f32 %v8746_v54, %v4689_v23 }
 0x4f7   :  { %3141 = vperm.xlu1 %6864, %v3136_v36   ;;  %v3606_v36 = vadd.f32 %v8755_v50, %v3475_v13  ;;  %v9063_v13 = vpop.permute.xlu0 %921 }
 0x4f8   :  { %v4899_v35 = vadd.f32 %v4898_v11, %v4690_v17  ;;  %v4321_v11 = vsel %vm4276_vm3, %v8992_v63, %v6975_v1  ;;  %v1162_v17 = vmul.f32 %v7514_v34, %v10591_v15 }
 0x4f9   :  { %v1905_v55 = vpop.permute.xlu1 %1904  ;;  %vm3734_vm2 = vcmp.gt.f32.partialorder %v3606_v36, 0.0 }
 0x4fa   :  { %v2196_v58 = vmul.f32 %v7519_v51, %v1905_v55  ;;  %vm5016_vm1 = vcmp.gt.f32.partialorder %v4899_v35, 0.0  ;;  %v5080_v31 = vmul.f32 0.2, %v4899_v35  ;;  %v3862_v55 = vmul.f32 0.2, %v3606_v36 }
 0x4fb   :  { %v2315_v1 = vadd.f32 %v2187_v8, %v1162_v17  ;;  %v2198_v8 = vmul.f32 %v7519_v51, %v8983_v19  ;;  %v9077_v17 = vld [vmem:[%s10439_s24 + $0xe8] ss:$2 sm:$0xff] }
 0x4fc   :  { %v2324_v53 = vadd.f32 %v2196_v58, %v1171_v56  ;;  %v3009_v57 = vpop.permute.xlu2 %3008  ;;  %v9056_v23 = vsel %vm5016_vm1, %v4899_v35, %v5080_v31  ;;  %v1969_v35 = vperm.slane %v8898_v29, 6  ;;  %v1983_v19 = vperm.slane %v9077_v17, 0 }
 0x4fd   :  { %3113 = vperm.xlu2 %6865, %v3108_v41   ;;  %4709 = vmatmul.f32.gmra.mxu0 %v4321_v11  ;;  %v1173_v11 = vmul.f32 %v7514_v34, %v9021_v32  ;;  %v2189_v32 = vmul.f32 %v7519_v51, %v1856_v7 }
 0x4fe   :  { %v3477_v10 = vadd.f32 %v3349_v45, %v2324_v53  ;;  %6807 = vmatmul.msk.f32.gmra.mxu3 %vm4276_vm3, %v9056_v23  ;;  %v3990_v45 = vsel %vm3734_vm2, %v3606_v36, %v3862_v55  ;;  %v3122_v55 = vperm.slane %v8909_v6, 6 }
 0x4ff   :  { %914 = vperm.xlu1 %6864, %v909_v5  }
 0x500   :  { %v3608_v56 = vadd.f32 %v8755_v50, %v3477_v10 }
 0x501   :  { %v2995_v63 = vpop.permute.xlu1 %2994 }
 0x502   :  { %v3864_v41 = vmul.f32 0.2, %v3608_v56  ;;  %v3340_v30 = vmul.f32 %v7526_v40, %v2995_v63  ;;  %vm3736_vm4 = vcmp.gt.f32.partialorder %v3608_v56, 0.0  ;;  %v2326_v63 = vadd.f32 %v2198_v8, %v1173_v11 }
 0x504   :  { %v3468_v58 = vadd.f32 %v3340_v30, %v2315_v1  ;;  %v845_v31 = vpop.permute.xlu2 %844  ;;  %v3992_v5 = vsel %vm3736_vm4, %v3608_v56, %v3864_v41  ;;  %v1884_v56 = vpop.permute.xlu0 %1883  ;;  %v3351_v30 = vmul.f32 %v7526_v40, %v9005_v0  ;;  %v4585_v0 = vadd.f32 %v8746_v54, %v8009_v20 }
 0x505   :  { %1974 = vperm.xlu2 %6865, %v1969_v35   ;;  %v6986_v53 = vpack.i.bf16 %v3992_v5, %v3990_v45  ;;  %v1166_v41 = vmul.f32 %v7514_v34, %v845_v31  ;;  %v9094_v31 = vld [vmem:[%s10439_s24 + $0xe7] ss:$2 sm:$0xff] }
 0x506   :  { %v3599_v10 = vadd.f32 %v8755_v50, %v3468_v58  ;;  %v3342_v58 = vmul.f32 %v7526_v40, %v3009_v57  ;;  %v3479_v11 = vadd.f32 %v3351_v30, %v2326_v63  ;;  %v4794_v30 = vadd.f32 %v8014_v44, %v4585_v0 }
 0x507   :  { %6987 = vrot.lane.b32.xlu0 %v6986_v53, %s7099_s27  ;;  %v2191_v53 = vmul.f32 %v7519_v51, %v9043_v33  ;;  %v958_v33 = vperm.slane %v9094_v31, 0 }
 0x508   :  { %vm3727_vm5 = vcmp.gt.f32.partialorder %v3599_v10, 0.0  ;;  %v3855_v15 = vmul.f32 0.2, %v3599_v10  ;;  %vm4981_vm8 = vcmp.gt.f32.partialorder %v4794_v30, 0.0 }
 0x509   :  { %v831_v36 = vpop.permute.xlu1 %830  ;;  %v2319_v8 = vadd.f32 %v2191_v53, %v1166_v41 }
 0x50a   :  { %v1164_v35 = vmul.f32 %v7514_v34, %v831_v36  ;;  %v3983_v1 = vsel %vm3727_vm5, %v3599_v10, %v3855_v15 }
 0x50b   :  { %6768 = vmatmul.msk.f32.gmra.mxu1 %vm4276_vm3, %v3983_v1 }
 0x50c   :  { %v2317_v45 = vadd.f32 %v2189_v32, %v1164_v35  ;;  %v3023_v5 = vpop.permute.xlu2 %3022  ;;  %v1920_v35 = vperm.slane %v8812_v46, 7  ;;  %v3037_v41 = vpop.permute.xlu0 %3036 }
 0x50d   :  { %3127 = vperm.xlu2 %6865, %v3122_v55   ;;  %v3344_v7 = vmul.f32 %v7526_v40, %v3023_v5  ;;  %v3610_v55 = vadd.f32 %v8755_v50, %v3479_v11  ;;  %v3346_v44 = vmul.f32 %v7526_v40, %v3037_v41 }
 0x50e   :  { %v3470_v10 = vadd.f32 %v3342_v58, %v2317_v45  ;;  %v2193_v45 = vmul.f32 %v7519_v51, %v1884_v56 }
 0x50f   :  { %1988 = vperm.xlu0 %6863, %v1983_v19   ;;  %v3472_v15 = vadd.f32 %v3344_v7, %v2319_v8  ;;  %v3866_v7 = vmul.f32 0.2, %v3610_v55  ;;  %vm3738_vm7 = vcmp.gt.f32.partialorder %v3610_v55, 0.0  ;;  %v895_v8 = vperm.slane %v8799_v61, 7 }
 0x510   :  { %v3601_v57 = vadd.f32 %v8755_v50, %v3470_v10  ;;  %v1175_v61 = vmul.f32 %v7514_v34, %v9019_v37 }
 0x511   :  { %v6978_v36 = vpop.permute.xlu1 %6977  ;;  %v3603_v5 = vadd.f32 %v8755_v50, %v3472_v15 }
 0x512   :  { %v6979_v63 = vunpack.i.l.bf16 %v6978_v36  ;;  %vm3729_vm6 = vcmp.gt.f32.partialorder %v3601_v57, 0.0  ;;  %v3857_v32 = vmul.f32 0.2, %v3601_v57  ;;  %v6980_v11 = vunpack.i.h.bf16 %v6978_v36 }
 0x513   :  { %v3859_v0 = vmul.f32 0.2, %v3603_v5  ;;  %vm3731_vm9 = vcmp.gt.f32.partialorder %v3603_v5, 0.0  ;;  %v4591_v36 = vadd.f32 %v8746_v54, %v8073_v2  ;;  %v3087_v2 = vperm.slane %v8909_v6, 1  ;;  %v5346_v54 = vld [vmem:[%s10502_s5 + $0x78] sm:$0xff] }
 0x514   :  { %v859_v19 = vpop.permute.xlu2 %858  ;;  %v4322_v20 = vsel %vm4276_vm3, %v9013_v62, %v6979_v63  ;;  %v9105_v58 = vsel %vm3729_vm6, %v3601_v57, %v3857_v32  ;;  %v5045_v62 = vmul.f32 0.2, %v4794_v30  ;;  %v3994_v57 = vsel %vm3738_vm7, %v3610_v55, %v3866_v7  ;;  %5455 = vmatpush.msra.mxu2 %v5346_v54  ;;  %v5344_v7 = vld [vmem:[%s10502_s5 + $0x68] sm:$0xff]  ;;  %v9182_v54 = vld [vmem:[%s10503_s4] ss:$0 sm:$0xff] }
 0x515   :  { %963 = vperm.xlu2 %6865, %v958_v33   ;;  %v1168_v53 = vmul.f32 %v7514_v34, %v859_v19  ;;  %4712 = vmatmul.f32.gmra.mxu0 %v4322_v20  ;;  %v4323_v33 = vsel %vm4276_vm3, %v3983_v1, %v6980_v11  ;;  %v9116_v32 = vsel %vm3731_vm9, %v3603_v5, %v3859_v0  ;;  %v3073_v55 = vperm.slane %v8824_v26, 7  ;;  %v5345_v26 = vld [vmem:[%s10502_s5 + $0x70] sm:$0xff]  ;;  %v5342_v0 = vld [vmem:[%s10502_s5 + $0x58] sm:$0xff] }
 0x516   :  { %6769 = vmatmul.msk.f32.gmra.mxu1 %vm4276_vm3, %v9105_v58  ;;  %v5109_v15 = vsel %vm4981_vm8, %v4794_v30, %v5045_v62  ;;  %v4800_v19 = vadd.f32 %v8078_v38, %v4591_v36  ;;  %5456 = vmatpush.msra.mxu2 %v5345_v26  ;;  %v873_v26 = vpop.permute.xlu0 %872 }
 0x517   :  { %v2321_v46 = vadd.f32 %v2193_v45, %v1168_v53  ;;  %1925 = vperm.xlu0 %6863, %v1920_v35   ;;  %v6991_v35 = vpack.i.bf16 %v3994_v57, %v5109_v15  ;;  %v5341_v57 = vld [vmem:[%s10502_s5 + $0x50] sm:$0xff] }
 0x518   :  { %v5047_v38 = vmul.f32 0.2, %v4800_v19  ;;  %vm4983_vm12 = vcmp.gt.f32.partialorder %v4800_v19, 0.0  ;;  %5457 = vmatpush.msra.mxu2 %v5344_v7  ;;  %v9192_v7 = vld [vmem:[%s10499_s3] ss:$0 sm:$0xff] }
 0x519   :  { %v3474_v10 = vadd.f32 %v3346_v44, %v2321_v46  ;;  %v1933_v56 = vpop.permute.xlu1 %1932  ;;  %v5343_v46 = vld [vmem:[%s10502_s5 + $0x60] sm:$0xff] }
 0x51a   :  { %v2200_v41 = vmul.f32 %v7519_v51, %v1933_v56  ;;  %v5111_v11 = vsel %vm4983_vm12, %v4800_v19, %v5047_v38  ;;  %5458 = vmatpush.msra.mxu2 %v5343_v46  ;;  %v5336_v38 = vld [vmem:[%s10502_s5 + $0x28] sm:$0xff] }
 0x51b   :  { %v3605_v63 = vadd.f32 %v8755_v50, %v3474_v10 }
 0x51c   :  { %v2328_v20 = vadd.f32 %v2200_v41, %v1175_v61  ;;  %5459 = vmatpush.msra.mxu2 %v5342_v0  ;;  %v923_v41 = vperm.slane %v8942_v60, 3  ;;  %v1948_v61 = vperm.slane %v8898_v29, 3  ;;  %v5334_v0 = vld [vmem:[%s10502_s5 + $0x18] sm:$0xff] }
 0x51d   :  { %900 = vperm.xlu2 %6865, %v895_v8   ;;  %4715 = vmatmul.f32.gmra.mxu0 %v4323_v33  ;;  %v3861_v30 = vmul.f32 0.2, %v3605_v63  ;;  %vm3733_vm11 = vcmp.gt.f32.partialorder %v3605_v63, 0.0  ;;  %v972_v8 = vperm.slane %v9094_v31, 2  ;;  %v5340_v33 = vld [vmem:[%s10502_s5 + $0x48] sm:$0xff] }
 0x51e   :  { %6770 = vmatmul.msk.f32.gmra.mxu1 %vm4276_vm3, %v9116_v32  ;;  %5460 = vmatpush.msra.mxu2 %v5341_v57 }
 0x51f   :  { %6992 = vrot.lane.b32.xlu0 %v6991_v35, %s7099_s27  ;;  %v9133_v37 = vsel %vm3733_vm11, %v3605_v63, %v3861_v30  ;;  %v1177_v63 = vmul.f32 %v7514_v34, %v9063_v13  ;;  %v9162_v35 = vpop.f32.mrf.mxu1  ;;  %v3101_v13 = vperm.slane %v8909_v6, 3 }
 0x520   :  { %5461 = vmatpush.msra.mxu2 %v5340_v33 }
 0x521   :  { %v3086_v1 = vpop.permute.xlu1 %3085 }
 0x522   :  { %v3353_v45 = vmul.f32 %v7526_v40, %v3086_v1  ;;  %v5339_v1 = vld [vmem:[%s10502_s5 + $0x40] sm:$0xff] }
 0x523   :  { %5462 = vmatpush.msra.mxu2 %v5339_v1 }
 0x524   :  { %v3481_v5 = vadd.f32 %v3353_v45, %v2328_v20  ;;  %v5338_v20 = vld [vmem:[%s10502_s5 + $0x38] sm:$0xff] }
 0x525   :  { %3078 = vperm.xlu2 %6865, %v3073_v55   ;;  %v9169_v55 = vpop.f32.mrf.mxu0  ;;  %5463 = vmatpush.msra.mxu2 %v5338_v20 }
 0x526   :  { %v3612_v53 = vadd.f32 %v8755_v50, %v3481_v5  ;;  %6771 = vmatmul.msk.f32.gmra.mxu1 %vm4276_vm3, %v9133_v37  ;;  %v1934_v50 = vperm.slane %v8898_v29, 1  ;;  %v4597_v5 = vadd.f32 %v9182_v54, %v8197_v28  ;;  %v1997_v28 = vperm.slane %v9077_v17, 2 }
 0x527   :  { %3092 = vperm.xlu0 %6863, %v3087_v2   ;;  %v5337_v2 = vld [vmem:[%s10502_s5 + $0x30] sm:$0xff] }
 0x528   :  { %vm3740_vm13 = vcmp.gt.f32.partialorder %v3612_v53, 0.0  ;;  %v3868_v44 = vmul.f32 0.2, %v3612_v53  ;;  %5464 = vmatpush.msra.mxu2 %v5337_v2 }
 0x529   :  { %v1947_v62 = vpop.permute.xlu1 %1946 }
 0x52a   :  { %v3996_v10 = vsel %vm3740_vm13, %v3612_v53, %v3868_v44  ;;  %v2202_v15 = vmul.f32 %v7519_v51, %v1947_v62  ;;  %v4904_v53 = vpop.f32.mrf.mxu1  ;;  %5465 = vmatpush.msra.mxu2 %v5336_v38  ;;  %v3150_v62 = vperm.slane %v9033_v24, 2 }
 0x52b   :  { %v6996_v56 = vpack.i.bf16 %v3996_v10, %v5111_v11  ;;  %v4806_v11 = vadd.f32 %v8199_v9, %v4597_v5  ;;  %v5333_v9 = vld [vmem:[%s10502_s5 + $0x10] sm:$0xff] }
 0x52c   :  { %v2330_v30 = vadd.f32 %v2202_v15, %v1177_v63  ;;  %v5332_v63 = vld [vmem:[%s10502_s5 + $0x8] sm:$0xff] }
 0x52d   :  { %1939 = vperm.xlu2 %6865, %v1934_v50   ;;  %6997 = vrot.lane.b32.xlu1 %v6996_v56, %s7099_s27  ;;  %v5335_v50 = vld [vmem:[%s10502_s5 + $0x20] sm:$0xff]  ;;  %v5049_v33 = vmul.f32 0.2, %v4806_v11  ;;  %vm4985_vm15 = vcmp.gt.f32.partialorder %v4806_v11, 0.0 }
 0x52e   :  { %5466 = vmatpush.msra.mxu2 %v5335_v50 }
 0x52f   :  { %977 = vperm.xlu0 %6863, %v972_v8   ;;  %v937_v8 = vperm.slane %v8942_v60, 5  ;;  %v5113_v20 = vsel %vm4985_vm15, %v4806_v11, %v5049_v33 }
 0x530   :  { %5467 = vmatpush.msra.mxu2 %v5334_v0 }
 0x531   :  { %v3100_v36 = vpop.permute.xlu1 %3099 }
 0x532   :  { %v3355_v19 = vmul.f32 %v7526_v40, %v3100_v36  ;;  %5468 = vmatpush.msra.mxu2 %v5333_v9  ;;  %v4907_v2 = vpop.f32.mrf.mxu1 }
 0x534   :  { %v3483_v45 = vadd.f32 %v3355_v19, %v2330_v30  ;;  %5469 = vmatpush.msra.mxu2 %v5332_v63  ;;  %v986_v19 = vperm.slane %v9094_v31, 4 }
 0x535   :  { %928 = vperm.xlu2 %6865, %v923_v41   ;;  %1953 = vperm.xlu1 %6864, %v1948_v61   ;;  %v3051_v61 = vpop.permute.xlu0 %3050 }
 0x536   :  { %v3614_v44 = vadd.f32 %v9192_v7, %v3483_v45  ;;  %v1170_v45 = vmul.f32 %v7514_v34, %v873_v26 }
 0x537   :  { %3106 = vperm.xlu0 %6863, %v3101_v13   ;;  %v5331_v13 = vld [vmem:[%s10502_s5] sm:$0xff] }
 0x538   :  { %v3870_v57 = vmul.f32 0.2, %v3614_v44  ;;  %vm3742_vm14 = vcmp.gt.f32.partialorder %v3614_v44, 0.0  ;;  %5470 = vmatpush.msra.mxu2 %v5331_v13 }
 0x539   :  { %v9195_v46 = vpop.permute.xlu1 %935 }
 0x53a   :  { %v4695_v10 = vpop.f32.mrf.mxu0  ;;  %v3998_v41 = vsel %vm3742_vm14, %v3614_v44, %v3870_v57  ;;  %v3115_v57 = vperm.slane %v8909_v6, 5 }
 0x53b   :  { %v4696_v56 = vadd.f32 %v9182_v54, %v4695_v10  ;;  %v7001_v44 = vpack.i.bf16 %v3998_v41, %v5113_v20 }
 0x53d   :  { %v4905_v15 = vadd.f32 %v4904_v53, %v4696_v56  ;;  %2002 = vperm.xlu2 %6865, %v1997_v28   ;;  %3155 = vperm.xlu1 %6864, %v3150_v62   ;;  %v2011_v28 = vperm.slane %v9077_v17, 4  ;;  %v3348_v62 = vmul.f32 %v7526_v40, %v3051_v61 }
 0x53f   :  { %942 = vperm.xlu0 %6863, %v937_v8   ;;  %vm5018_vm0 = vcmp.gt.f32.partialorder %v4905_v15, 0.0  ;;  %v5082_v36 = vmul.f32 0.2, %v4905_v15 }
 0x541   :  { %v1898_v1 = vpop.permute.xlu1 %1897  ;;  %v9214_v30 = vsel %vm5018_vm0, %v4905_v15, %v5082_v36  ;;  %v1962_v15 = vperm.slane %v8898_v29, 5 }
 0x542   :  { %v2195_v5 = vmul.f32 %v7519_v51, %v1898_v1  ;;  %v4698_v38 = vpop.f32.mrf.mxu0  ;;  %6808 = vmatmul.msk.f32.gmra.mxu3 %vm4276_vm3, %v9214_v30 }
 0x543   :  { %v4699_v53 = vadd.f32 %v9182_v54, %v4698_v38 }
 0x544   :  { %v2323_v50 = vadd.f32 %v2195_v5, %v1170_v45  ;;  %v3164_v5 = vperm.slane %v9033_v24, 4 }
 0x545   :  { %v9227_v10 = vadd.f32 %v4907_v2, %v4699_v53  ;;  %991 = vperm.xlu1 %6864, %v986_v19   ;;  %7002 = vrot.lane.b32.xlu2 %v7001_v44, %s7099_s27 }
 0x546   :  { %v3476_v26 = vadd.f32 %v3348_v62, %v2323_v50 }
 0x547   :  { %v6983_v11 = vpop.permute.xlu2 %6982  ;;  %2016 = vperm.xlu0 %6863, %v2011_v28   ;;  %v4603_v28 = vadd.f32 %v9182_v54, %v8230_v25 }
 0x548   :  { %v3607_v56 = vadd.f32 %v9192_v7, %v3476_v26  ;;  %v6984_v8 = vunpack.i.l.bf16 %v6983_v11  ;;  %v6985_v19 = vunpack.i.h.bf16 %v6983_v11  ;;  %v887_v26 = vpop.permute.xlu0 %886  ;;  %v1179_v11 = vmul.f32 %v7514_v34, %v9195_v46 }
 0x549   :  { %v9231_v0 = vpop.permute.xlu1 %949 }
 0x54a   :  { %v4701_v9 = vpop.f32.mrf.mxu0  ;;  %v4910_v33 = vpop.f32.mrf.mxu1  ;;  %v4324_v63 = vsel %vm4276_vm3, %v9105_v58, %v6984_v8  ;;  %vm3735_vm1 = vcmp.gt.f32.partialorder %v3607_v56, 0.0  ;;  %v3863_v36 = vmul.f32 0.2, %v3607_v56  ;;  %v951_v58 = vperm.slane %v8942_v60, 7 }
 0x54b   :  { %v4702_v41 = vadd.f32 %v9182_v54, %v4701_v9  ;;  %4718 = vmatmul.f32.gmra.mxu0 %v4324_v63  ;;  %v4325_v53 = vsel %vm4276_vm3, %v9116_v32, %v6985_v19  ;;  %v4812_v8 = vadd.f32 %v8233_v14, %v4603_v28  ;;  %v1000_v63 = vperm.slane %v9094_v31, 6 }
 0x54c   :  { %v9238_v61 = vsel %vm3735_vm1, %v3607_v56, %v3863_v36  ;;  %v3129_v28 = vperm.slane %v8909_v6, 7 }
 0x54d   :  { %v4911_v1 = vadd.f32 %v4910_v33, %v4702_v41  ;;  %3120 = vperm.xlu1 %6864, %v3115_v57   ;;  %1967 = vperm.xlu2 %6865, %v1962_v15   ;;  %v1172_v57 = vmul.f32 %v7514_v34, %v887_v26  ;;  %v2025_v33 = vperm.slane %v9077_v17, 6  ;;  %v5051_v46 = vmul.f32 0.2, %v4812_v8 }
 0x54e   :  { %6772 = vmatmul.msk.f32.gmra.mxu1 %vm4276_vm3, %v9238_v61  ;;  %vm4987_vm4 = vcmp.gt.f32.partialorder %v4812_v8, 0.0 }
 0x54f   :  { %v5084_v13 = vmul.f32 0.2, %v4911_v1  ;;  %v1961_v20 = vpop.permute.xlu2 %1960  ;;  %vm5020_vm2 = vcmp.gt.f32.partialorder %v4911_v1, 0.0 }
 0x550   :  { %v2204_v62 = vmul.f32 %v7519_v51, %v1961_v20 }
 0x551   :  { %v1912_v45 = vpop.permute.xlu1 %1911  ;;  %v9242_v2 = vsel %vm5020_vm2, %v4911_v1, %v5084_v13 }
 0x552   :  { %v4704_v38 = vpop.f32.mrf.mxu0  ;;  %6809 = vmatmul.msk.f32.gmra.mxu3 %vm4276_vm3, %v9242_v2  ;;  %v4913_v50 = vpop.f32.mrf.mxu1  ;;  %v2197_v56 = vmul.f32 %v7519_v51, %v1912_v45  ;;  %v2332_v15 = vadd.f32 %v2204_v62, %v1179_v11  ;;  %v1181_v11 = vmul.f32 %v7514_v34, %v9231_v0  ;;  %v3178_v0 = vperm.slane %v9033_v24, 6 }
 0x553   :  { %v4705_v44 = vadd.f32 %v9182_v54, %v4704_v38  ;;  %4721 = vmatmul.f32.gmra.mxu0 %v4325_v53 }
 0x554   :  { %v2325_v36 = vadd.f32 %v2197_v56, %v1172_v57  ;;  %v1976_v56 = vperm.slane %v8898_v29, 7  ;;  %v9288_v29 = vld [vmem:[%s10439_s24 + $0xf8] ss:$2 sm:$0xff] }
 0x555   :  { %v9254_v60 = vadd.f32 %v4913_v50, %v4705_v44  ;;  %956 = vperm.xlu1 %6864, %v951_v58   ;;  %3169 = vperm.xlu2 %6865, %v3164_v5   ;;  %v5115_v58 = vsel %vm4987_vm4, %v4812_v8, %v5051_v46  ;;  %v4609_v50 = vadd.f32 %v9182_v54, %v8275_v47 }
 0x557   :  { %v3114_v32 = vpop.permute.xlu2 %3113 }
 0x558   :  { %v3357_v25 = vmul.f32 %v7526_v40, %v3114_v32  ;;  %v4818_v32 = vadd.f32 %v8280_v16, %v4609_v50 }
 0x559   :  { %v3065_v9 = vpop.permute.xlu1 %3064 }
 0x55a   :  { %v3485_v41 = vadd.f32 %v3357_v25, %v2332_v15  ;;  %v3350_v1 = vmul.f32 %v7526_v40, %v3065_v9  ;;  %v965_v15 = vperm.slane %v9094_v31, 1  ;;  %v5053_v9 = vmul.f32 0.2, %v4818_v32 }
 0x55b   :  { %vm4989_vm7 = vcmp.gt.f32.partialorder %v4818_v32, 0.0 }
 0x55c   :  { %v3616_v19 = vadd.f32 %v9192_v7, %v3485_v41  ;;  %v3478_v13 = vadd.f32 %v3350_v1, %v2325_v36  ;;  %v2039_v1 = vperm.slane %v9288_v29, 0 }
 0x55d   :  { %2030 = vperm.xlu1 %6864, %v2025_v33   ;;  %1005 = vperm.xlu2 %6865, %v1000_v63   ;;  %v5117_v63 = vsel %vm4989_vm7, %v4818_v32, %v5053_v9 }
 0x55e   :  { %vm3744_vm5 = vcmp.gt.f32.partialorder %v3616_v19, 0.0  ;;  %v3872_v14 = vmul.f32 0.2, %v3616_v19  ;;  %v3609_v20 = vadd.f32 %v9192_v7, %v3478_v13  ;;  %v4916_v13 = vpop.f32.mrf.mxu1 }
 0x55f   :  { %v1975_v45 = vpop.permute.xlu2 %1974 }
 0x560   :  { %v4000_v5 = vsel %vm3744_vm5, %v3616_v19, %v3872_v14  ;;  %vm3737_vm6 = vcmp.gt.f32.partialorder %v3609_v20, 0.0  ;;  %v3865_v38 = vmul.f32 0.2, %v3609_v20  ;;  %v2206_v26 = vmul.f32 %v7519_v51, %v1975_v45  ;;  %v9297_v14 = vld [vmem:[%s10439_s24 + $0xf7] ss:$2 sm:$0xff] }
 0x561   :  { %v5204_v53 = vpop.permute.xlu1 %5203  ;;  %v7006_v44 = vpack.i.bf16 %v4000_v5, %v5115_v58  ;;  %v1014_v5 = vperm.slane %v9297_v14, 0 }
 0x562   :  { %6788 = vmatmul.msk.f32.vlgmr.msra.gmra.mxu2 %vm7702_vm10, %v5204_v53  ;;  %v9270_v62 = vsel %vm3737_vm6, %v3609_v20, %v3865_v38  ;;  %v2334_v8 = vadd.f32 %v2206_v26, %v1181_v11  ;;  %v1990_v38 = vperm.slane %v9077_v17, 1 }
 0x563   :  { %7007 = vrot.lane.b32.xlu0 %v7006_v44, %s7099_s27  ;;  %6773 = vmatmul.msk.f32.gmra.mxu1 %vm4276_vm3, %v9270_v62 }
 0x565   :  { %3134 = vperm.xlu2 %6865, %v3129_v28  }
 0x566   :  { %v4919_v11 = vpop.f32.mrf.mxu1 }
 0x567   :  { %v3128_v6 = vpop.permute.xlu2 %3127 }
 0x568   :  { %v3359_v57 = vmul.f32 %v7526_v40, %v3128_v6 }
 0x56a   :  { %v3487_v25 = vadd.f32 %v3359_v57, %v2334_v8  ;;  %v4615_v8 = vadd.f32 %v9182_v54, %v8344_v59  ;;  %v4621_v59 = vadd.f32 %v9182_v54, %v8476_v43 }
 0x56b   :  { %1981 = vperm.xlu0 %6863, %v1976_v56   ;;  %v9311_v56 = vld [vmem:[%s10439_s24 + $0xf9] ss:$2 sm:$0xff] }
 0x56c   :  { %v3618_v47 = vadd.f32 %v9192_v7, %v3487_v25  ;;  %v3192_v25 = vperm.slane %v9311_v56, 0 }
 0x56d   :  { %970 = vperm.xlu2 %6865, %v965_v15   ;;  %v3143_v15 = vperm.slane %v9033_v24, 1 }
 0x56e   :  { %vm3746_vm8 = vcmp.gt.f32.partialorder %v3618_v47, 0.0  ;;  %v3874_v33 = vmul.f32 0.2, %v3618_v47 }
 0x56f   :  { %v964_v16 = vpop.permute.xlu2 %963 }
 0x570   :  { %v4002_v36 = vsel %vm3746_vm8, %v3618_v47, %v3874_v33  ;;  %v3142_v47 = vpop.permute.xlu1 %3141 }
 0x571   :  { %v7011_v41 = vpack.i.bf16 %v4002_v36, %v5117_v63  ;;  %v4824_v36 = vadd.f32 %v8349_v49, %v4615_v8  ;;  %v2053_v49 = vperm.slane %v9288_v29, 2 }
 0x572   :  { %v4707_v46 = vpop.f32.mrf.mxu0 }
 0x573   :  { %v4708_v19 = vadd.f32 %v9182_v54, %v4707_v46  ;;  %3183 = vperm.xlu0 %6863, %v3178_v0   ;;  %7012 = vrot.lane.b32.xlu1 %v7011_v41, %s7099_s27  ;;  %v1183_v0 = vmul.f32 %v7514_v34, %v964_v16  ;;  %v3361_v41 = vmul.f32 %v7526_v40, %v3142_v47  ;;  %v5055_v16 = vmul.f32 0.2, %v4824_v36 }
 0x574   :  { %vm4991_vm11 = vcmp.gt.f32.partialorder %v4824_v36, 0.0 }
 0x575   :  { %v4917_v20 = vadd.f32 %v4916_v13, %v4708_v19  ;;  %2044 = vperm.xlu2 %6865, %v2039_v1  }
 0x577   :  { %v901_v45 = vpop.permute.xlu2 %900  ;;  %vm5022_vm9 = vcmp.gt.f32.partialorder %v4917_v20, 0.0  ;;  %v5086_v58 = vmul.f32 0.2, %v4917_v20 }
 0x579   :  { %v6988_v53 = vpop.permute.xlu0 %6987  ;;  %v9301_v44 = vsel %vm5022_vm9, %v4917_v20, %v5086_v58  ;;  %v1028_v20 = vperm.slane %v9297_v14, 2  ;;  %v4830_v58 = vadd.f32 %v8478_v22, %v4621_v59 }
 0x57a   :  { %v6989_v28 = vunpack.i.l.bf16 %v6988_v53  ;;  %v4710_v50 = vpop.f32.mrf.mxu0  ;;  %6810 = vmatmul.msk.f32.gmra.mxu3 %vm4276_vm3, %v9301_v44  ;;  %v6990_v9 = vunpack.i.h.bf16 %v6988_v53  ;;  %v1174_v53 = vmul.f32 %v7514_v34, %v901_v45  ;;  %v979_v45 = vperm.slane %v9094_v31, 3 }
 0x57b   :  { %v4711_v26 = vadd.f32 %v9182_v54, %v4710_v50  ;;  %1019 = vperm.xlu0 %6863, %v1014_v5   ;;  %1995 = vperm.xlu1 %6864, %v1990_v38   ;;  %v5057_v50 = vmul.f32 0.2, %v4830_v58  ;;  %vm4993_vm14 = vcmp.gt.f32.partialorder %v4830_v58, 0.0 }
 0x57c   :  { %v4326_v6 = vsel %vm4276_vm3, %v9133_v37, %v6989_v28  ;;  %v4627_v37 = vadd.f32 %v9182_v54, %v8494_v27  ;;  %v4327_v46 = vsel %vm4276_vm3, %v9238_v61, %v6990_v9  ;;  %v5119_v28 = vsel %vm4991_vm11, %v4824_v36, %v5055_v16  ;;  %v915_v16 = vpop.permute.xlu1 %914 }
 0x57d   :  { %v9313_v32 = vadd.f32 %v4919_v11, %v4711_v26  ;;  %4724 = vmatmul.f32.gmra.mxu0 %v4326_v6 }
 0x57e   :  { %v4836_v27 = vadd.f32 %v8496_v4, %v4627_v37 }
 0x57f   :  { %v3079_v57 = vpop.permute.xlu2 %3078 }
 0x580   :  { %v5059_v5 = vmul.f32 0.2, %v4836_v27  ;;  %vm4995_vm13 = vcmp.gt.f32.partialorder %v4836_v27, 0.0  ;;  %v3352_v26 = vmul.f32 %v7526_v40, %v3079_v57 }
 0x581   :  { %v1989_v33 = vpop.permute.xlu0 %1988 }
 0x582   :  { %v2208_v63 = vmul.f32 %v7519_v51, %v1989_v33  ;;  %v5123_v8 = vsel %vm4995_vm13, %v4836_v27, %v5059_v5  ;;  %v2067_v5 = vperm.slane %v9288_v29, 4 }
 0x583   :  { %3148 = vperm.xlu0 %6863, %v3143_v15   ;;  %3197 = vperm.xlu1 %6864, %v3192_v25   ;;  %v5121_v25 = vsel %vm4993_vm14, %v4830_v58, %v5057_v50  ;;  %v2004_v50 = vperm.slane %v9077_v17, 3 }
 0x584   :  { %v2336_v1 = vadd.f32 %v2208_v63, %v1183_v0  ;;  %v7021_v33 = vpack.i.bf16 %v5123_v8, %v5121_v25 }
 0x585   :  { %4727 = vmatmul.f32.gmra.mxu0 %v4327_v46 }
 0x586   :  { %v3489_v19 = vadd.f32 %v3361_v41, %v2336_v1  ;;  %v3206_v41 = vperm.slane %v9311_v56, 2 }
 0x587   :  { %v1940_v13 = vpop.permute.xlu2 %1939 }
 0x588   :  { %v3620_v43 = vadd.f32 %v9192_v7, %v3489_v19  ;;  %v4922_v1 = vpop.f32.mrf.mxu1 }
 0x589   :  { %v1926_v38 = vpop.permute.xlu0 %1925 }
 0x58a   :  { %v3876_v61 = vmul.f32 0.2, %v3620_v43  ;;  %v2199_v4 = vmul.f32 %v7519_v51, %v1926_v38  ;;  %vm3748_vm12 = vcmp.gt.f32.partialorder %v3620_v43, 0.0 }
 0x58b   :  { %1033 = vperm.xlu0 %6863, %v1028_v20   ;;  %2058 = vperm.xlu1 %6864, %v2053_v49   ;;  %v2201_v49 = vmul.f32 %v7519_v51, %v1940_v13 }
 0x58c   :  { %v2327_v11 = vadd.f32 %v2199_v4, %v1174_v53  ;;  %v4004_v6 = vsel %vm3748_vm12, %v3620_v43, %v3876_v61  ;;  %v1042_v43 = vperm.slane %v9297_v14, 4 }
 0x58d   :  { %v7016_v22 = vpack.i.bf16 %v4004_v6, %v5119_v28 }
 0x58e   :  { %v3480_v15 = vadd.f32 %v3352_v26, %v2327_v11 }
 0x58f   :  { %7017 = vrot.lane.b32.xlu2 %v7016_v22, %s7099_s27  ;;  %v9340_v37 = vpop.permute.xlu2 %928 }
 0x590   :  { %v3611_v9 = vadd.f32 %v9192_v7, %v3480_v15  ;;  %v3220_v15 = vperm.slane %v9311_v56, 4 }
 0x591   :  { %v6993_v47 = vpop.permute.xlu0 %6992 }
 0x592   :  { %v6995_v0 = vunpack.i.h.bf16 %v6993_v47  ;;  %v6994_v63 = vunpack.i.l.bf16 %v6993_v47  ;;  %v4713_v57 = vpop.f32.mrf.mxu0  ;;  %vm3739_vm15 = vcmp.gt.f32.partialorder %v3611_v9, 0.0  ;;  %v3867_v36 = vmul.f32 0.2, %v3611_v9 }
 0x593   :  { %v4714_v59 = vadd.f32 %v9182_v54, %v4713_v57  ;;  %7022 = vrot.lane.b32.xlu0 %v7021_v33, %s7099_s27  ;;  %984 = vperm.xlu1 %6864, %v979_v45   ;;  %v4925_v26 = vpop.f32.mrf.mxu1  ;;  %v993_v45 = vperm.slane %v9094_v31, 5 }
 0x594   :  { %v4328_v46 = vsel %vm4276_vm3, %v9270_v62, %v6995_v0  ;;  %v3995_v27 = vsel %vm3739_vm15, %v3611_v9, %v3867_v36  ;;  %v5300_v19 = vsel %vm4276_vm3, %v7995_v3, %v6994_v63  ;;  %v1176_v62 = vmul.f32 %v7514_v34, %v915_v16 }
 0x595   :  { %v4923_v20 = vadd.f32 %v4922_v1, %v4714_v59  ;;  %4730 = vmatmul.f32.gmra.mxu0 %v4328_v46  ;;  %6774 = vmatmul.msk.f32.gmra.mxu1 %vm4276_vm3, %v3995_v27  ;;  %v3157_v36 = vperm.slane %v9033_v24, 3  ;;  %v3171_v46 = vperm.slane %v9033_v24, 5 }
 0x596   :  { %5474 = vmatmul.f32.gmra.mxu2 %v5300_v19  ;;  %v2329_v3 = vadd.f32 %v2201_v49, %v1176_v62 }
 0x597   :  { %3211 = vperm.xlu2 %6865, %v3206_v41   ;;  %vm5024_vm0 = vcmp.gt.f32.partialorder %v4923_v20, 0.0  ;;  %v5088_v58 = vmul.f32 0.2, %v4923_v20  ;;  %v2003_v61 = vpop.permute.xlu2 %2002 }
 0x599   :  { %v3093_v38 = vpop.permute.xlu0 %3092  ;;  %v9354_v53 = vsel %vm5024_vm0, %v4923_v20, %v5088_v58  ;;  %v4633_v58 = vadd.f32 %v9182_v54, %v8531_v39 }
 0x59a   :  { %v3354_v4 = vmul.f32 %v7526_v40, %v3093_v38  ;;  %v4716_v28 = vpop.f32.mrf.mxu0  ;;  %6811 = vmatmul.msk.f32.gmra.mxu3 %vm4276_vm3, %v9354_v53  ;;  %v2210_v38 = vmul.f32 %v7519_v51, %v2003_v61 }
 0x59b   :  { %v4717_v13 = vadd.f32 %v9182_v54, %v4716_v28  ;;  %1047 = vperm.xlu0 %6863, %v1042_v43   ;;  %2072 = vperm.xlu1 %6864, %v2067_v5   ;;  %v2018_v5 = vperm.slane %v9077_v17, 5 }
 0x59c   :  { %v3482_v11 = vadd.f32 %v3354_v4, %v2329_v3  ;;  %v4842_v4 = vadd.f32 %v8535_v48, %v4633_v58  ;;  %v2032_v58 = vperm.slane %v9077_v17, 7  ;;  %v1021_v17 = vperm.slane %v9297_v14, 1 }
 0x59d   :  { %v9361_v6 = vadd.f32 %v4925_v26, %v4717_v13 }
 0x59e   :  { %v3613_v22 = vadd.f32 %v9192_v7, %v3482_v11  ;;  %v5061_v61 = vmul.f32 0.2, %v4842_v4  ;;  %vm4997_vm4 = vcmp.gt.f32.partialorder %v4842_v4, 0.0 }
 0x59f   :  { %v6998_v8 = vpop.permute.xlu1 %6997  ;;  %2009 = vperm.xlu2 %6865, %v2004_v50   ;;  %v7003_v59 = vpop.permute.xlu2 %7002 }
 0x5a0   :  { %v7000_v25 = vunpack.i.h.bf16 %v6998_v8  ;;  %v6999_v9 = vunpack.i.l.bf16 %v6998_v8  ;;  %vm3741_vm1 = vcmp.gt.f32.partialorder %v3613_v22, 0.0  ;;  %v3869_v33 = vmul.f32 0.2, %v3613_v22 }
 0x5a1   :  { %v978_v47 = vpop.permute.xlu0 %977  ;;  %v7005_v41 = vunpack.i.h.bf16 %v7003_v59  ;;  %v7004_v19 = vunpack.i.l.bf16 %v7003_v59  ;;  %v7095_v59 = vld [vmem:[%s10439_s24 + $0xe9] ss:$2 sm:$0xff] }
 0x5a2   :  { %v4329_v0 = vsel %vm4276_vm3, %v3995_v27, %v7000_v25  ;;  %v5301_v63 = vsel %vm4276_vm3, %v8055_v12, %v6999_v9  ;;  %v3997_v57 = vsel %vm3741_vm1, %v3613_v22, %v3869_v33  ;;  %v1178_v27 = vmul.f32 %v7514_v34, %v9340_v37  ;;  %v10592_v9 = vld [vmem:[#allocation16_spill] sm:$0xff] }
 0x5a3   :  { %3225 = vperm.xlu0 %6863, %v3220_v15   ;;  %998 = vperm.xlu1 %6864, %v993_v45   ;;  %v4330_v43 = vsel %vm4276_vm3, %v3997_v57, %v7005_v41  ;;  %v1185_v24 = vmul.f32 %v7514_v34, %v978_v47  ;;  %v5302_v37 = vsel %vm4276_vm3, %v8110_v18, %v7004_v19  ;;  %v1007_v18 = vperm.slane %v9094_v31, 7 }
 0x5a4   :  { %4733 = vmatmul.f32.gmra.mxu0 %v4329_v0  ;;  %6775 = vmatmul.msk.f32.gmra.mxu1 %vm4276_vm3, %v3997_v57  ;;  %v5125_v25 = vsel %vm4997_vm4, %v4842_v4, %v5061_v61  ;;  %v4639_v47 = vadd.f32 %v9182_v54, %v10592_v9  ;;  %v3185_v41 = vperm.slane %v7095_v59, 7  ;;  %v3199_v9 = vperm.slane %v9311_v56, 1 }
 0x5a5   :  { %5477 = vmatmul.f32.gmra.mxu2 %v5301_v63  ;;  %v2338_v13 = vadd.f32 %v2210_v38, %v1185_v24 }
 0x5a7   :  { %v1954_v1 = vpop.permute.xlu1 %1953  ;;  %3162 = vperm.xlu2 %6865, %v3157_v36   ;;  %v1968_v39 = vpop.permute.xlu2 %1967 }
 0x5a8   :  { %v2203_v12 = vmul.f32 %v7519_v51, %v1954_v1  ;;  %v10593_v1 = vld [vmem:[#allocation4_spill] sm:$0xff] }
 0x5a9   :  { %v3107_v16 = vpop.permute.xlu0 %3106 }
 0x5aa   :  { %v2331_v20 = vadd.f32 %v2203_v12, %v1178_v27  ;;  %v3356_v49 = vmul.f32 %v7526_v40, %v3107_v16  ;;  %v2205_v16 = vmul.f32 %v7519_v51, %v1968_v39 }
 0x5ab   :  { %3176 = vperm.xlu1 %6864, %v3171_v46   ;;  %v4848_v46 = vadd.f32 %v10593_v1, %v4639_v47  ;;  %v2060_v1 = vperm.slane %v9288_v29, 3 }
 0x5ac   :  { %v3484_v62 = vadd.f32 %v3356_v49, %v2331_v20  ;;  %4736 = vmatmul.f32.gmra.mxu0 %v4330_v43 }
 0x5ad   :  { %5480 = vmatmul.f32.gmra.mxu2 %v5302_v37  ;;  %v5063_v43 = vmul.f32 0.2, %v4848_v46  ;;  %vm4999_vm6 = vcmp.gt.f32.partialorder %v4848_v46, 0.0 }
 0x5ae   :  { %v3615_v3 = vadd.f32 %v9192_v7, %v3484_v62 }
 0x5af   :  { %v3156_v28 = vpop.permute.xlu1 %3155  ;;  %2023 = vperm.xlu2 %6865, %v2018_v5   ;;  %v3170_v0 = vpop.permute.xlu2 %3169  ;;  %v5127_v4 = vsel %vm4999_vm6, %v4848_v46, %v5063_v43 }
 0x5b0   :  { %v3363_v50 = vmul.f32 %v7526_v40, %v3156_v28  ;;  %vm3743_vm2 = vcmp.gt.f32.partialorder %v3615_v3, 0.0  ;;  %v3871_v26 = vmul.f32 0.2, %v3615_v3  ;;  %v3365_v27 = vmul.f32 %v7526_v40, %v3170_v0 }
 0x5b1   :  { %v943_v11 = vpop.permute.xlu0 %942 }
 0x5b2   :  { %v3491_v22 = vadd.f32 %v3363_v50, %v2338_v13  ;;  %v9387_v8 = vsel %vm3743_vm2, %v3615_v3, %v3871_v26  ;;  %v1180_v19 = vmul.f32 %v7514_v34, %v943_v11  ;;  %v4928_v26 = vpop.f32.mrf.mxu1 }
 0x5b3   :  { %6776 = vmatmul.msk.f32.gmra.mxu1 %vm4276_vm3, %v9387_v8 }
 0x5b4   :  { %v3622_v48 = vadd.f32 %v9192_v7, %v3491_v22  ;;  %v2333_v5 = vadd.f32 %v2205_v16, %v1180_v19 }
 0x5b6   :  { %vm3750_vm5 = vcmp.gt.f32.partialorder %v3622_v48, 0.0  ;;  %v3878_v15 = vmul.f32 0.2, %v3622_v48 }
 0x5b7   :  { %v992_v45 = vpop.permute.xlu1 %991  ;;  %1012 = vperm.xlu2 %6865, %v1007_v18   ;;  %v1006_v3 = vpop.permute.xlu2 %1005 }
 0x5b8   :  { %v4006_v33 = vsel %vm3750_vm5, %v3622_v48, %v3878_v15  ;;  %v1187_v36 = vmul.f32 %v7514_v34, %v992_v45  ;;  %v2046_v48 = vperm.slane %v9288_v29, 1 }
 0x5b9   :  { %v2017_v63 = vpop.permute.xlu0 %2016  ;;  %v7026_v57 = vpack.i.bf16 %v5125_v25, %v4006_v33 }
 0x5ba   :  { %v2212_v31 = vmul.f32 %v7519_v51, %v2017_v63  ;;  %v4931_v0 = vpop.f32.mrf.mxu1 }
 0x5bb   :  { %7027 = vrot.lane.b32.xlu0 %v7026_v57, %s7099_s27 }
 0x5bc   :  { %v2340_v12 = vadd.f32 %v2212_v31, %v1187_v36 }
 0x5be   :  { %v3493_v20 = vadd.f32 %v3365_v27, %v2340_v12  ;;  %v10594_v27 = vld [vmem:[#allocation5_spill] sm:$0xff] }
 0x5bf   :  { %v3121_v49 = vpop.permute.xlu1 %3120  ;;  %3190 = vperm.xlu2 %6865, %v3185_v41   ;;  %v3135_v15 = vpop.permute.xlu2 %3134 }
 0x5c0   :  { %v3624_v24 = vadd.f32 %v9192_v7, %v3493_v20  ;;  %v3358_v62 = vmul.f32 %v7526_v40, %v3121_v49  ;;  %v3360_v43 = vmul.f32 %v7526_v40, %v3135_v15  ;;  %v2074_v15 = vperm.slane %v9288_v29, 5 }
 0x5c2   :  { %v3880_v37 = vmul.f32 0.2, %v3624_v24  ;;  %v3486_v38 = vadd.f32 %v3358_v62, %v2333_v5  ;;  %vm3752_vm7 = vcmp.gt.f32.partialorder %v3624_v24, 0.0  ;;  %v10595_v62 = vld [vmem:[#allocation22_spill] sm:$0xff] }
 0x5c3   :  { %2037 = vperm.xlu0 %6863, %v2032_v58   ;;  %v2081_v58 = vperm.slane %v9288_v29, 6 }
 0x5c4   :  { %v3617_v39 = vadd.f32 %v9192_v7, %v3486_v38  ;;  %v4008_v28 = vsel %vm3752_vm7, %v3624_v24, %v3880_v37 }
 0x5c5   :  { %v7031_v13 = vpack.i.bf16 %v5127_v4, %v4008_v28 }
 0x5c6   :  { %vm3745_vm8 = vcmp.gt.f32.partialorder %v3617_v39, 0.0  ;;  %v3873_v50 = vmul.f32 0.2, %v3617_v39 }
 0x5c7   :  { %7032 = vrot.lane.b32.xlu1 %v7031_v13, %s7099_s27  ;;  %v957_v63 = vpop.permute.xlu1 %956  ;;  %v971_v41 = vpop.permute.xlu2 %970  ;;  %v10596_v13 = vld [vmem:[#allocation10_spill] sm:$0xff] }
 0x5c8   :  { %v4719_v11 = vpop.f32.mrf.mxu0  ;;  %v4001_v22 = vsel %vm3745_vm8, %v3617_v39, %v3873_v50  ;;  %v1182_v20 = vmul.f32 %v7514_v34, %v957_v63  ;;  %v1189_v39 = vmul.f32 %v7514_v34, %v1006_v3 }
 0x5c9   :  { %v4720_v18 = vadd.f32 %v9182_v54, %v4719_v11  ;;  %6777 = vmatmul.msk.f32.gmra.mxu1 %vm4276_vm3, %v4001_v22 }
 0x5cb   :  { %v4929_v61 = vadd.f32 %v4928_v26, %v4720_v18  ;;  %1026 = vperm.xlu0 %6863, %v1021_v17  }
 0x5cd   :  { %vm5026_vm9 = vcmp.gt.f32.partialorder %v4929_v61, 0.0  ;;  %v5090_v45 = vmul.f32 0.2, %v4929_v61 }
 0x5cf   :  { %2051 = vperm.xlu1 %6864, %v2046_v48   ;;  %v9414_v25 = vsel %vm5026_vm9, %v4929_v61, %v5090_v45  ;;  %v2031_v12 = vpop.permute.xlu1 %2030  ;;  %v2045_v24 = vpop.permute.xlu2 %2044 }
 0x5d0   :  { %v4722_v47 = vpop.f32.mrf.mxu0  ;;  %6812 = vmatmul.msk.f32.gmra.mxu3 %vm4276_vm3, %v9414_v25  ;;  %v2214_v38 = vmul.f32 %v7519_v51, %v2031_v12 }
 0x5d1   :  { %v4723_v33 = vadd.f32 %v9182_v54, %v4722_v47 }
 0x5d2   :  { %v2342_v18 = vadd.f32 %v2214_v38, %v1189_v39  ;;  %v1184_v38 = vmul.f32 %v7514_v34, %v971_v41  ;;  %v10600_v39 = vld [vmem:[#allocation17_spill] sm:$0xff] }
 0x5d3   :  { %v9420_v57 = vadd.f32 %v4931_v0, %v4723_v33  ;;  %3204 = vperm.xlu0 %6863, %v3199_v9   ;;  %v10597_v9 = vld [vmem:[#allocation6_spill] sm:$0xff] }
 0x5d5   :  { %v7008_v36 = vpop.permute.xlu0 %7007 }
 0x5d6   :  { %v7010_v31 = vunpack.i.h.bf16 %v7008_v36  ;;  %v7009_v59 = vunpack.i.l.bf16 %v7008_v36 }
 0x5d8   :  { %v4331_v46 = vsel %vm4276_vm3, %v9387_v8, %v7010_v31  ;;  %v5303_v19 = vsel %vm4276_vm3, %v10594_v27, %v7009_v59  ;;  %v4645_v8 = vadd.f32 %v9182_v54, %v10595_v62 }
 0x5d9   :  { %4739 = vmatmul.f32.gmra.mxu0 %v4331_v46  ;;  %5483 = vmatmul.f32.gmra.mxu2 %v5303_v19 }
 0x5da   :  { %v4854_v50 = vadd.f32 %v10596_v13, %v4645_v8 }
 0x5db   :  { %2065 = vperm.xlu0 %6863, %v2060_v1  }
 0x5dc   :  { %v5065_v63 = vmul.f32 0.2, %v4854_v50  ;;  %vm5001_vm12 = vcmp.gt.f32.partialorder %v4854_v50, 0.0 }
 0x5dd   :  { %v1982_v16 = vpop.permute.xlu0 %1981 }
 0x5de   :  { %v2207_v49 = vmul.f32 %v7519_v51, %v1982_v16  ;;  %v5129_v27 = vsel %vm5001_vm12, %v4854_v50, %v5065_v63 }
 0x5e0   :  { %v2335_v5 = vadd.f32 %v2207_v49, %v1182_v20  ;;  %v10598_v20 = vld [vmem:[#allocation7_spill] sm:$0xff] }
 0x5e2   :  { %v3488_v37 = vadd.f32 %v3360_v43, %v2335_v5  ;;  %v10599_v43 = vld [vmem:[#allocation15_spill] sm:$0xff] }
 0x5e3   :  { %2086 = vperm.xlu0 %6863, %v2081_v58   ;;  %v4651_v5 = vadd.f32 %v9182_v54, %v10599_v43 }
 0x5e4   :  { %v3619_v4 = vadd.f32 %v9192_v7, %v3488_v37  ;;  %v2216_v37 = vmul.f32 %v7519_v51, %v2045_v24 }
 0x5e5   :  { %v7013_v28 = vpop.permute.xlu1 %7012  ;;  %v3184_v11 = vpop.permute.xlu0 %3183 }
 0x5e6   :  { %v7015_v17 = vunpack.i.h.bf16 %v7013_v28  ;;  %v7014_v26 = vunpack.i.l.bf16 %v7013_v28  ;;  %vm3747_vm11 = vcmp.gt.f32.partialorder %v3619_v4, 0.0  ;;  %v3367_v61 = vmul.f32 %v7526_v40, %v3184_v11 }
 0x5e7   :  { %v3875_v48 = vmul.f32 0.2, %v3619_v4  ;;  %v4860_v28 = vadd.f32 %v10600_v39, %v4651_v5  ;;  %v3213_v39 = vperm.slane %v9311_v56, 3 }
 0x5e8   :  { %v4332_v45 = vsel %vm4276_vm3, %v4001_v22, %v7015_v17  ;;  %v5304_v47 = vsel %vm4276_vm3, %v10597_v9, %v7014_v26  ;;  %v3495_v33 = vadd.f32 %v3367_v61, %v2342_v18  ;;  %v1035_v26 = vperm.slane %v9297_v14, 3 }
 0x5e9   :  { %v7018_v3 = vpop.permute.xlu2 %7017  ;;  %4742 = vmatmul.f32.gmra.mxu0 %v4332_v45  ;;  %v4003_v0 = vsel %vm3747_vm11, %v3619_v4, %v3875_v48  ;;  %5486 = vmatmul.f32.gmra.mxu2 %v5304_v47  ;;  %vm5003_vm14 = vcmp.gt.f32.partialorder %v4860_v28, 0.0 }
 0x5ea   :  { %6778 = vmatmul.msk.f32.gmra.mxu1 %vm4276_vm3, %v4003_v0  ;;  %v3626_v36 = vadd.f32 %v9192_v7, %v3495_v33  ;;  %v7020_v31 = vunpack.i.h.bf16 %v7018_v3  ;;  %v7019_v59 = vunpack.i.l.bf16 %v7018_v3  ;;  %v4934_v33 = vpop.f32.mrf.mxu1 }
 0x5eb   :  { %2079 = vperm.xlu0 %6863, %v2074_v15   ;;  %v5067_v15 = vmul.f32 0.2, %v4860_v28 }
 0x5ec   :  { %vm3754_vm13 = vcmp.gt.f32.partialorder %v3626_v36, 0.0  ;;  %v3882_v1 = vmul.f32 0.2, %v3626_v36  ;;  %v4333_v16 = vsel %vm4276_vm3, %v4003_v0, %v7020_v31  ;;  %v5305_v49 = vsel %vm4276_vm3, %v10598_v20, %v7019_v59  ;;  %v9471_v20 = vpop.f32.mrf.mxu3 }
 0x5ed   :  { %v1996_v22 = vpop.permute.xlu1 %1995  ;;  %v1020_v46 = vpop.permute.xlu0 %1019  ;;  %v5131_v31 = vsel %vm5003_vm14, %v4860_v28, %v5067_v15  ;;  %v10602_v15 = vld [vmem:[#allocation14_spill] sm:$0xff] }
 0x5ee   :  { %v4010_v19 = vsel %vm3754_vm13, %v3626_v36, %v3882_v1  ;;  %v1191_v62 = vmul.f32 %v7514_v34, %v1020_v46  ;;  %v2209_v8 = vmul.f32 %v7519_v51, %v1996_v22  ;;  %v1056_v22 = vperm.slane %v9297_v14, 6 }
 0x5ef   :  { %v7036_v12 = vpack.i.bf16 %v5129_v27, %v4010_v19 }
 0x5f0   :  { %v2344_v13 = vadd.f32 %v2216_v37, %v1191_v62  ;;  %v2337_v11 = vadd.f32 %v2209_v8, %v1184_v38 }
 0x5f1   :  { %v3212_v58 = vpop.permute.xlu2 %3211  ;;  %4745 = vmatmul.f32.gmra.mxu0 %v4333_v16  ;;  %5489 = vmatmul.f32.gmra.mxu2 %v5305_v49 }
 0x5f2   :  { %7037 = vrot.lane.b32.xlu2 %v7036_v12, %s7099_s27  ;;  %v4937_v62 = vpop.f32.mrf.mxu1  ;;  %v3371_v8 = vmul.f32 %v7526_v40, %v3212_v58  ;;  %v9487_v58 = vld [vmem:[%s10503_s4] ss:$0 sm:$0xff] }
 0x5f5   :  { %v3198_v4 = vpop.permute.xlu1 %3197  ;;  %v3149_v17 = vpop.permute.xlu0 %3148 }
 0x5f6   :  { %v3369_v50 = vmul.f32 %v7526_v40, %v3198_v4  ;;  %v3362_v18 = vmul.f32 %v7526_v40, %v3149_v17  ;;  %v1049_v17 = vperm.slane %v9297_v14, 5 }
 0x5f8   :  { %v3497_v61 = vadd.f32 %v3369_v50, %v2344_v13  ;;  %v3490_v48 = vadd.f32 %v3362_v18, %v2337_v11 }
 0x5f9   :  { %v2010_v9 = vpop.permute.xlu2 %2009 }
 0x5fa   :  { %v3628_v45 = vadd.f32 %v9192_v7, %v3497_v61  ;;  %1040 = vperm.xlu2 %6865, %v1035_v26   ;;  %v4725_v24 = vpop.f32.mrf.mxu0  ;;  %v3621_v41 = vadd.f32 %v9192_v7, %v3490_v48  ;;  %v2211_v28 = vmul.f32 %v7519_v51, %v2010_v9  ;;  %v10601_v61 = vld [vmem:[#allocation8_spill] sm:$0xff] }
 0x5fb   :  { %v4726_v47 = vadd.f32 %v9182_v54, %v4725_v24  ;;  %v4657_v48 = vadd.f32 %v9487_v58, %v10601_v61 }
 0x5fc   :  { %vm3756_vm15 = vcmp.gt.f32.partialorder %v3628_v45, 0.0  ;;  %v3884_v3 = vmul.f32 0.2, %v3628_v45  ;;  %vm3749_vm0 = vcmp.gt.f32.partialorder %v3621_v41, 0.0  ;;  %v3877_v36 = vmul.f32 0.2, %v3621_v41 }
 0x5fd   :  { %v4935_v0 = vadd.f32 %v4934_v33, %v4726_v47  ;;  %v2059_v63 = vpop.permute.xlu1 %2058  ;;  %v1034_v1 = vpop.permute.xlu0 %1033  ;;  %v10603_v33 = vld [vmem:[#allocation19_spill] sm:$0xff] }
 0x5fe   :  { %v2218_v59 = vmul.f32 %v7519_v51, %v2059_v63  ;;  %v4012_v46 = vsel %vm3756_vm15, %v3628_v45, %v3884_v3  ;;  %v1193_v7 = vmul.f32 %v7514_v34, %v1034_v1  ;;  %v9464_v19 = vsel %vm3749_vm0, %v3621_v41, %v3877_v36  ;;  %v9496_v41 = vld [vmem:[%s10499_s3] ss:$0 sm:$0xff] }
 0x5ff   :  { %v5092_v27 = vmul.f32 0.2, %v4935_v0  ;;  %v7041_v12 = vpack.i.bf16 %v5131_v31, %v4012_v46  ;;  %6779 = vmatmul.msk.f32.gmra.mxu1 %vm4276_vm3, %v9464_v19  ;;  %vm5028_vm1 = vcmp.gt.f32.partialorder %v4935_v0, 0.0  ;;  %v4866_v3 = vadd.f32 %v10603_v33, %v4657_v48 }
 0x600   :  { %v2346_v43 = vadd.f32 %v2218_v59, %v1193_v7  ;;  %v3234_v59 = vperm.slane %v9311_v56, 6  ;;  %vm5021_vm0 = vcmp.gt.f32.partialorder %v9254_v60, 0.0 }
 0x601   :  { %7042 = vrot.lane.b32.xlu1 %v7041_v12, %s7099_s27  ;;  %v9469_v16 = vsel %vm5028_vm1, %v4935_v0, %v5092_v27  ;;  %v3163_v37 = vpop.permute.xlu2 %3162  ;;  %v10604_v0 = vld [vmem:[#allocation29_spill] sm:$0xff]  ;;  %v5069_v12 = vmul.f32 0.2, %v4866_v3  ;;  %vm5005_vm5 = vcmp.gt.f32.partialorder %v4866_v3, 0.0  ;;  %vm5019_vm1 = vcmp.gt.f32.partialorder %v9227_v10, 0.0 }
 0x602   :  { %1061 = vperm.xlu2 %6865, %v1056_v22   ;;  %v4728_v49 = vpop.f32.mrf.mxu0  ;;  %6813 = vmatmul.msk.f32.gmra.mxu3 %vm4276_vm3, %v9469_v16  ;;  %v3499_v26 = vadd.f32 %v3371_v8, %v2346_v43  ;;  %v4675_v63 = vadd.f32 %v9487_v58, %v10604_v0  ;;  %v3227_v22 = vperm.slane %v9311_v56, 5  ;;  %v10607_v8 = vld [vmem:[#allocation27_spill] sm:$0xff] }
 0x603   :  { %v4729_v5 = vadd.f32 %v9182_v54, %v4728_v49  ;;  %v3364_v54 = vmul.f32 %v7526_v40, %v3163_v37  ;;  %v10605_v49 = vld [vmem:[#allocation28_spill] sm:$0xff]  ;;  %v4663_v37 = vadd.f32 %v9487_v58, %v10607_v8 }
 0x604   :  { %v3630_v9 = vadd.f32 %v9496_v41, %v3499_v26  ;;  %v4884_v43 = vadd.f32 %v10605_v49, %v4675_v63 }
 0x605   :  { %v9477_v38 = vadd.f32 %v4937_v62, %v4729_v5  ;;  %v985_v4 = vpop.permute.xlu1 %984  ;;  %v7023_v50 = vpop.permute.xlu0 %7022  ;;  %v10606_v5 = vld [vmem:[#allocation3_spill] sm:$0xff] }
 0x606   :  { %v1186_v13 = vmul.f32 %v7514_v34, %v985_v4  ;;  %v7024_v11 = vunpack.i.l.bf16 %v7023_v50  ;;  %v7025_v36 = vunpack.i.h.bf16 %v7023_v50  ;;  %v3886_v27 = vmul.f32 0.2, %v3630_v9 }
 0x607   :  { %vm3758_vm4 = vcmp.gt.f32.partialorder %v3630_v9, 0.0  ;;  %v5075_v48 = vmul.f32 0.2, %v4884_v43  ;;  %vm5011_vm6 = vcmp.gt.f32.partialorder %v4884_v43, 0.0 }
 0x608   :  { %v2339_v18 = vadd.f32 %v2211_v28, %v1186_v13  ;;  %v5306_v45 = vsel %vm4276_vm3, %v10602_v15, %v7024_v11  ;;  %v5307_v62 = vsel %vm4276_vm3, %v10606_v5, %v7025_v36  ;;  %v4014_v50 = vsel %vm3758_vm4, %v3630_v9, %v3886_v27  ;;  %v10609_v15 = vld [vmem:[#allocation23_spill] sm:$0xff]  ;;  %v10610_v36 = vld [vmem:[#allocation21_spill] sm:$0xff] }
 0x609   :  { %3218 = vperm.xlu1 %6864, %v3213_v39   ;;  %5492 = vmatmul.f32.gmra.mxu2 %v5306_v45  ;;  %v4872_v45 = vadd.f32 %v10609_v15, %v4663_v37  ;;  %v4681_v5 = vadd.f32 %v9487_v58, %v8976_v42  ;;  %vm5025_vm4 = vcmp.gt.f32.partialorder %v9361_v6, 0.0 }
 0x60a   :  { %v3492_v24 = vadd.f32 %v3364_v54, %v2339_v18  ;;  %1054 = vperm.xlu2 %6865, %v1049_v17   ;;  %v10608_v17 = vld [vmem:[#allocation33_spill] sm:$0xff]  ;;  %v5133_v54 = vsel %vm5005_vm5, %v4866_v3, %v5069_v12 }
 0x60b   :  { %v4669_v26 = vadd.f32 %v9487_v58, %v10608_v17  ;;  %v5071_v27 = vmul.f32 0.2, %v4872_v45  ;;  %vm5007_vm8 = vcmp.gt.f32.partialorder %v4872_v45, 0.0 }
 0x60c   :  { %v3623_v47 = vadd.f32 %v9496_v41, %v3492_v24 }
 0x60d   :  { %v2073_v31 = vpop.permute.xlu1 %2072  ;;  %v1048_v1 = vpop.permute.xlu0 %1047  ;;  %v4878_v9 = vadd.f32 %v10610_v36, %v4669_v26 }
 0x60e   :  { %vm3751_vm2 = vcmp.gt.f32.partialorder %v3623_v47, 0.0  ;;  %v3879_v46 = vmul.f32 0.2, %v3623_v47  ;;  %v2220_v39 = vmul.f32 %v7519_v51, %v2073_v31  ;;  %v1195_v28 = vmul.f32 %v7514_v34, %v1048_v1  ;;  %v2024_v31 = vpop.permute.xlu2 %2023 }
 0x60f   :  { %v5139_v1 = vsel %vm5011_vm6, %v4884_v43, %v5075_v48  ;;  %v2213_v49 = vmul.f32 %v7519_v51, %v2024_v31  ;;  %v5073_v43 = vmul.f32 0.2, %v4878_v9  ;;  %vm5009_vm11 = vcmp.gt.f32.partialorder %v4878_v9, 0.0 }
 0x610   :  { %v9505_v7 = vsel %vm3751_vm2, %v3623_v47, %v3879_v46  ;;  %v7046_v47 = vpack.i.bf16 %v5133_v54, %v4014_v50  ;;  %v2348_v33 = vadd.f32 %v2220_v39, %v1195_v28  ;;  %v2088_v39 = vperm.slane %v9288_v29, 7 }
 0x611   :  { %3239 = vperm.xlu1 %6864, %v3234_v59   ;;  %6780 = vmatmul.msk.f32.gmra.mxu1 %vm4276_vm3, %v9505_v7  ;;  %v5135_v28 = vsel %vm5007_vm8, %v4872_v45, %v5071_v27  ;;  %v5137_v17 = vsel %vm5009_vm11, %v4878_v9, %v5073_v43  ;;  %v1063_v48 = vperm.slane %v9297_v14, 7  ;;  %vm5027_vm2 = vcmp.gt.f32.partialorder %v9420_v57, 0.0 }
 0x612   :  { %3232 = vperm.xlu2 %6865, %v3227_v22   ;;  %5495 = vmatmul.f32.gmra.mxu2 %v5307_v62  ;;  %v4731_v4 = vpop.f32.mrf.mxu0  ;;  %v4940_v11 = vpop.f32.mrf.mxu1 }
 0x613   :  { %v4732_v13 = vadd.f32 %v9487_v58, %v4731_v4  ;;  %v9525_v22 = vpop.f32.mrf.mxu3 }
 0x615   :  { %v4941_v18 = vadd.f32 %v4940_v11, %v4732_v13  ;;  %v999_v61 = vpop.permute.xlu1 %998  ;;  %v3226_v24 = vpop.permute.xlu0 %3225  ;;  %v4890_v11 = vadd.f32 %v8980_v52, %v4681_v5  ;;  %v10612_v52 = vld [vmem:[#allocation42_spill] sm:$0xff] }
 0x616   :  { %v3373_v63 = vmul.f32 %v7526_v40, %v3226_v24  ;;  %v1188_v46 = vmul.f32 %v7514_v34, %v999_v61 }
 0x617   :  { %vm5030_vm7 = vcmp.gt.f32.partialorder %v4941_v18, 0.0  ;;  %v5094_v0 = vmul.f32 0.2, %v4941_v18  ;;  %v5077_v15 = vmul.f32 0.2, %v4890_v11  ;;  %vm5013_vm13 = vcmp.gt.f32.partialorder %v4890_v11, 0.0 }
 0x618   :  { %v3501_v59 = vadd.f32 %v3373_v63, %v2348_v33  ;;  %v2341_v37 = vadd.f32 %v2213_v49, %v1188_v46  ;;  %v10613_v49 = vld [vmem:[#allocation9_spill] sm:$0xff] }
 0x619   :  { %7047 = vrot.lane.b32.xlu1 %v7046_v47, %s7099_s27  ;;  %v9523_v3 = vsel %vm5030_vm7, %v4941_v18, %v5094_v0  ;;  %v10611_v18 = vld [vmem:[#allocation30_spill] sm:$0xff]  ;;  %v5141_v33 = vsel %vm5013_vm13, %v4890_v11, %v5077_v15  ;;  %v1013_v0 = vpop.permute.xlu2 %1012 }
 0x61a   :  { %5235 = vrot.lane.b32.xlu2 %v5139_v1, %s7099_s27  ;;  %6814 = vmatmul.msk.f32.gmra.mxu3 %vm4276_vm3, %v9523_v3  ;;  %v3632_v12 = vadd.f32 %v9496_v41, %v3501_v59  ;;  %v4687_v61 = vadd.f32 %v9487_v58, %v10611_v18  ;;  %v3241_v59 = vperm.slane %v9311_v56, 7  ;;  %v5085_v56 = vmul.f32 0.2, %v9254_v60 }
 0x61c   :  { %vm3760_vm9 = vcmp.gt.f32.partialorder %v3632_v12, 0.0  ;;  %v3888_v62 = vmul.f32 0.2, %v3632_v12  ;;  %v4896_v24 = vadd.f32 %v10612_v52, %v4687_v61 }
 0x61d   :  { %v3177_v8 = vpop.permute.xlu1 %3176 }
 0x61e   :  { %v3366_v4 = vmul.f32 %v7526_v40, %v3177_v8  ;;  %v4016_v13 = vsel %vm3760_vm9, %v3632_v12, %v3888_v62  ;;  %v5079_v36 = vmul.f32 0.2, %v4896_v24  ;;  %vm5015_vm14 = vcmp.gt.f32.partialorder %v4896_v24, 0.0 }
 0x61f   :  { %v7051_v26 = vpack.i.bf16 %v5135_v28, %v4016_v13  ;;  %v5083_v8 = vmul.f32 0.2, %v9227_v10  ;;  %v1190_v28 = vmul.f32 %v7514_v34, %v1013_v0 }
 0x620   :  { %v3494_v50 = vadd.f32 %v3366_v4, %v2341_v37  ;;  %v5143_v27 = vsel %vm5015_vm14, %v4896_v24, %v5079_v36  ;;  %v10614_v24 = vld [vmem:[#allocation20_spill] sm:$0xff] }
 0x621   :  { %5233 = vrot.lane.b32.xlu1 %v5137_v17, %s7099_s27  ;;  %v4734_v54 = vpop.f32.mrf.mxu0  ;;  %7052 = vrot.lane.b32.xlu0 %v7051_v26, %s7099_s27  ;;  %v4943_v47 = vpop.f32.mrf.mxu1  ;;  %v5149_v26 = vsel %vm5021_vm0, %v9254_v60, %v5085_v56  ;;  %vm5029_vm0 = vcmp.gt.f32.partialorder %v9477_v38, 0.0 }
 0x622   :  { %v3625_v42 = vadd.f32 %v9496_v41, %v3494_v50  ;;  %2093 = vperm.xlu2 %6865, %v2088_v39   ;;  %v3191_v37 = vpop.permute.xlu2 %3190  ;;  %v9562_v39 = vpop.f32.mrf.mxu3  ;;  %v4735_v0 = vadd.f32 %v9487_v58, %v4734_v54 }
 0x623   :  { %v3368_v50 = vmul.f32 %v7526_v40, %v3191_v37  ;;  %v10615_v37 = vld [vmem:[#allocation11_spill] sm:$0xff] }
 0x624   :  { %vm3753_vm12 = vcmp.gt.f32.partialorder %v3625_v42, 0.0  ;;  %v3881_v29 = vmul.f32 0.2, %v3625_v42 }
 0x626   :  { %v9544_v45 = vsel %vm3753_vm12, %v3625_v42, %v3881_v29  ;;  %v5147_v42 = vsel %vm5019_vm1, %v9227_v10, %v5083_v8 }
 0x627   :  { %6781 = vmatmul.msk.f32.gmra.mxu1 %vm4276_vm3, %v9544_v45 }
 0x629   :  { %1068 = vperm.xlu1 %6864, %v1063_v48   ;;  %5237 = vrot.lane.b32.xlu0 %v5141_v33, %s7099_s27  ;;  %v4737_v63 = vpop.f32.mrf.mxu0  ;;  %v5091_v48 = vmul.f32 0.2, %v9420_v57  ;;  %v5089_v33 = vmul.f32 0.2, %v9361_v6 }
 0x62a   :  { %v4738_v1 = vadd.f32 %v9487_v58, %v4737_v63 }
 0x62b   :  { %v5155_v36 = vsel %vm5027_vm2, %v9420_v57, %v5091_v48 }
 0x62d   :  { %v7028_v9 = vpop.permute.xlu0 %7027 }
 0x62e   :  { %v7030_v14 = vunpack.i.h.bf16 %v7028_v9  ;;  %v7029_v31 = vunpack.i.l.bf16 %v7028_v9 }
 0x630   :  { %v4946_v46 = vpop.f32.mrf.mxu1  ;;  %v4334_v12 = vsel %vm4276_vm3, %v9464_v19, %v7029_v31  ;;  %v5308_v43 = vsel %vm4276_vm3, %v10613_v49, %v7030_v14  ;;  %v5153_v31 = vsel %vm5025_vm4, %v9361_v6, %v5089_v33 }
 0x631   :  { %v4947_v5 = vadd.f32 %v4946_v46, %v4738_v1  ;;  %5239 = vrot.lane.b32.xlu1 %v5143_v27, %s7099_s27  ;;  %4748 = vmatmul.f32.gmra.mxu0 %v4334_v12 }
 0x632   :  { %3246 = vperm.xlu0 %6863, %v3241_v59   ;;  %5498 = vmatmul.f32.gmra.mxu2 %v5308_v43 }
 0x633   :  { %vm5032_vm15 = vcmp.gt.f32.partialorder %v4947_v5, 0.0  ;;  %v5096_v62 = vmul.f32 0.2, %v4947_v5 }
 0x635   :  { %v2038_v4 = vpop.permute.xlu0 %2037  ;;  %v9560_v19 = vsel %vm5032_vm15, %v4947_v5, %v5096_v62  ;;  %vm5023_vm15 = vcmp.gt.f32.partialorder %v9313_v32, 0.0 }
 0x636   :  { %v2215_v13 = vmul.f32 %v7519_v51, %v2038_v4  ;;  %6815 = vmatmul.msk.f32.gmra.mxu3 %vm4276_vm3, %v9560_v19 }
 0x638   :  { %v2343_v17 = vadd.f32 %v2215_v13, %v1190_v28 }
 0x639   :  { %v7033_v11 = vpop.permute.xlu1 %7032  ;;  %5245 = vrot.lane.b32.xlu1 %v5149_v26, %s7099_s27 }
 0x63a   :  { %v3496_v18 = vadd.f32 %v3368_v50, %v2343_v17  ;;  %v7035_v61 = vunpack.i.h.bf16 %v7033_v11  ;;  %v7034_v29 = vunpack.i.l.bf16 %v7033_v11  ;;  %5243 = vrot.lane.b32.xlu0 %v5147_v42, %s7099_s27 }
 0x63c   :  { %v3627_v15 = vadd.f32 %v9496_v41, %v3496_v18  ;;  %v4335_v52 = vsel %vm4276_vm3, %v9505_v7, %v7034_v29  ;;  %v5309_v60 = vsel %vm4276_vm3, %v10614_v24, %v7035_v61  ;;  %v4944_v7 = vadd.f32 %v4943_v47, %v4735_v0 }
 0x63d   :  { %v1027_v10 = vpop.permute.xlu0 %1026  ;;  %4751 = vmatmul.f32.gmra.mxu0 %v4335_v52  ;;  %5501 = vmatmul.f32.gmra.mxu2 %v5309_v60  ;;  %v9607_v60 = vpop.f32.mrf.mxu3 }
 0x63e   :  { %vm3755_vm5 = vcmp.gt.f32.partialorder %v3627_v15, 0.0  ;;  %v3883_v63 = vmul.f32 0.2, %v3627_v15  ;;  %v1192_v59 = vmul.f32 %v7514_v34, %v1027_v10  ;;  %v5095_v1 = vmul.f32 0.2, %v4944_v7 }
 0x63f   :  { %vm5031_vm6 = vcmp.gt.f32.partialorder %v4944_v7, 0.0 }
 0x640   :  { %v4011_v9 = vsel %vm3755_vm5, %v3627_v15, %v3883_v63  ;;  %v5159_v12 = vsel %vm5031_vm6, %v4944_v7, %v5095_v1 }
 0x641   :  { %v2052_v14 = vpop.permute.xlu1 %2051  ;;  %5251 = vrot.lane.b32.xlu1 %v5155_v36, %s7099_s27  ;;  %6782 = vmatmul.msk.f32.gmra.mxu1 %vm4276_vm3, %v4011_v9 }
 0x642   :  { %v2217_v54 = vmul.f32 %v7519_v51, %v2052_v14  ;;  %5249 = vrot.lane.b32.xlu0 %v5153_v31, %s7099_s27  ;;  %v10616_v14 = vld [vmem:[#allocation13_spill] sm:$0xff] }
 0x644   :  { %v2345_v27 = vadd.f32 %v2217_v54, %v1192_v59 }
 0x645   :  { %v3205_v46 = vpop.permute.xlu0 %3204 }
 0x646   :  { %v3370_v57 = vmul.f32 %v7526_v40, %v3205_v46  ;;  %v4949_v50 = vpop.f32.mrf.mxu1 }
 0x648   :  { %v3498_v47 = vadd.f32 %v3370_v57, %v2345_v27 }
 0x64a   :  { %v3629_v49 = vadd.f32 %v9496_v41, %v3498_v47  ;;  %5255 = vrot.lane.b32.xlu0 %v5159_v12, %s7099_s27 }
 0x64c   :  { %v7038_v6 = vpop.permute.xlu2 %7037  ;;  %vm3757_vm7 = vcmp.gt.f32.partialorder %v3629_v49, 0.0  ;;  %v3885_v43 = vmul.f32 0.2, %v3629_v49 }
 0x64d   :  { %v7040_v5 = vunpack.i.h.bf16 %v7038_v6  ;;  %v7039_v62 = vunpack.i.l.bf16 %v7038_v6 }
 0x64e   :  { %v9594_v56 = vsel %vm3757_vm7, %v3629_v49, %v3885_v43 }
 0x64f   :  { %v4336_v8 = vsel %vm4276_vm3, %v9544_v45, %v7039_v62  ;;  %6783 = vmatmul.msk.f32.gmra.mxu1 %vm4276_vm3, %v9594_v56  ;;  %v5310_v4 = vsel %vm4276_vm3, %v10615_v37, %v7040_v5  ;;  %v2066_v45 = vpop.permute.xlu0 %2065  ;;  %v4693_v5 = vadd.f32 %v9487_v58, %v9169_v55 }
 0x650   :  { %4754 = vmatmul.f32.gmra.mxu0 %v4336_v8  ;;  %5504 = vmatmul.f32.gmra.mxu2 %v5310_v4  ;;  %v2219_v46 = vmul.f32 %v7519_v51, %v2066_v45 }
 0x654   :  { %v1041_v26 = vpop.permute.xlu2 %1040 }
 0x655   :  { %v1194_v54 = vmul.f32 %v7514_v34, %v1041_v26 }
 0x656   :  { %v4740_v28 = vpop.f32.mrf.mxu0 }
 0x657   :  { %v4741_v13 = vadd.f32 %v9487_v58, %v4740_v28  ;;  %v2087_v33 = vpop.permute.xlu0 %2086  ;;  %v2347_v47 = vadd.f32 %v2219_v46, %v1194_v54 }
 0x658   :  { %v2222_v4 = vmul.f32 %v7519_v51, %v2087_v33 }
 0x659   :  { %v4950_v17 = vadd.f32 %v4949_v50, %v4741_v13  ;;  %v4902_v13 = vadd.f32 %v9162_v35, %v4693_v5 }
 0x65b   :  { %v5097_v11 = vmul.f32 0.2, %v4950_v17  ;;  %vm5033_vm8 = vcmp.gt.f32.partialorder %v4950_v17, 0.0  ;;  %v5081_v45 = vmul.f32 0.2, %v4902_v13  ;;  %vm5017_vm12 = vcmp.gt.f32.partialorder %v4902_v13, 0.0 }
 0x65c   :  { %v1062_v18 = vpop.permute.xlu2 %1061 }
 0x65d   :  { %v5161_v42 = vsel %vm5033_vm8, %v4950_v17, %v5097_v11  ;;  %v1197_v62 = vmul.f32 %v7514_v34, %v1062_v18 }
 0x65e   :  { %5257 = vrot.lane.b32.xlu1 %v5161_v42, %s7099_s27 }
 0x65f   :  { %v2080_v59 = vpop.permute.xlu0 %2079  ;;  %v2350_v17 = vadd.f32 %v2222_v4, %v1197_v62 }
 0x660   :  { %v2221_v12 = vmul.f32 %v7519_v51, %v2080_v59 }
 0x664   :  { %v1055_v0 = vpop.permute.xlu2 %1054 }
 0x665   :  { %v1196_v27 = vmul.f32 %v7514_v34, %v1055_v0 }
 0x666   :  { %v4743_v61 = vpop.f32.mrf.mxu0 }
 0x667   :  { %v4744_v29 = vadd.f32 %v9487_v58, %v4743_v61  ;;  %v4952_v48 = vpop.f32.mrf.mxu1  ;;  %v2349_v6 = vadd.f32 %v2221_v12, %v1196_v27  ;;  %v10618_v12 = vld [vmem:[#allocation31_spill] sm:$0xff] }
 0x669   :  { %v4953_v15 = vadd.f32 %v4952_v48, %v4744_v29  ;;  %v5145_v48 = vsel %vm5017_vm12, %v4902_v13, %v5081_v45  ;;  %v5871_v45 = vld [vmem:[%s10619_s28 + $0x70] sm:$0xff] }
 0x66b   :  { %vm5034_vm9 = vcmp.gt.f32.partialorder %v4953_v15, 0.0  ;;  %v5098_v52 = vmul.f32 0.2, %v4953_v15 }
 0x66c   :  { %v3233_v1 = vpop.permute.xlu2 %3232 }
 0x66d   :  { %v9605_v24 = vsel %vm5034_vm9, %v4953_v15, %v5098_v52  ;;  %v3374_v49 = vmul.f32 %v7526_v40, %v3233_v1 }
 0x66e   :  { %6816 = vmatmul.msk.f32.gmra.mxu3 %vm4276_vm3, %v9605_v24 }
 0x66f   :  { %v3502_v8 = vadd.f32 %v3374_v49, %v2349_v6  ;;  %v5880_v6 = vld [vmem:[%s10619_s28 + $0xb8] sm:$0xff] }
 0x670   :  { %6006 = vmatpush.msrb.mxu2 %v5880_v6  ;;  %v9705_v6 = vld [vmem:[%s10624_s29] ss:$0 sm:$0xff] }
 0x671   :  { %v3633_v26 = vadd.f32 %v9496_v41, %v3502_v8 }
 0x673   :  { %v7043_v10 = vpop.permute.xlu1 %7042  ;;  %v3889_v61 = vmul.f32 0.2, %v3633_v26  ;;  %vm3761_vm13 = vcmp.gt.f32.partialorder %v3633_v26, 0.0 }
 0x674   :  { %v7045_v63 = vunpack.i.h.bf16 %v7043_v10  ;;  %v7044_v36 = vunpack.i.l.bf16 %v7043_v10 }
 0x675   :  { %v9630_v33 = vsel %vm3761_vm13, %v3633_v26, %v3889_v61 }
 0x676   :  { %v4337_v7 = vsel %vm4276_vm3, %v4011_v9, %v7044_v36  ;;  %v5311_v31 = vsel %vm4276_vm3, %v10616_v14, %v7045_v63  ;;  %v9634_v63 = vpop.f32.mrf.mxu2 }
 0x677   :  { %4757 = vmatmul.f32.gmra.mxu0 %v4337_v7  ;;  %5507 = vmatmul.f32.gmra.mxu2 %v5311_v31  ;;  %v10617_v7 = vld [vmem:[#allocation26_spill] sm:$0xff]  ;;  %v5087_v31 = vmul.f32 0.2, %v9313_v32 }
 0x67b   :  { %v3219_v57 = vpop.permute.xlu1 %3218 }
 0x67c   :  { %v3372_v9 = vmul.f32 %v7526_v40, %v3219_v57  ;;  %v5236_v57 = vpop.permute.xlu2 %5235  ;;  %v4955_v5 = vpop.f32.mrf.mxu1 }
 0x67e   :  { %v3500_v43 = vadd.f32 %v3372_v9, %v2347_v47  ;;  %v9643_v27 = vpop.f32.mrf.mxu2  ;;  %v5872_v9 = vld [vmem:[%s10619_s28 + $0x78] sm:$0xff] }
 0x67f   :  { %5933 = vmatpush.msrb.mxu3 %v5872_v9 }
 0x680   :  { %v3631_v37 = vadd.f32 %v9496_v41, %v3500_v43  ;;  %v4746_v43 = vpop.f32.mrf.mxu0 }
 0x681   :  { %v4747_v62 = vadd.f32 %v9487_v58, %v4746_v43  ;;  %5934 = vmatpush.msrb.mxu3 %v5871_v45 }
 0x682   :  { %vm3759_vm11 = vcmp.gt.f32.partialorder %v3631_v37, 0.0  ;;  %v3887_v28 = vmul.f32 0.2, %v3631_v37 }
 0x683   :  { %v3240_v50 = vpop.permute.xlu1 %3239  ;;  %v4956_v4 = vadd.f32 %v4955_v5, %v4747_v62  ;;  %v5473_v62 = vadd.f32 %v9705_v6, %v9634_v63 }
 0x684   :  { %v3375_v11 = vmul.f32 %v7526_v40, %v3240_v50  ;;  %v4015_v42 = vsel %vm3759_vm11, %v3631_v37, %v3887_v28  ;;  %v10620_v50 = vld [vmem:[#allocation12_spill] sm:$0xff]  ;;  %v2094_v26 = vpop.permute.xlu2 %2093 }
 0x685   :  { %6784 = vmatmul.msk.f32.gmra.mxu1 %vm4276_vm3, %v4015_v42  ;;  %vm5035_vm1 = vcmp.gt.f32.partialorder %v4956_v4, 0.0 }
 0x686   :  { %v3503_v55 = vadd.f32 %v3375_v11, %v2350_v17  ;;  %v9659_v37 = vpop.f32.mrf.mxu2 }
 0x688   :  { %v3634_v18 = vadd.f32 %v9496_v41, %v3503_v55  ;;  %v2223_v55 = vmul.f32 %v7519_v51, %v2094_v26 }
 0x68a   :  { %vm3762_vm14 = vcmp.gt.f32.partialorder %v3634_v18, 0.0  ;;  %v3890_v29 = vmul.f32 0.2, %v3634_v18 }
 0x68b   :  { %v7048_v35 = vpop.permute.xlu1 %7047 }
 0x68c   :  { %v7050_v15 = vunpack.i.h.bf16 %v7048_v35  ;;  %v7049_v52 = vunpack.i.l.bf16 %v7048_v35  ;;  %v4018_v0 = vsel %vm3762_vm14, %v3634_v18, %v3890_v29  ;;  %v10621_v35 = vld [vmem:[#allocation25_spill] sm:$0xff] }
 0x68d   :  { %6785 = vmatmul.msk.f32.gmra.mxu1 %vm4276_vm3, %v9630_v33  ;;  %v7056_v10 = vpack.i.bf16 %v5145_v48, %v4018_v0 }
 0x68e   :  { %v4338_v36 = vsel %vm4276_vm3, %v9594_v56, %v7049_v52  ;;  %v5312_v14 = vsel %vm4276_vm3, %v10617_v7, %v7050_v15  ;;  %v5151_v56 = vsel %vm5023_vm15, %v9313_v32, %v5087_v31  ;;  %v5093_v32 = vmul.f32 0.2, %v9477_v38  ;;  %v4958_v31 = vpop.f32.mrf.mxu1 }
 0x68f   :  { %7057 = vrot.lane.b32.xlu2 %v7056_v10, %s7099_s27  ;;  %4760 = vmatmul.f32.gmra.mxu0 %v4338_v36  ;;  %v5315_v15 = vsel %vm4276_vm3, %v10621_v35, %v5236_v57  ;;  %v10622_v36 = vld [vmem:[#allocation37_spill] sm:$0xff]  ;;  %v5870_v57 = vld [vmem:[%s10619_s28 + $0x68] sm:$0xff] }
 0x690   :  { %5510 = vmatmul.f32.gmra.mxu2 %v5312_v14  ;;  %v5157_v13 = vsel %vm5029_vm0, %v9477_v38, %v5093_v32  ;;  %5935 = vmatpush.msrb.mxu3 %v5870_v57 }
 0x693   :  { %v5234_v54 = vpop.permute.xlu1 %5233  ;;  %v7053_v59 = vpop.permute.xlu0 %7052 }
 0x694   :  { %v7055_v1 = vunpack.i.h.bf16 %v7053_v59  ;;  %v7054_v46 = vunpack.i.l.bf16 %v7053_v59  ;;  %v5314_v17 = vsel %vm4276_vm3, %v10620_v50, %v5234_v54 }
 0x696   :  { %v4339_v47 = vsel %vm4276_vm3, %v4015_v42, %v7054_v46  ;;  %v5313_v49 = vsel %vm4276_vm3, %v10618_v12, %v7055_v1  ;;  %v5099_v42 = vmul.f32 0.2, %v4956_v4  ;;  %v9685_v46 = vpop.f32.mrf.mxu3  ;;  %v10623_v12 = vld [vmem:[#allocation18_spill] sm:$0xff] }
 0x697   :  { %5247 = vrot.lane.b32.xlu2 %v5151_v56, %s7099_s27  ;;  %4763 = vmatmul.f32.gmra.mxu0 %v4339_v47  ;;  %v5879_v56 = vld [vmem:[%s10619_s28 + $0xb0] sm:$0xff]  ;;  %v5869_v47 = vld [vmem:[%s10619_s28 + $0x60] sm:$0xff] }
 0x698   :  { %5513 = vmatmul.f32.gmra.mxu2 %v5313_v49  ;;  %v5163_v29 = vsel %vm5035_vm1, %v4956_v4, %v5099_v42  ;;  %5936 = vmatpush.msrb.mxu3 %v5869_v47 }
 0x699   :  { %6007 = vmatpush.msrb.mxu2 %v5879_v56 }
 0x69b   :  { %v5238_v8 = vpop.permute.xlu0 %5237  ;;  %v1069_v28 = vpop.permute.xlu1 %1068 }
 0x69c   :  { %v1198_v11 = vmul.f32 %v7514_v34, %v1069_v28  ;;  %v9674_v34 = vpop.f32.mrf.mxu2  ;;  %v5316_v7 = vsel %vm4276_vm3, %v10622_v36, %v5238_v8 }
 0x69e   :  { %v2351_v38 = vadd.f32 %v2223_v55, %v1198_v11  ;;  %v9710_v28 = vpop.f32.mrf.mxu3 }
 0x69f   :  { %5253 = vrot.lane.b32.xlu2 %v5157_v13, %s7099_s27  ;;  %v5586_v13 = vadd.f32 %v9471_v20, %v5473_v62 }
 0x6a0   :  { %5516 = vmatmul.f32.gmra.mxu2 %v5314_v17 }
 0x6a1   :  { %v5713_v11 = vmul.f32 0.2, %v5586_v13  ;;  %vm5681_vm6 = vcmp.gt.f32.partialorder %v5586_v13, 0.0 }
 0x6a3   :  { %v5240_v1 = vpop.permute.xlu1 %5239  ;;  %v5745_v45 = vsel %vm5681_vm6, %v5586_v13, %v5713_v11 }
 0x6a4   :  { %v3247_v18 = vpop.permute.xlu0 %3246  ;;  %v9681_v14 = vpop.f32.mrf.mxu2  ;;  %v5317_v49 = vsel %vm4276_vm3, %v10623_v12, %v5240_v1 }
 0x6a5   :  { %v3376_v61 = vmul.f32 %v7526_v40, %v3247_v18  ;;  %v4961_v5 = vpop.f32.mrf.mxu1 }
 0x6a6   :  { %v5603_v42 = vpop.f32.mrf.mxu3 }
 0x6a7   :  { %v3504_v48 = vadd.f32 %v3376_v61, %v2351_v38  ;;  %5259 = vrot.lane.b32.xlu2 %v5163_v29, %s7099_s27 }
 0x6a8   :  { %5519 = vmatmul.f32.gmra.mxu2 %v5315_v15 }
 0x6a9   :  { %v3635_v51 = vadd.f32 %v9496_v41, %v3504_v48 }
 0x6ab   :  { %vm3763_vm2 = vcmp.gt.f32.partialorder %v3635_v51, 0.0  ;;  %v3891_v52 = vmul.f32 0.2, %v3635_v51 }
 0x6ac   :  { %v9700_v9 = vpop.f32.mrf.mxu2 }
 0x6ad   :  { %v4019_v0 = vsel %vm3763_vm2, %v3635_v51, %v3891_v52  ;;  %v5868_v52 = vld [vmem:[%s10619_s28 + $0x58] sm:$0xff] }
 0x6ae   :  { %6786 = vmatmul.msk.f32.gmra.mxu1 %vm4276_vm3, %v4019_v0  ;;  %v4749_v10 = vpop.f32.mrf.mxu0  ;;  %v9720_v15 = vpop.f32.mrf.mxu3  ;;  %v5878_v0 = vld [vmem:[%s10619_s28 + $0xa8] sm:$0xff]  ;;  %5937 = vmatpush.msrb.mxu3 %v5868_v52 }
 0x6af   :  { %v4750_v40 = vadd.f32 %v9487_v58, %v4749_v10  ;;  %6008 = vmatpush.msrb.mxu2 %v5878_v0 }
 0x6b0   :  { %5522 = vmatmul.f32.gmra.mxu2 %v5316_v7  ;;  %v5867_v7 = vld [vmem:[%s10619_s28 + $0x50] sm:$0xff] }
 0x6b1   :  { %v4959_v54 = vadd.f32 %v4958_v31, %v4750_v40  ;;  %5938 = vmatpush.msrb.mxu3 %v5867_v7 }
 0x6b3   :  { %v5100_v59 = vmul.f32 0.2, %v4959_v54  ;;  %vm5036_vm4 = vcmp.gt.f32.partialorder %v4959_v54, 0.0 }
 0x6b4   :  { %v5490_v17 = vpop.f32.mrf.mxu2 }
 0x6b5   :  { %v9683_v41 = vsel %vm5036_vm4, %v4959_v54, %v5100_v59  ;;  %v5491_v26 = vadd.f32 %v9705_v6, %v5490_v17 }
 0x6b6   :  { %6817 = vmatmul.msk.f32.gmra.mxu3 %vm4276_vm3, %v9683_v41  ;;  %v5609_v40 = vpop.f32.mrf.mxu3 }
 0x6b7   :  { %v5604_v55 = vadd.f32 %v5603_v42, %v5491_v26  ;;  %v5866_v26 = vld [vmem:[%s10619_s28 + $0x48] sm:$0xff] }
 0x6b8   :  { %5525 = vmatmul.f32.gmra.mxu2 %v5317_v49  ;;  %v5244_v49 = vpop.permute.xlu0 %5243  ;;  %5939 = vmatpush.msrb.mxu3 %v5866_v26 }
 0x6b9   :  { %v5719_v18 = vmul.f32 0.2, %v5604_v55  ;;  %vm5687_vm7 = vcmp.gt.f32.partialorder %v5604_v55, 0.0  ;;  %v5319_v62 = vsel %vm4276_vm3, %v9214_v30, %v5244_v49  ;;  %v5877_v30 = vld [vmem:[%s10619_s28 + $0xa0] sm:$0xff] }
 0x6ba   :  { %v4752_v43 = vpop.f32.mrf.mxu0  ;;  %6009 = vmatpush.msrb.mxu2 %v5877_v30 }
 0x6bb   :  { %v4753_v32 = vadd.f32 %v9487_v58, %v4752_v43  ;;  %v5751_v48 = vsel %vm5687_vm7, %v5604_v55, %v5719_v18 }
 0x6bc   :  { %v9717_v20 = vpop.f32.mrf.mxu2 }
 0x6bd   :  { %v4962_v8 = vadd.f32 %v4961_v5, %v4753_v32 }
 0x6be   :  { %v4964_v61 = vpop.f32.mrf.mxu1  ;;  %v9737_v31 = vpop.f32.mrf.mxu3 }
 0x6bf   :  { %v5101_v4 = vmul.f32 0.2, %v4962_v8  ;;  %vm5037_vm5 = vcmp.gt.f32.partialorder %v4962_v8, 0.0 }
 0x6c1   :  { %v5165_v50 = vsel %vm5037_vm5, %v4962_v8, %v5101_v4 }
 0x6c2   :  { %5261 = vrot.lane.b32.xlu0 %v5165_v50, %s7099_s27 }
 0x6c4   :  { %v5496_v10 = vpop.f32.mrf.mxu2 }
 0x6c5   :  { %v5497_v18 = vadd.f32 %v9705_v6, %v5496_v10  ;;  %v5250_v10 = vpop.permute.xlu0 %5249 }
 0x6c6   :  { %v9741_v56 = vpop.f32.mrf.mxu3 }
 0x6ca   :  { %5793 = vrot.lane.b32.xlu0 %v5745_v45, %s7099_s27 }
 0x6cc   :  { %v9732_v36 = vpop.f32.mrf.mxu2  ;;  %v4967_v4 = vpop.f32.mrf.mxu1 }
 0x6cd   :  { %v4755_v63 = vpop.f32.mrf.mxu0 }
 0x6ce   :  { %v4756_v38 = vadd.f32 %v9487_v58, %v4755_v63  ;;  %v9749_v32 = vpop.f32.mrf.mxu3 }
 0x6d0   :  { %v4965_v29 = vadd.f32 %v4964_v61, %v4756_v38 }
 0x6d2   :  { %v5102_v35 = vmul.f32 0.2, %v4965_v29  ;;  %5799 = vrot.lane.b32.xlu0 %v5751_v48, %s7099_s27  ;;  %vm5038_vm8 = vcmp.gt.f32.partialorder %v4965_v29, 0.0  ;;  %v5610_v48 = vadd.f32 %v5609_v40, %v5497_v18  ;;  %v5322_v40 = vsel %vm4276_vm3, %v9354_v53, %v5250_v10 }
 0x6d4   :  { %v9722_v51 = vsel %vm5038_vm8, %v4965_v29, %v5102_v35  ;;  %v9739_v59 = vpop.f32.mrf.mxu2  ;;  %v5721_v0 = vmul.f32 0.2, %v5610_v48  ;;  %vm5689_vm13 = vcmp.gt.f32.partialorder %v5610_v48, 0.0 }
 0x6d5   :  { %6818 = vmatmul.msk.f32.gmra.mxu3 %vm4276_vm3, %v9722_v51 }
 0x6d6   :  { %v5753_v7 = vsel %vm5689_vm13, %v5610_v48, %v5721_v0  ;;  %v5862_v48 = vld [vmem:[%s10619_s28 + $0x28] sm:$0xff] }
 0x6dc   :  { %v9747_v43 = vpop.f32.mrf.mxu2 }
 0x6e9   :  { %v7058_v54 = vpop.permute.xlu2 %7057 }
 0x6ea   :  { %v7060_v1 = vunpack.i.h.bf16 %v7058_v54  ;;  %v7059_v57 = vunpack.i.l.bf16 %v7058_v54 }
 0x6ec   :  { %v4340_v47 = vsel %vm4276_vm3, %v9630_v33, %v7059_v57  ;;  %v5318_v12 = vsel %vm4276_vm3, %v9056_v23, %v7060_v1  ;;  %v5479_v33 = vadd.f32 %v9705_v6, %v9659_v37  ;;  %v5246_v23 = vpop.permute.xlu1 %5245  ;;  %v5621_v37 = vpop.f32.mrf.mxu3 }
 0x6ed   :  { %4766 = vmatmul.f32.gmra.mxu0 %v4340_v47  ;;  %5528 = vmatmul.f32.gmra.mxu2 %v5318_v12  ;;  %v5320_v45 = vsel %vm4276_vm3, %v9242_v2, %v5246_v23  ;;  %v5865_v2 = vld [vmem:[%s10619_s28 + $0x40] sm:$0xff] }
 0x6ee   :  { %v5592_v11 = vadd.f32 %v9562_v39, %v5479_v33  ;;  %5940 = vmatpush.msrb.mxu3 %v5865_v2  ;;  %v5864_v33 = vld [vmem:[%s10619_s28 + $0x38] sm:$0xff] }
 0x6f0   :  { %v5715_v61 = vmul.f32 0.2, %v5592_v11  ;;  %vm5683_vm12 = vcmp.gt.f32.partialorder %v5592_v11, 0.0  ;;  %5941 = vmatpush.msrb.mxu3 %v5864_v33 }
 0x6f1   :  { %v5248_v39 = vpop.permute.xlu2 %5247 }
 0x6f2   :  { %v5747_v35 = vsel %vm5683_vm12, %v5592_v11, %v5715_v61  ;;  %v5321_v52 = vsel %vm4276_vm3, %v9301_v44, %v5248_v39 }
 0x6f4   :  { %v4758_v5 = vpop.f32.mrf.mxu0  ;;  %v5252_v47 = vpop.permute.xlu1 %5251 }
 0x6f5   :  { %v4759_v8 = vadd.f32 %v9487_v58, %v4758_v5  ;;  %5531 = vmatmul.f32.gmra.mxu2 %v5319_v62  ;;  %v5323_v62 = vsel %vm4276_vm3, %v9414_v25, %v5252_v47  ;;  %v5485_v25 = vadd.f32 %v9705_v6, %v9681_v14  ;;  %v5503_v14 = vadd.f32 %v9705_v6, %v9739_v59 }
 0x6f7   :  { %v4968_v13 = vadd.f32 %v4967_v4, %v4759_v8  ;;  %v9787_v8 = vpop.f32.mrf.mxu3  ;;  %v5616_v39 = vadd.f32 %v9741_v56, %v5503_v14 }
 0x6f9   :  { %v5103_v50 = vmul.f32 0.2, %v4968_v13  ;;  %vm5039_vm9 = vcmp.gt.f32.partialorder %v4968_v13, 0.0  ;;  %v5723_v56 = vmul.f32 0.2, %v5616_v39  ;;  %vm5691_vm2 = vcmp.gt.f32.partialorder %v5616_v39, 0.0 }
 0x6fa   :  { %v5508_v17 = vpop.f32.mrf.mxu2 }
 0x6fb   :  { %v5509_v42 = vadd.f32 %v9705_v6, %v5508_v17  ;;  %v5167_v55 = vsel %vm5039_vm9, %v4968_v13, %v5103_v50  ;;  %v5876_v13 = vld [vmem:[%s10619_s28 + $0x98] sm:$0xff]  ;;  %v5254_v17 = vpop.permute.xlu2 %5253  ;;  %v5755_v10 = vsel %vm5691_vm2, %v5616_v39, %v5723_v56 }
 0x6fc   :  { %5263 = vrot.lane.b32.xlu1 %v5167_v55, %s7099_s27  ;;  %6010 = vmatpush.msrb.mxu2 %v5876_v13  ;;  %v5324_v55 = vsel %vm4276_vm3, %v9469_v16, %v5254_v17  ;;  %v5863_v16 = vld [vmem:[%s10619_s28 + $0x30] sm:$0xff]  ;;  %v5258_v2 = vpop.permute.xlu1 %5257  ;;  %v5860_v17 = vld [vmem:[%s10619_s28 + $0x18] sm:$0xff] }
 0x6fd   :  { %v5622_v63 = vadd.f32 %v5621_v37, %v5509_v42  ;;  %5534 = vmatmul.f32.gmra.mxu2 %v5320_v45  ;;  %5942 = vmatpush.msrb.mxu3 %v5863_v16 }
 0x6ff   :  { %vm5693_vm11 = vcmp.gt.f32.partialorder %v5622_v63, 0.0  ;;  %v5725_v38 = vmul.f32 0.2, %v5622_v63  ;;  %v5627_v37 = vpop.f32.mrf.mxu3  ;;  %5943 = vmatpush.msrb.mxu3 %v5862_v48 }
 0x701   :  { %v5757_v29 = vsel %vm5693_vm11, %v5622_v63, %v5725_v38  ;;  %v5256_v38 = vpop.permute.xlu0 %5255 }
 0x702   :  { %5805 = vrot.lane.b32.xlu0 %v5757_v29, %s7099_s27  ;;  %v4970_v1 = vpop.f32.mrf.mxu1  ;;  %v5325_v59 = vsel %vm4276_vm3, %v9523_v3, %v5256_v38 }
 0x704   :  { %5795 = vrot.lane.b32.xlu1 %v5747_v35, %s7099_s27  ;;  %v5875_v35 = vld [vmem:[%s10619_s28 + $0x90] sm:$0xff] }
 0x705   :  { %5537 = vmatmul.f32.gmra.mxu2 %v5321_v52 }
 0x706   :  { %6011 = vmatpush.msrb.mxu2 %v5875_v35 }
 0x707   :  { %v9820_v52 = vpop.f32.mrf.mxu3 }
 0x70a   :  { %v4973_v23 = vpop.f32.mrf.mxu1 }
 0x70c   :  { %v4761_v54 = vpop.f32.mrf.mxu0  ;;  %5801 = vrot.lane.b32.xlu1 %v5753_v7, %s7099_s27  ;;  %v5326_v7 = vsel %vm4276_vm3, %v9560_v19, %v5258_v2  ;;  %v5861_v19 = vld [vmem:[%s10619_s28 + $0x20] sm:$0xff] }
 0x70d   :  { %v4762_v57 = vadd.f32 %v9487_v58, %v4761_v54  ;;  %5540 = vmatmul.f32.gmra.mxu2 %v5322_v40  ;;  %5944 = vmatpush.msrb.mxu3 %v5861_v19 }
 0x70f   :  { %v4971_v44 = vadd.f32 %v4970_v1, %v4762_v57  ;;  %v5633_v54 = vpop.f32.mrf.mxu3  ;;  %v5260_v57 = vpop.permute.xlu2 %5259  ;;  %5945 = vmatpush.msrb.mxu3 %v5860_v17 }
 0x711   :  { %v5104_v12 = vmul.f32 0.2, %v4971_v44  ;;  %vm5040_vm14 = vcmp.gt.f32.partialorder %v4971_v44, 0.0 }
 0x713   :  { %v9779_v49 = vpop.f32.mrf.mxu2  ;;  %v9781_v5 = vsel %vm5040_vm14, %v4971_v44, %v5104_v12  ;;  %v5327_v12 = vsel %vm4276_vm3, %v9605_v24, %v5260_v57 }
 0x714   :  { %6819 = vmatmul.msk.f32.gmra.mxu3 %vm4276_vm3, %v9781_v5  ;;  %v4764_v53 = vpop.f32.mrf.mxu0 }
 0x715   :  { %5543 = vmatmul.f32.gmra.mxu2 %v5323_v62  ;;  %v4765_v4 = vadd.f32 %v9487_v58, %v4764_v53  ;;  %v5598_v58 = vadd.f32 %v9685_v46, %v5485_v25 }
 0x717   :  { %v4974_v50 = vadd.f32 %v4973_v23, %v4765_v4  ;;  %v5717_v18 = vmul.f32 0.2, %v5598_v58  ;;  %vm5685_vm1 = vcmp.gt.f32.partialorder %v5598_v58, 0.0  ;;  %v9831_v62 = vpop.f32.mrf.mxu3 }
 0x719   :  { %v5105_v26 = vmul.f32 0.2, %v4974_v50  ;;  %vm5041_vm15 = vcmp.gt.f32.partialorder %v4974_v50, 0.0  ;;  %v5749_v29 = vsel %vm5685_vm1, %v5598_v58, %v5717_v18  ;;  %v5857_v58 = vld [vmem:[%s10619_s28] sm:$0xff] }
 0x71b   :  { %v5514_v30 = vpop.f32.mrf.mxu2  ;;  %v5169_v42 = vsel %vm5041_vm15, %v4974_v50, %v5105_v26  ;;  %v5859_v26 = vld [vmem:[%s10619_s28 + $0x10] sm:$0xff] }
 0x71c   :  { %v5515_v11 = vadd.f32 %v9705_v6, %v5514_v30  ;;  %5265 = vrot.lane.b32.xlu2 %v5169_v42, %s7099_s27  ;;  %5946 = vmatpush.msrb.mxu3 %v5859_v26  ;;  %v5858_v30 = vld [vmem:[%s10619_s28 + $0x8] sm:$0xff] }
 0x71d   :  { %5546 = vmatmul.f32.gmra.mxu2 %v5324_v55  ;;  %v7098_v55 = vld [vmem:[%s10503_s4] ss:$0 sm:$0xff] }
 0x71e   :  { %v5628_v45 = vadd.f32 %v5627_v37, %v5515_v11  ;;  %5947 = vmatpush.msrb.mxu3 %v5858_v30  ;;  %v5873_v11 = vld [vmem:[%s10619_s28 + $0x80] sm:$0xff] }
 0x71f   :  { %v5639_v23 = vpop.f32.mrf.mxu3 }
 0x720   :  { %vm5695_vm0 = vcmp.gt.f32.partialorder %v5628_v45, 0.0  ;;  %v5727_v63 = vmul.f32 0.2, %v5628_v45  ;;  %5948 = vmatpush.msrb.mxu3 %v5857_v58 }
 0x722   :  { %v5759_v46 = vsel %vm5695_vm0, %v5628_v45, %v5727_v63 }
 0x723   :  { %v9805_v61 = vpop.f32.mrf.mxu2  ;;  %5807 = vrot.lane.b32.xlu1 %v5759_v46, %s7099_s27 }
 0x724   :  { %5797 = vrot.lane.b32.xlu2 %v5749_v29, %s7099_s27  ;;  %v5476_v29 = vadd.f32 %v9705_v6, %v9643_v27  ;;  %v5482_v27 = vadd.f32 %v9705_v6, %v9674_v34  ;;  %v5488_v34 = vadd.f32 %v9705_v6, %v9700_v9 }
 0x725   :  { %5549 = vmatmul.f32.gmra.mxu2 %v5325_v59 }
 0x726   :  { %v5589_v48 = vadd.f32 %v9525_v22, %v5476_v29 }
 0x727   :  { %v9866_v39 = vpop.f32.mrf.mxu3 }
 0x728   :  { %vm5682_vm8 = vcmp.gt.f32.partialorder %v5589_v48, 0.0 }
 0x72b   :  { %v5520_v3 = vpop.f32.mrf.mxu2  ;;  %v4976_v45 = vpop.f32.mrf.mxu1 }
 0x72c   :  { %v5521_v0 = vadd.f32 %v9705_v6, %v5520_v3  ;;  %5803 = vrot.lane.b32.xlu2 %v5755_v10, %s7099_s27  ;;  %v5714_v10 = vmul.f32 0.2, %v5589_v48 }
 0x72d   :  { %5552 = vmatmul.f32.gmra.mxu2 %v5326_v7 }
 0x72e   :  { %v5634_v40 = vadd.f32 %v5633_v54, %v5521_v0 }
 0x72f   :  { %v5645_v3 = vpop.f32.mrf.mxu3 }
 0x730   :  { %v5729_v1 = vmul.f32 0.2, %v5634_v40  ;;  %vm5697_vm4 = vcmp.gt.f32.partialorder %v5634_v40, 0.0 }
 0x732   :  { %v5761_v47 = vsel %vm5697_vm4, %v5634_v40, %v5729_v1  ;;  %v5746_v1 = vsel %vm5682_vm8, %v5589_v48, %v5714_v10 }
 0x733   :  { %v9827_v44 = vpop.f32.mrf.mxu2 }
 0x734   :  { %5809 = vrot.lane.b32.xlu2 %v5761_v47, %s7099_s27  ;;  %v5262_v53 = vpop.permute.xlu0 %5261 }
 0x735   :  { %5555 = vmatmul.f32.gmra.mxu2 %v5327_v12  ;;  %v5328_v13 = vsel %vm4276_vm3, %v9683_v41, %v5262_v53  ;;  %v5874_v41 = vld [vmem:[%s10619_s28 + $0x88] sm:$0xff] }
 0x736   :  { %6012 = vmatpush.msrb.mxu2 %v5874_v41 }
 0x737   :  { %v9885_v47 = vpop.f32.mrf.mxu3 }
 0x738   :  { %6013 = vmatpush.msrb.mxu2 %v5873_v11 }
 0x73b   :  { %v5526_v4 = vpop.f32.mrf.mxu2 }
 0x73c   :  { %v5527_v33 = vadd.f32 %v9705_v6, %v5526_v4 }
 0x73d   :  { %5558 = vmatmul.f32.gmra.mxu2 %v5328_v13 }
 0x73e   :  { %v5640_v24 = vadd.f32 %v5639_v23, %v5527_v33 }
 0x73f   :  { %v5651_v23 = vpop.f32.mrf.mxu3 }
 0x740   :  { %vm5699_vm5 = vcmp.gt.f32.partialorder %v5640_v24, 0.0  ;;  %v5731_v25 = vmul.f32 0.2, %v5640_v24 }
 0x742   :  { %v5763_v50 = vsel %vm5699_vm5, %v5640_v24, %v5731_v25  ;;  %v5494_v25 = vadd.f32 %v9705_v6, %v9717_v20  ;;  %v5500_v20 = vadd.f32 %v9705_v6, %v9732_v36 }
 0x743   :  { %5811 = vrot.lane.b32.xlu0 %v5763_v50, %s7099_s27 }
 0x744   :  { %v5607_v26 = vadd.f32 %v9720_v15, %v5494_v25  ;;  %v5613_v15 = vadd.f32 %v9737_v31, %v5500_v20 }
 0x746   :  { %vm5688_vm13 = vcmp.gt.f32.partialorder %v5607_v26, 0.0  ;;  %v5722_v36 = vmul.f32 0.2, %v5613_v15  ;;  %vm5690_vm15 = vcmp.gt.f32.partialorder %v5613_v15, 0.0 }
 0x747   :  { %v9901_v11 = vpop.f32.mrf.mxu3 }
 0x76a   :  { %v4767_v42 = vpop.f32.mrf.mxu0 }
 0x76b   :  { %v4768_v37 = vadd.f32 %v7098_v55, %v4767_v42  ;;  %v5720_v42 = vmul.f32 0.2, %v5607_v26 }
 0x76d   :  { %v4977_v14 = vadd.f32 %v4976_v45, %v4768_v37  ;;  %v5752_v45 = vsel %vm5688_vm13, %v5607_v26, %v5720_v42 }
 0x76e   :  { %v5264_v63 = vpop.permute.xlu1 %5263 }
 0x76f   :  { %v5106_v18 = vmul.f32 0.2, %v4977_v14  ;;  %v5329_v38 = vsel %vm4276_vm3, %v9722_v51, %v5264_v63  ;;  %vm5042_vm6 = vcmp.gt.f32.partialorder %v4977_v14, 0.0  ;;  %v5794_v51 = vpop.permute.xlu0 %5793 }
 0x770   :  { %v9864_v46 = vpop.f32.mrf.mxu2  ;;  %5561 = vmatmul.f32.gmra.mxu2 %v5329_v38 }
 0x771   :  { %v5170_v16 = vsel %vm5042_vm6, %v4977_v14, %v5106_v18  ;;  %v5657_v18 = vpop.f32.mrf.mxu3 }
 0x772   :  { %6820 = vmatmul.msk.f32.gmra.mxu3 %vm4276_vm3, %v5170_v16  ;;  %v5506_v16 = vadd.f32 %v9705_v6, %v9747_v43  ;;  %v5512_v43 = vadd.f32 %v9705_v6, %v9779_v49 }
 0x774   :  { %v5619_v48 = vadd.f32 %v9749_v32, %v5506_v16  ;;  %v5625_v32 = vadd.f32 %v9787_v8, %v5512_v43 }
 0x776   :  { %v5266_v59 = vpop.permute.xlu2 %5265  ;;  %v5796_v22 = vpop.permute.xlu1 %5795  ;;  %vm5692_vm0 = vcmp.gt.f32.partialorder %v5619_v48, 0.0  ;;  %v5726_v49 = vmul.f32 0.2, %v5625_v32  ;;  %vm5694_vm1 = vcmp.gt.f32.partialorder %v5625_v32, 0.0 }
 0x777   :  { %v5330_v56 = vsel %vm4276_vm3, %v9781_v5, %v5266_v59  ;;  %v5595_v5 = vadd.f32 %v9607_v60, %v5482_v27  ;;  %v5842_v57 = vsel %vm4276_vm3, %v5746_v1, %v5796_v22  ;;  %v5601_v60 = vadd.f32 %v9710_v28, %v5488_v34  ;;  %v5800_v17 = vpop.permute.xlu0 %5799 }
 0x778   :  { %v5532_v35 = vpop.f32.mrf.mxu2  ;;  %5564 = vmatmul.f32.gmra.mxu2 %v5330_v56  ;;  %v5754_v56 = vsel %vm5690_vm15, %v5613_v15, %v5722_v36 }
 0x779   :  { %v5533_v2 = vadd.f32 %v9705_v6, %v5532_v35  ;;  %v5716_v12 = vmul.f32 0.2, %v5595_v5  ;;  %vm5684_vm9 = vcmp.gt.f32.partialorder %v5595_v5, 0.0  ;;  %v5718_v9 = vmul.f32 0.2, %v5601_v60 }
 0x77a   :  { %6822 = vmatmul.msk.f32.vlgmr.msrb.gmra.mxu3 %vm7702_vm10, %v5794_v51  ;;  %vm5686_vm12 = vcmp.gt.f32.partialorder %v5601_v60, 0.0 }
 0x77b   :  { %v5646_v0 = vadd.f32 %v5645_v3, %v5533_v2  ;;  %v5748_v4 = vsel %vm5684_vm9, %v5595_v5, %v5716_v12  ;;  %v5750_v30 = vsel %vm5686_vm12, %v5601_v60, %v5718_v9  ;;  %v9917_v2 = vpop.f32.mrf.mxu3  ;;  %v5724_v3 = vmul.f32 0.2, %v5619_v48 }
 0x77c   :  { %v5844_v58 = vsel %vm4276_vm3, %v5750_v30, %v5800_v17  ;;  %v5758_v60 = vsel %vm5694_vm1, %v5625_v32, %v5726_v49 }
 0x77d   :  { %vm5701_vm7 = vcmp.gt.f32.partialorder %v5646_v0, 0.0  ;;  %v5733_v7 = vmul.f32 0.2, %v5646_v0  ;;  %v5756_v27 = vsel %vm5692_vm0, %v5619_v48, %v5724_v3 }
 0x77e   :  { %v5798_v19 = vpop.permute.xlu2 %5797  ;;  %v5802_v55 = vpop.permute.xlu1 %5801 }
 0x77f   :  { %v5765_v54 = vsel %vm5701_vm7, %v5646_v0, %v5733_v7  ;;  %v5843_v13 = vsel %vm4276_vm3, %v5748_v4, %v5798_v19  ;;  %v5845_v63 = vsel %vm4276_vm3, %v5752_v45, %v5802_v55  ;;  %v5806_v0 = vpop.permute.xlu0 %5805 }
 0x780   :  { %v9880_v40 = vpop.f32.mrf.mxu2  ;;  %5813 = vrot.lane.b32.xlu1 %v5765_v54, %s7099_s27  ;;  %6823 = vmatmul.msk.f32.vlgmr.msrb.gmra.mxu2 %vm4276_vm3, %v5746_v1  ;;  %v5847_v22 = vsel %vm4276_vm3, %v5756_v27, %v5806_v0  ;;  %v5518_v1 = vadd.f32 %v9705_v6, %v9805_v61  ;;  %v5524_v61 = vadd.f32 %v9705_v6, %v9827_v44  ;;  %v6170_v0 = vld [vmem:[%s10395_s9 + $0x98] sm:$0xff] }
 0x781   :  { %v5536_v55 = vadd.f32 %v9705_v6, %v9880_v40 }
 0x782   :  { %5952 = vmatmul.f32.gmra.mxu3 %v5842_v57  ;;  %v5631_v12 = vadd.f32 %v9820_v52, %v5518_v1 }
 0x783   :  { %v5663_v54 = vpop.f32.mrf.mxu3  ;;  %v5649_v15 = vadd.f32 %v9885_v47, %v5536_v55 }
 0x784   :  { %vm5696_vm4 = vcmp.gt.f32.partialorder %v5631_v12, 0.0 }
 0x785   :  { %vm5702_vm8 = vcmp.gt.f32.partialorder %v5649_v15, 0.0 }
 0x786   :  { %v5804_v59 = vpop.permute.xlu2 %5803 }
 0x787   :  { %v5846_v51 = vsel %vm4276_vm3, %v5754_v56, %v5804_v59 }
 0x788   :  { %v5538_v53 = vpop.f32.mrf.mxu2  ;;  %6824 = vmatmul.msk.f32.gmra.mxu2 %vm4276_vm3, %v5748_v4 }
 0x789   :  { %v5539_v33 = vadd.f32 %v9705_v6, %v5538_v53 }
 0x78a   :  { %5955 = vmatmul.f32.gmra.mxu3 %v5843_v13 }
 0x78b   :  { %v5652_v24 = vadd.f32 %v5651_v23, %v5539_v33  ;;  %v5666_v4 = vpop.f32.mrf.mxu3  ;;  %v5728_v33 = vmul.f32 0.2, %v5631_v12  ;;  %v5637_v23 = vadd.f32 %v9831_v62, %v5524_v61 }
 0x78d   :  { %vm5703_vm11 = vcmp.gt.f32.partialorder %v5652_v24, 0.0  ;;  %v5735_v50 = vmul.f32 0.2, %v5652_v24  ;;  %v5760_v52 = vsel %vm5696_vm4, %v5631_v12, %v5728_v33  ;;  %v5730_v44 = vmul.f32 0.2, %v5637_v23 }
 0x78e   :  { %v5810_v13 = vpop.permute.xlu2 %5809  ;;  %vm5698_vm5 = vcmp.gt.f32.partialorder %v5637_v23, 0.0 }
 0x78f   :  { %v5767_v28 = vsel %vm5703_vm11, %v5652_v24, %v5735_v50  ;;  %v5849_v9 = vsel %vm4276_vm3, %v5760_v52, %v5810_v13  ;;  %v5762_v20 = vsel %vm5698_vm5, %v5637_v23, %v5730_v44  ;;  %v10004_v23 = vld [vmem:[%s10394_s8] ss:$0 sm:$0xff] }
 0x790   :  { %v9896_v41 = vpop.f32.mrf.mxu2  ;;  %5815 = vrot.lane.b32.xlu2 %v5767_v28, %s7099_s27  ;;  %6825 = vmatmul.msk.f32.gmra.mxu2 %vm4276_vm3, %v5750_v30  ;;  %v5530_v28 = vadd.f32 %v9705_v6, %v9864_v46 }
 0x792   :  { %5958 = vmatmul.f32.gmra.mxu3 %v5844_v58  ;;  %v5643_v58 = vadd.f32 %v9866_v39, %v5530_v28  ;;  %v5542_v39 = vadd.f32 %v9705_v6, %v9896_v41 }
 0x793   :  { %v5669_v50 = vpop.f32.mrf.mxu3 }
 0x794   :  { %v5732_v46 = vmul.f32 0.2, %v5643_v58  ;;  %vm5700_vm7 = vcmp.gt.f32.partialorder %v5643_v58, 0.0 }
 0x795   :  { %v5808_v34 = vpop.permute.xlu1 %5807 }
 0x796   :  { %v5848_v53 = vsel %vm4276_vm3, %v5758_v60, %v5808_v34 }
 0x798   :  { %v5544_v37 = vpop.f32.mrf.mxu2  ;;  %6826 = vmatmul.msk.f32.gmra.mxu2 %vm4276_vm3, %v5752_v45  ;;  %v5734_v45 = vmul.f32 0.2, %v5649_v15 }
 0x799   :  { %v5545_v14 = vadd.f32 %v9705_v6, %v5544_v37  ;;  %v5764_v37 = vsel %vm5700_vm7, %v5643_v58, %v5732_v46 }
 0x79a   :  { %5961 = vmatmul.f32.gmra.mxu3 %v5845_v63  ;;  %v5766_v63 = vsel %vm5702_vm8, %v5649_v15, %v5734_v45 }
 0x79b   :  { %v5658_v38 = vadd.f32 %v5657_v18, %v5545_v14  ;;  %v5655_v14 = vadd.f32 %v9901_v11, %v5542_v39  ;;  %v6174_v11 = vld [vmem:[%s10395_s9 + $0xb8] sm:$0xff] }
 0x79c   :  { %6252 = vmatpush.msra.mxu2 %v6174_v11 }
 0x79d   :  { %vm5705_vm14 = vcmp.gt.f32.partialorder %v5658_v38, 0.0  ;;  %v5737_v29 = vmul.f32 0.2, %v5658_v38  ;;  %v5736_v18 = vmul.f32 0.2, %v5655_v14  ;;  %vm5704_vm9 = vcmp.gt.f32.partialorder %v5655_v14, 0.0 }
 0x79f   :  { %v5769_v31 = vsel %vm5705_vm14, %v5658_v38, %v5737_v29  ;;  %v9954_v38 = vsel %vm5704_vm9, %v5655_v14, %v5736_v18 }
 0x7a0   :  { %5817 = vrot.lane.b32.xlu0 %v5769_v31, %s7099_s27  ;;  %v9913_v35 = vpop.f32.mrf.mxu2  ;;  %6827 = vmatmul.msk.f32.gmra.mxu2 %vm4276_vm3, %v5754_v56  ;;  %v6173_v56 = vld [vmem:[%s10395_s9 + $0xb0] sm:$0xff] }
 0x7a1   :  { %v5548_v40 = vadd.f32 %v9705_v6, %v9913_v35  ;;  %v5672_v35 = vpop.f32.mrf.mxu3  ;;  %6253 = vmatpush.msra.mxu2 %v6173_v56 }
 0x7a2   :  { %5964 = vmatmul.f32.gmra.mxu3 %v5846_v51  ;;  %v6172_v51 = vld [vmem:[%s10395_s9 + $0xa8] sm:$0xff] }
 0x7a3   :  { %v5661_v47 = vadd.f32 %v9917_v2, %v5548_v40  ;;  %v6171_v2 = vld [vmem:[%s10395_s9 + $0xa0] sm:$0xff]  ;;  %6254 = vmatpush.msra.mxu2 %v6172_v51 }
 0x7a5   :  { %v5738_v16 = vmul.f32 0.2, %v5661_v47  ;;  %vm5706_vm11 = vcmp.gt.f32.partialorder %v5661_v47, 0.0  ;;  %6255 = vmatpush.msra.mxu2 %v6171_v2 }
 0x7a7   :  { %v9962_v29 = vsel %vm5706_vm11, %v5661_v47, %v5738_v16  ;;  %6256 = vmatpush.msra.mxu2 %v6170_v0 }
 0x7a8   :  { %v5550_v10 = vpop.f32.mrf.mxu2  ;;  %6828 = vmatmul.msk.f32.gmra.mxu2 %vm4276_vm3, %v5756_v27  ;;  %v6169_v27 = vld [vmem:[%s10395_s9 + $0x90] sm:$0xff] }
 0x7a9   :  { %v5551_v7 = vadd.f32 %v9705_v6, %v5550_v10  ;;  %v5675_v10 = vpop.f32.mrf.mxu3  ;;  %6257 = vmatpush.msra.mxu2 %v6169_v27 }
 0x7aa   :  { %5967 = vmatmul.f32.gmra.mxu3 %v5847_v22 }
 0x7ab   :  { %v5664_v5 = vadd.f32 %v5663_v54, %v5551_v7  ;;  %v6168_v7 = vld [vmem:[%s10395_s9 + $0x88] sm:$0xff]  ;;  %v6167_v54 = vld [vmem:[%s10395_s9 + $0x80] sm:$0xff] }
 0x7ac   :  { %6258 = vmatpush.msra.mxu2 %v6168_v7 }
 0x7ad   :  { %vm5707_vm2 = vcmp.gt.f32.partialorder %v5664_v5, 0.0  ;;  %v5739_v57 = vmul.f32 0.2, %v5664_v5 }
 0x7ae   :  { %6259 = vmatpush.msra.mxu2 %v6167_v54 }
 0x7af   :  { %v5771_v8 = vsel %vm5707_vm2, %v5664_v5, %v5739_v57 }
 0x7b0   :  { %v5553_v19 = vpop.f32.mrf.mxu2  ;;  %5819 = vrot.lane.b32.xlu1 %v5771_v8, %s7099_s27  ;;  %6829 = vmatmul.msk.f32.gmra.mxu2 %vm4276_vm3, %v5758_v60 }
 0x7b1   :  { %v5554_v41 = vadd.f32 %v9705_v6, %v5553_v19 }
 0x7b2   :  { %5970 = vmatmul.f32.gmra.mxu3 %v5848_v53 }
 0x7b3   :  { %v5667_v36 = vadd.f32 %v5666_v4, %v5554_v41 }
 0x7b5   :  { %v5812_v30 = vpop.permute.xlu0 %5811  ;;  %v5740_v48 = vmul.f32 0.2, %v5667_v36  ;;  %vm5708_vm12 = vcmp.gt.f32.partialorder %v5667_v36, 0.0 }
 0x7b6   :  { %v5850_v42 = vsel %vm4276_vm3, %v5762_v20, %v5812_v30 }
 0x7b7   :  { %v9976_v3 = vsel %vm5708_vm12, %v5667_v36, %v5740_v48 }
 0x7b8   :  { %v5556_v24 = vpop.f32.mrf.mxu2  ;;  %6830 = vmatmul.msk.f32.gmra.mxu2 %vm4276_vm3, %v5760_v52 }
 0x7b9   :  { %v5557_v25 = vadd.f32 %v9705_v6, %v5556_v24 }
 0x7ba   :  { %5973 = vmatmul.f32.gmra.mxu3 %v5849_v9 }
 0x7bb   :  { %v5670_v17 = vadd.f32 %v5669_v50, %v5557_v25 }
 0x7bd   :  { %vm5709_vm6 = vcmp.gt.f32.partialorder %v5670_v17, 0.0  ;;  %v5741_v26 = vmul.f32 0.2, %v5670_v17 }
 0x7bf   :  { %v5773_v62 = vsel %vm5709_vm6, %v5670_v17, %v5741_v26 }
 0x7c0   :  { %5821 = vrot.lane.b32.xlu2 %v5773_v62, %s7099_s27  ;;  %6831 = vmatmul.msk.f32.gmra.mxu2 %vm4276_vm3, %v5762_v20  ;;  %v5559_v59 = vpop.f32.mrf.mxu2 }
 0x7c1   :  { %v5560_v31 = vadd.f32 %v9705_v6, %v5559_v59 }
 0x7c2   :  { %5976 = vmatmul.f32.gmra.mxu3 %v5850_v42 }
 0x7c3   :  { %v5673_v43 = vadd.f32 %v5672_v35, %v5560_v31 }
 0x7c5   :  { %v5742_v32 = vmul.f32 0.2, %v5673_v43  ;;  %vm5710_vm13 = vcmp.gt.f32.partialorder %v5673_v43, 0.0 }
 0x7c7   :  { %v9989_v22 = vsel %vm5710_vm13, %v5673_v43, %v5742_v32 }
 0x7c8   :  { %6832 = vmatmul.msk.f32.gmra.mxu2 %vm4276_vm3, %v5764_v37 }
 0x7d0   :  { %6833 = vmatmul.msk.f32.gmra.mxu2 %vm4276_vm3, %v5766_v63 }
 0x7d8   :  { %6834 = vmatmul.msk.f32.gmra.mxu2 %vm4276_vm3, %v9954_v38 }
 0x7e0   :  { %6835 = vmatmul.msk.f32.gmra.mxu2 %vm4276_vm3, %v9962_v29 }
 0x7e8   :  { %6836 = vmatmul.msk.f32.gmra.mxu2 %vm4276_vm3, %v9976_v3 }
 0x7ea   :  { %v5816_v12 = vpop.permute.xlu2 %5815 }
 0x7eb   :  { %v5852_v53 = vsel %vm4276_vm3, %v5766_v63, %v5816_v12  ;;  %v6165_v12 = vld [vmem:[%s10395_s9 + $0x70] sm:$0xff] }
 0x7f0   :  { %6837 = vmatmul.msk.f32.gmra.mxu2 %vm4276_vm3, %v9989_v22 }
 0x7f2   :  { %v5814_v5 = vpop.permute.xlu1 %5813 }
 0x7f3   :  { %v5562_v1 = vpop.f32.mrf.mxu2  ;;  %v5851_v49 = vsel %vm4276_vm3, %v5764_v37, %v5814_v5 }
 0x7f4   :  { %v5563_v57 = vadd.f32 %v9705_v6, %v5562_v1  ;;  %5979 = vmatmul.f32.gmra.mxu3 %v5851_v49 }
 0x7f5   :  { %v5678_v34 = vpop.f32.mrf.mxu3 }
 0x7f6   :  { %v5676_v8 = vadd.f32 %v5675_v10, %v5563_v57 }
 0x7f8   :  { %vm5711_vm14 = vcmp.gt.f32.partialorder %v5676_v8, 0.0  ;;  %v5743_v19 = vmul.f32 0.2, %v5676_v8 }
 0x7fa   :  { %v5775_v60 = vsel %vm5711_vm14, %v5676_v8, %v5743_v19  ;;  %v6166_v8 = vld [vmem:[%s10395_s9 + $0x78] sm:$0xff] }
 0x7fb   :  { %5823 = vrot.lane.b32.xlu0 %v5775_v60, %s7099_s27  ;;  %v5565_v4 = vpop.f32.mrf.mxu2  ;;  %6203 = vmatpush.msra.mxu3 %v6166_v8 }
 0x7fc   :  { %5982 = vmatmul.f32.gmra.mxu3 %v5852_v53  ;;  %v5566_v61 = vadd.f32 %v9705_v6, %v5565_v4  ;;  %v6164_v53 = vld [vmem:[%s10395_s9 + $0x68] sm:$0xff] }
 0x7fd   :  { %v5950_v33 = vpop.f32.mrf.mxu3  ;;  %6204 = vmatpush.msra.mxu3 %v6165_v12 }
 0x7fe   :  { %v5679_v13 = vadd.f32 %v5678_v34, %v5566_v61  ;;  %v5951_v52 = vadd.f32 %v10004_v23, %v5950_v33 }
 0x7ff   :  { %6205 = vmatpush.msra.mxu3 %v6164_v53 }
 0x800   :  { %vm5712_vm15 = vcmp.gt.f32.partialorder %v5679_v13, 0.0  ;;  %v5744_v24 = vmul.f32 0.2, %v5679_v13 }
 0x802   :  { %v5776_v25 = vsel %vm5712_vm15, %v5679_v13, %v5744_v24  ;;  %v6163_v24 = vld [vmem:[%s10395_s9 + $0x60] sm:$0xff] }
 0x803   :  { %v6015_v9 = vpop.f32.mrf.mxu2  ;;  %6838 = vmatmul.msk.f32.gmra.mxu2 %vm4276_vm3, %v5776_v25  ;;  %6206 = vmatpush.msra.mxu3 %v6163_v24 }
 0x804   :  { %v6016_v50 = vadd.f32 %v6015_v9, %v5951_v52  ;;  %v6162_v52 = vld [vmem:[%s10395_s9 + $0x58] sm:$0xff]  ;;  %v6161_v9 = vld [vmem:[%s10395_s9 + $0x50] sm:$0xff] }
 0x805   :  { %v5953_v17 = vpop.f32.mrf.mxu3  ;;  %6207 = vmatpush.msra.mxu3 %v6162_v52 }
 0x806   :  { %v6079_v28 = vmul.f32 0.2, %v6016_v50  ;;  %vm6063_vm0 = vcmp.gt.f32.partialorder %v6016_v50, 0.0  ;;  %v5954_v44 = vadd.f32 %v10004_v23, %v5953_v17 }
 0x807   :  { %6208 = vmatpush.msra.mxu3 %v6161_v9 }
 0x808   :  { %v6095_v6 = vsel %vm6063_vm0, %v6016_v50, %v6079_v28  ;;  %v6160_v28 = vld [vmem:[%s10395_s9 + $0x48] sm:$0xff] }
 0x809   :  { %6119 = vrot.lane.b32.xlu1 %v6095_v6, %s7099_s27  ;;  %6209 = vmatpush.msra.mxu3 %v6160_v28 }
 0x80b   :  { %v6018_v26 = vpop.f32.mrf.mxu2 }
 0x80c   :  { %v6019_v30 = vadd.f32 %v6018_v26, %v5954_v44 }
 0x80d   :  { %v5956_v62 = vpop.f32.mrf.mxu3 }
 0x80e   :  { %vm6064_vm1 = vcmp.gt.f32.partialorder %v6019_v30, 0.0  ;;  %v6080_v58 = vmul.f32 0.2, %v6019_v30  ;;  %v5957_v55 = vadd.f32 %v10004_v23, %v5956_v62  ;;  %v6158_v62 = vld [vmem:[%s10395_s9 + $0x38] sm:$0xff] }
 0x810   :  { %v10010_v20 = vsel %vm6064_vm1, %v6019_v30, %v6080_v58  ;;  %v6159_v30 = vld [vmem:[%s10395_s9 + $0x40] sm:$0xff] }
 0x811   :  { %6841 = vmatmul.msk.f32.vlgmr.msra.gmra.mxu2 %vm4276_vm3, %v10010_v20  ;;  %6210 = vmatpush.msra.mxu3 %v6159_v30 }
 0x812   :  { %v5818_v42 = vpop.permute.xlu0 %5817 }
 0x813   :  { %v5853_v46 = vsel %vm4276_vm3, %v9954_v38, %v5818_v42  ;;  %v6021_v15 = vpop.f32.mrf.mxu2  ;;  %6211 = vmatpush.msra.mxu3 %v6158_v62 }
 0x814   :  { %5985 = vmatmul.f32.gmra.mxu3 %v5853_v46  ;;  %v6022_v37 = vadd.f32 %v6021_v15, %v5957_v55  ;;  %v6157_v55 = vld [vmem:[%s10395_s9 + $0x30] sm:$0xff]  ;;  %v6156_v46 = vld [vmem:[%s10395_s9 + $0x28] sm:$0xff] }
 0x815   :  { %v5959_v39 = vpop.f32.mrf.mxu3  ;;  %6212 = vmatpush.msra.mxu3 %v6157_v55 }
 0x816   :  { %v6081_v45 = vmul.f32 0.2, %v6022_v37  ;;  %vm6065_vm2 = vcmp.gt.f32.partialorder %v6022_v37, 0.0  ;;  %v5960_v63 = vadd.f32 %v10004_v23, %v5959_v39  ;;  %v6154_v39 = vld [vmem:[%s10395_s9 + $0x18] sm:$0xff] }
 0x817   :  { %6213 = vmatpush.msra.mxu3 %v6156_v46 }
 0x818   :  { %v6097_v14 = vsel %vm6065_vm2, %v6022_v37, %v6081_v45  ;;  %v6155_v37 = vld [vmem:[%s10395_s9 + $0x20] sm:$0xff]  ;;  %v6153_v45 = vld [vmem:[%s10395_s9 + $0x10] sm:$0xff] }
 0x819   :  { %6121 = vrot.lane.b32.xlu2 %v6097_v14, %s7099_s27  ;;  %6214 = vmatpush.msra.mxu3 %v6155_v37  ;;  %v6152_v14 = vld [vmem:[%s10395_s9 + $0x8] sm:$0xff] }
 0x81a   :  { %v5822_v56 = vpop.permute.xlu2 %5821 }
 0x81b   :  { %v6024_v40 = vpop.f32.mrf.mxu2  ;;  %v5855_v43 = vsel %vm4276_vm3, %v9976_v3, %v5822_v56  ;;  %6215 = vmatpush.msra.mxu3 %v6154_v39 }
 0x81c   :  { %v6025_v18 = vadd.f32 %v6024_v40, %v5960_v63  ;;  %v6151_v63 = vld [vmem:[%s10395_s9] sm:$0xff] }
 0x81d   :  { %v5962_v47 = vpop.f32.mrf.mxu3  ;;  %6216 = vmatpush.msra.mxu3 %v6153_v45 }
 0x81e   :  { %v6082_v41 = vmul.f32 0.2, %v6025_v18  ;;  %vm6066_vm4 = vcmp.gt.f32.partialorder %v6025_v18, 0.0  ;;  %v5963_v11 = vadd.f32 %v10004_v23, %v5962_v47 }
 0x81f   :  { %6217 = vmatpush.msra.mxu3 %v6152_v14 }
 0x820   :  { %v10019_v16 = vsel %vm6066_vm4, %v6025_v18, %v6082_v41 }
 0x821   :  { %6842 = vmatmul.msk.f32.gmra.mxu2 %vm4276_vm3, %v10019_v16  ;;  %6218 = vmatpush.msra.mxu3 %v6151_v63 }
 0x822   :  { %v5820_v38 = vpop.permute.xlu1 %5819 }
 0x823   :  { %v5854_v36 = vsel %vm4276_vm3, %v9962_v29, %v5820_v38  ;;  %v6027_v59 = vpop.f32.mrf.mxu2 }
 0x824   :  { %5988 = vmatmul.f32.gmra.mxu3 %v5854_v36  ;;  %v6028_v31 = vadd.f32 %v6027_v59, %v5963_v11 }
 0x825   :  { %v5965_v48 = vpop.f32.mrf.mxu3 }
 0x826   :  { %vm6067_vm5 = vcmp.gt.f32.partialorder %v6028_v31, 0.0  ;;  %v6083_v35 = vmul.f32 0.2, %v6028_v31  ;;  %v5966_v2 = vadd.f32 %v10004_v23, %v5965_v48 }
 0x828   :  { %v6099_v51 = vsel %vm6067_vm5, %v6028_v31, %v6083_v35 }
 0x829   :  { %6123 = vrot.lane.b32.xlu0 %v6099_v51, %s7099_s27 }
 0x82b   :  { %v6030_v0 = vpop.f32.mrf.mxu2 }
 0x82c   :  { %5991 = vmatmul.f32.gmra.mxu3 %v5855_v43  ;;  %v6031_v32 = vadd.f32 %v6030_v0, %v5966_v2 }
 0x82d   :  { %v5968_v10 = vpop.f32.mrf.mxu3 }
 0x82e   :  { %vm6068_vm6 = vcmp.gt.f32.partialorder %v6031_v32, 0.0  ;;  %v6084_v29 = vmul.f32 0.2, %v6031_v32  ;;  %v5969_v7 = vadd.f32 %v10004_v23, %v5968_v10 }
 0x830   :  { %v10030_v27 = vsel %vm6068_vm6, %v6031_v32, %v6084_v29 }
 0x831   :  { %6843 = vmatmul.msk.f32.gmra.mxu2 %vm4276_vm3, %v10030_v27 }
 0x833   :  { %v6033_v54 = vpop.f32.mrf.mxu2 }
 0x834   :  { %v6034_v5 = vadd.f32 %v6033_v54, %v5969_v7 }
 0x835   :  { %v5971_v1 = vpop.f32.mrf.mxu3 }
 0x836   :  { %vm6069_vm7 = vcmp.gt.f32.partialorder %v6034_v5, 0.0  ;;  %v6085_v49 = vmul.f32 0.2, %v6034_v5  ;;  %v5972_v3 = vadd.f32 %v10004_v23, %v5971_v1 }
 0x838   :  { %v6101_v57 = vsel %vm6069_vm7, %v6034_v5, %v6085_v49 }
 0x839   :  { %6125 = vrot.lane.b32.xlu1 %v6101_v57, %s7099_s27 }
 0x83b   :  { %v6036_v34 = vpop.f32.mrf.mxu2 }
 0x83c   :  { %v6037_v19 = vadd.f32 %v6036_v34, %v5972_v3 }
 0x83d   :  { %v5974_v60 = vpop.f32.mrf.mxu3 }
 0x83e   :  { %vm6070_vm8 = vcmp.gt.f32.partialorder %v6037_v19, 0.0  ;;  %v6086_v4 = vmul.f32 0.2, %v6037_v19  ;;  %v5975_v33 = vadd.f32 %v10004_v23, %v5974_v60 }
 0x840   :  { %v10046_v61 = vsel %vm6070_vm8, %v6037_v19, %v6086_v4  ;;  %vm6341_vm8 = vcmask 261120  }
 0x841   :  { %6844 = vmatmul.msk.f32.gmra.mxu2 %vm4276_vm3, %v10046_v61 }
 0x843   :  { %v6039_v13 = vpop.f32.mrf.mxu2 }
 0x844   :  { %v6040_v25 = vadd.f32 %v6039_v13, %v5975_v33 }
 0x845   :  { %v5977_v17 = vpop.f32.mrf.mxu3 }
 0x846   :  { %vm6071_vm9 = vcmp.gt.f32.partialorder %v6040_v25, 0.0  ;;  %v6087_v50 = vmul.f32 0.2, %v6040_v25  ;;  %v5978_v44 = vadd.f32 %v10004_v23, %v5977_v17 }
 0x848   :  { %v6103_v6 = vsel %vm6071_vm9, %v6040_v25, %v6087_v50  ;;  %vm6366_vm9 = vcmask 785408  }
 0x849   :  { %6127 = vrot.lane.b32.xlu2 %v6103_v6, %s7099_s27 }
 0x84b   :  { %v6042_v26 = vpop.f32.mrf.mxu2 }
 0x84c   :  { %v6043_v58 = vadd.f32 %v6042_v26, %v5978_v44 }
 0x84e   :  { %vm6072_vm11 = vcmp.gt.f32.partialorder %v6043_v58, 0.0  ;;  %v6088_v42 = vmul.f32 0.2, %v6043_v58 }
 0x850   :  { %v10077_v15 = vsel %vm6072_vm11, %v6043_v58, %v6088_v42 }
 0x851   :  { %6845 = vmatmul.msk.f32.gmra.mxu2 %vm4276_vm3, %v10077_v15 }
 0x853   :  { %v6045_v47 = vpop.f32.mrf.mxu2 }
 0x85b   :  { %v6048_v56 = vpop.f32.mrf.mxu2 }
 0x863   :  { %v6051_v10 = vpop.f32.mrf.mxu2 }
 0x86b   :  { %v6054_v1 = vpop.f32.mrf.mxu2 }
 0x86d   :  { %v5824_v40 = vpop.permute.xlu0 %5823 }
 0x86e   :  { %v5856_v18 = vsel %vm4276_vm3, %v9989_v22, %v5824_v40 }
 0x86f   :  { %5994 = vmatmul.f32.gmra.mxu3 %v5856_v18 }
 0x873   :  { %v6122_v22 = vpop.permute.xlu2 %6121  ;;  %v6057_v53 = vpop.f32.mrf.mxu2 }
 0x874   :  { %v6144_v43 = vsel %vm4276_vm3, %v10010_v20, %v6122_v22 }
 0x877   :  { %v5980_v41 = vpop.f32.mrf.mxu3 }
 0x878   :  { %v5981_v38 = vadd.f32 %v10004_v23, %v5980_v41  ;;  %v6361_v41 = vld [vmem:[%s10397_s11 + $0x58] sm:$0xff] }
 0x879   :  { %6383 = vmatpush.msrb.mxu3 %v6361_v41 }
 0x87a   :  { %v6046_v11 = vadd.f32 %v6045_v47, %v5981_v38  ;;  %v6360_v38 = vld [vmem:[%s10397_s11 + $0x50] sm:$0xff] }
 0x87b   :  { %v6120_v59 = vpop.permute.xlu1 %6119  ;;  %6384 = vmatpush.msrb.mxu3 %v6360_v38 }
 0x87c   :  { %v6089_v36 = vmul.f32 0.2, %v6046_v11  ;;  %vm6073_vm12 = vcmp.gt.f32.partialorder %v6046_v11, 0.0  ;;  %6840 = vmatmul.msk.f32.vlgmr.msra.gmra.mxu3 %vm7702_vm10, %v6120_v59  ;;  %v6359_v59 = vld [vmem:[%s10397_s11 + $0x48] sm:$0xff] }
 0x87d   :  { %6385 = vmatpush.msrb.mxu3 %v6359_v59 }
 0x87e   :  { %v6105_v31 = vsel %vm6073_vm12, %v6046_v11, %v6089_v36 }
 0x87f   :  { %v5983_v48 = vpop.f32.mrf.mxu3  ;;  %6129 = vrot.lane.b32.xlu0 %v6105_v31, %s7099_s27 }
 0x880   :  { %v5984_v35 = vadd.f32 %v10004_v23, %v5983_v48  ;;  %v6358_v48 = vld [vmem:[%s10397_s11 + $0x40] sm:$0xff] }
 0x881   :  { %6386 = vmatpush.msrb.mxu3 %v6358_v48 }
 0x882   :  { %v6049_v51 = vadd.f32 %v6048_v56, %v5984_v35  ;;  %v6357_v56 = vld [vmem:[%s10397_s11 + $0x38] sm:$0xff] }
 0x883   :  { %6387 = vmatpush.msrb.mxu3 %v6357_v56  ;;  %v6451_v56 = vld [vmem:[%s10399_s13 + $0x58] sm:$0xff] }
 0x884   :  { %v6090_v2 = vmul.f32 0.2, %v6049_v51  ;;  %vm6074_vm13 = vcmp.gt.f32.partialorder %v6049_v51, 0.0  ;;  %6222 = vmatmul.f32.gmra.mxu3 %v6144_v43  ;;  %6466 = vmatpush.msrb.mxu2 %v6451_v56  ;;  %v6582_v56 = vld [vmem:[%s10405_s19 + $0x28] sm:$0xff] }
 0x886   :  { %v10105_v0 = vsel %vm6074_vm13, %v6049_v51, %v6090_v2  ;;  %v6060_v17 = vpop.f32.mrf.mxu2 }
 0x887   :  { %6846 = vmatmul.msk.f32.gmra.mxu2 %vm4276_vm3, %v10105_v0 }
 0x894   :  { %v6261_v62 = vpop.f32.mrf.mxu2 }
 0x897   :  { %v5986_v21 = vpop.f32.mrf.mxu3 }
 0x898   :  { %v5987_v32 = vadd.f32 %v10004_v23, %v5986_v21 }
 0x89a   :  { %v6052_v29 = vadd.f32 %v6051_v10, %v5987_v32 }
 0x89b   :  { %v6124_v54 = vpop.permute.xlu0 %6123 }
 0x89c   :  { %v6091_v7 = vmul.f32 0.2, %v6052_v29  ;;  %vm6075_vm10 = vcmp.gt.f32.partialorder %v6052_v29, 0.0  ;;  %v6145_v5 = vsel %vm4276_vm3, %v10019_v16, %v6124_v54 }
 0x89d   :  { %6225 = vmatmul.f32.gmra.mxu3 %v6145_v5 }
 0x89e   :  { %v6107_v20 = vsel %vm6075_vm10, %v6052_v29, %v6091_v7 }
 0x89f   :  { %6131 = vrot.lane.b32.xlu1 %v6107_v20, %s7099_s27 }
 0x8a3   :  { %v6128_v4 = vpop.permute.xlu2 %6127 }
 0x8a4   :  { %v6147_v24 = vsel %vm4276_vm3, %v10046_v61, %v6128_v4  ;;  %v10128_v61 = vld [vmem:[%s10396_s10] ss:$0 sm:$0xff] }
 0x8a7   :  { %v5989_v49 = vpop.f32.mrf.mxu3 }
 0x8a8   :  { %v5990_v57 = vadd.f32 %v10004_v23, %v5989_v49  ;;  %v6355_v49 = vld [vmem:[%s10397_s11 + $0x28] sm:$0xff] }
 0x8aa   :  { %v6055_v3 = vadd.f32 %v6054_v1, %v5990_v57  ;;  %v6356_v1 = vld [vmem:[%s10397_s11 + $0x30] sm:$0xff]  ;;  %v6354_v57 = vld [vmem:[%s10397_s11 + $0x20] sm:$0xff] }
 0x8ab   :  { %v6126_v8 = vpop.permute.xlu1 %6125  ;;  %6388 = vmatpush.msrb.mxu3 %v6356_v1  ;;  %v6441_v1 = vld [vmem:[%s10399_s13 + $0x8] sm:$0xff] }
 0x8ac   :  { %v6092_v34 = vmul.f32 0.2, %v6055_v3  ;;  %vm6076_vm14 = vcmp.gt.f32.partialorder %v6055_v3, 0.0  ;;  %v6146_v12 = vsel %vm4276_vm3, %v10030_v27, %v6126_v8  ;;  %v6351_v8 = vld [vmem:[%s10397_s11 + $0x8] sm:$0xff] }
 0x8ad   :  { %6228 = vmatmul.f32.gmra.mxu3 %v6146_v12  ;;  %v6350_v12 = vld [vmem:[%s10397_s11] sm:$0xff] }
 0x8ae   :  { %v6108_v19 = vsel %vm6076_vm14, %v6055_v3, %v6092_v34  ;;  %6389 = vmatpush.msrb.mxu3 %v6355_v49  ;;  %v6353_v3 = vld [vmem:[%s10397_s11 + $0x18] sm:$0xff]  ;;  %v6352_v34 = vld [vmem:[%s10397_s11 + $0x10] sm:$0xff]  ;;  %v6440_v49 = vld [vmem:[%s10399_s13] sm:$0xff] }
 0x8af   :  { %v5992_v60 = vpop.f32.mrf.mxu3  ;;  %6847 = vmatmul.msk.f32.gmra.mxu2 %vm4276_vm3, %v6108_v19 }
 0x8b0   :  { %v5993_v16 = vadd.f32 %v10004_v23, %v5992_v60  ;;  %6390 = vmatpush.msrb.mxu3 %v6354_v57 }
 0x8b2   :  { %v6058_v33 = vadd.f32 %v6057_v53, %v5993_v16  ;;  %6391 = vmatpush.msrb.mxu3 %v6353_v3 }
 0x8b4   :  { %v6093_v13 = vmul.f32 0.2, %v6058_v33  ;;  %vm6077_vm15 = vcmp.gt.f32.partialorder %v6058_v33, 0.0  ;;  %6392 = vmatpush.msrb.mxu3 %v6352_v34 }
 0x8b5   :  { %6231 = vmatmul.f32.gmra.mxu3 %v6147_v24 }
 0x8b6   :  { %v6109_v52 = vsel %vm6077_vm15, %v6058_v33, %v6093_v13  ;;  %6393 = vmatpush.msrb.mxu3 %v6351_v8 }
 0x8b7   :  { %6133 = vrot.lane.b32.xlu2 %v6109_v52, %s7099_s27 }
 0x8b8   :  { %6394 = vmatpush.msrb.mxu3 %v6350_v12 }
 0x8f1   :  { %v6130_v27 = vpop.permute.xlu0 %6129 }
 0x8f2   :  { %v5995_v25 = vpop.f32.mrf.mxu3  ;;  %v6148_v9 = vsel %vm4276_vm3, %v10077_v15, %v6130_v27  ;;  %v6264_v15 = vpop.f32.mrf.mxu2 }
 0x8f3   :  { %v5996_v50 = vadd.f32 %v10004_v23, %v5995_v25  ;;  %6234 = vmatmul.f32.gmra.mxu3 %v6148_v9 }
 0x8f5   :  { %v6061_v28 = vadd.f32 %v6060_v17, %v5996_v50 }
 0x8f7   :  { %v6094_v6 = vmul.f32 0.2, %v6061_v28  ;;  %vm6078_vm0 = vcmp.gt.f32.partialorder %v6061_v28, 0.0 }
 0x8f9   :  { %v6110_v44 = vsel %vm6078_vm0, %v6061_v28, %v6094_v6 }
 0x8fa   :  { %6848 = vmatmul.msk.f32.gmra.mxu2 %vm4276_vm3, %v6110_v44  ;;  %v6267_v36 = vpop.f32.mrf.mxu2 }
 0x8ff   :  { %v6220_v26 = vpop.f32.mrf.mxu3 }
 0x900   :  { %v6221_v30 = vadd.f32 %v10128_v61, %v6220_v26 }
 0x902   :  { %v6262_v58 = vadd.f32 %v6261_v62, %v6221_v30  ;;  %v6270_v43 = vpop.f32.mrf.mxu2 }
 0x904   :  { %v6293_v42 = vmul.f32 0.2, %v6262_v58  ;;  %vm6285_vm1 = vcmp.gt.f32.partialorder %v6262_v58, 0.0 }
 0x906   :  { %v6301_v23 = vsel %vm6285_vm1, %v6262_v58, %v6293_v42 }
 0x907   :  { %v6223_v55 = vpop.f32.mrf.mxu3  ;;  %6313 = vrot.lane.b32.xlu0 %v6301_v23, %s7100_s1 }
 0x908   :  { %v6224_v46 = vadd.f32 %v10128_v61, %v6223_v55 }
 0x90a   :  { %v6265_v37 = vadd.f32 %v6264_v15, %v6224_v46  ;;  %v6273_v7 = vpop.f32.mrf.mxu2 }
 0x90c   :  { %v6294_v39 = vmul.f32 0.2, %v6265_v37  ;;  %vm6286_vm2 = vcmp.gt.f32.partialorder %v6265_v37, 0.0 }
 0x90e   :  { %v10133_v45 = vsel %vm6286_vm2, %v6265_v37, %v6294_v39  ;;  %vm6598_vm2 = vcmask 1043456  }
 0x90f   :  { %6329 = vrot.lane.b32.xlu1 %v10133_v45, %s7099_s27 }
 0x911   :  { %v6132_v14 = vpop.permute.xlu1 %6131  ;;  %v6134_v40 = vpop.permute.xlu2 %6133 }
 0x912   :  { %v6149_v63 = vsel %vm4276_vm3, %v10105_v0, %v6132_v14  ;;  %v6150_v18 = vsel %vm4276_vm3, %v6108_v19, %v6134_v40  ;;  %v6276_v16 = vpop.f32.mrf.mxu2 }
 0x913   :  { %6237 = vmatmul.f32.gmra.mxu3 %v6149_v63  ;;  %v7066_v63 = vld [vmem:[%s10398_s12] ss:$0 sm:$0xff] }
 0x91b   :  { %6240 = vmatmul.f32.gmra.mxu3 %v6150_v18 }
 0x920   :  { %v6226_v47 = vpop.f32.mrf.mxu3 }
 0x921   :  { %v6227_v11 = vadd.f32 %v10128_v61, %v6226_v47 }
 0x923   :  { %v6268_v31 = vadd.f32 %v6267_v36, %v6227_v11 }
 0x925   :  { %v6295_v35 = vmul.f32 0.2, %v6268_v31  ;;  %vm6287_vm4 = vcmp.gt.f32.partialorder %v6268_v31, 0.0 }
 0x927   :  { %v6303_v22 = vsel %vm6287_vm4, %v6268_v31, %v6295_v35  ;;  %vm6640_vm4 = vcmask 1041408  }
 0x928   :  { %6315 = vrot.lane.b32.xlu2 %v6303_v22, %s7100_s1  ;;  %v6450_v22 = vld [vmem:[%s10399_s13 + $0x50] sm:$0xff] }
 0x929   :  { %6467 = vmatpush.msrb.mxu2 %v6450_v22  ;;  %v6581_v22 = vld [vmem:[%s10405_s19 + $0x20] sm:$0xff] }
 0x930   :  { %v6229_v51 = vpop.f32.mrf.mxu3 }
 0x931   :  { %v6230_v2 = vadd.f32 %v10128_v61, %v6229_v51  ;;  %v6449_v51 = vld [vmem:[%s10399_s13 + $0x48] sm:$0xff] }
 0x932   :  { %v6279_v50 = vpop.f32.mrf.mxu2  ;;  %6468 = vmatpush.msrb.mxu2 %v6449_v51  ;;  %v6580_v51 = vld [vmem:[%s10405_s19 + $0x18] sm:$0xff] }
 0x933   :  { %v6271_v0 = vadd.f32 %v6270_v43, %v6230_v2  ;;  %v6448_v2 = vld [vmem:[%s10399_s13 + $0x40] sm:$0xff]  ;;  %v6447_v43 = vld [vmem:[%s10399_s13 + $0x38] sm:$0xff] }
 0x934   :  { %6469 = vmatpush.msrb.mxu2 %v6448_v2  ;;  %v7068_v2 = vld [vmem:[%s10401_s16] ss:$0 sm:$0xff] }
 0x935   :  { %v6296_v21 = vmul.f32 0.2, %v6271_v0  ;;  %vm6288_vm5 = vcmp.gt.f32.partialorder %v6271_v0, 0.0 }
 0x936   :  { %6470 = vmatpush.msrb.mxu2 %v6447_v43 }
 0x937   :  { %v10158_v32 = vsel %vm6288_vm5, %v6271_v0, %v6296_v21  ;;  %v6446_v0 = vld [vmem:[%s10399_s13 + $0x30] sm:$0xff] }
 0x938   :  { %v6232_v10 = vpop.f32.mrf.mxu3  ;;  %6331 = vrot.lane.b32.xlu0 %v10158_v32, %s7099_s27  ;;  %6471 = vmatpush.msrb.mxu2 %v6446_v0 }
 0x939   :  { %v6233_v29 = vadd.f32 %v10128_v61, %v6232_v10 }
 0x93b   :  { %v6274_v54 = vadd.f32 %v6273_v7, %v6233_v29  ;;  %v6445_v7 = vld [vmem:[%s10399_s13 + $0x28] sm:$0xff] }
 0x93c   :  { %6472 = vmatpush.msrb.mxu2 %v6445_v7  ;;  %v6577_v7 = vld [vmem:[%s10405_s19] sm:$0xff] }
 0x93d   :  { %v6297_v5 = vmul.f32 0.2, %v6274_v54  ;;  %vm6289_vm6 = vcmp.gt.f32.partialorder %v6274_v54, 0.0 }
 0x93f   :  { %v6305_v20 = vsel %vm6289_vm6, %v6274_v54, %v6297_v5  ;;  %v6444_v54 = vld [vmem:[%s10399_s13 + $0x20] sm:$0xff]  ;;  %v6443_v5 = vld [vmem:[%s10399_s13 + $0x18] sm:$0xff]  ;;  %vm6594_vm6 = vcmask 818176  }
 0x940   :  { %6317 = vrot.lane.b32.xlu1 %v6305_v20, %s7100_s1  ;;  %6473 = vmatpush.msrb.mxu2 %v6444_v54  ;;  %v6442_v20 = vld [vmem:[%s10399_s13 + $0x10] sm:$0xff] }
 0x941   :  { %v6631_v54 = vld [vmem:[%s10407_s21 + $0x30] sm:$0x3] }
 0x942   :  { %6474 = vmatpush.msrb.mxu2 %v6443_v5  ;;  %v6630_v5 = vld [vmem:[%s10407_s21 + $0x28] sm:$0xff] }
 0x944   :  { %6475 = vmatpush.msrb.mxu2 %v6442_v20  ;;  %v6629_v20 = vld [vmem:[%s10407_s21 + $0x20] sm:$0xff] }
 0x946   :  { %6476 = vmatpush.msrb.mxu2 %v6441_v1  ;;  %v6628_v1 = vld [vmem:[%s10407_s21 + $0x18] sm:$0xff] }
 0x948   :  { %6477 = vmatpush.msrb.mxu2 %v6440_v49  ;;  %v7069_v49 = vld [vmem:[%s10404_s18] ss:$0 sm:$0xff] }
 0x976   :  { %v6235_v19 = vpop.f32.mrf.mxu3 }
 0x977   :  { %v6236_v60 = vadd.f32 %v10128_v61, %v6235_v19 }
 0x979   :  { %v6277_v53 = vadd.f32 %v6276_v16, %v6236_v60  ;;  %v6314_v13 = vpop.permute.xlu0 %6313 }
 0x97a   :  { %v6342_v24 = vsel %vm6341_vm8, 0.0, %v6314_v13 }
 0x97b   :  { %v6298_v4 = vmul.f32 0.2, %v6277_v53  ;;  %vm6290_vm7 = vcmp.gt.f32.partialorder %v6277_v53, 0.0 }
 0x97d   :  { %v6306_v33 = vsel %vm6290_vm7, %v6277_v53, %v6298_v4  ;;  %v6282_v30 = vpop.f32.mrf.mxu2 }
 0x97e   :  { %6333 = vrot.lane.b32.xlu2 %v6306_v33, %s7099_s27 }
 0x981   :  { %v6330_v52 = vpop.permute.xlu1 %6329 }
 0x982   :  { %v6346_v27 = vsel %vm4276_vm3, %v6342_v24, %v6330_v52  ;;  %v6316_v23 = vpop.permute.xlu2 %6315  ;;  %v7067_v24 = vld [vmem:[%s10400_s14] ss:$0 sm:$0xff] }
 0x983   :  { %6849 = vmatmul.msk.f32.vlgmr.msrb.gmra.mxu3 %vm6366_vm9, %v6346_v27  ;;  %v6343_v55 = vsel %vm6341_vm8, %v10133_v45, %v6316_v23  ;;  %v6506_v23 = vld [vmem:[%s10402_s15 + $0x28] sm:$0xff] }
 0x996   :  { %v6238_v25 = vpop.f32.mrf.mxu3 }
 0x997   :  { %v6239_v9 = vadd.f32 %v10128_v61, %v6238_v25 }
 0x999   :  { %v6280_v17 = vadd.f32 %v6279_v50, %v6239_v9 }
 0x99b   :  { %v6299_v28 = vmul.f32 0.2, %v6280_v17  ;;  %vm6291_vm11 = vcmp.gt.f32.partialorder %v6280_v17, 0.0 }
 0x99d   :  { %v6307_v6 = vsel %vm6291_vm11, %v6280_v17, %v6299_v28  ;;  %vm6667_vm11 = vcmask 7168  }
 0x99e   :  { %6319 = vrot.lane.b32.xlu0 %v6307_v6, %s7100_s1  ;;  %v6241_v44 = vpop.f32.mrf.mxu3  ;;  %v6512_v6 = vld [vmem:[%s10402_s15 + $0x58] sm:$0xff] }
 0x99f   :  { %v6242_v26 = vadd.f32 %v10128_v61, %v6241_v44  ;;  %v6511_v44 = vld [vmem:[%s10402_s15 + $0x50] sm:$0xff]  ;;  %6524 = vmatpush.msra.mxu3 %v6512_v6 }
 0x9a1   :  { %v6283_v62 = vadd.f32 %v6282_v30, %v6242_v26  ;;  %v6510_v30 = vld [vmem:[%s10402_s15 + $0x48] sm:$0xff]  ;;  %6525 = vmatpush.msra.mxu3 %v6511_v44 }
 0x9a3   :  { %v6300_v58 = vmul.f32 0.2, %v6283_v62  ;;  %vm6292_vm12 = vcmp.gt.f32.partialorder %v6283_v62, 0.0  ;;  %6526 = vmatpush.msra.mxu3 %v6510_v30 }
 0x9a5   :  { %v6308_v42 = vsel %vm6292_vm12, %v6283_v62, %v6300_v58  ;;  %v6509_v62 = vld [vmem:[%s10402_s15 + $0x40] sm:$0xff]  ;;  %v6508_v58 = vld [vmem:[%s10402_s15 + $0x38] sm:$0xff] }
 0x9a6   :  { %6335 = vrot.lane.b32.xlu1 %v6308_v42, %s7099_s27  ;;  %6527 = vmatpush.msra.mxu3 %v6509_v62  ;;  %v6507_v42 = vld [vmem:[%s10402_s15 + $0x30] sm:$0xff] }
 0x9a8   :  { %6528 = vmatpush.msra.mxu3 %v6508_v58 }
 0x9aa   :  { %v6332_v46 = vpop.permute.xlu0 %6331  ;;  %6529 = vmatpush.msra.mxu3 %v6507_v42 }
 0x9ab   :  { %v6347_v15 = vsel %vm4276_vm3, %v6343_v55, %v6332_v46  ;;  %v6505_v55 = vld [vmem:[%s10402_s15 + $0x20] sm:$0xff]  ;;  %v6504_v46 = vld [vmem:[%s10402_s15 + $0x18] sm:$0xff] }
 0x9ac   :  { %6850 = vmatmul.msk.f32.gmra.mxu3 %vm6366_vm9, %v6347_v15  ;;  %v6503_v15 = vld [vmem:[%s10402_s15 + $0x10] sm:$0xff] }
 0x9ad   :  { %6530 = vmatpush.msra.mxu3 %v6506_v23 }
 0x9af   :  { %6531 = vmatpush.msra.mxu3 %v6505_v55 }
 0x9b1   :  { %6532 = vmatpush.msra.mxu3 %v6504_v46 }
 0x9b2   :  { %v6318_v37 = vpop.permute.xlu1 %6317 }
 0x9b3   :  { %v6344_v61 = vsel %vm6341_vm8, %v10158_v32, %v6318_v37  ;;  %v6502_v37 = vld [vmem:[%s10402_s15 + $0x8] sm:$0xff]  ;;  %6533 = vmatpush.msra.mxu3 %v6503_v15 }
 0x9b5   :  { %6534 = vmatpush.msra.mxu3 %v6502_v37 }
 0x9d8   :  { %v6334_v39 = vpop.permute.xlu2 %6333 }
 0x9d9   :  { %v6348_v14 = vsel %vm4276_vm3, %v6344_v61, %v6334_v39  ;;  %v6501_v61 = vld [vmem:[%s10402_s15] sm:$0xff]  ;;  %v6546_v39 = vld [vmem:[%s10403_s17 + $0x18] sm:$0xff] }
 0x9da   :  { %6851 = vmatmul.msk.f32.gmra.mxu3 %vm6366_vm9, %v6348_v14  ;;  %v6545_v14 = vld [vmem:[%s10403_s17 + $0x10] sm:$0xff]  ;;  %6566 = vmatpush.msra.mxu2 %v6546_v39 }
 0x9db   :  { %6535 = vmatpush.msra.mxu3 %v6501_v61 }
 0x9dc   :  { %6567 = vmatpush.msra.mxu2 %v6545_v14 }
 0x9dd   :  { %6859 = vmatpush.msk.msrb.mxu3 %vm6640_vm4, %v6631_v54 }
 0x9df   :  { %6654 = vmatpush.msrb.mxu3 %v6630_v5 }
 0x9e1   :  { %6655 = vmatpush.msrb.mxu3 %v6629_v20 }
 0x9e3   :  { %6656 = vmatpush.msrb.mxu3 %v6628_v1 }
 0xa06   :  { %v6396_v40 = vpop.f32.mrf.mxu3 }
 0xa07   :  { %v6397_v45 = vadd.f32 %v7066_v63, %v6396_v40 }
 0xa09   :  { %vm6408_vm13 = vcmp.gt.f32.partialorder %v6397_v45, 0.0  ;;  %v6412_v18 = vmul.f32 0.2, %v6397_v45 }
 0xa0b   :  { %v6416_v47 = vsel %vm6408_vm13, %v6397_v45, %v6412_v18 }
 0xa0c   :  { %6422 = vrot.lane.b32.xlu2 %v6416_v47, %s7100_s1 }
 0xa10   :  { %v6320_v41 = vpop.permute.xlu0 %6319 }
 0xa11   :  { %v6345_v38 = vsel %vm6341_vm8, %v6306_v33, %v6320_v41  ;;  %v6543_v41 = vld [vmem:[%s10403_s17] sm:$0xff] }
 0xa18   :  { %v6336_v11 = vpop.permute.xlu1 %6335 }
 0xa19   :  { %v6349_v36 = vsel %vm4276_vm3, %v6345_v38, %v6336_v11  ;;  %v6589_v38 = vld [vmem:[%s10405_s19 + $0x60] sm:$0xf]  ;;  %v6588_v11 = vld [vmem:[%s10405_s19 + $0x58] sm:$0xff] }
 0xa1a   :  { %6852 = vmatmul.msk.f32.gmra.mxu3 %vm6366_vm9, %v6349_v36  ;;  %v6587_v36 = vld [vmem:[%s10405_s19 + $0x50] sm:$0xff] }
 0xa2f   :  { %v6399_v59 = vpop.f32.mrf.mxu3 }
 0xa30   :  { %v6400_v31 = vadd.f32 %v7066_v63, %v6399_v59  ;;  %v6586_v59 = vld [vmem:[%s10405_s19 + $0x48] sm:$0xff] }
 0xa32   :  { %vm6409_vm10 = vcmp.gt.f32.partialorder %v6400_v31, 0.0  ;;  %v6413_v48 = vmul.f32 0.2, %v6400_v31 }
 0xa34   :  { %v6417_v35 = vsel %vm6409_vm10, %v6400_v31, %v6413_v48  ;;  %v6585_v31 = vld [vmem:[%s10405_s19 + $0x40] sm:$0xff]  ;;  %v6584_v48 = vld [vmem:[%s10405_s19 + $0x38] sm:$0xff] }
 0xa35   :  { %6430 = vrot.lane.b32.xlu0 %v6417_v35, %s7099_s27 }
 0xa5d   :  { %v6402_v21 = vpop.f32.mrf.mxu3 }
 0xa5e   :  { %v6403_v32 = vadd.f32 %v7066_v63, %v6402_v21 }
 0xa60   :  { %vm6410_vm14 = vcmp.gt.f32.partialorder %v6403_v32, 0.0  ;;  %v6414_v10 = vmul.f32 0.2, %v6403_v32 }
 0xa62   :  { %v6418_v29 = vsel %vm6410_vm14, %v6403_v32, %v6414_v10  ;;  %v6579_v10 = vld [vmem:[%s10405_s19 + $0x10] sm:$0xff] }
 0xa63   :  { %6424 = vrot.lane.b32.xlu1 %v6418_v29, %s7100_s1  ;;  %v6578_v29 = vld [vmem:[%s10405_s19 + $0x8] sm:$0xff] }
 0xa66   :  { %v6423_v12 = vpop.permute.xlu2 %6422 }
 0xa67   :  { %v6436_v19 = vsel %vm6341_vm8, 0.0, %v6423_v12  ;;  %v6627_v12 = vld [vmem:[%s10407_s21 + $0x10] sm:$0xff] }
 0xa68   :  { %6657 = vmatpush.msrb.mxu3 %v6627_v12 }
 0xa9d   :  { %v6405_v57 = vpop.f32.mrf.mxu3 }
 0xa9e   :  { %v6406_v3 = vadd.f32 %v7066_v63, %v6405_v57  ;;  %v6544_v63 = vld [vmem:[%s10403_s17 + $0x8] sm:$0xff] }
 0xa9f   :  { %6568 = vmatpush.msra.mxu2 %v6544_v63 }
 0xaa0   :  { %vm6411_vm15 = vcmp.gt.f32.partialorder %v6406_v3, 0.0  ;;  %v6415_v34 = vmul.f32 0.2, %v6406_v3 }
 0xaa1   :  { %6569 = vmatpush.msra.mxu2 %v6543_v41 }
 0xaa2   :  { %v6419_v8 = vsel %vm6411_vm15, %v6406_v3, %v6415_v34 }
 0xaa3   :  { %6432 = vrot.lane.b32.xlu2 %v6419_v8, %s7099_s27 }
 0xaa7   :  { %v6431_v60 = vpop.permute.xlu0 %6430 }
 0xaa8   :  { %v6438_v16 = vsel %vm4276_vm3, %v6436_v19, %v6431_v60  ;;  %v6626_v19 = vld [vmem:[%s10407_s21 + $0x8] sm:$0xff]  ;;  %v6625_v60 = vld [vmem:[%s10407_s21] sm:$0xff] }
 0xaa9   :  { %6853 = vmatmul.msk.f32.vlgmr.msrb.gmra.mxu2 %vm6366_vm9, %v6438_v16  ;;  %6658 = vmatpush.msrb.mxu3 %v6626_v19  ;;  %v28_v16 = vstv %s10408_s22 }
 0xaaa   :  { %6857 = vmatpush.msk.msrb.mxu2 %vm6598_vm2, %v6589_v38  ;;  %29 = vst [vmem:[#allocation2] sm:$0x1] %v28_v16 }
 0xaab   :  { %6659 = vmatpush.msrb.mxu3 %v6625_v60 }
 0xaac   :  { %6606 = vmatpush.msrb.mxu2 %v6588_v11 }
 0xaae   :  { %6607 = vmatpush.msrb.mxu2 %v6587_v36 }
 0xab0   :  { %6608 = vmatpush.msrb.mxu2 %v6586_v59 }
 0xab2   :  { %6609 = vmatpush.msrb.mxu2 %v6585_v31 }
 0xab4   :  { %6610 = vmatpush.msrb.mxu2 %v6584_v48 }
 0xad5   :  { %v6425_v53 = vpop.permute.xlu1 %6424 }
 0xad6   :  { %v6437_v4 = vsel %vm6341_vm8, %v6417_v35, %v6425_v53  ;;  %v6583_v35 = vld [vmem:[%s10405_s19 + $0x30] sm:$0xff]  ;;  %v7070_v53 = vld [vmem:[%s10406_s20] ss:$0 sm:$0xff] }
 0xad7   :  { %6611 = vmatpush.msrb.mxu2 %v6583_v35 }
 0xad9   :  { %6612 = vmatpush.msrb.mxu2 %v6582_v56 }
 0xadb   :  { %6613 = vmatpush.msrb.mxu2 %v6581_v22 }
 0xadd   :  { %6614 = vmatpush.msrb.mxu2 %v6580_v51 }
 0xadf   :  { %6615 = vmatpush.msrb.mxu2 %v6579_v10 }
 0xae1   :  { %6616 = vmatpush.msrb.mxu2 %v6578_v29 }
 0xae3   :  { %6617 = vmatpush.msrb.mxu2 %v6577_v7 }
 0xafd   :  { %v6433_v33 = vpop.permute.xlu2 %6432 }
 0xafe   :  { %v6439_v13 = vsel %vm4276_vm3, %v6437_v4, %v6433_v33 }
 0xaff   :  { %6854 = vmatmul.msk.f32.gmra.mxu2 %vm6366_vm9, %v6439_v13 }
 0xb2c   :  { %v6479_v52 = vpop.f32.mrf.mxu2 }
 0xb2d   :  { %v6480_v27 = vadd.f32 %v7067_v24, %v6479_v52  ;;  %v7071_v52 = vld [vmem:[#allocation2] ss:$0 sm:$0xff] }
 0xb2f   :  { %vm6485_vm0 = vcmp.gt.f32.partialorder %v6480_v27, 0.0  ;;  %v6487_v25 = vmul.f32 0.2, %v6480_v27 }
 0xb31   :  { %v6489_v9 = vsel %vm6485_vm0, %v6480_v27, %v6487_v25 }
 0xb32   :  { %6492 = vrot.lane.b32.xlu0 %v6489_v9, %s7100_s1 }
 0xb82   :  { %v6482_v50 = vpop.f32.mrf.mxu2 }
 0xb83   :  { %v6483_v17 = vadd.f32 %v7067_v24, %v6482_v50 }
 0xb85   :  { %vm6486_vm1 = vcmp.gt.f32.partialorder %v6483_v17, 0.0  ;;  %v6488_v28 = vmul.f32 0.2, %v6483_v17 }
 0xb87   :  { %v6490_v26 = vsel %vm6486_vm1, %v6483_v17, %v6488_v28 }
 0xb88   :  { %6496 = vrot.lane.b32.xlu1 %v6490_v26, %s7099_s27 }
 0xba4   :  { %v6493_v40 = vpop.permute.xlu0 %6492 }
 0xba5   :  { %v6499_v45 = vsel %vm6341_vm8, 0.0, %v6493_v40 }
 0xbfa   :  { %v6497_v18 = vpop.permute.xlu1 %6496 }
 0xbfb   :  { %v6500_v47 = vsel %vm4276_vm3, %v6499_v45, %v6497_v18 }
 0xbfc   :  { %6855 = vmatmul.msk.f32.vlgmr.msra.gmra.mxu3 %vm6366_vm9, %v6500_v47 }
 0xc7f   :  { %v6537_v43 = vpop.f32.mrf.mxu3 }
 0xc80   :  { %v6538_v0 = vadd.f32 %v7068_v2, %v6537_v43 }
 0xc82   :  { %vm6540_vm3 = vcmp.gt.f32.partialorder %v6538_v0, 0.0  ;;  %v6541_v21 = vmul.f32 0.2, %v6538_v0 }
 0xc84   :  { %v6542_v32 = vsel %vm6540_vm3, %v6538_v0, %v6541_v21 }
 0xc85   :  { %6856 = vmatmul.msk.f32.vlgmr.msra.gmra.mxu2 %vm6341_vm8, %v6542_v32  ;;  %vm6636_vm8 = vcmask 408576  }
 0xd08   :  { %v6571_v57 = vpop.f32.mrf.mxu2 }
 0xd09   :  { %v6572_v3 = vadd.f32 %v7069_v49, %v6571_v57 }
 0xd0b   :  { %vm6574_vm5 = vcmp.gt.f32.partialorder %v6572_v3, 0.0  ;;  %v6575_v34 = vmul.f32 0.2, %v6572_v3 }
 0xd0d   :  { %v6576_v8 = vsel %vm6574_vm5, %v6572_v3, %v6575_v34 }
 0xd0e   :  { %6858 = vmatmul.msk.f32.vlgmr.msrb.gmra.mxu2 %vm6594_vm6, %v6576_v8 }
 0xd91   :  { %v6619_v4 = vpop.f32.mrf.mxu2 }
 0xd92   :  { %v6620_v33 = vadd.f32 %v7070_v53, %v6619_v4 }
 0xd94   :  { %vm6622_vm7 = vcmp.gt.f32.partialorder %v6620_v33, 0.0  ;;  %v6623_v13 = vmul.f32 0.2, %v6620_v33 }
 0xd96   :  { %v6624_v24 = vsel %vm6622_vm7, %v6620_v33, %v6623_v13 }
 0xd97   :  { %6860 = vmatmul.msk.f32.vlgmr.msrb.gmra.mxu3 %vm6636_vm8, %v6624_v24 }
 0xe1a   :  { %v6661_v27 = vpop.f32.mrf.mxu3 }
 0xe1b   :  { %v6662_v25 = vadd.f32 %v7071_v52, %v6661_v27 }
 0xe1d   :  { %vm6664_vm9 = vcmp.gt.f32.partialorder %v6662_v25, 0.0  ;;  %v6665_v9 = vmul.f32 0.2, %v6662_v25 }
 0xe1f   :  { %v6666_v50 = vsel %vm6664_vm9, %v6662_v25, %v6665_v9 }
 0xe20   :  { %6668 = vst.msk [vmem:[%s10409_s23] sm:$0xff] %vm6667_vm11, %v6666_v50 }

</bundles_post_ra>
